<compile_context>
chip_gen: v6e
topology: v6e:2x2x1
jax: 0.10.0
libtpu: 0.0.40
codegen_flags: <defaults>
</compile_context>

<pallas_src>
import functools

import jax
import jax.numpy as jnp
from jax.experimental import pallas as pl
from jax.experimental.pallas import tpu as pltpu


_VMEM_LIMIT = 32 * 1024 * 1024   # explicit: safe on v5e/v6e (128 MiB) and v7x (64 MiB)


# ---------------------------------------------------------------------------
# Kernel 1: fused matmul + shift + ReLU   (used for conv1 via wrapper im2col)
# ---------------------------------------------------------------------------
def _matmul_bias_relu_kernel(x_ref, w_ref, shift_ref, o_ref):
    y = jnp.dot(x_ref[...], w_ref[...], preferred_element_type=jnp.float32)
    o_ref[...] = jnp.maximum(y + shift_ref[...], 0.0).astype(o_ref.dtype)


# ---------------------------------------------------------------------------
# Kernel 2: fused Conv2d(stride=2) + folded-BN + ReLU, im2col done in-kernel
# ---------------------------------------------------------------------------
def _conv_tap_kernel(x_ref, w_ref, shift_ref, o_ref, *, k, Wp2, L):
    """One image per grid step.
    x_ref    : (1, 4, S, Cin) bf16 -- the 4 stride-2 phases of the zero-padded
               input, each flattened over (H/2, W/2) (+ zero slack rows), so
               every im2col tap is a contiguous row-slice at a static offset.
    w_ref    : (k*k, Cin, Cout) bf16, BN scale pre-folded.
    shift_ref: (1, Cout) f32  (BN shift + conv bias), f32 epilogue.
    o_ref    : (1, L, Cout) bf16, L = Ho * Wp2 (junk cols dropped by wrapper)."""
    Cout = o_ref.shape[-1]
    acc = jnp.zeros((L, Cout), jnp.float32)
    for ki in range(k):
        for kj in range(k):
            phase = (ki % 2) * 2 + (kj % 2)
            off = (ki // 2) * Wp2 + (kj // 2)
            tap = x_ref[0, phase, off:off + L, :]                 # (L, Cin) bf16
            acc += jnp.dot(tap, w_ref[ki * k + kj],
                           preferred_element_type=jnp.float32)
    y = jnp.maximum(acc + shift_ref[...], 0.0)                    # shift + ReLU (f32)
    o_ref[0] = y.astype(o_ref.dtype)


# ---------------------------------------------------------------------------
# Kernel 3: fused fc1 (+ReLU) + fc2 (+Tanh); fc2 as an in-kernel lane reduction
# ---------------------------------------------------------------------------
def _fc_head_kernel(f_ref, a_ref, w1f_ref, w1a_ref, b1_ref, w2t_ref, b2_ref, o_ref):
    h = jnp.dot(f_ref[...], w1f_ref[...], preferred_element_type=jnp.float32)
    h = h + jnp.dot(a_ref[...], w1a_ref[...], preferred_element_type=jnp.float32)
    h = jnp.maximum(h + b1_ref[...], 0.0)                         # fc1 + ReLU (f32)
    y = jnp.sum(h * w2t_ref[...], axis=-1, keepdims=True) + b2_ref[...]   # fc2 (512->1)
    o_ref[...] = jnp.tanh(y)


# ---------------------------------------------------------------------------
# Wrappers
# ---------------------------------------------------------------------------
def _pick_tile(m, cap=1024):
    if m <= cap:
        return m
    for tm in range(cap, 0, -8):
        if m % tm == 0:
            return tm
    return m


def _im2col_nchw(x_nchw, k, stride, pad):
    """im2col for conv1 only (Cin=3); built straight from the NCHW input."""
    n, c, h, w = x_nchw.shape
    xp = jnp.pad(x_nchw, ((0, 0), (0, 0), (pad, pad), (pad, pad)))
    ho = (h + 2 * pad - k) // stride + 1
    wo = (w + 2 * pad - k) // stride + 1
    taps = []
    for ki in range(k):
        for kj in range(k):
            taps.append(xp[:, :, ki:ki + stride * ho:stride, kj:kj + stride * wo:stride])
    cols = jnp.stack(taps, axis=1)                   # (N, k*k, C, Ho, Wo)
    cols = jnp.transpose(cols, (0, 3, 4, 1, 2))      # (N, Ho, Wo, k*k, C)
    return cols.reshape(n * ho * wo, k * k * c), ho, wo


def conv1_bn_relu(x_nchw, w_folded, shift, *, k=5, pad=2, stride=2):
    n = x_nchw.shape[0]
    cout = w_folded.shape[-1]
    cols, ho, wo = _im2col_nchw(x_nchw.astype(jnp.bfloat16), k, stride, pad)
    kp = w_folded.shape[0]                           # K padded to 128 at fold time
    cols = jnp.pad(cols, ((0, 0), (0, kp - cols.shape[1])))
    m = cols.shape[0]
    tm = _pick_tile(m, 1024)
    out = pl.pallas_call(
        _matmul_bias_relu_kernel,
        out_shape=jax.ShapeDtypeStruct((m, cout), jnp.bfloat16),
        grid_spec=pltpu.PrefetchScalarGridSpec(
            num_scalar_prefetch=0,
            grid=(m // tm,),
            in_specs=[
                pl.BlockSpec((tm, kp), lambda i: (i, 0)),
                pl.BlockSpec((kp, cout), lambda i: (0, 0)),
                pl.BlockSpec((1, cout), lambda i: (0, 0)),
            ],
            out_specs=pl.BlockSpec((tm, cout), lambda i: (i, 0)),
        ),
        compiler_params=pltpu.CompilerParams(
            dimension_semantics=("parallel",),
            vmem_limit_bytes=_VMEM_LIMIT),
    )(cols, w_folded, shift)
    return out.reshape(n, ho, wo, cout)


def _phase_split_flat(x_nhwc, pad, k):
    """Zero-pad and split into the 4 stride-2 phases, each flattened over space
    (plus zero slack rows), so in-kernel im2col taps are contiguous slices."""
    xp = jnp.pad(x_nhwc, ((0, 0), (pad, pad), (pad, pad), (0, 0)))
    n, hp, wp, c = xp.shape
    assert hp % 2 == 0 and wp % 2 == 0
    hp2, wp2 = hp // 2, wp // 2
    xp = xp.reshape(n, hp2, 2, wp2, 2, c)
    xp = jnp.transpose(xp, (0, 2, 4, 1, 3, 5))       # (N, 2, 2, Hp2, Wp2, C)
    xp = xp.reshape(n, 4, hp2 * wp2, c)
    r = (k - 1) // 2
    xp = jnp.pad(xp, ((0, 0), (0, 0), (0, r * wp2 + r), (0, 0)))
    return xp, hp2, wp2


def conv_bn_relu_fused(x_nhwc, w_taps, shift, *, k, pad):
    n, h, w, _ = x_nhwc.shape
    cout = w_taps.shape[-1]
    ho = (h + 2 * pad - k) // 2 + 1
    wo = (w + 2 * pad - k) // 2 + 1
    xs, _, wp2 = _phase_split_flat(x_nhwc, pad, k)
    s, cin = xs.shape[2], xs.shape[3]
    length = ho * wp2                                # rows per image incl. junk cols
    kernel = functools.partial(_conv_tap_kernel, k=k, Wp2=wp2, L=length)
    out = pl.pallas_call(
        kernel,
        out_shape=jax.ShapeDtypeStruct((n, length, cout), jnp.bfloat16),
        grid_spec=pltpu.PrefetchScalarGridSpec(
            num_scalar_prefetch=0,
            grid=(n,),
            in_specs=[
                pl.BlockSpec((1, 4, s, cin), lambda i: (i, 0, 0, 0)),
                pl.BlockSpec((k * k, cin, cout), lambda i: (0, 0, 0)),
                pl.BlockSpec((1, cout), lambda i: (0, 0)),
            ],
            out_specs=pl.BlockSpec((1, length, cout), lambda i: (i, 0, 0)),
        ),
        compiler_params=pltpu.CompilerParams(
            dimension_semantics=("parallel",),
            vmem_limit_bytes=_VMEM_LIMIT),
    )(xs, w_taps, shift)
    return out.reshape(n, ho, wp2, cout)[:, :, :wo, :]   # drop junk columns


def fc_head(feat, action, w1f, w1a, b1, w2t, b2):
    n, df = feat.shape
    da = action.shape[1]
    dh = w1f.shape[1]
    return pl.pallas_call(
        _fc_head_kernel,
        out_shape=jax.ShapeDtypeStruct((n, 1), jnp.float32),
        grid_spec=pltpu.PrefetchScalarGridSpec(
            num_scalar_prefetch=0,
            grid=(1,),
            in_specs=[
                pl.BlockSpec((n, df), lambda i: (0, 0)),
                pl.BlockSpec((n, da), lambda i: (0, 0)),
                pl.BlockSpec((df, dh), lambda i: (0, 0)),
                pl.BlockSpec((da, dh), lambda i: (0, 0)),
                pl.BlockSpec((1, dh), lambda i: (0, 0)),
                pl.BlockSpec((1, dh), lambda i: (0, 0)),
                pl.BlockSpec((1, 1), lambda i: (0, 0)),
            ],
            out_specs=pl.BlockSpec((n, 1), lambda i: (0, 0)),
        ),
        compiler_params=pltpu.CompilerParams(
            dimension_semantics=("arbitrary",),
            vmem_limit_bytes=_VMEM_LIMIT),
    )(feat, action, w1f, w1a, b1, w2t, b2)


# ---------------------------------------------------------------------------
# Parameters (deterministic synthetic) and trace-time folding
# ---------------------------------------------------------------------------
def _uniform(key, shape, bound):
    return jax.random.uniform(key, shape, jnp.float32, -bound, bound)


def init_params(key, act_dim):
    conv_cfg = [(5, 3, 32), (3, 32, 64), (3, 64, 64), (3, 64, 128)]
    params = {}
    for idx, (k, cin, cout) in enumerate(conv_cfg, start=1):
        key, kw, kb, kg, kbt, km, kv = jax.random.split(key, 7)
        bound = 1.0 / float(cin * k * k) ** 0.5
        params[f"conv{idx}"] = dict(
            w=_uniform(kw, (k, k, cin, cout), bound),
            b=_uniform(kb, (cout,), bound),
            gamma=1.0 + 0.1 * jax.random.normal(kg, (cout,)),
            beta=0.1 * jax.random.normal(kbt, (cout,)),
            mean=0.05 * jax.random.normal(km, (cout,)),
            var=1.0 + 0.1 * jax.random.uniform(kv, (cout,)),
        )
    feat = 128 * 4 * 4
    key, k1w, k1b, k2w, k2b = jax.random.split(key, 5)
    b1 = 1.0 / float(feat + act_dim) ** 0.5
    params["fc1"] = dict(w=_uniform(k1w, (feat + act_dim, 512), b1),
                         b=_uniform(k1b, (512,), b1))
    b2 = 1.0 / float(512) ** 0.5
    params["fc2"] = dict(w=_uniform(k2w, (512, 1), b2),
                         b=_uniform(k2b, (1,), b2))
    return params


def fold_params(params):
    """Fold BN into weights, permute fc1 rows to NHWC flatten order, cast to bf16."""
    eps = 1e-5
    ks = {"conv1": 5, "conv2": 3, "conv3": 3, "conv4": 3}
    folded = {}
    for name, k in ks.items():
        p = params[name]
        scale = p["gamma"] * jax.lax.rsqrt(p["var"] + eps)
        shift = (p["beta"] - p["mean"] * scale + p["b"] * scale)
        w = p["w"] * scale                                    # fold BN scale into conv weight
        _, _, cin, cout = w.shape
        if name == "conv1":
            wm = w.reshape(k * k * cin, cout)
            kp = ((k * k * cin + 127) // 128) * 128           # pad K (75 -> 128)
            wm = jnp.pad(wm, ((0, kp - k * k * cin), (0, 0)))
            folded[name] = (wm.astype(jnp.bfloat16),
                            shift.reshape(1, cout).astype(jnp.float32))
        else:
            folded[name] = (w.reshape(k * k, cin, cout).astype(jnp.bfloat16),
                            shift.reshape(1, cout).astype(jnp.float32))
    # fc1: permute the 2048 feature rows from PyTorch's (C,H,W) flatten order to
    # the NHWC (H,W,C) order produced by the conv stack; split off action rows.
    feat_dim = 128 * 4 * 4
    w1 = params["fc1"]["w"]
    w1f = jnp.transpose(w1[:feat_dim].reshape(128, 4, 4, -1), (1, 2, 0, 3))
    w1f = w1f.reshape(feat_dim, -1)
    folded["fc1"] = (w1f.astype(jnp.bfloat16),
                     w1[feat_dim:].astype(jnp.bfloat16),
                     params["fc1"]["b"].reshape(1, -1).astype(jnp.float32))
    folded["fc2"] = (params["fc2"]["w"].reshape(1, -1).astype(jnp.float32),   # (1, 512)
                     params["fc2"]["b"].reshape(1, 1).astype(jnp.float32))
    return folded


# ---------------------------------------------------------------------------
# Critic forward pass
# ---------------------------------------------------------------------------
@jax.jit
def critic_forward(folded, state_nchw, action):
    x = conv1_bn_relu(state_nchw, *folded["conv1"], k=5, pad=2)        # 64 -> 32
    x = conv_bn_relu_fused(x, *folded["conv2"], k=3, pad=1)            # 32 -> 16
    x = conv_bn_relu_fused(x, *folded["conv3"], k=3, pad=1)            # 16 -> 8
    x = conv_bn_relu_fused(x, *folded["conv4"], k=3, pad=1)            # 8  -> 4
    n = x.shape[0]
    feat = x.reshape(n, -1)          # NHWC flatten; fc1 rows were permuted to match
    w1f, w1a, b1 = folded["fc1"]
    w2t, b2 = folded["fc2"]
    return fc_head(feat, action.astype(jnp.bfloat16), w1f, w1a, b1, w2t, b2)


# ---------------------------------------------------------------------------
if __name__ == "__main__":
    key = jax.random.PRNGKey(0)
    act_dim = 4
    batch = 2

    kp, ks, ka = jax.random.split(key, 3)
    params = init_params(kp, act_dim)
    folded = fold_params(params)

    # Spatial size must be 64x64 so the conv stack flattens to 128*4*4.
    state = jax.random.normal(ks, (batch, 3, 64, 64), jnp.float32)     # NCHW
    action = jax.random.normal(ka, (batch, act_dim), jnp.float32)

    out = critic_forward(folded, state, action)
    out = jax.block_until_ready(out)

    assert out.shape == (batch, 1), out.shape
    assert bool(jnp.all(jnp.isfinite(out)))
    assert bool(jnp.all(jnp.abs(out) <= 1.0))   # tanh range
    print("KERNEL_OK")
</pallas_src>

<mosaic_0001>
module attributes {stable_mosaic.version = 11 : i64} {
  func.func @_matmul_bias_relu_kernel(%arg0: i32, %arg1: memref<1024x128xbf16, #tpu.memory_space<vmem>>, %arg2: memref<128x32xbf16, #tpu.memory_space<vmem>>, %arg3: memref<1x32xf32, #tpu.memory_space<vmem>>, %arg4: memref<1024x32xbf16, #tpu.memory_space<vmem>>) attributes {dimension_semantics = [#tpu.dimension_semantics<parallel>], iteration_bounds = array<i64: 2>, scalar_prefetch = 0 : i64, scratch_operands = 0 : i64, tpu.core_type = #tpu.core_type<tc>, window_params = [{transform_indices = @transform_0, window_bounds = array<i64: 1024, 128>}, {pipeline_mode = #tpu.pipeline_mode<synchronous>, transform_indices = @transform_1, window_bounds = array<i64: 128, 32>}, {pipeline_mode = #tpu.pipeline_mode<synchronous>, transform_indices = @transform_2, window_bounds = array<i64: 1, 32>}, {transform_indices = @transform_3, window_bounds = array<i64: 1024, 32>}]} {
    %c0 = arith.constant 0 : index
    %c0_0 = arith.constant 0 : index
    %0 = vector.load %arg1[%c0, %c0_0] : memref<1024x128xbf16, #tpu.memory_space<vmem>>, vector<1024x128xbf16>
    %c0_1 = arith.constant 0 : index
    %c0_2 = arith.constant 0 : index
    %1 = vector.load %arg2[%c0_1, %c0_2] : memref<128x32xbf16, #tpu.memory_space<vmem>>, vector<128x32xbf16>
    %cst = arith.constant dense<0.000000e+00> : vector<1024x32xf32>
    %2 = tpu.matmul %0, %1, %cst {dimension_numbers = #tpu.dot_dimension_numbers<[1], [0], [0], [1], [0, 0, 1, 1], [], []>} : vector<1024x128xbf16>, vector<128x32xbf16>, vector<1024x32xf32> -> vector<1024x32xf32>
    %c0_3 = arith.constant 0 : index
    %c0_4 = arith.constant 0 : index
    %3 = vector.load %arg3[%c0_3, %c0_4] : memref<1x32xf32, #tpu.memory_space<vmem>>, vector<1x32xf32>
    %4 = vector.broadcast %3 : vector<1x32xf32> to vector<1024x32xf32>
    %5 = arith.addf %2, %4 : vector<1024x32xf32>
    %cst_5 = arith.constant 0.000000e+00 : f32
    %6 = vector.broadcast %cst_5 : f32 to vector<1024x32xf32>
    %7 = arith.maximumf %5, %6 : vector<1024x32xf32>
    %8 = arith.truncf %7 : vector<1024x32xf32> to vector<1024x32xbf16>
    %c0_6 = arith.constant 0 : index
    %c0_7 = arith.constant 0 : index
    %9 = vector.load %arg4[%c0_6, %c0_7] : memref<1024x32xbf16, #tpu.memory_space<vmem>>, vector<1024x32xbf16>
    tpu.vector_store %arg4[%c0_6, %c0_7], %8 {strides = array<i32>} : memref<1024x32xbf16, #tpu.memory_space<vmem>>, vector<1024x32xbf16>,
    return
  }
  func.func @transform_0(%arg0: i32) -> (i32, i32) {
    %c0_i32 = arith.constant 0 : i32
    %c0_i32_0 = arith.constant 0 : i32
    return %arg0, %c0_i32 : i32, i32
  }
  func.func @transform_1(%arg0: i32) -> (i32, i32) {
    %c0_i32 = arith.constant 0 : i32
    %c0_i32_0 = arith.constant 0 : i32
    %c0_i32_1 = arith.constant 0 : i32
    return %c0_i32, %c0_i32_0 : i32, i32
  }
  func.func @transform_2(%arg0: i32) -> (i32, i32) {
    %c0_i32 = arith.constant 0 : i32
    %c0_i32_0 = arith.constant 0 : i32
    %c0_i32_1 = arith.constant 0 : i32
    return %c0_i32, %c0_i32_0 : i32, i32
  }
  func.func @transform_3(%arg0: i32) -> (i32, i32) {
    %c0_i32 = arith.constant 0 : i32
    %c0_i32_0 = arith.constant 0 : i32
    return %arg0, %c0_i32 : i32, i32
  }
}

module attributes {stable_mosaic.version = 11 : i64} {
  func.func @_conv_tap_kernel(%arg0: i32, %arg1: memref<1x4x307x32xbf16, #tpu.memory_space<vmem>>, %arg2: memref<9x32x64xbf16, #tpu.memory_space<vmem>>, %arg3: memref<1x64xf32, #tpu.memory_space<vmem>>, %arg4: memref<1x272x64xbf16, #tpu.memory_space<vmem>>) attributes {dimension_semantics = [#tpu.dimension_semantics<parallel>], iteration_bounds = array<i64: 2>, scalar_prefetch = 0 : i64, scratch_operands = 0 : i64, tpu.core_type = #tpu.core_type<tc>, window_params = [{transform_indices = @transform_0, window_bounds = array<i64: 1, 4, 307, 32>}, {pipeline_mode = #tpu.pipeline_mode<synchronous>, transform_indices = @transform_1, window_bounds = array<i64: 9, 32, 64>}, {pipeline_mode = #tpu.pipeline_mode<synchronous>, transform_indices = @transform_2, window_bounds = array<i64: 1, 64>}, {transform_indices = @transform_3, window_bounds = array<i64: 1, 272, 64>}]} {
    %cst = arith.constant 0.000000e+00 : f32
    %0 = vector.broadcast %cst : f32 to vector<272x64xf32>
    %c0 = arith.constant 0 : index
    %c0_0 = arith.constant 0 : index
    %c0_1 = arith.constant 0 : index
    %c0_2 = arith.constant 0 : index
    %1 = vector.load %arg1[%c0, %c0_0, %c0_1, %c0_2] : memref<1x4x307x32xbf16, #tpu.memory_space<vmem>>, vector<1x1x272x32xbf16>
    %2 = vector.shape_cast %1 : vector<1x1x272x32xbf16> to vector<272x32xbf16>
    %c0_3 = arith.constant 0 : index
    %c0_4 = arith.constant 0 : index
    %c0_5 = arith.constant 0 : index
    %3 = vector.load %arg2[%c0_3, %c0_4, %c0_5] : memref<9x32x64xbf16, #tpu.memory_space<vmem>>, vector<1x32x64xbf16>
    %4 = vector.shape_cast %3 : vector<1x32x64xbf16> to vector<32x64xbf16>
    %cst_6 = arith.constant dense<0.000000e+00> : vector<272x64xf32>
    %5 = tpu.matmul %2, %4, %cst_6 {dimension_numbers = #tpu.dot_dimension_numbers<[1], [0], [0], [1], [0, 0, 1, 1], [], []>} : vector<272x32xbf16>, vector<32x64xbf16>, vector<272x64xf32> -> vector<272x64xf32>
    %6 = arith.addf %0, %5 : vector<272x64xf32>
    %c0_7 = arith.constant 0 : index
    %c1 = arith.constant 1 : index
    %c0_8 = arith.constant 0 : index
    %c0_9 = arith.constant 0 : index
    %7 = vector.load %arg1[%c0_7, %c1, %c0_8, %c0_9] : memref<1x4x307x32xbf16, #tpu.memory_space<vmem>>, vector<1x1x272x32xbf16>
    %8 = vector.shape_cast %7 : vector<1x1x272x32xbf16> to vector<272x32xbf16>
    %c1_10 = arith.constant 1 : index
    %c0_11 = arith.constant 0 : index
    %c0_12 = arith.constant 0 : index
    %9 = vector.load %arg2[%c1_10, %c0_11, %c0_12] : memref<9x32x64xbf16, #tpu.memory_space<vmem>>, vector<1x32x64xbf16>
    %10 = vector.shape_cast %9 : vector<1x32x64xbf16> to vector<32x64xbf16>
    %cst_13 = arith.constant dense<0.000000e+00> : vector<272x64xf32>
    %11 = tpu.matmul %8, %10, %cst_13 {dimension_numbers = #tpu.dot_dimension_numbers<[1], [0], [0], [1], [0, 0, 1, 1], [], []>} : vector<272x32xbf16>, vector<32x64xbf16>, vector<272x64xf32> -> vector<272x64xf32>
    %12 = arith.addf %6, %11 : vector<272x64xf32>
    %c0_14 = arith.constant 0 : index
    %c0_15 = arith.constant 0 : index
    %c1_16 = arith.constant 1 : index
    %c0_17 = arith.constant 0 : index
    %13 = vector.load %arg1[%c0_14, %c0_15, %c1_16, %c0_17] : memref<1x4x307x32xbf16, #tpu.memory_space<vmem>>, vector<1x1x272x32xbf16>
    %14 = vector.shape_cast %13 : vector<1x1x272x32xbf16> to vector<272x32xbf16>
    %c2 = arith.constant 2 : index
    %c0_18 = arith.constant 0 : index
    %c0_19 = arith.constant 0 : index
    %15 = vector.load %arg2[%c2, %c0_18, %c0_19] : memref<9x32x64xbf16, #tpu.memory_space<vmem>>, vector<1x32x64xbf16>
    %16 = vector.shape_cast %15 : vector<1x32x64xbf16> to vector<32x64xbf16>
    %cst_20 = arith.constant dense<0.000000e+00> : vector<272x64xf32>
    %17 = tpu.matmul %14, %16, %cst_20 {dimension_numbers = #tpu.dot_dimension_numbers<[1], [0], [0], [1], [0, 0, 1, 1], [], []>} : vector<272x32xbf16>, vector<32x64xbf16>, vector<272x64xf32> -> vector<272x64xf32>
    %18 = arith.addf %12, %17 : vector<272x64xf32>
    %c0_21 = arith.constant 0 : index
    %c2_22 = arith.constant 2 : index
    %c0_23 = arith.constant 0 : index
    %c0_24 = arith.constant 0 : index
    %19 = vector.load %arg1[%c0_21, %c2_22, %c0_23, %c0_24] : memref<1x4x307x32xbf16, #tpu.memory_space<vmem>>, vector<1x1x272x32xbf16>
    %20 = vector.shape_cast %19 : vector<1x1x272x32xbf16> to vector<272x32xbf16>
    %c3 = arith.constant 3 : index
    %c0_25 = arith.constant 0 : index
    %c0_26 = arith.constant 0 : index
    %21 = vector.load %arg2[%c3, %c0_25, %c0_26] : memref<9x32x64xbf16, #tpu.memory_space<vmem>>, vector<1x32x64xbf16>
    %22 = vector.shape_cast %21 : vector<1x32x64xbf16> to vector<32x64xbf16>
    %cst_27 = arith.constant dense<0.000000e+00> : vector<272x64xf32>
    %23 = tpu.matmul %20, %22, %cst_27 {dimension_numbers = #tpu.dot_dimension_numbers<[1], [0], [0], [1], [0, 0, 1, 1], [], []>} : vector<272x32xbf16>, vector<32x64xbf16>, vector<272x64xf32> -> vector<272x64xf32>
    %24 = arith.addf %18, %23 : vector<272x64xf32>
    %c0_28 = arith.constant 0 : index
    %c3_29 = arith.constant 3 : index
    %c0_30 = arith.constant 0 : index
    %c0_31 = arith.constant 0 : index
    %25 = vector.load %arg1[%c0_28, %c3_29, %c0_30, %c0_31] : memref<1x4x307x32xbf16, #tpu.memory_space<vmem>>, vector<1x1x272x32xbf16>
    %26 = vector.shape_cast %25 : vector<1x1x272x32xbf16> to vector<272x32xbf16>
    %c4 = arith.constant 4 : index
    %c0_32 = arith.constant 0 : index
    %c0_33 = arith.constant 0 : index
    %27 = vector.load %arg2[%c4, %c0_32, %c0_33] : memref<9x32x64xbf16, #tpu.memory_space<vmem>>, vector<1x32x64xbf16>
    %28 = vector.shape_cast %27 : vector<1x32x64xbf16> to vector<32x64xbf16>
    %cst_34 = arith.constant dense<0.000000e+00> : vector<272x64xf32>
    %29 = tpu.matmul %26, %28, %cst_34 {dimension_numbers = #tpu.dot_dimension_numbers<[1], [0], [0], [1], [0, 0, 1, 1], [], []>} : vector<272x32xbf16>, vector<32x64xbf16>, vector<272x64xf32> -> vector<272x64xf32>
    %30 = arith.addf %24, %29 : vector<272x64xf32>
    %c0_35 = arith.constant 0 : index
    %c2_36 = arith.constant 2 : index
    %c1_37 = arith.constant 1 : index
    %c0_38 = arith.constant 0 : index
    %31 = vector.load %arg1[%c0_35, %c2_36, %c1_37, %c0_38] : memref<1x4x307x32xbf16, #tpu.memory_space<vmem>>, vector<1x1x272x32xbf16>
    %32 = vector.shape_cast %31 : vector<1x1x272x32xbf16> to vector<272x32xbf16>
    %c5 = arith.constant 5 : index
    %c0_39 = arith.constant 0 : index
    %c0_40 = arith.constant 0 : index
    %33 = vector.load %arg2[%c5, %c0_39, %c0_40] : memref<9x32x64xbf16, #tpu.memory_space<vmem>>, vector<1x32x64xbf16>
    %34 = vector.shape_cast %33 : vector<1x32x64xbf16> to vector<32x64xbf16>
    %cst_41 = arith.constant dense<0.000000e+00> : vector<272x64xf32>
    %35 = tpu.matmul %32, %34, %cst_41 {dimension_numbers = #tpu.dot_dimension_numbers<[1], [0], [0], [1], [0, 0, 1, 1], [], []>} : vector<272x32xbf16>, vector<32x64xbf16>, vector<272x64xf32> -> vector<272x64xf32>
    %36 = arith.addf %30, %35 : vector<272x64xf32>
    %c0_42 = arith.constant 0 : index
    %c0_43 = arith.constant 0 : index
    %c17 = arith.constant 17 : index
    %c0_44 = arith.constant 0 : index
    %37 = vector.load %arg1[%c0_42, %c0_43, %c17, %c0_44] : memref<1x4x307x32xbf16, #tpu.memory_space<vmem>>, vector<1x1x272x32xbf16>
    %38 = vector.shape_cast %37 : vector<1x1x272x32xbf16> to vector<272x32xbf16>
    %c6 = arith.constant 6 : index
    %c0_45 = arith.constant 0 : index
    %c0_46 = arith.constant 0 : index
    %39 = vector.load %arg2[%c6, %c0_45, %c0_46] : memref<9x32x64xbf16, #tpu.memory_space<vmem>>, vector<1x32x64xbf16>
    %40 = vector.shape_cast %39 : vector<1x32x64xbf16> to vector<32x64xbf16>
    %cst_47 = arith.constant dense<0.000000e+00> : vector<272x64xf32>
    %41 = tpu.matmul %38, %40, %cst_47 {dimension_numbers = #tpu.dot_dimension_numbers<[1], [0], [0], [1], [0, 0, 1, 1], [], []>} : vector<272x32xbf16>, vector<32x64xbf16>, vector<272x64xf32> -> vector<272x64xf32>
    %42 = arith.addf %36, %41 : vector<272x64xf32>
    %c0_48 = arith.constant 0 : index
    %c1_49 = arith.constant 1 : index
    %c17_50 = arith.constant 17 : index
    %c0_51 = arith.constant 0 : index
    %43 = vector.load %arg1[%c0_48, %c1_49, %c17_50, %c0_51] : memref<1x4x307x32xbf16, #tpu.memory_space<vmem>>, vector<1x1x272x32xbf16>
    %44 = vector.shape_cast %43 : vector<1x1x272x32xbf16> to vector<272x32xbf16>
    %c7 = arith.constant 7 : index
    %c0_52 = arith.constant 0 : index
    %c0_53 = arith.constant 0 : index
    %45 = vector.load %arg2[%c7, %c0_52, %c0_53] : memref<9x32x64xbf16, #tpu.memory_space<vmem>>, vector<1x32x64xbf16>
    %46 = vector.shape_cast %45 : vector<1x32x64xbf16> to vector<32x64xbf16>
    %cst_54 = arith.constant dense<0.000000e+00> : vector<272x64xf32>
    %47 = tpu.matmul %44, %46, %cst_54 {dimension_numbers = #tpu.dot_dimension_numbers<[1], [0], [0], [1], [0, 0, 1, 1], [], []>} : vector<272x32xbf16>, vector<32x64xbf16>, vector<272x64xf32> -> vector<272x64xf32>
    %48 = arith.addf %42, %47 : vector<272x64xf32>
    %c0_55 = arith.constant 0 : index
    %c0_56 = arith.constant 0 : index
    %c18 = arith.constant 18 : index
    %c0_57 = arith.constant 0 : index
    %49 = vector.load %arg1[%c0_55, %c0_56, %c18, %c0_57] : memref<1x4x307x32xbf16, #tpu.memory_space<vmem>>, vector<1x1x272x32xbf16>
    %50 = vector.shape_cast %49 : vector<1x1x272x32xbf16> to vector<272x32xbf16>
    %c8 = arith.constant 8 : index
    %c0_58 = arith.constant 0 : index
    %c0_59 = arith.constant 0 : index
    %51 = vector.load %arg2[%c8, %c0_58, %c0_59] : memref<9x32x64xbf16, #tpu.memory_space<vmem>>, vector<1x32x64xbf16>
    %52 = vector.shape_cast %51 : vector<1x32x64xbf16> to vector<32x64xbf16>
    %cst_60 = arith.constant dense<0.000000e+00> : vector<272x64xf32>
    %53 = tpu.matmul %50, %52, %cst_60 {dimension_numbers = #tpu.dot_dimension_numbers<[1], [0], [0], [1], [0, 0, 1, 1], [], []>} : vector<272x32xbf16>, vector<32x64xbf16>, vector<272x64xf32> -> vector<272x64xf32>
    %54 = arith.addf %48, %53 : vector<272x64xf32>
    %c0_61 = arith.constant 0 : index
    %c0_62 = arith.constant 0 : index
    %55 = vector.load %arg3[%c0_61, %c0_62] : memref<1x64xf32, #tpu.memory_space<vmem>>, vector<1x64xf32>
    %56 = vector.broadcast %55 : vector<1x64xf32> to vector<272x64xf32>
    %57 = arith.addf %54, %56 : vector<272x64xf32>
    %cst_63 = arith.constant 0.000000e+00 : f32
    %58 = vector.broadcast %cst_63 : f32 to vector<272x64xf32>
    %59 = arith.maximumf %57, %58 : vector<272x64xf32>
    %60 = arith.truncf %59 : vector<272x64xf32> to vector<272x64xbf16>
    %c0_64 = arith.constant 0 : index
    %c0_65 = arith.constant 0 : index
    %c0_66 = arith.constant 0 : index
    %61 = vector.load %arg4[%c0_64, %c0_65, %c0_66] : memref<1x272x64xbf16, #tpu.memory_space<vmem>>, vector<1x272x64xbf16>
    %62 = vector.shape_cast %61 : vector<1x272x64xbf16> to vector<272x64xbf16>
    %63 = vector.shape_cast %60 : vector<272x64xbf16> to vector<1x272x64xbf16>
    tpu.vector_store %arg4[%c0_64, %c0_65, %c0_66], %63 {strides = array<i32>} : memref<1x272x64xbf16, #tpu.memory_space<vmem>>, vector<1x272x64xbf16>,
    return
  }
  func.func @transform_0(%arg0: i32) -> (i32, i32, i32, i32) {
    %c0_i32 = arith.constant 0 : i32
    %c0_i32_0 = arith.constant 0 : i32
    %c0_i32_1 = arith.constant 0 : i32
    %c0_i32_2 = arith.constant 0 : i32
    return %arg0, %c0_i32, %c0_i32_0, %c0_i32_1 : i32, i32, i32, i32
  }
  func.func @transform_1(%arg0: i32) -> (i32, i32, i32) {
    %c0_i32 = arith.constant 0 : i32
    %c0_i32_0 = arith.constant 0 : i32
    %c0_i32_1 = arith.constant 0 : i32
    %c0_i32_2 = arith.constant 0 : i32
    return %c0_i32, %c0_i32_0, %c0_i32_1 : i32, i32, i32
  }
  func.func @transform_2(%arg0: i32) -> (i32, i32) {
    %c0_i32 = arith.constant 0 : i32
    %c0_i32_0 = arith.constant 0 : i32
    %c0_i32_1 = arith.constant 0 : i32
    return %c0_i32, %c0_i32_0 : i32, i32
  }
  func.func @transform_3(%arg0: i32) -> (i32, i32, i32) {
    %c0_i32 = arith.constant 0 : i32
    %c0_i32_0 = arith.constant 0 : i32
    %c0_i32_1 = arith.constant 0 : i32
    return %arg0, %c0_i32, %c0_i32_0 : i32, i32, i32
  }
}

module attributes {stable_mosaic.version = 11 : i64} {
  func.func @_conv_tap_kernel(%arg0: i32, %arg1: memref<1x4x91x64xbf16, #tpu.memory_space<vmem>>, %arg2: memref<9x64x64xbf16, #tpu.memory_space<vmem>>, %arg3: memref<1x64xf32, #tpu.memory_space<vmem>>, %arg4: memref<1x72x64xbf16, #tpu.memory_space<vmem>>) attributes {dimension_semantics = [#tpu.dimension_semantics<parallel>], iteration_bounds = array<i64: 2>, scalar_prefetch = 0 : i64, scratch_operands = 0 : i64, tpu.core_type = #tpu.core_type<tc>, window_params = [{transform_indices = @transform_0, window_bounds = array<i64: 1, 4, 91, 64>}, {pipeline_mode = #tpu.pipeline_mode<synchronous>, transform_indices = @transform_1, window_bounds = array<i64: 9, 64, 64>}, {pipeline_mode = #tpu.pipeline_mode<synchronous>, transform_indices = @transform_2, window_bounds = array<i64: 1, 64>}, {transform_indices = @transform_3, window_bounds = array<i64: 1, 72, 64>}]} {
    %cst = arith.constant 0.000000e+00 : f32
    %0 = vector.broadcast %cst : f32 to vector<72x64xf32>
    %c0 = arith.constant 0 : index
    %c0_0 = arith.constant 0 : index
    %c0_1 = arith.constant 0 : index
    %c0_2 = arith.constant 0 : index
    %1 = vector.load %arg1[%c0, %c0_0, %c0_1, %c0_2] : memref<1x4x91x64xbf16, #tpu.memory_space<vmem>>, vector<1x1x72x64xbf16>
    %2 = vector.shape_cast %1 : vector<1x1x72x64xbf16> to vector<72x64xbf16>
    %c0_3 = arith.constant 0 : index
    %c0_4 = arith.constant 0 : index
    %c0_5 = arith.constant 0 : index
    %3 = vector.load %arg2[%c0_3, %c0_4, %c0_5] : memref<9x64x64xbf16, #tpu.memory_space<vmem>>, vector<1x64x64xbf16>
    %4 = vector.shape_cast %3 : vector<1x64x64xbf16> to vector<64x64xbf16>
    %cst_6 = arith.constant dense<0.000000e+00> : vector<72x64xf32>
    %5 = tpu.matmul %2, %4, %cst_6 {dimension_numbers = #tpu.dot_dimension_numbers<[1], [0], [0], [1], [0, 0, 1, 1], [], []>} : vector<72x64xbf16>, vector<64x64xbf16>, vector<72x64xf32> -> vector<72x64xf32>
    %6 = arith.addf %0, %5 : vector<72x64xf32>
    %c0_7 = arith.constant 0 : index
    %c1 = arith.constant 1 : index
    %c0_8 = arith.constant 0 : index
    %c0_9 = arith.constant 0 : index
    %7 = vector.load %arg1[%c0_7, %c1, %c0_8, %c0_9] : memref<1x4x91x64xbf16, #tpu.memory_space<vmem>>, vector<1x1x72x64xbf16>
    %8 = vector.shape_cast %7 : vector<1x1x72x64xbf16> to vector<72x64xbf16>
    %c1_10 = arith.constant 1 : index
    %c0_11 = arith.constant 0 : index
    %c0_12 = arith.constant 0 : index
    %9 = vector.load %arg2[%c1_10, %c0_11, %c0_12] : memref<9x64x64xbf16, #tpu.memory_space<vmem>>, vector<1x64x64xbf16>
    %10 = vector.shape_cast %9 : vector<1x64x64xbf16> to vector<64x64xbf16>
    %cst_13 = arith.constant dense<0.000000e+00> : vector<72x64xf32>
    %11 = tpu.matmul %8, %10, %cst_13 {dimension_numbers = #tpu.dot_dimension_numbers<[1], [0], [0], [1], [0, 0, 1, 1], [], []>} : vector<72x64xbf16>, vector<64x64xbf16>, vector<72x64xf32> -> vector<72x64xf32>
    %12 = arith.addf %6, %11 : vector<72x64xf32>
    %c0_14 = arith.constant 0 : index
    %c0_15 = arith.constant 0 : index
    %c1_16 = arith.constant 1 : index
    %c0_17 = arith.constant 0 : index
    %13 = vector.load %arg1[%c0_14, %c0_15, %c1_16, %c0_17] : memref<1x4x91x64xbf16, #tpu.memory_space<vmem>>, vector<1x1x72x64xbf16>
    %14 = vector.shape_cast %13 : vector<1x1x72x64xbf16> to vector<72x64xbf16>
    %c2 = arith.constant 2 : index
    %c0_18 = arith.constant 0 : index
    %c0_19 = arith.constant 0 : index
    %15 = vector.load %arg2[%c2, %c0_18, %c0_19] : memref<9x64x64xbf16, #tpu.memory_space<vmem>>, vector<1x64x64xbf16>
    %16 = vector.shape_cast %15 : vector<1x64x64xbf16> to vector<64x64xbf16>
    %cst_20 = arith.constant dense<0.000000e+00> : vector<72x64xf32>
    %17 = tpu.matmul %14, %16, %cst_20 {dimension_numbers = #tpu.dot_dimension_numbers<[1], [0], [0], [1], [0, 0, 1, 1], [], []>} : vector<72x64xbf16>, vector<64x64xbf16>, vector<72x64xf32> -> vector<72x64xf32>
    %18 = arith.addf %12, %17 : vector<72x64xf32>
    %c0_21 = arith.constant 0 : index
    %c2_22 = arith.constant 2 : index
    %c0_23 = arith.constant 0 : index
    %c0_24 = arith.constant 0 : index
    %19 = vector.load %arg1[%c0_21, %c2_22, %c0_23, %c0_24] : memref<1x4x91x64xbf16, #tpu.memory_space<vmem>>, vector<1x1x72x64xbf16>
    %20 = vector.shape_cast %19 : vector<1x1x72x64xbf16> to vector<72x64xbf16>
    %c3 = arith.constant 3 : index
    %c0_25 = arith.constant 0 : index
    %c0_26 = arith.constant 0 : index
    %21 = vector.load %arg2[%c3, %c0_25, %c0_26] : memref<9x64x64xbf16, #tpu.memory_space<vmem>>, vector<1x64x64xbf16>
    %22 = vector.shape_cast %21 : vector<1x64x64xbf16> to vector<64x64xbf16>
    %cst_27 = arith.constant dense<0.000000e+00> : vector<72x64xf32>
    %23 = tpu.matmul %20, %22, %cst_27 {dimension_numbers = #tpu.dot_dimension_numbers<[1], [0], [0], [1], [0, 0, 1, 1], [], []>} : vector<72x64xbf16>, vector<64x64xbf16>, vector<72x64xf32> -> vector<72x64xf32>
    %24 = arith.addf %18, %23 : vector<72x64xf32>
    %c0_28 = arith.constant 0 : index
    %c3_29 = arith.constant 3 : index
    %c0_30 = arith.constant 0 : index
    %c0_31 = arith.constant 0 : index
    %25 = vector.load %arg1[%c0_28, %c3_29, %c0_30, %c0_31] : memref<1x4x91x64xbf16, #tpu.memory_space<vmem>>, vector<1x1x72x64xbf16>
    %26 = vector.shape_cast %25 : vector<1x1x72x64xbf16> to vector<72x64xbf16>
    %c4 = arith.constant 4 : index
    %c0_32 = arith.constant 0 : index
    %c0_33 = arith.constant 0 : index
    %27 = vector.load %arg2[%c4, %c0_32, %c0_33] : memref<9x64x64xbf16, #tpu.memory_space<vmem>>, vector<1x64x64xbf16>
    %28 = vector.shape_cast %27 : vector<1x64x64xbf16> to vector<64x64xbf16>
    %cst_34 = arith.constant dense<0.000000e+00> : vector<72x64xf32>
    %29 = tpu.matmul %26, %28, %cst_34 {dimension_numbers = #tpu.dot_dimension_numbers<[1], [0], [0], [1], [0, 0, 1, 1], [], []>} : vector<72x64xbf16>, vector<64x64xbf16>, vector<72x64xf32> -> vector<72x64xf32>
    %30 = arith.addf %24, %29 : vector<72x64xf32>
    %c0_35 = arith.constant 0 : index
    %c2_36 = arith.constant 2 : index
    %c1_37 = arith.constant 1 : index
    %c0_38 = arith.constant 0 : index
    %31 = vector.load %arg1[%c0_35, %c2_36, %c1_37, %c0_38] : memref<1x4x91x64xbf16, #tpu.memory_space<vmem>>, vector<1x1x72x64xbf16>
    %32 = vector.shape_cast %31 : vector<1x1x72x64xbf16> to vector<72x64xbf16>
    %c5 = arith.constant 5 : index
    %c0_39 = arith.constant 0 : index
    %c0_40 = arith.constant 0 : index
    %33 = vector.load %arg2[%c5, %c0_39, %c0_40] : memref<9x64x64xbf16, #tpu.memory_space<vmem>>, vector<1x64x64xbf16>
    %34 = vector.shape_cast %33 : vector<1x64x64xbf16> to vector<64x64xbf16>
    %cst_41 = arith.constant dense<0.000000e+00> : vector<72x64xf32>
    %35 = tpu.matmul %32, %34, %cst_41 {dimension_numbers = #tpu.dot_dimension_numbers<[1], [0], [0], [1], [0, 0, 1, 1], [], []>} : vector<72x64xbf16>, vector<64x64xbf16>, vector<72x64xf32> -> vector<72x64xf32>
    %36 = arith.addf %30, %35 : vector<72x64xf32>
    %c0_42 = arith.constant 0 : index
    %c0_43 = arith.constant 0 : index
    %c9 = arith.constant 9 : index
    %c0_44 = arith.constant 0 : index
    %37 = vector.load %arg1[%c0_42, %c0_43, %c9, %c0_44] : memref<1x4x91x64xbf16, #tpu.memory_space<vmem>>, vector<1x1x72x64xbf16>
    %38 = vector.shape_cast %37 : vector<1x1x72x64xbf16> to vector<72x64xbf16>
    %c6 = arith.constant 6 : index
    %c0_45 = arith.constant 0 : index
    %c0_46 = arith.constant 0 : index
    %39 = vector.load %arg2[%c6, %c0_45, %c0_46] : memref<9x64x64xbf16, #tpu.memory_space<vmem>>, vector<1x64x64xbf16>
    %40 = vector.shape_cast %39 : vector<1x64x64xbf16> to vector<64x64xbf16>
    %cst_47 = arith.constant dense<0.000000e+00> : vector<72x64xf32>
    %41 = tpu.matmul %38, %40, %cst_47 {dimension_numbers = #tpu.dot_dimension_numbers<[1], [0], [0], [1], [0, 0, 1, 1], [], []>} : vector<72x64xbf16>, vector<64x64xbf16>, vector<72x64xf32> -> vector<72x64xf32>
    %42 = arith.addf %36, %41 : vector<72x64xf32>
    %c0_48 = arith.constant 0 : index
    %c1_49 = arith.constant 1 : index
    %c9_50 = arith.constant 9 : index
    %c0_51 = arith.constant 0 : index
    %43 = vector.load %arg1[%c0_48, %c1_49, %c9_50, %c0_51] : memref<1x4x91x64xbf16, #tpu.memory_space<vmem>>, vector<1x1x72x64xbf16>
    %44 = vector.shape_cast %43 : vector<1x1x72x64xbf16> to vector<72x64xbf16>
    %c7 = arith.constant 7 : index
    %c0_52 = arith.constant 0 : index
    %c0_53 = arith.constant 0 : index
    %45 = vector.load %arg2[%c7, %c0_52, %c0_53] : memref<9x64x64xbf16, #tpu.memory_space<vmem>>, vector<1x64x64xbf16>
    %46 = vector.shape_cast %45 : vector<1x64x64xbf16> to vector<64x64xbf16>
    %cst_54 = arith.constant dense<0.000000e+00> : vector<72x64xf32>
    %47 = tpu.matmul %44, %46, %cst_54 {dimension_numbers = #tpu.dot_dimension_numbers<[1], [0], [0], [1], [0, 0, 1, 1], [], []>} : vector<72x64xbf16>, vector<64x64xbf16>, vector<72x64xf32> -> vector<72x64xf32>
    %48 = arith.addf %42, %47 : vector<72x64xf32>
    %c0_55 = arith.constant 0 : index
    %c0_56 = arith.constant 0 : index
    %c10 = arith.constant 10 : index
    %c0_57 = arith.constant 0 : index
    %49 = vector.load %arg1[%c0_55, %c0_56, %c10, %c0_57] : memref<1x4x91x64xbf16, #tpu.memory_space<vmem>>, vector<1x1x72x64xbf16>
    %50 = vector.shape_cast %49 : vector<1x1x72x64xbf16> to vector<72x64xbf16>
    %c8 = arith.constant 8 : index
    %c0_58 = arith.constant 0 : index
    %c0_59 = arith.constant 0 : index
    %51 = vector.load %arg2[%c8, %c0_58, %c0_59] : memref<9x64x64xbf16, #tpu.memory_space<vmem>>, vector<1x64x64xbf16>
    %52 = vector.shape_cast %51 : vector<1x64x64xbf16> to vector<64x64xbf16>
    %cst_60 = arith.constant dense<0.000000e+00> : vector<72x64xf32>
    %53 = tpu.matmul %50, %52, %cst_60 {dimension_numbers = #tpu.dot_dimension_numbers<[1], [0], [0], [1], [0, 0, 1, 1], [], []>} : vector<72x64xbf16>, vector<64x64xbf16>, vector<72x64xf32> -> vector<72x64xf32>
    %54 = arith.addf %48, %53 : vector<72x64xf32>
    %c0_61 = arith.constant 0 : index
    %c0_62 = arith.constant 0 : index
    %55 = vector.load %arg3[%c0_61, %c0_62] : memref<1x64xf32, #tpu.memory_space<vmem>>, vector<1x64xf32>
    %56 = vector.broadcast %55 : vector<1x64xf32> to vector<72x64xf32>
    %57 = arith.addf %54, %56 : vector<72x64xf32>
    %cst_63 = arith.constant 0.000000e+00 : f32
    %58 = vector.broadcast %cst_63 : f32 to vector<72x64xf32>
    %59 = arith.maximumf %57, %58 : vector<72x64xf32>
    %60 = arith.truncf %59 : vector<72x64xf32> to vector<72x64xbf16>
    %c0_64 = arith.constant 0 : index
    %c0_65 = arith.constant 0 : index
    %c0_66 = arith.constant 0 : index
    %61 = vector.load %arg4[%c0_64, %c0_65, %c0_66] : memref<1x72x64xbf16, #tpu.memory_space<vmem>>, vector<1x72x64xbf16>
    %62 = vector.shape_cast %61 : vector<1x72x64xbf16> to vector<72x64xbf16>
    %63 = vector.shape_cast %60 : vector<72x64xbf16> to vector<1x72x64xbf16>
    tpu.vector_store %arg4[%c0_64, %c0_65, %c0_66], %63 {strides = array<i32>} : memref<1x72x64xbf16, #tpu.memory_space<vmem>>, vector<1x72x64xbf16>,
    return
  }
  func.func @transform_0(%arg0: i32) -> (i32, i32, i32, i32) {
    %c0_i32 = arith.constant 0 : i32
    %c0_i32_0 = arith.constant 0 : i32
    %c0_i32_1 = arith.constant 0 : i32
    %c0_i32_2 = arith.constant 0 : i32
    return %arg0, %c0_i32, %c0_i32_0, %c0_i32_1 : i32, i32, i32, i32
  }
  func.func @transform_1(%arg0: i32) -> (i32, i32, i32) {
    %c0_i32 = arith.constant 0 : i32
    %c0_i32_0 = arith.constant 0 : i32
    %c0_i32_1 = arith.constant 0 : i32
    %c0_i32_2 = arith.constant 0 : i32
    return %c0_i32, %c0_i32_0, %c0_i32_1 : i32, i32, i32
  }
  func.func @transform_2(%arg0: i32) -> (i32, i32) {
    %c0_i32 = arith.constant 0 : i32
    %c0_i32_0 = arith.constant 0 : i32
    %c0_i32_1 = arith.constant 0 : i32
    return %c0_i32, %c0_i32_0 : i32, i32
  }
  func.func @transform_3(%arg0: i32) -> (i32, i32, i32) {
    %c0_i32 = arith.constant 0 : i32
    %c0_i32_0 = arith.constant 0 : i32
    %c0_i32_1 = arith.constant 0 : i32
    return %arg0, %c0_i32, %c0_i32_0 : i32, i32, i32
  }
}

module attributes {stable_mosaic.version = 11 : i64} {
  func.func @_conv_tap_kernel(%arg0: i32, %arg1: memref<1x4x31x64xbf16, #tpu.memory_space<vmem>>, %arg2: memref<9x64x128xbf16, #tpu.memory_space<vmem>>, %arg3: memref<1x128xf32, #tpu.memory_space<vmem>>, %arg4: memref<1x20x128xbf16, #tpu.memory_space<vmem>>) attributes {dimension_semantics = [#tpu.dimension_semantics<parallel>], iteration_bounds = array<i64: 2>, scalar_prefetch = 0 : i64, scratch_operands = 0 : i64, tpu.core_type = #tpu.core_type<tc>, window_params = [{transform_indices = @transform_0, window_bounds = array<i64: 1, 4, 31, 64>}, {pipeline_mode = #tpu.pipeline_mode<synchronous>, transform_indices = @transform_1, window_bounds = array<i64: 9, 64, 128>}, {pipeline_mode = #tpu.pipeline_mode<synchronous>, transform_indices = @transform_2, window_bounds = array<i64: 1, 128>}, {transform_indices = @transform_3, window_bounds = array<i64: 1, 20, 128>}]} {
    %cst = arith.constant 0.000000e+00 : f32
    %0 = vector.broadcast %cst : f32 to vector<20x128xf32>
    %c0 = arith.constant 0 : index
    %c0_0 = arith.constant 0 : index
    %c0_1 = arith.constant 0 : index
    %c0_2 = arith.constant 0 : index
    %1 = vector.load %arg1[%c0, %c0_0, %c0_1, %c0_2] : memref<1x4x31x64xbf16, #tpu.memory_space<vmem>>, vector<1x1x20x64xbf16>
    %2 = vector.shape_cast %1 : vector<1x1x20x64xbf16> to vector<20x64xbf16>
    %c0_3 = arith.constant 0 : index
    %c0_4 = arith.constant 0 : index
    %c0_5 = arith.constant 0 : index
    %3 = vector.load %arg2[%c0_3, %c0_4, %c0_5] : memref<9x64x128xbf16, #tpu.memory_space<vmem>>, vector<1x64x128xbf16>
    %4 = vector.shape_cast %3 : vector<1x64x128xbf16> to vector<64x128xbf16>
    %cst_6 = arith.constant dense<0.000000e+00> : vector<20x128xf32>
    %5 = tpu.matmul %2, %4, %cst_6 {dimension_numbers = #tpu.dot_dimension_numbers<[1], [0], [0], [1], [0, 0, 1, 1], [], []>} : vector<20x64xbf16>, vector<64x128xbf16>, vector<20x128xf32> -> vector<20x128xf32>
    %6 = arith.addf %0, %5 : vector<20x128xf32>
    %c0_7 = arith.constant 0 : index
    %c1 = arith.constant 1 : index
    %c0_8 = arith.constant 0 : index
    %c0_9 = arith.constant 0 : index
    %7 = vector.load %arg1[%c0_7, %c1, %c0_8, %c0_9] : memref<1x4x31x64xbf16, #tpu.memory_space<vmem>>, vector<1x1x20x64xbf16>
    %8 = vector.shape_cast %7 : vector<1x1x20x64xbf16> to vector<20x64xbf16>
    %c1_10 = arith.constant 1 : index
    %c0_11 = arith.constant 0 : index
    %c0_12 = arith.constant 0 : index
    %9 = vector.load %arg2[%c1_10, %c0_11, %c0_12] : memref<9x64x128xbf16, #tpu.memory_space<vmem>>, vector<1x64x128xbf16>
    %10 = vector.shape_cast %9 : vector<1x64x128xbf16> to vector<64x128xbf16>
    %cst_13 = arith.constant dense<0.000000e+00> : vector<20x128xf32>
    %11 = tpu.matmul %8, %10, %cst_13 {dimension_numbers = #tpu.dot_dimension_numbers<[1], [0], [0], [1], [0, 0, 1, 1], [], []>} : vector<20x64xbf16>, vector<64x128xbf16>, vector<20x128xf32> -> vector<20x128xf32>
    %12 = arith.addf %6, %11 : vector<20x128xf32>
    %c0_14 = arith.constant 0 : index
    %c0_15 = arith.constant 0 : index
    %c1_16 = arith.constant 1 : index
    %c0_17 = arith.constant 0 : index
    %13 = vector.load %arg1[%c0_14, %c0_15, %c1_16, %c0_17] : memref<1x4x31x64xbf16, #tpu.memory_space<vmem>>, vector<1x1x20x64xbf16>
    %14 = vector.shape_cast %13 : vector<1x1x20x64xbf16> to vector<20x64xbf16>
    %c2 = arith.constant 2 : index
    %c0_18 = arith.constant 0 : index
    %c0_19 = arith.constant 0 : index
    %15 = vector.load %arg2[%c2, %c0_18, %c0_19] : memref<9x64x128xbf16, #tpu.memory_space<vmem>>, vector<1x64x128xbf16>
    %16 = vector.shape_cast %15 : vector<1x64x128xbf16> to vector<64x128xbf16>
    %cst_20 = arith.constant dense<0.000000e+00> : vector<20x128xf32>
    %17 = tpu.matmul %14, %16, %cst_20 {dimension_numbers = #tpu.dot_dimension_numbers<[1], [0], [0], [1], [0, 0, 1, 1], [], []>} : vector<20x64xbf16>, vector<64x128xbf16>, vector<20x128xf32> -> vector<20x128xf32>
    %18 = arith.addf %12, %17 : vector<20x128xf32>
    %c0_21 = arith.constant 0 : index
    %c2_22 = arith.constant 2 : index
    %c0_23 = arith.constant 0 : index
    %c0_24 = arith.constant 0 : index
    %19 = vector.load %arg1[%c0_21, %c2_22, %c0_23, %c0_24] : memref<1x4x31x64xbf16, #tpu.memory_space<vmem>>, vector<1x1x20x64xbf16>
    %20 = vector.shape_cast %19 : vector<1x1x20x64xbf16> to vector<20x64xbf16>
    %c3 = arith.constant 3 : index
    %c0_25 = arith.constant 0 : index
    %c0_26 = arith.constant 0 : index
    %21 = vector.load %arg2[%c3, %c0_25, %c0_26] : memref<9x64x128xbf16, #tpu.memory_space<vmem>>, vector<1x64x128xbf16>
    %22 = vector.shape_cast %21 : vector<1x64x128xbf16> to vector<64x128xbf16>
    %cst_27 = arith.constant dense<0.000000e+00> : vector<20x128xf32>
    %23 = tpu.matmul %20, %22, %cst_27 {dimension_numbers = #tpu.dot_dimension_numbers<[1], [0], [0], [1], [0, 0, 1, 1], [], []>} : vector<20x64xbf16>, vector<64x128xbf16>, vector<20x128xf32> -> vector<20x128xf32>
    %24 = arith.addf %18, %23 : vector<20x128xf32>
    %c0_28 = arith.constant 0 : index
    %c3_29 = arith.constant 3 : index
    %c0_30 = arith.constant 0 : index
    %c0_31 = arith.constant 0 : index
    %25 = vector.load %arg1[%c0_28, %c3_29, %c0_30, %c0_31] : memref<1x4x31x64xbf16, #tpu.memory_space<vmem>>, vector<1x1x20x64xbf16>
    %26 = vector.shape_cast %25 : vector<1x1x20x64xbf16> to vector<20x64xbf16>
    %c4 = arith.constant 4 : index
    %c0_32 = arith.constant 0 : index
    %c0_33 = arith.constant 0 : index
    %27 = vector.load %arg2[%c4, %c0_32, %c0_33] : memref<9x64x128xbf16, #tpu.memory_space<vmem>>, vector<1x64x128xbf16>
    %28 = vector.shape_cast %27 : vector<1x64x128xbf16> to vector<64x128xbf16>
    %cst_34 = arith.constant dense<0.000000e+00> : vector<20x128xf32>
    %29 = tpu.matmul %26, %28, %cst_34 {dimension_numbers = #tpu.dot_dimension_numbers<[1], [0], [0], [1], [0, 0, 1, 1], [], []>} : vector<20x64xbf16>, vector<64x128xbf16>, vector<20x128xf32> -> vector<20x128xf32>
    %30 = arith.addf %24, %29 : vector<20x128xf32>
    %c0_35 = arith.constant 0 : index
    %c2_36 = arith.constant 2 : index
    %c1_37 = arith.constant 1 : index
    %c0_38 = arith.constant 0 : index
    %31 = vector.load %arg1[%c0_35, %c2_36, %c1_37, %c0_38] : memref<1x4x31x64xbf16, #tpu.memory_space<vmem>>, vector<1x1x20x64xbf16>
    %32 = vector.shape_cast %31 : vector<1x1x20x64xbf16> to vector<20x64xbf16>
    %c5 = arith.constant 5 : index
    %c0_39 = arith.constant 0 : index
    %c0_40 = arith.constant 0 : index
    %33 = vector.load %arg2[%c5, %c0_39, %c0_40] : memref<9x64x128xbf16, #tpu.memory_space<vmem>>, vector<1x64x128xbf16>
    %34 = vector.shape_cast %33 : vector<1x64x128xbf16> to vector<64x128xbf16>
    %cst_41 = arith.constant dense<0.000000e+00> : vector<20x128xf32>
    %35 = tpu.matmul %32, %34, %cst_41 {dimension_numbers = #tpu.dot_dimension_numbers<[1], [0], [0], [1], [0, 0, 1, 1], [], []>} : vector<20x64xbf16>, vector<64x128xbf16>, vector<20x128xf32> -> vector<20x128xf32>
    %36 = arith.addf %30, %35 : vector<20x128xf32>
    %c0_42 = arith.constant 0 : index
    %c0_43 = arith.constant 0 : index
    %c5_44 = arith.constant 5 : index
    %c0_45 = arith.constant 0 : index
    %37 = vector.load %arg1[%c0_42, %c0_43, %c5_44, %c0_45] : memref<1x4x31x64xbf16, #tpu.memory_space<vmem>>, vector<1x1x20x64xbf16>
    %38 = vector.shape_cast %37 : vector<1x1x20x64xbf16> to vector<20x64xbf16>
    %c6 = arith.constant 6 : index
    %c0_46 = arith.constant 0 : index
    %c0_47 = arith.constant 0 : index
    %39 = vector.load %arg2[%c6, %c0_46, %c0_47] : memref<9x64x128xbf16, #tpu.memory_space<vmem>>, vector<1x64x128xbf16>
    %40 = vector.shape_cast %39 : vector<1x64x128xbf16> to vector<64x128xbf16>
    %cst_48 = arith.constant dense<0.000000e+00> : vector<20x128xf32>
    %41 = tpu.matmul %38, %40, %cst_48 {dimension_numbers = #tpu.dot_dimension_numbers<[1], [0], [0], [1], [0, 0, 1, 1], [], []>} : vector<20x64xbf16>, vector<64x128xbf16>, vector<20x128xf32> -> vector<20x128xf32>
    %42 = arith.addf %36, %41 : vector<20x128xf32>
    %c0_49 = arith.constant 0 : index
    %c1_50 = arith.constant 1 : index
    %c5_51 = arith.constant 5 : index
    %c0_52 = arith.constant 0 : index
    %43 = vector.load %arg1[%c0_49, %c1_50, %c5_51, %c0_52] : memref<1x4x31x64xbf16, #tpu.memory_space<vmem>>, vector<1x1x20x64xbf16>
    %44 = vector.shape_cast %43 : vector<1x1x20x64xbf16> to vector<20x64xbf16>
    %c7 = arith.constant 7 : index
    %c0_53 = arith.constant 0 : index
    %c0_54 = arith.constant 0 : index
    %45 = vector.load %arg2[%c7, %c0_53, %c0_54] : memref<9x64x128xbf16, #tpu.memory_space<vmem>>, vector<1x64x128xbf16>
    %46 = vector.shape_cast %45 : vector<1x64x128xbf16> to vector<64x128xbf16>
    %cst_55 = arith.constant dense<0.000000e+00> : vector<20x128xf32>
    %47 = tpu.matmul %44, %46, %cst_55 {dimension_numbers = #tpu.dot_dimension_numbers<[1], [0], [0], [1], [0, 0, 1, 1], [], []>} : vector<20x64xbf16>, vector<64x128xbf16>, vector<20x128xf32> -> vector<20x128xf32>
    %48 = arith.addf %42, %47 : vector<20x128xf32>
    %c0_56 = arith.constant 0 : index
    %c0_57 = arith.constant 0 : index
    %c6_58 = arith.constant 6 : index
    %c0_59 = arith.constant 0 : index
    %49 = vector.load %arg1[%c0_56, %c0_57, %c6_58, %c0_59] : memref<1x4x31x64xbf16, #tpu.memory_space<vmem>>, vector<1x1x20x64xbf16>
    %50 = vector.shape_cast %49 : vector<1x1x20x64xbf16> to vector<20x64xbf16>
    %c8 = arith.constant 8 : index
    %c0_60 = arith.constant 0 : index
    %c0_61 = arith.constant 0 : index
    %51 = vector.load %arg2[%c8, %c0_60, %c0_61] : memref<9x64x128xbf16, #tpu.memory_space<vmem>>, vector<1x64x128xbf16>
    %52 = vector.shape_cast %51 : vector<1x64x128xbf16> to vector<64x128xbf16>
    %cst_62 = arith.constant dense<0.000000e+00> : vector<20x128xf32>
    %53 = tpu.matmul %50, %52, %cst_62 {dimension_numbers = #tpu.dot_dimension_numbers<[1], [0], [0], [1], [0, 0, 1, 1], [], []>} : vector<20x64xbf16>, vector<64x128xbf16>, vector<20x128xf32> -> vector<20x128xf32>
    %54 = arith.addf %48, %53 : vector<20x128xf32>
    %c0_63 = arith.constant 0 : index
    %c0_64 = arith.constant 0 : index
    %55 = vector.load %arg3[%c0_63, %c0_64] : memref<1x128xf32, #tpu.memory_space<vmem>>, vector<1x128xf32>
    %56 = vector.broadcast %55 : vector<1x128xf32> to vector<20x128xf32>
    %57 = arith.addf %54, %56 : vector<20x128xf32>
    %cst_65 = arith.constant 0.000000e+00 : f32
    %58 = vector.broadcast %cst_65 : f32 to vector<20x128xf32>
    %59 = arith.maximumf %57, %58 : vector<20x128xf32>
    %60 = arith.truncf %59 : vector<20x128xf32> to vector<20x128xbf16>
    %c0_66 = arith.constant 0 : index
    %c0_67 = arith.constant 0 : index
    %c0_68 = arith.constant 0 : index
    %61 = vector.load %arg4[%c0_66, %c0_67, %c0_68] : memref<1x20x128xbf16, #tpu.memory_space<vmem>>, vector<1x20x128xbf16>
    %62 = vector.shape_cast %61 : vector<1x20x128xbf16> to vector<20x128xbf16>
    %63 = vector.shape_cast %60 : vector<20x128xbf16> to vector<1x20x128xbf16>
    tpu.vector_store %arg4[%c0_66, %c0_67, %c0_68], %63 {strides = array<i32>} : memref<1x20x128xbf16, #tpu.memory_space<vmem>>, vector<1x20x128xbf16>,
    return
  }
  func.func @transform_0(%arg0: i32) -> (i32, i32, i32, i32) {
    %c0_i32 = arith.constant 0 : i32
    %c0_i32_0 = arith.constant 0 : i32
    %c0_i32_1 = arith.constant 0 : i32
    %c0_i32_2 = arith.constant 0 : i32
    return %arg0, %c0_i32, %c0_i32_0, %c0_i32_1 : i32, i32, i32, i32
  }
  func.func @transform_1(%arg0: i32) -> (i32, i32, i32) {
    %c0_i32 = arith.constant 0 : i32
    %c0_i32_0 = arith.constant 0 : i32
    %c0_i32_1 = arith.constant 0 : i32
    %c0_i32_2 = arith.constant 0 : i32
    return %c0_i32, %c0_i32_0, %c0_i32_1 : i32, i32, i32
  }
  func.func @transform_2(%arg0: i32) -> (i32, i32) {
    %c0_i32 = arith.constant 0 : i32
    %c0_i32_0 = arith.constant 0 : i32
    %c0_i32_1 = arith.constant 0 : i32
    return %c0_i32, %c0_i32_0 : i32, i32
  }
  func.func @transform_3(%arg0: i32) -> (i32, i32, i32) {
    %c0_i32 = arith.constant 0 : i32
    %c0_i32_0 = arith.constant 0 : i32
    %c0_i32_1 = arith.constant 0 : i32
    return %arg0, %c0_i32, %c0_i32_0 : i32, i32, i32
  }
}

module attributes {stable_mosaic.version = 11 : i64} {
  func.func @_fc_head_kernel(%arg0: i32, %arg1: memref<2x2048xbf16, #tpu.memory_space<vmem>>, %arg2: memref<2x4xbf16, #tpu.memory_space<vmem>>, %arg3: memref<2048x512xbf16, #tpu.memory_space<vmem>>, %arg4: memref<4x512xbf16, #tpu.memory_space<vmem>>, %arg5: memref<1x512xf32, #tpu.memory_space<vmem>>, %arg6: memref<1x512xf32, #tpu.memory_space<vmem>>, %arg7: memref<1x1xf32, #tpu.memory_space<vmem>>, %arg8: memref<2x1xf32, #tpu.memory_space<vmem>>) attributes {dimension_semantics = [#tpu.dimension_semantics<arbitrary>], iteration_bounds = array<i64: 1>, scalar_prefetch = 0 : i64, scratch_operands = 0 : i64, tpu.core_type = #tpu.core_type<tc>, window_params = [{pipeline_mode = #tpu.pipeline_mode<synchronous>, transform_indices = @transform_0, window_bounds = array<i64: 2, 2048>}, {pipeline_mode = #tpu.pipeline_mode<synchronous>, transform_indices = @transform_1, window_bounds = array<i64: 2, 4>}, {pipeline_mode = #tpu.pipeline_mode<synchronous>, transform_indices = @transform_2, window_bounds = array<i64: 2048, 512>}, {pipeline_mode = #tpu.pipeline_mode<synchronous>, transform_indices = @transform_3, window_bounds = array<i64: 4, 512>}, {pipeline_mode = #tpu.pipeline_mode<synchronous>, transform_indices = @transform_4, window_bounds = array<i64: 1, 512>}, {pipeline_mode = #tpu.pipeline_mode<synchronous>, transform_indices = @transform_5, window_bounds = array<i64: 1, 512>}, {pipeline_mode = #tpu.pipeline_mode<synchronous>, transform_indices = @transform_6, window_bounds = array<i64: 1, 1>}, {pipeline_mode = #tpu.pipeline_mode<synchronous>, transform_indices = @transform_7, window_bounds = array<i64: 2, 1>}]} {
    %c0 = arith.constant 0 : index
    %c0_0 = arith.constant 0 : index
    %0 = vector.load %arg1[%c0, %c0_0] : memref<2x2048xbf16, #tpu.memory_space<vmem>>, vector<2x2048xbf16>
    %c0_1 = arith.constant 0 : index
    %c0_2 = arith.constant 0 : index
    %1 = vector.load %arg3[%c0_1, %c0_2] : memref<2048x512xbf16, #tpu.memory_space<vmem>>, vector<2048x512xbf16>
    %cst = arith.constant dense<0.000000e+00> : vector<2x512xf32>
    %2 = tpu.matmul %0, %1, %cst {dimension_numbers = #tpu.dot_dimension_numbers<[1], [0], [0], [1], [0, 0, 1, 1], [], []>} : vector<2x2048xbf16>, vector<2048x512xbf16>, vector<2x512xf32> -> vector<2x512xf32>
    %c0_3 = arith.constant 0 : index
    %c0_4 = arith.constant 0 : index
    %3 = vector.load %arg2[%c0_3, %c0_4] : memref<2x4xbf16, #tpu.memory_space<vmem>>, vector<2x4xbf16>
    %c0_5 = arith.constant 0 : index
    %c0_6 = arith.constant 0 : index
    %4 = vector.load %arg4[%c0_5, %c0_6] : memref<4x512xbf16, #tpu.memory_space<vmem>>, vector<4x512xbf16>
    %cst_7 = arith.constant dense<0.000000e+00> : vector<2x512xf32>
    %5 = tpu.matmul %3, %4, %cst_7 {dimension_numbers = #tpu.dot_dimension_numbers<[1], [0], [0], [1], [0, 0, 1, 1], [], []>} : vector<2x4xbf16>, vector<4x512xbf16>, vector<2x512xf32> -> vector<2x512xf32>
    %6 = arith.addf %2, %5 : vector<2x512xf32>
    %c0_8 = arith.constant 0 : index
    %c0_9 = arith.constant 0 : index
    %7 = vector.load %arg5[%c0_8, %c0_9] : memref<1x512xf32, #tpu.memory_space<vmem>>, vector<1x512xf32>
    %8 = vector.broadcast %7 : vector<1x512xf32> to vector<2x512xf32>
    %9 = arith.addf %6, %8 : vector<2x512xf32>
    %cst_10 = arith.constant 0.000000e+00 : f32
    %10 = vector.broadcast %cst_10 : f32 to vector<2x512xf32>
    %11 = arith.maximumf %9, %10 : vector<2x512xf32>
    %c0_11 = arith.constant 0 : index
    %c0_12 = arith.constant 0 : index
    %12 = vector.load %arg6[%c0_11, %c0_12] : memref<1x512xf32, #tpu.memory_space<vmem>>, vector<1x512xf32>
    %13 = vector.broadcast %12 : vector<1x512xf32> to vector<2x512xf32>
    %14 = arith.mulf %11, %13 : vector<2x512xf32>
    %cst_13 = arith.constant dense<0.000000e+00> : vector<2xf32>
    %15 = vector.multi_reduction <add>, %14, %cst_13 [1] : vector<2x512xf32> to vector<2xf32>
    %16 = vector.shape_cast %15 : vector<2xf32> to vector<2x1xf32>
    %c0_14 = arith.constant 0 : index
    %c0_15 = arith.constant 0 : index
    %17 = vector.load %arg7[%c0_14, %c0_15] : memref<1x1xf32, #tpu.memory_space<vmem>>, vector<1x1xf32>
    %18 = vector.broadcast %17 : vector<1x1xf32> to vector<2x1xf32>
    %19 = arith.addf %16, %18 : vector<2x1xf32>
    %20 = math.tanh %19 : vector<2x1xf32>
    %c0_16 = arith.constant 0 : index
    %c0_17 = arith.constant 0 : index
    %21 = vector.load %arg8[%c0_16, %c0_17] : memref<2x1xf32, #tpu.memory_space<vmem>>, vector<2x1xf32>
    tpu.vector_store %arg8[%c0_16, %c0_17], %20 {strides = array<i32>} : memref<2x1xf32, #tpu.memory_space<vmem>>, vector<2x1xf32>,
    return
  }
  func.func @transform_0(%arg0: i32) -> (i32, i32) {
    %c0_i32 = arith.constant 0 : i32
    %c0_i32_0 = arith.constant 0 : i32
    %c0_i32_1 = arith.constant 0 : i32
    return %c0_i32, %c0_i32_0 : i32, i32
  }
  func.func @transform_1(%arg0: i32) -> (i32, i32) {
    %c0_i32 = arith.constant 0 : i32
    %c0_i32_0 = arith.constant 0 : i32
    %c0_i32_1 = arith.constant 0 : i32
    return %c0_i32, %c0_i32_0 : i32, i32
  }
  func.func @transform_2(%arg0: i32) -> (i32, i32) {
    %c0_i32 = arith.constant 0 : i32
    %c0_i32_0 = arith.constant 0 : i32
    %c0_i32_1 = arith.constant 0 : i32
    return %c0_i32, %c0_i32_0 : i32, i32
  }
  func.func @transform_3(%arg0: i32) -> (i32, i32) {
    %c0_i32 = arith.constant 0 : i32
    %c0_i32_0 = arith.constant 0 : i32
    %c0_i32_1 = arith.constant 0 : i32
    return %c0_i32, %c0_i32_0 : i32, i32
  }
  func.func @transform_4(%arg0: i32) -> (i32, i32) {
    %c0_i32 = arith.constant 0 : i32
    %c0_i32_0 = arith.constant 0 : i32
    %c0_i32_1 = arith.constant 0 : i32
    return %c0_i32, %c0_i32_0 : i32, i32
  }
  func.func @transform_5(%arg0: i32) -> (i32, i32) {
    %c0_i32 = arith.constant 0 : i32
    %c0_i32_0 = arith.constant 0 : i32
    %c0_i32_1 = arith.constant 0 : i32
    return %c0_i32, %c0_i32_0 : i32, i32
  }
  func.func @transform_6(%arg0: i32) -> (i32, i32) {
    %c0_i32 = arith.constant 0 : i32
    %c0_i32_0 = arith.constant 0 : i32
    %c0_i32_1 = arith.constant 0 : i32
    return %c0_i32, %c0_i32_0 : i32, i32
  }
  func.func @transform_7(%arg0: i32) -> (i32, i32) {
    %c0_i32 = arith.constant 0 : i32
    %c0_i32_0 = arith.constant 0 : i32
    %c0_i32_1 = arith.constant 0 : i32
    return %c0_i32, %c0_i32_0 : i32, i32
  }
}

</mosaic_0001>

<bundles_post_ra>
// kernel: critic_forward.5
= control target key start
LH: loop header
LB: loop body
LE: loop exit
PB: predicated region body
PF: predicated region fallthrough
CT: control target
= control target key end

     0   :  { %s2809_s12 = smov 0   ;;  %s3319_s0 = inlined_call_operand.vmem [shape: bf16[2048,128], index: 0, kind: input, shape index: {}]   ;;  %s3320_s1 = inlined_call_operand.vmem [shape: bf16[128,32], index: 1, kind: input, shape index: {}]   ;;  %s3321_s2 = inlined_call_operand.vmem [shape: f32[1,32], index: 2, kind: input, shape index: {}]   ;;  %s3322_s3 = inlined_call_operand.vmem [shape: bf16[2048,32], index: 3, kind: output, shape index: {}]  }
   0x1 LB: > { %s2128_s13 = sadd.s32 4294967295, %s2787_s12   ;;  %p2132_p0 = scmp.ge.s32.totalorder %s2787_s12, 1  ;;  %s2787_s12 = sphi %s2809_s12, %s13_s12  }
   0x2   : > { %p138_p1 = scmp.lt.s32.totalorder %s2787_s12, 3 }
   0x4   : > { %p139_p2 = pnand %p2132_p0, %p138_p1 }
   0x5   : > { %s2133_s16 = sshll.u32 (!%p139_p2), %s2128_s13, 7 }
   0x6   : > { %142 = sbr.rel (%p139_p2) target bundleno = 371 (0x173), region = 32  ;;  %p163_p3 = scmp.lt.s32.totalorder (!%p139_p2), %s2133_s16, 255 }
   0xb   : > { %v2708_v0 = vld [vmem:[%s3320_s1 + $0x38] sm:$0xff]   ;;  %v2709_v1 = vld [vmem:[%s3320_s1 + $0x30] sm:$0xff]   ;;  %s3324_s16 = smov (!%p163_p3, %s2133_s16), 255  ;;  %v2710_v2 = vld [vmem:[%s3320_s1 + $0x28] sm:$0xff]   ;;  %vm1943_vm0 = vcmask 257024  }
   0xc   : > { %2540 = vmatprep.subr.bf16.mxu0 %v2708_v0  ;;  %2684 = vmatprep.subr.bf16.mxu1 %v2708_v0  ;;  %s2134_s21 = sshll.u32 %s3324_s16, 2  ;;  %v2711_v3 = vld [vmem:[%s3320_s1 + $0x20] sm:$0xff]   ;;  %v2712_v6 = vld [vmem:[%s3320_s1 + $0x18] sm:$0xff]   ;;  %v2713_v7 = vld [vmem:[%s3320_s1 + $0x10] sm:$0xff]  }
   0xd   : > { %2541 = vmatpush3.bf16.msra.mxu0 %v2708_v0  ;;  %2692 = vmatpush3.bf16.msra.mxu1 %v2708_v0  ;;  %s2834_s24 = scalar_lea.vmem %s3319_s0, %s2134_s21  ;;  %v2714_v8 = vld [vmem:[%s3320_s1 + $0x8] sm:$0xff]   ;;  %v2715_v9 = vld [vmem:[%s3320_s1] sm:$0xff]   ;;  %s2929_s13 = scalar_lea.vmem %s3322_s3, %s2134_s21 }
   0xe   : > { %2542 = vmatprep.subr.bf16.mxu0 %v2709_v1  ;;  %2685 = vmatprep.subr.bf16.mxu1 %v2709_v1  ;;  %v2716_v4 = vld [vmem:[%s2834_s24] sm:$0xff]   ;;  %v2718_v10 = vld [vmem:[%s2834_s24 + $0x8] sm:$0xff]   ;;  %v2720_v12 = vld [vmem:[%s2834_s24 + $0x10] sm:$0xff]  }
   0xf   : > { %v2717_v5 = vld [vmem:[%s2834_s24 + $0x100] sm:$0xff]   ;;  %2556 = vmatprep.mubr.bf16.mxu0 %v2716_v4  ;;  %v2719_v11 = vld [vmem:[%s2834_s24 + $0x108] sm:$0xff]   ;;  %v2721_v13 = vld [vmem:[%s2834_s24 + $0x110] sm:$0xff]  }
  0x10   : > { %2620 = vmatprep.mubr.bf16.mxu1 %v2717_v5  ;;  %v2722_v14 = vld [vmem:[%s2834_s24 + $0x18] sm:$0xff]   ;;  %v2724_v16 = vld [vmem:[%s2834_s24 + $0x20] sm:$0xff]   ;;  %v2726_v18 = vld [vmem:[%s2834_s24 + $0x28] sm:$0xff]  }
  0x11   : > { %2543 = vmatpush3.bf16.msra.mxu0 %v2709_v1  ;;  %2693 = vmatpush3.bf16.msra.mxu1 %v2709_v1  ;;  %v2723_v15 = vld [vmem:[%s2834_s24 + $0x118] sm:$0xff]   ;;  %v2725_v17 = vld [vmem:[%s2834_s24 + $0x120] sm:$0xff]   ;;  %v2727_v19 = vld [vmem:[%s2834_s24 + $0x128] sm:$0xff]  }
  0x12   : > { %2544 = vmatprep.subr.bf16.mxu0 %v2710_v2  ;;  %2686 = vmatprep.subr.bf16.mxu1 %v2710_v2  ;;  %v2728_v20 = vld [vmem:[%s2834_s24 + $0x30] sm:$0xff]   ;;  %v2730_v22 = vld [vmem:[%s2834_s24 + $0x38] sm:$0xff]   ;;  %v2732_v24 = vld [vmem:[%s2834_s24 + $0x40] sm:$0xff]  }
  0x13   : > { %v2729_v21 = vld [vmem:[%s2834_s24 + $0x130] sm:$0xff]   ;;  %v2731_v23 = vld [vmem:[%s2834_s24 + $0x138] sm:$0xff]   ;;  %v2733_v25 = vld [vmem:[%s2834_s24 + $0x140] sm:$0xff]  }
  0x14   : > { %v2734_v26 = vld [vmem:[%s2834_s24 + $0x48] sm:$0xff]   ;;  %v2736_v28 = vld [vmem:[%s2834_s24 + $0x50] sm:$0xff]   ;;  %v2738_v30 = vld [vmem:[%s2834_s24 + $0x58] sm:$0xff]  }
  0x15   : > { %2545 = vmatpush3.bf16.msra.mxu0 %v2710_v2  ;;  %2694 = vmatpush3.bf16.msra.mxu1 %v2710_v2  ;;  %v2735_v27 = vld [vmem:[%s2834_s24 + $0x148] sm:$0xff]   ;;  %v2737_v29 = vld [vmem:[%s2834_s24 + $0x150] sm:$0xff]   ;;  %v2739_v31 = vld [vmem:[%s2834_s24 + $0x158] sm:$0xff]  }
  0x16   : > { %2546 = vmatprep.subr.bf16.mxu0 %v2711_v3  ;;  %2687 = vmatprep.subr.bf16.mxu1 %v2711_v3  ;;  %v2740_v32 = vld [vmem:[%s2834_s24 + $0x60] sm:$0xff]   ;;  %v2742_v34 = vld [vmem:[%s2834_s24 + $0x68] sm:$0xff]   ;;  %v2744_v36 = vld [vmem:[%s2834_s24 + $0x70] sm:$0xff]  }
  0x17   : > { %v2741_v33 = vld [vmem:[%s2834_s24 + $0x160] sm:$0xff]   ;;  %v2743_v35 = vld [vmem:[%s2834_s24 + $0x168] sm:$0xff]   ;;  %v2745_v37 = vld [vmem:[%s2834_s24 + $0x170] sm:$0xff]  }
  0x18   : > { %v2746_v38 = vld [vmem:[%s2834_s24 + $0x78] sm:$0xff]   ;;  %v2748_v40 = vld [vmem:[%s2834_s24 + $0x80] sm:$0xff]   ;;  %v2750_v42 = vld [vmem:[%s2834_s24 + $0x88] sm:$0xff]  }
  0x19   : > { %2547 = vmatpush3.bf16.msra.mxu0 %v2711_v3  ;;  %2695 = vmatpush3.bf16.msra.mxu1 %v2711_v3  ;;  %v2747_v39 = vld [vmem:[%s2834_s24 + $0x178] sm:$0xff]   ;;  %v2749_v41 = vld [vmem:[%s2834_s24 + $0x180] sm:$0xff]   ;;  %v2751_v43 = vld [vmem:[%s2834_s24 + $0x188] sm:$0xff]  }
  0x1a   : > { %2548 = vmatprep.subr.bf16.mxu0 %v2712_v6  ;;  %2688 = vmatprep.subr.bf16.mxu1 %v2712_v6  ;;  %v2752_v44 = vld [vmem:[%s2834_s24 + $0x90] sm:$0xff]   ;;  %v2754_v46 = vld [vmem:[%s2834_s24 + $0x98] sm:$0xff]   ;;  %v2756_v48 = vld [vmem:[%s2834_s24 + $0xa0] sm:$0xff]  }
  0x1b   : > { %v2753_v45 = vld [vmem:[%s2834_s24 + $0x190] sm:$0xff]   ;;  %v2755_v47 = vld [vmem:[%s2834_s24 + $0x198] sm:$0xff]   ;;  %v2757_v49 = vld [vmem:[%s2834_s24 + $0x1a0] sm:$0xff]  }
  0x1c   : > { %v2758_v50 = vld [vmem:[%s2834_s24 + $0xa8] sm:$0xff]   ;;  %v2760_v52 = vld [vmem:[%s2834_s24 + $0xb0] sm:$0xff]   ;;  %v2762_v54 = vld [vmem:[%s2834_s24 + $0xb8] sm:$0xff]  }
  0x1d   : > { %2549 = vmatpush3.bf16.msra.mxu0 %v2712_v6  ;;  %2696 = vmatpush3.bf16.msra.mxu1 %v2712_v6  ;;  %v2759_v51 = vld [vmem:[%s2834_s24 + $0x1a8] sm:$0xff]   ;;  %v2761_v53 = vld [vmem:[%s2834_s24 + $0x1b0] sm:$0xff]   ;;  %v2763_v55 = vld [vmem:[%s2834_s24 + $0x1b8] sm:$0xff]  }
  0x1e   : > { %2550 = vmatprep.subr.bf16.mxu0 %v2713_v7  ;;  %2689 = vmatprep.subr.bf16.mxu1 %v2713_v7  ;;  %v2764_v56 = vld [vmem:[%s2834_s24 + $0xc0] sm:$0xff]   ;;  %v2766_v58 = vld [vmem:[%s2834_s24 + $0xc8] sm:$0xff]   ;;  %v2768_v60 = vld [vmem:[%s2834_s24 + $0xd0] sm:$0xff]  }
  0x1f   : > { %v2765_v57 = vld [vmem:[%s2834_s24 + $0x1c0] sm:$0xff]   ;;  %v2767_v59 = vld [vmem:[%s2834_s24 + $0x1c8] sm:$0xff]   ;;  %v2769_v61 = vld [vmem:[%s2834_s24 + $0x1d0] sm:$0xff]  }
  0x20   : > { %v2770_v62 = vld [vmem:[%s2834_s24 + $0xd8] sm:$0xff]   ;;  %v2772_v0 = vld [vmem:[%s2834_s24 + $0xe0] sm:$0xff]   ;;  %v2774_v2 = vld [vmem:[%s2834_s24 + $0xe8] sm:$0xff]  }
  0x21   : > { %2551 = vmatpush3.bf16.msra.mxu0 %v2713_v7  ;;  %2697 = vmatpush3.bf16.msra.mxu1 %v2713_v7  ;;  %v2771_v63 = vld [vmem:[%s2834_s24 + $0x1d8] sm:$0xff]   ;;  %v2773_v1 = vld [vmem:[%s2834_s24 + $0x1e0] sm:$0xff]   ;;  %v2775_v3 = vld [vmem:[%s2834_s24 + $0x1e8] sm:$0xff]  }
  0x22   : > { %2552 = vmatprep.subr.bf16.mxu0 %v2714_v8  ;;  %2690 = vmatprep.subr.bf16.mxu1 %v2714_v8  ;;  %v2776_v4 = vld [vmem:[%s2834_s24 + $0xf0] sm:$0xff]   ;;  %v2778_v6 = vld [vmem:[%s2834_s24 + $0xf8] sm:$0xff]  }
  0x23   : > { %v2777_v5 = vld [vmem:[%s2834_s24 + $0x1f0] sm:$0xff]   ;;  %v2779_v7 = vld [vmem:[%s2834_s24 + $0x1f8] sm:$0xff]  }
  0x25   : > { %2553 = vmatpush3.bf16.msra.mxu0 %v2714_v8  ;;  %2698 = vmatpush3.bf16.msra.mxu1 %v2714_v8  ;;  %v2918_v8 = vld [vmem:[%s3321_s2] ss:$0 sm:$0xff] }
  0x26   : > { %2554 = vmatprep.subr.bf16.mxu0 %v2715_v9  ;;  %2691 = vmatprep.subr.bf16.mxu1 %v2715_v9 }
  0x29   : > { %2555 = vmatpush3.bf16.msra.mxu0 %v2715_v9  ;;  %2699 = vmatpush3.bf16.msra.mxu1 %v2715_v9 }
  0x2c   : > { %2557 = vmatmul.mubr.bf16.vlgmr.msra.gmra.mxu0 %v2718_v10  ;;  %2621 = vmatmul.mubr.bf16.vlgmr.msra.gmra.mxu1 %v2719_v11 }
  0x2d   : > { %2560 = vmatprep.mubr.bf16.mxu0 %v2720_v12  ;;  %2624 = vmatprep.mubr.bf16.mxu1 %v2721_v13 }
  0x34   : > { %2561 = vmatmul.mubr.bf16.gmra.mxu0 %v2722_v14  ;;  %2625 = vmatmul.mubr.bf16.gmra.mxu1 %v2723_v15 }
  0x35   : > { %2564 = vmatprep.mubr.bf16.mxu0 %v2724_v16  ;;  %2628 = vmatprep.mubr.bf16.mxu1 %v2725_v17 }
  0x3c   : > { %2565 = vmatmul.mubr.bf16.gmra.mxu0 %v2726_v18  ;;  %2629 = vmatmul.mubr.bf16.gmra.mxu1 %v2727_v19 }
  0x3d   : > { %2568 = vmatprep.mubr.bf16.mxu0 %v2728_v20  ;;  %2632 = vmatprep.mubr.bf16.mxu1 %v2729_v21 }
  0x44   : > { %2569 = vmatmul.mubr.bf16.gmra.mxu0 %v2730_v22  ;;  %2633 = vmatmul.mubr.bf16.gmra.mxu1 %v2731_v23 }
  0x45   : > { %2572 = vmatprep.mubr.bf16.mxu0 %v2732_v24  ;;  %2636 = vmatprep.mubr.bf16.mxu1 %v2733_v25 }
  0x4c   : > { %2573 = vmatmul.mubr.bf16.gmra.mxu0 %v2734_v26  ;;  %2637 = vmatmul.mubr.bf16.gmra.mxu1 %v2735_v27 }
  0x4d   : > { %2576 = vmatprep.mubr.bf16.mxu0 %v2736_v28  ;;  %2640 = vmatprep.mubr.bf16.mxu1 %v2737_v29 }
  0x54   : > { %2577 = vmatmul.mubr.bf16.gmra.mxu0 %v2738_v30  ;;  %2641 = vmatmul.mubr.bf16.gmra.mxu1 %v2739_v31 }
  0x55   : > { %2580 = vmatprep.mubr.bf16.mxu0 %v2740_v32  ;;  %2644 = vmatprep.mubr.bf16.mxu1 %v2741_v33 }
  0x5c   : > { %2581 = vmatmul.mubr.bf16.gmra.mxu0 %v2742_v34  ;;  %2645 = vmatmul.mubr.bf16.gmra.mxu1 %v2743_v35 }
  0x5d   : > { %2584 = vmatprep.mubr.bf16.mxu0 %v2744_v36  ;;  %2648 = vmatprep.mubr.bf16.mxu1 %v2745_v37 }
  0x64   : > { %2585 = vmatmul.mubr.bf16.gmra.mxu0 %v2746_v38  ;;  %2649 = vmatmul.mubr.bf16.gmra.mxu1 %v2747_v39 }
  0x65   : > { %2588 = vmatprep.mubr.bf16.mxu0 %v2748_v40  ;;  %2652 = vmatprep.mubr.bf16.mxu1 %v2749_v41 }
  0x6c   : > { %2589 = vmatmul.mubr.bf16.gmra.mxu0 %v2750_v42  ;;  %2653 = vmatmul.mubr.bf16.gmra.mxu1 %v2751_v43 }
  0x6d   : > { %2592 = vmatprep.mubr.bf16.mxu0 %v2752_v44  ;;  %2656 = vmatprep.mubr.bf16.mxu1 %v2753_v45 }
  0x74   : > { %2593 = vmatmul.mubr.bf16.gmra.mxu0 %v2754_v46  ;;  %2657 = vmatmul.mubr.bf16.gmra.mxu1 %v2755_v47 }
  0x75   : > { %2596 = vmatprep.mubr.bf16.mxu0 %v2756_v48  ;;  %2660 = vmatprep.mubr.bf16.mxu1 %v2757_v49 }
  0x7c   : > { %2597 = vmatmul.mubr.bf16.gmra.mxu0 %v2758_v50  ;;  %2661 = vmatmul.mubr.bf16.gmra.mxu1 %v2759_v51 }
  0x7d   : > { %2600 = vmatprep.mubr.bf16.mxu0 %v2760_v52  ;;  %2664 = vmatprep.mubr.bf16.mxu1 %v2761_v53 }
  0x84   : > { %2601 = vmatmul.mubr.bf16.gmra.mxu0 %v2762_v54  ;;  %2665 = vmatmul.mubr.bf16.gmra.mxu1 %v2763_v55 }
  0x85   : > { %2604 = vmatprep.mubr.bf16.mxu0 %v2764_v56  ;;  %2668 = vmatprep.mubr.bf16.mxu1 %v2765_v57 }
  0x8c   : > { %2605 = vmatmul.mubr.bf16.gmra.mxu0 %v2766_v58  ;;  %2669 = vmatmul.mubr.bf16.gmra.mxu1 %v2767_v59 }
  0x8d   : > { %2608 = vmatprep.mubr.bf16.mxu0 %v2768_v60  ;;  %2672 = vmatprep.mubr.bf16.mxu1 %v2769_v61 }
  0x94   : > { %2609 = vmatmul.mubr.bf16.gmra.mxu0 %v2770_v62  ;;  %2673 = vmatmul.mubr.bf16.gmra.mxu1 %v2771_v63 }
  0x95   : > { %2612 = vmatprep.mubr.bf16.mxu0 %v2772_v0  ;;  %2676 = vmatprep.mubr.bf16.mxu1 %v2773_v1 }
  0x9c   : > { %2613 = vmatmul.mubr.bf16.gmra.mxu0 %v2774_v2  ;;  %2677 = vmatmul.mubr.bf16.gmra.mxu1 %v2775_v3 }
  0x9d   : > { %2616 = vmatprep.mubr.bf16.mxu0 %v2776_v4  ;;  %2680 = vmatprep.mubr.bf16.mxu1 %v2777_v5 }
  0xa4   : > { %2617 = vmatmul.mubr.bf16.gmra.mxu0 %v2778_v6  ;;  %2681 = vmatmul.mubr.bf16.gmra.mxu1 %v2779_v7 }
  0xec   : > { %v2558_v9 = vpop.f32.mrf.mxu0  ;;  %v2622_v10 = vpop.f32.mrf.mxu1 }
  0xed   : > { %v801_v11 = vadd.f32 %v2558_v9, %v2918_v8  ;;  %v1057_v12 = vadd.f32 %v2622_v10, %v2918_v8 }
  0xee   : > { %v792_v13 = vpop.f32.mrf.mxu0  ;;  %v1048_v14 = vpop.f32.mrf.mxu1 }
  0xef   : > { %v1305_v15 = vmax.f32 %v801_v11, 0.0  ;;  %v1369_v16 = vmax.f32 %v1057_v12, 0.0  ;;  %v793_v17 = vadd.f32 %v2918_v8, %v792_v13  ;;  %v1049_v18 = vadd.f32 %v2918_v8, %v1048_v14 }
  0xf0   : > { %v2559_v19 = vpop.f32.mrf.mxu0  ;;  %v2623_v20 = vpop.f32.mrf.mxu1 }
  0xf1   : > { %v2342_v21 = vpack.c.bf16 %v1305_v15, %v1305_v15  ;;  %v2406_v22 = vpack.c.bf16 %v1369_v16, %v1369_v16  ;;  %v1303_v23 = vmax.f32 %v793_v17, 0.0  ;;  %v1367_v24 = vmax.f32 %v1049_v18, 0.0 }
  0xf2   : > { %v804_v25 = vadd.f32 %v2559_v19, %v2918_v8  ;;  %v1060_v26 = vadd.f32 %v2623_v20, %v2918_v8  ;;  %v795_v27 = vpop.f32.mrf.mxu0  ;;  %v1051_v28 = vpop.f32.mrf.mxu1 }
  0xf3   : > { %1946 = vst.msk [vmem:[%s2929_s13 + $0x8] sm:$0xf] %vm1943_vm0, %v2342_v21  ;;  %2010 = vst.msk [vmem:[%s2929_s13 + $0x108] sm:$0xf] %vm1943_vm0, %v2406_v22  ;;  %v2340_v29 = vpack.c.bf16 %v1303_v23, %v1303_v23  ;;  %v2404_v30 = vpack.c.bf16 %v1367_v24, %v1367_v24  ;;  %v796_v31 = vadd.f32 %v2918_v8, %v795_v27 }
  0xf4   : > { %v1052_v32 = vadd.f32 %v2918_v8, %v1051_v28  ;;  %v1306_v33 = vmax.f32 %v804_v25, 0.0  ;;  %v1370_v34 = vmax.f32 %v1060_v26, 0.0  ;;  %v2562_v35 = vpop.f32.mrf.mxu0  ;;  %v2626_v36 = vpop.f32.mrf.mxu1 }
  0xf5   : > { %1944 = vst.msk [vmem:[%s2929_s13] sm:$0xf] %vm1943_vm0, %v2340_v29  ;;  %2008 = vst.msk [vmem:[%s2929_s13 + $0x100] sm:$0xf] %vm1943_vm0, %v2404_v30  ;;  %v1304_v37 = vmax.f32 %v796_v31, 0.0  ;;  %v817_v39 = vadd.f32 %v2562_v35, %v2918_v8  ;;  %v1073_v40 = vadd.f32 %v2626_v36, %v2918_v8 }
  0xf6   : > { %v1368_v38 = vmax.f32 %v1052_v32, 0.0  ;;  %v2343_v41 = vpack.c.bf16 %v1306_v33, %v1306_v33  ;;  %v2407_v42 = vpack.c.bf16 %v1370_v34, %v1370_v34  ;;  %v808_v43 = vpop.f32.mrf.mxu0  ;;  %v1064_v44 = vpop.f32.mrf.mxu1 }
  0xf7   : > { %v2341_v45 = vpack.c.bf16 %v1304_v37, %v1304_v37  ;;  %v1309_v47 = vmax.f32 %v817_v39, 0.0  ;;  %v1373_v48 = vmax.f32 %v1073_v40, 0.0  ;;  %v809_v49 = vadd.f32 %v2918_v8, %v808_v43 }
  0xf8   : > { %v2405_v46 = vpack.c.bf16 %v1368_v38, %v1368_v38  ;;  %1947 = vst.msk [vmem:[%s2929_s13 + $0xc] sm:$0xf] %vm1943_vm0, %v2343_v41  ;;  %2011 = vst.msk [vmem:[%s2929_s13 + $0x10c] sm:$0xf] %vm1943_vm0, %v2407_v42  ;;  %v1065_v50 = vadd.f32 %v2918_v8, %v1064_v44  ;;  %v2563_v51 = vpop.f32.mrf.mxu0  ;;  %v2627_v52 = vpop.f32.mrf.mxu1 }
  0xf9   : > { %1945 = vst.msk [vmem:[%s2929_s13 + $0x4] sm:$0xf] %vm1943_vm0, %v2341_v45  ;;  %v2346_v53 = vpack.c.bf16 %v1309_v47, %v1309_v47  ;;  %v2410_v54 = vpack.c.bf16 %v1373_v48, %v1373_v48  ;;  %v820_v55 = vadd.f32 %v2563_v51, %v2918_v8  ;;  %v1076_v56 = vadd.f32 %v2627_v52, %v2918_v8 }
  0xfa   : > { %2009 = vst.msk [vmem:[%s2929_s13 + $0x104] sm:$0xf] %vm1943_vm0, %v2405_v46  ;;  %v1307_v57 = vmax.f32 %v809_v49, 0.0  ;;  %v1371_v58 = vmax.f32 %v1065_v50, 0.0  ;;  %v811_v59 = vpop.f32.mrf.mxu0  ;;  %v1067_v60 = vpop.f32.mrf.mxu1 }
  0xfb   : > { %1950 = vst.msk [vmem:[%s2929_s13 + $0x18] sm:$0xf] %vm1943_vm0, %v2346_v53  ;;  %2014 = vst.msk [vmem:[%s2929_s13 + $0x118] sm:$0xf] %vm1943_vm0, %v2410_v54  ;;  %v1310_v61 = vmax.f32 %v820_v55, 0.0  ;;  %v1374_v62 = vmax.f32 %v1076_v56, 0.0  ;;  %v812_v63 = vadd.f32 %v2918_v8, %v811_v59  ;;  %v1068_v0 = vadd.f32 %v2918_v8, %v1067_v60 }
  0xfc   : > { %v2344_v1 = vpack.c.bf16 %v1307_v57, %v1307_v57  ;;  %v2408_v2 = vpack.c.bf16 %v1371_v58, %v1371_v58  ;;  %v2566_v3 = vpop.f32.mrf.mxu0  ;;  %v2630_v4 = vpop.f32.mrf.mxu1 }
  0xfd   : > { %v2347_v5 = vpack.c.bf16 %v1310_v61, %v1310_v61  ;;  %v2411_v6 = vpack.c.bf16 %v1374_v62, %v1374_v62  ;;  %v1308_v7 = vmax.f32 %v812_v63, 0.0  ;;  %v1372_v9 = vmax.f32 %v1068_v0, 0.0 }
  0xfe   : > { %1948 = vst.msk [vmem:[%s2929_s13 + $0x10] sm:$0xf] %vm1943_vm0, %v2344_v1  ;;  %2012 = vst.msk [vmem:[%s2929_s13 + $0x110] sm:$0xf] %vm1943_vm0, %v2408_v2  ;;  %v833_v10 = vadd.f32 %v2566_v3, %v2918_v8  ;;  %v1089_v11 = vadd.f32 %v2630_v4, %v2918_v8  ;;  %v824_v12 = vpop.f32.mrf.mxu0  ;;  %v1080_v13 = vpop.f32.mrf.mxu1 }
  0xff   : > { %1951 = vst.msk [vmem:[%s2929_s13 + $0x1c] sm:$0xf] %vm1943_vm0, %v2347_v5  ;;  %2015 = vst.msk [vmem:[%s2929_s13 + $0x11c] sm:$0xf] %vm1943_vm0, %v2411_v6  ;;  %v2345_v14 = vpack.c.bf16 %v1308_v7, %v1308_v7  ;;  %v2409_v15 = vpack.c.bf16 %v1372_v9, %v1372_v9  ;;  %v825_v16 = vadd.f32 %v2918_v8, %v824_v12 }
 0x100   : > { %v1081_v17 = vadd.f32 %v2918_v8, %v1080_v13  ;;  %v1313_v18 = vmax.f32 %v833_v10, 0.0  ;;  %v1377_v19 = vmax.f32 %v1089_v11, 0.0  ;;  %v2567_v20 = vpop.f32.mrf.mxu0  ;;  %v2631_v21 = vpop.f32.mrf.mxu1 }
 0x101   : > { %1949 = vst.msk [vmem:[%s2929_s13 + $0x14] sm:$0xf] %vm1943_vm0, %v2345_v14  ;;  %2013 = vst.msk [vmem:[%s2929_s13 + $0x114] sm:$0xf] %vm1943_vm0, %v2409_v15  ;;  %v1311_v22 = vmax.f32 %v825_v16, 0.0  ;;  %v836_v24 = vadd.f32 %v2567_v20, %v2918_v8  ;;  %v1092_v25 = vadd.f32 %v2631_v21, %v2918_v8 }
 0x102   : > { %v1375_v23 = vmax.f32 %v1081_v17, 0.0  ;;  %v2350_v26 = vpack.c.bf16 %v1313_v18, %v1313_v18  ;;  %v2414_v27 = vpack.c.bf16 %v1377_v19, %v1377_v19  ;;  %v827_v28 = vpop.f32.mrf.mxu0  ;;  %v1083_v29 = vpop.f32.mrf.mxu1 }
 0x103   : > { %v2348_v30 = vpack.c.bf16 %v1311_v22, %v1311_v22  ;;  %v1314_v32 = vmax.f32 %v836_v24, 0.0  ;;  %v1378_v33 = vmax.f32 %v1092_v25, 0.0  ;;  %v828_v34 = vadd.f32 %v2918_v8, %v827_v28 }
 0x104   : > { %v2412_v31 = vpack.c.bf16 %v1375_v23, %v1375_v23  ;;  %1954 = vst.msk [vmem:[%s2929_s13 + $0x28] sm:$0xf] %vm1943_vm0, %v2350_v26  ;;  %2018 = vst.msk [vmem:[%s2929_s13 + $0x128] sm:$0xf] %vm1943_vm0, %v2414_v27  ;;  %v1084_v35 = vadd.f32 %v2918_v8, %v1083_v29  ;;  %v2570_v36 = vpop.f32.mrf.mxu0  ;;  %v2634_v37 = vpop.f32.mrf.mxu1 }
 0x105   : > { %1952 = vst.msk [vmem:[%s2929_s13 + $0x20] sm:$0xf] %vm1943_vm0, %v2348_v30  ;;  %v2351_v38 = vpack.c.bf16 %v1314_v32, %v1314_v32  ;;  %v2415_v39 = vpack.c.bf16 %v1378_v33, %v1378_v33  ;;  %v849_v40 = vadd.f32 %v2570_v36, %v2918_v8  ;;  %v1105_v41 = vadd.f32 %v2634_v37, %v2918_v8 }
 0x106   : > { %2016 = vst.msk [vmem:[%s2929_s13 + $0x120] sm:$0xf] %vm1943_vm0, %v2412_v31  ;;  %v1312_v42 = vmax.f32 %v828_v34, 0.0  ;;  %v1376_v43 = vmax.f32 %v1084_v35, 0.0  ;;  %v840_v44 = vpop.f32.mrf.mxu0  ;;  %v1096_v45 = vpop.f32.mrf.mxu1 }
 0x107   : > { %1955 = vst.msk [vmem:[%s2929_s13 + $0x2c] sm:$0xf] %vm1943_vm0, %v2351_v38  ;;  %2019 = vst.msk [vmem:[%s2929_s13 + $0x12c] sm:$0xf] %vm1943_vm0, %v2415_v39  ;;  %v1317_v46 = vmax.f32 %v849_v40, 0.0  ;;  %v1381_v47 = vmax.f32 %v1105_v41, 0.0  ;;  %v841_v48 = vadd.f32 %v2918_v8, %v840_v44  ;;  %v1097_v49 = vadd.f32 %v2918_v8, %v1096_v45 }
 0x108   : > { %v2349_v50 = vpack.c.bf16 %v1312_v42, %v1312_v42  ;;  %v2413_v51 = vpack.c.bf16 %v1376_v43, %v1376_v43  ;;  %v2571_v52 = vpop.f32.mrf.mxu0  ;;  %v2635_v53 = vpop.f32.mrf.mxu1 }
 0x109   : > { %v2354_v54 = vpack.c.bf16 %v1317_v46, %v1317_v46  ;;  %v2418_v55 = vpack.c.bf16 %v1381_v47, %v1381_v47  ;;  %v1315_v56 = vmax.f32 %v841_v48, 0.0  ;;  %v1379_v57 = vmax.f32 %v1097_v49, 0.0 }
 0x10a   : > { %1953 = vst.msk [vmem:[%s2929_s13 + $0x24] sm:$0xf] %vm1943_vm0, %v2349_v50  ;;  %2017 = vst.msk [vmem:[%s2929_s13 + $0x124] sm:$0xf] %vm1943_vm0, %v2413_v51  ;;  %v852_v58 = vadd.f32 %v2571_v52, %v2918_v8  ;;  %v1108_v59 = vadd.f32 %v2635_v53, %v2918_v8  ;;  %v843_v60 = vpop.f32.mrf.mxu0  ;;  %v1099_v61 = vpop.f32.mrf.mxu1 }
 0x10b   : > { %1958 = vst.msk [vmem:[%s2929_s13 + $0x38] sm:$0xf] %vm1943_vm0, %v2354_v54  ;;  %2022 = vst.msk [vmem:[%s2929_s13 + $0x138] sm:$0xf] %vm1943_vm0, %v2418_v55  ;;  %v2352_v62 = vpack.c.bf16 %v1315_v56, %v1315_v56  ;;  %v2416_v63 = vpack.c.bf16 %v1379_v57, %v1379_v57  ;;  %v844_v0 = vadd.f32 %v2918_v8, %v843_v60 }
 0x10c   : > { %v1100_v1 = vadd.f32 %v2918_v8, %v1099_v61  ;;  %v1318_v2 = vmax.f32 %v852_v58, 0.0  ;;  %v1382_v3 = vmax.f32 %v1108_v59, 0.0  ;;  %v2574_v4 = vpop.f32.mrf.mxu0  ;;  %v2638_v5 = vpop.f32.mrf.mxu1 }
 0x10d   : > { %1956 = vst.msk [vmem:[%s2929_s13 + $0x30] sm:$0xf] %vm1943_vm0, %v2352_v62  ;;  %2020 = vst.msk [vmem:[%s2929_s13 + $0x130] sm:$0xf] %vm1943_vm0, %v2416_v63  ;;  %v1316_v6 = vmax.f32 %v844_v0, 0.0  ;;  %v865_v9 = vadd.f32 %v2574_v4, %v2918_v8  ;;  %v1121_v10 = vadd.f32 %v2638_v5, %v2918_v8 }
 0x10e   : > { %v1380_v7 = vmax.f32 %v1100_v1, 0.0  ;;  %v2355_v11 = vpack.c.bf16 %v1318_v2, %v1318_v2  ;;  %v2419_v12 = vpack.c.bf16 %v1382_v3, %v1382_v3  ;;  %v856_v13 = vpop.f32.mrf.mxu0  ;;  %v1112_v14 = vpop.f32.mrf.mxu1 }
 0x10f   : > { %v2353_v15 = vpack.c.bf16 %v1316_v6, %v1316_v6  ;;  %v1321_v17 = vmax.f32 %v865_v9, 0.0  ;;  %v1385_v18 = vmax.f32 %v1121_v10, 0.0  ;;  %v857_v19 = vadd.f32 %v2918_v8, %v856_v13 }
 0x110   : > { %v2417_v16 = vpack.c.bf16 %v1380_v7, %v1380_v7  ;;  %1959 = vst.msk [vmem:[%s2929_s13 + $0x3c] sm:$0xf] %vm1943_vm0, %v2355_v11  ;;  %2023 = vst.msk [vmem:[%s2929_s13 + $0x13c] sm:$0xf] %vm1943_vm0, %v2419_v12  ;;  %v1113_v20 = vadd.f32 %v2918_v8, %v1112_v14  ;;  %v2575_v21 = vpop.f32.mrf.mxu0  ;;  %v2639_v22 = vpop.f32.mrf.mxu1 }
 0x111   : > { %1957 = vst.msk [vmem:[%s2929_s13 + $0x34] sm:$0xf] %vm1943_vm0, %v2353_v15  ;;  %v2358_v23 = vpack.c.bf16 %v1321_v17, %v1321_v17  ;;  %v2422_v24 = vpack.c.bf16 %v1385_v18, %v1385_v18  ;;  %v868_v25 = vadd.f32 %v2575_v21, %v2918_v8  ;;  %v1124_v26 = vadd.f32 %v2639_v22, %v2918_v8 }
 0x112   : > { %2021 = vst.msk [vmem:[%s2929_s13 + $0x134] sm:$0xf] %vm1943_vm0, %v2417_v16  ;;  %v1319_v27 = vmax.f32 %v857_v19, 0.0  ;;  %v1383_v28 = vmax.f32 %v1113_v20, 0.0  ;;  %v859_v29 = vpop.f32.mrf.mxu0  ;;  %v1115_v30 = vpop.f32.mrf.mxu1 }
 0x113   : > { %1962 = vst.msk [vmem:[%s2929_s13 + $0x48] sm:$0xf] %vm1943_vm0, %v2358_v23  ;;  %2026 = vst.msk [vmem:[%s2929_s13 + $0x148] sm:$0xf] %vm1943_vm0, %v2422_v24  ;;  %v1322_v31 = vmax.f32 %v868_v25, 0.0  ;;  %v1386_v32 = vmax.f32 %v1124_v26, 0.0  ;;  %v860_v33 = vadd.f32 %v2918_v8, %v859_v29  ;;  %v1116_v34 = vadd.f32 %v2918_v8, %v1115_v30 }
 0x114   : > { %v2356_v35 = vpack.c.bf16 %v1319_v27, %v1319_v27  ;;  %v2420_v36 = vpack.c.bf16 %v1383_v28, %v1383_v28  ;;  %v2578_v37 = vpop.f32.mrf.mxu0  ;;  %v2642_v38 = vpop.f32.mrf.mxu1 }
 0x115   : > { %v2359_v39 = vpack.c.bf16 %v1322_v31, %v1322_v31  ;;  %v2423_v40 = vpack.c.bf16 %v1386_v32, %v1386_v32  ;;  %v1320_v41 = vmax.f32 %v860_v33, 0.0  ;;  %v1384_v42 = vmax.f32 %v1116_v34, 0.0 }
 0x116   : > { %1960 = vst.msk [vmem:[%s2929_s13 + $0x40] sm:$0xf] %vm1943_vm0, %v2356_v35  ;;  %2024 = vst.msk [vmem:[%s2929_s13 + $0x140] sm:$0xf] %vm1943_vm0, %v2420_v36  ;;  %v881_v43 = vadd.f32 %v2578_v37, %v2918_v8  ;;  %v1137_v44 = vadd.f32 %v2642_v38, %v2918_v8  ;;  %v872_v45 = vpop.f32.mrf.mxu0  ;;  %v1128_v46 = vpop.f32.mrf.mxu1 }
 0x117   : > { %1963 = vst.msk [vmem:[%s2929_s13 + $0x4c] sm:$0xf] %vm1943_vm0, %v2359_v39  ;;  %2027 = vst.msk [vmem:[%s2929_s13 + $0x14c] sm:$0xf] %vm1943_vm0, %v2423_v40  ;;  %v2357_v47 = vpack.c.bf16 %v1320_v41, %v1320_v41  ;;  %v2421_v48 = vpack.c.bf16 %v1384_v42, %v1384_v42  ;;  %v873_v49 = vadd.f32 %v2918_v8, %v872_v45 }
 0x118   : > { %v1129_v50 = vadd.f32 %v2918_v8, %v1128_v46  ;;  %v1325_v51 = vmax.f32 %v881_v43, 0.0  ;;  %v1389_v52 = vmax.f32 %v1137_v44, 0.0  ;;  %v2579_v53 = vpop.f32.mrf.mxu0  ;;  %v2643_v54 = vpop.f32.mrf.mxu1 }
 0x119   : > { %1961 = vst.msk [vmem:[%s2929_s13 + $0x44] sm:$0xf] %vm1943_vm0, %v2357_v47  ;;  %2025 = vst.msk [vmem:[%s2929_s13 + $0x144] sm:$0xf] %vm1943_vm0, %v2421_v48  ;;  %v1323_v55 = vmax.f32 %v873_v49, 0.0  ;;  %v884_v57 = vadd.f32 %v2579_v53, %v2918_v8  ;;  %v1140_v58 = vadd.f32 %v2643_v54, %v2918_v8 }
 0x11a   : > { %v1387_v56 = vmax.f32 %v1129_v50, 0.0  ;;  %v2362_v59 = vpack.c.bf16 %v1325_v51, %v1325_v51  ;;  %v2426_v60 = vpack.c.bf16 %v1389_v52, %v1389_v52  ;;  %v875_v61 = vpop.f32.mrf.mxu0  ;;  %v1131_v62 = vpop.f32.mrf.mxu1 }
 0x11b   : > { %v2360_v63 = vpack.c.bf16 %v1323_v55, %v1323_v55  ;;  %v1326_v1 = vmax.f32 %v884_v57, 0.0  ;;  %v1390_v2 = vmax.f32 %v1140_v58, 0.0  ;;  %v876_v3 = vadd.f32 %v2918_v8, %v875_v61 }
 0x11c   : > { %v2424_v0 = vpack.c.bf16 %v1387_v56, %v1387_v56  ;;  %1966 = vst.msk [vmem:[%s2929_s13 + $0x58] sm:$0xf] %vm1943_vm0, %v2362_v59  ;;  %2030 = vst.msk [vmem:[%s2929_s13 + $0x158] sm:$0xf] %vm1943_vm0, %v2426_v60  ;;  %v1132_v4 = vadd.f32 %v2918_v8, %v1131_v62  ;;  %v2582_v5 = vpop.f32.mrf.mxu0  ;;  %v2646_v6 = vpop.f32.mrf.mxu1 }
 0x11d   : > { %1964 = vst.msk [vmem:[%s2929_s13 + $0x50] sm:$0xf] %vm1943_vm0, %v2360_v63  ;;  %v2363_v7 = vpack.c.bf16 %v1326_v1, %v1326_v1  ;;  %v2427_v9 = vpack.c.bf16 %v1390_v2, %v1390_v2  ;;  %v897_v10 = vadd.f32 %v2582_v5, %v2918_v8  ;;  %v1153_v11 = vadd.f32 %v2646_v6, %v2918_v8 }
 0x11e   : > { %2028 = vst.msk [vmem:[%s2929_s13 + $0x150] sm:$0xf] %vm1943_vm0, %v2424_v0  ;;  %v1324_v12 = vmax.f32 %v876_v3, 0.0  ;;  %v1388_v13 = vmax.f32 %v1132_v4, 0.0  ;;  %v888_v14 = vpop.f32.mrf.mxu0  ;;  %v1144_v15 = vpop.f32.mrf.mxu1 }
 0x11f   : > { %1967 = vst.msk [vmem:[%s2929_s13 + $0x5c] sm:$0xf] %vm1943_vm0, %v2363_v7  ;;  %2031 = vst.msk [vmem:[%s2929_s13 + $0x15c] sm:$0xf] %vm1943_vm0, %v2427_v9  ;;  %v1329_v16 = vmax.f32 %v897_v10, 0.0  ;;  %v1393_v17 = vmax.f32 %v1153_v11, 0.0  ;;  %v889_v18 = vadd.f32 %v2918_v8, %v888_v14  ;;  %v1145_v19 = vadd.f32 %v2918_v8, %v1144_v15 }
 0x120   : > { %v2361_v20 = vpack.c.bf16 %v1324_v12, %v1324_v12  ;;  %v2425_v21 = vpack.c.bf16 %v1388_v13, %v1388_v13  ;;  %v2583_v22 = vpop.f32.mrf.mxu0  ;;  %v2647_v23 = vpop.f32.mrf.mxu1 }
 0x121   : > { %v2366_v24 = vpack.c.bf16 %v1329_v16, %v1329_v16  ;;  %v2430_v25 = vpack.c.bf16 %v1393_v17, %v1393_v17  ;;  %v1327_v26 = vmax.f32 %v889_v18, 0.0  ;;  %v1391_v27 = vmax.f32 %v1145_v19, 0.0 }
 0x122   : > { %1965 = vst.msk [vmem:[%s2929_s13 + $0x54] sm:$0xf] %vm1943_vm0, %v2361_v20  ;;  %2029 = vst.msk [vmem:[%s2929_s13 + $0x154] sm:$0xf] %vm1943_vm0, %v2425_v21  ;;  %v900_v28 = vadd.f32 %v2583_v22, %v2918_v8  ;;  %v1156_v29 = vadd.f32 %v2647_v23, %v2918_v8  ;;  %v891_v30 = vpop.f32.mrf.mxu0  ;;  %v1147_v31 = vpop.f32.mrf.mxu1 }
 0x123   : > { %1970 = vst.msk [vmem:[%s2929_s13 + $0x68] sm:$0xf] %vm1943_vm0, %v2366_v24  ;;  %2034 = vst.msk [vmem:[%s2929_s13 + $0x168] sm:$0xf] %vm1943_vm0, %v2430_v25  ;;  %v2364_v32 = vpack.c.bf16 %v1327_v26, %v1327_v26  ;;  %v2428_v33 = vpack.c.bf16 %v1391_v27, %v1391_v27  ;;  %v892_v34 = vadd.f32 %v2918_v8, %v891_v30 }
 0x124   : > { %v1148_v35 = vadd.f32 %v2918_v8, %v1147_v31  ;;  %v1330_v36 = vmax.f32 %v900_v28, 0.0  ;;  %v1394_v37 = vmax.f32 %v1156_v29, 0.0  ;;  %v2586_v38 = vpop.f32.mrf.mxu0  ;;  %v2650_v39 = vpop.f32.mrf.mxu1 }
 0x125   : > { %1968 = vst.msk [vmem:[%s2929_s13 + $0x60] sm:$0xf] %vm1943_vm0, %v2364_v32  ;;  %2032 = vst.msk [vmem:[%s2929_s13 + $0x160] sm:$0xf] %vm1943_vm0, %v2428_v33  ;;  %v1328_v40 = vmax.f32 %v892_v34, 0.0  ;;  %v913_v42 = vadd.f32 %v2586_v38, %v2918_v8  ;;  %v1169_v43 = vadd.f32 %v2650_v39, %v2918_v8 }
 0x126   : > { %v1392_v41 = vmax.f32 %v1148_v35, 0.0  ;;  %v2367_v44 = vpack.c.bf16 %v1330_v36, %v1330_v36  ;;  %v2431_v45 = vpack.c.bf16 %v1394_v37, %v1394_v37  ;;  %v904_v46 = vpop.f32.mrf.mxu0  ;;  %v1160_v47 = vpop.f32.mrf.mxu1 }
 0x127   : > { %v2365_v48 = vpack.c.bf16 %v1328_v40, %v1328_v40  ;;  %v1333_v50 = vmax.f32 %v913_v42, 0.0  ;;  %v1397_v51 = vmax.f32 %v1169_v43, 0.0  ;;  %v905_v52 = vadd.f32 %v2918_v8, %v904_v46 }
 0x128   : > { %v2429_v49 = vpack.c.bf16 %v1392_v41, %v1392_v41  ;;  %1971 = vst.msk [vmem:[%s2929_s13 + $0x6c] sm:$0xf] %vm1943_vm0, %v2367_v44  ;;  %2035 = vst.msk [vmem:[%s2929_s13 + $0x16c] sm:$0xf] %vm1943_vm0, %v2431_v45  ;;  %v1161_v53 = vadd.f32 %v2918_v8, %v1160_v47  ;;  %v2587_v54 = vpop.f32.mrf.mxu0  ;;  %v2651_v55 = vpop.f32.mrf.mxu1 }
 0x129   : > { %1969 = vst.msk [vmem:[%s2929_s13 + $0x64] sm:$0xf] %vm1943_vm0, %v2365_v48  ;;  %v2370_v56 = vpack.c.bf16 %v1333_v50, %v1333_v50  ;;  %v2434_v57 = vpack.c.bf16 %v1397_v51, %v1397_v51  ;;  %v916_v58 = vadd.f32 %v2587_v54, %v2918_v8  ;;  %v1172_v59 = vadd.f32 %v2651_v55, %v2918_v8 }
 0x12a   : > { %2033 = vst.msk [vmem:[%s2929_s13 + $0x164] sm:$0xf] %vm1943_vm0, %v2429_v49  ;;  %v1331_v60 = vmax.f32 %v905_v52, 0.0  ;;  %v1395_v61 = vmax.f32 %v1161_v53, 0.0  ;;  %v907_v62 = vpop.f32.mrf.mxu0  ;;  %v1163_v63 = vpop.f32.mrf.mxu1 }
 0x12b   : > { %1974 = vst.msk [vmem:[%s2929_s13 + $0x78] sm:$0xf] %vm1943_vm0, %v2370_v56  ;;  %2038 = vst.msk [vmem:[%s2929_s13 + $0x178] sm:$0xf] %vm1943_vm0, %v2434_v57  ;;  %v1334_v0 = vmax.f32 %v916_v58, 0.0  ;;  %v1398_v1 = vmax.f32 %v1172_v59, 0.0  ;;  %v908_v2 = vadd.f32 %v2918_v8, %v907_v62  ;;  %v1164_v3 = vadd.f32 %v2918_v8, %v1163_v63 }
 0x12c   : > { %v2368_v4 = vpack.c.bf16 %v1331_v60, %v1331_v60  ;;  %v2432_v5 = vpack.c.bf16 %v1395_v61, %v1395_v61  ;;  %v2590_v6 = vpop.f32.mrf.mxu0  ;;  %v2654_v7 = vpop.f32.mrf.mxu1 }
 0x12d   : > { %v2371_v9 = vpack.c.bf16 %v1334_v0, %v1334_v0  ;;  %v2435_v10 = vpack.c.bf16 %v1398_v1, %v1398_v1  ;;  %v1332_v11 = vmax.f32 %v908_v2, 0.0  ;;  %v1396_v12 = vmax.f32 %v1164_v3, 0.0 }
 0x12e   : > { %1972 = vst.msk [vmem:[%s2929_s13 + $0x70] sm:$0xf] %vm1943_vm0, %v2368_v4  ;;  %2036 = vst.msk [vmem:[%s2929_s13 + $0x170] sm:$0xf] %vm1943_vm0, %v2432_v5  ;;  %v929_v13 = vadd.f32 %v2590_v6, %v2918_v8  ;;  %v1185_v14 = vadd.f32 %v2654_v7, %v2918_v8  ;;  %v920_v15 = vpop.f32.mrf.mxu0  ;;  %v1176_v16 = vpop.f32.mrf.mxu1 }
 0x12f   : > { %1975 = vst.msk [vmem:[%s2929_s13 + $0x7c] sm:$0xf] %vm1943_vm0, %v2371_v9  ;;  %2039 = vst.msk [vmem:[%s2929_s13 + $0x17c] sm:$0xf] %vm1943_vm0, %v2435_v10  ;;  %v2369_v17 = vpack.c.bf16 %v1332_v11, %v1332_v11  ;;  %v2433_v18 = vpack.c.bf16 %v1396_v12, %v1396_v12  ;;  %v921_v19 = vadd.f32 %v2918_v8, %v920_v15 }
 0x130   : > { %v1177_v20 = vadd.f32 %v2918_v8, %v1176_v16  ;;  %v1337_v21 = vmax.f32 %v929_v13, 0.0  ;;  %v1401_v22 = vmax.f32 %v1185_v14, 0.0  ;;  %v2591_v23 = vpop.f32.mrf.mxu0  ;;  %v2655_v24 = vpop.f32.mrf.mxu1 }
 0x131   : > { %1973 = vst.msk [vmem:[%s2929_s13 + $0x74] sm:$0xf] %vm1943_vm0, %v2369_v17  ;;  %2037 = vst.msk [vmem:[%s2929_s13 + $0x174] sm:$0xf] %vm1943_vm0, %v2433_v18  ;;  %v1335_v25 = vmax.f32 %v921_v19, 0.0  ;;  %v932_v27 = vadd.f32 %v2591_v23, %v2918_v8  ;;  %v1188_v28 = vadd.f32 %v2655_v24, %v2918_v8 }
 0x132   : > { %v1399_v26 = vmax.f32 %v1177_v20, 0.0  ;;  %v2374_v29 = vpack.c.bf16 %v1337_v21, %v1337_v21  ;;  %v2438_v30 = vpack.c.bf16 %v1401_v22, %v1401_v22  ;;  %v923_v31 = vpop.f32.mrf.mxu0  ;;  %v1179_v32 = vpop.f32.mrf.mxu1 }
 0x133   : > { %v2372_v33 = vpack.c.bf16 %v1335_v25, %v1335_v25  ;;  %v1338_v35 = vmax.f32 %v932_v27, 0.0  ;;  %v1402_v36 = vmax.f32 %v1188_v28, 0.0  ;;  %v924_v37 = vadd.f32 %v2918_v8, %v923_v31 }
 0x134   : > { %v2436_v34 = vpack.c.bf16 %v1399_v26, %v1399_v26  ;;  %1978 = vst.msk [vmem:[%s2929_s13 + $0x88] sm:$0xf] %vm1943_vm0, %v2374_v29  ;;  %2042 = vst.msk [vmem:[%s2929_s13 + $0x188] sm:$0xf] %vm1943_vm0, %v2438_v30  ;;  %v1180_v38 = vadd.f32 %v2918_v8, %v1179_v32  ;;  %v2594_v39 = vpop.f32.mrf.mxu0  ;;  %v2658_v40 = vpop.f32.mrf.mxu1 }
 0x135   : > { %1976 = vst.msk [vmem:[%s2929_s13 + $0x80] sm:$0xf] %vm1943_vm0, %v2372_v33  ;;  %v2375_v41 = vpack.c.bf16 %v1338_v35, %v1338_v35  ;;  %v2439_v42 = vpack.c.bf16 %v1402_v36, %v1402_v36  ;;  %v945_v43 = vadd.f32 %v2594_v39, %v2918_v8  ;;  %v1201_v44 = vadd.f32 %v2658_v40, %v2918_v8 }
 0x136   : > { %2040 = vst.msk [vmem:[%s2929_s13 + $0x180] sm:$0xf] %vm1943_vm0, %v2436_v34  ;;  %v1336_v45 = vmax.f32 %v924_v37, 0.0  ;;  %v1400_v46 = vmax.f32 %v1180_v38, 0.0  ;;  %v936_v47 = vpop.f32.mrf.mxu0  ;;  %v1192_v48 = vpop.f32.mrf.mxu1 }
 0x137   : > { %1979 = vst.msk [vmem:[%s2929_s13 + $0x8c] sm:$0xf] %vm1943_vm0, %v2375_v41  ;;  %2043 = vst.msk [vmem:[%s2929_s13 + $0x18c] sm:$0xf] %vm1943_vm0, %v2439_v42  ;;  %v1341_v49 = vmax.f32 %v945_v43, 0.0  ;;  %v1405_v50 = vmax.f32 %v1201_v44, 0.0  ;;  %v937_v51 = vadd.f32 %v2918_v8, %v936_v47  ;;  %v1193_v52 = vadd.f32 %v2918_v8, %v1192_v48 }
 0x138   : > { %v2373_v53 = vpack.c.bf16 %v1336_v45, %v1336_v45  ;;  %v2437_v54 = vpack.c.bf16 %v1400_v46, %v1400_v46  ;;  %v2595_v55 = vpop.f32.mrf.mxu0  ;;  %v2659_v56 = vpop.f32.mrf.mxu1 }
 0x139   : > { %v2378_v57 = vpack.c.bf16 %v1341_v49, %v1341_v49  ;;  %v2442_v58 = vpack.c.bf16 %v1405_v50, %v1405_v50  ;;  %v1339_v59 = vmax.f32 %v937_v51, 0.0  ;;  %v1403_v60 = vmax.f32 %v1193_v52, 0.0 }
 0x13a   : > { %1977 = vst.msk [vmem:[%s2929_s13 + $0x84] sm:$0xf] %vm1943_vm0, %v2373_v53  ;;  %2041 = vst.msk [vmem:[%s2929_s13 + $0x184] sm:$0xf] %vm1943_vm0, %v2437_v54  ;;  %v948_v61 = vadd.f32 %v2595_v55, %v2918_v8  ;;  %v1204_v62 = vadd.f32 %v2659_v56, %v2918_v8  ;;  %v939_v63 = vpop.f32.mrf.mxu0  ;;  %v1195_v0 = vpop.f32.mrf.mxu1 }
 0x13b   : > { %1982 = vst.msk [vmem:[%s2929_s13 + $0x98] sm:$0xf] %vm1943_vm0, %v2378_v57  ;;  %2046 = vst.msk [vmem:[%s2929_s13 + $0x198] sm:$0xf] %vm1943_vm0, %v2442_v58  ;;  %v2376_v1 = vpack.c.bf16 %v1339_v59, %v1339_v59  ;;  %v2440_v2 = vpack.c.bf16 %v1403_v60, %v1403_v60  ;;  %v940_v3 = vadd.f32 %v2918_v8, %v939_v63 }
 0x13c   : > { %v1196_v4 = vadd.f32 %v2918_v8, %v1195_v0  ;;  %v1342_v5 = vmax.f32 %v948_v61, 0.0  ;;  %v1406_v6 = vmax.f32 %v1204_v62, 0.0  ;;  %v2598_v7 = vpop.f32.mrf.mxu0  ;;  %v2662_v9 = vpop.f32.mrf.mxu1 }
 0x13d   : > { %1980 = vst.msk [vmem:[%s2929_s13 + $0x90] sm:$0xf] %vm1943_vm0, %v2376_v1  ;;  %2044 = vst.msk [vmem:[%s2929_s13 + $0x190] sm:$0xf] %vm1943_vm0, %v2440_v2  ;;  %v1340_v10 = vmax.f32 %v940_v3, 0.0  ;;  %v961_v12 = vadd.f32 %v2598_v7, %v2918_v8  ;;  %v1217_v13 = vadd.f32 %v2662_v9, %v2918_v8 }
 0x13e   : > { %v1404_v11 = vmax.f32 %v1196_v4, 0.0  ;;  %v2379_v14 = vpack.c.bf16 %v1342_v5, %v1342_v5  ;;  %v2443_v15 = vpack.c.bf16 %v1406_v6, %v1406_v6  ;;  %v952_v16 = vpop.f32.mrf.mxu0  ;;  %v1208_v17 = vpop.f32.mrf.mxu1 }
 0x13f   : > { %v2377_v18 = vpack.c.bf16 %v1340_v10, %v1340_v10  ;;  %v1345_v20 = vmax.f32 %v961_v12, 0.0  ;;  %v1409_v21 = vmax.f32 %v1217_v13, 0.0  ;;  %v953_v22 = vadd.f32 %v2918_v8, %v952_v16 }
 0x140   : > { %v2441_v19 = vpack.c.bf16 %v1404_v11, %v1404_v11  ;;  %1983 = vst.msk [vmem:[%s2929_s13 + $0x9c] sm:$0xf] %vm1943_vm0, %v2379_v14  ;;  %2047 = vst.msk [vmem:[%s2929_s13 + $0x19c] sm:$0xf] %vm1943_vm0, %v2443_v15  ;;  %v1209_v23 = vadd.f32 %v2918_v8, %v1208_v17  ;;  %v2599_v24 = vpop.f32.mrf.mxu0  ;;  %v2663_v25 = vpop.f32.mrf.mxu1 }
 0x141   : > { %1981 = vst.msk [vmem:[%s2929_s13 + $0x94] sm:$0xf] %vm1943_vm0, %v2377_v18  ;;  %v2382_v26 = vpack.c.bf16 %v1345_v20, %v1345_v20  ;;  %v2446_v27 = vpack.c.bf16 %v1409_v21, %v1409_v21  ;;  %v964_v28 = vadd.f32 %v2599_v24, %v2918_v8  ;;  %v1220_v29 = vadd.f32 %v2663_v25, %v2918_v8 }
 0x142   : > { %2045 = vst.msk [vmem:[%s2929_s13 + $0x194] sm:$0xf] %vm1943_vm0, %v2441_v19  ;;  %v1343_v30 = vmax.f32 %v953_v22, 0.0  ;;  %v1407_v31 = vmax.f32 %v1209_v23, 0.0  ;;  %v955_v32 = vpop.f32.mrf.mxu0  ;;  %v1211_v33 = vpop.f32.mrf.mxu1 }
 0x143   : > { %1986 = vst.msk [vmem:[%s2929_s13 + $0xa8] sm:$0xf] %vm1943_vm0, %v2382_v26  ;;  %2050 = vst.msk [vmem:[%s2929_s13 + $0x1a8] sm:$0xf] %vm1943_vm0, %v2446_v27  ;;  %v1346_v34 = vmax.f32 %v964_v28, 0.0  ;;  %v1410_v35 = vmax.f32 %v1220_v29, 0.0  ;;  %v956_v36 = vadd.f32 %v2918_v8, %v955_v32  ;;  %v1212_v37 = vadd.f32 %v2918_v8, %v1211_v33 }
 0x144   : > { %v2380_v38 = vpack.c.bf16 %v1343_v30, %v1343_v30  ;;  %v2444_v39 = vpack.c.bf16 %v1407_v31, %v1407_v31  ;;  %v2602_v40 = vpop.f32.mrf.mxu0  ;;  %v2666_v41 = vpop.f32.mrf.mxu1 }
 0x145   : > { %v2383_v42 = vpack.c.bf16 %v1346_v34, %v1346_v34  ;;  %v2447_v43 = vpack.c.bf16 %v1410_v35, %v1410_v35  ;;  %v1344_v44 = vmax.f32 %v956_v36, 0.0  ;;  %v1408_v45 = vmax.f32 %v1212_v37, 0.0 }
 0x146   : > { %1984 = vst.msk [vmem:[%s2929_s13 + $0xa0] sm:$0xf] %vm1943_vm0, %v2380_v38  ;;  %2048 = vst.msk [vmem:[%s2929_s13 + $0x1a0] sm:$0xf] %vm1943_vm0, %v2444_v39  ;;  %v977_v46 = vadd.f32 %v2602_v40, %v2918_v8  ;;  %v1233_v47 = vadd.f32 %v2666_v41, %v2918_v8  ;;  %v968_v48 = vpop.f32.mrf.mxu0  ;;  %v1224_v49 = vpop.f32.mrf.mxu1 }
 0x147   : > { %1987 = vst.msk [vmem:[%s2929_s13 + $0xac] sm:$0xf] %vm1943_vm0, %v2383_v42  ;;  %2051 = vst.msk [vmem:[%s2929_s13 + $0x1ac] sm:$0xf] %vm1943_vm0, %v2447_v43  ;;  %v2381_v50 = vpack.c.bf16 %v1344_v44, %v1344_v44  ;;  %v2445_v51 = vpack.c.bf16 %v1408_v45, %v1408_v45  ;;  %v969_v52 = vadd.f32 %v2918_v8, %v968_v48  ;;  %v3234_v45 = vld [vmem:[%s3321_s2] ss:$0 sm:$0xff] }
 0x148   : > { %v1225_v53 = vadd.f32 %v2918_v8, %v1224_v49  ;;  %v1349_v54 = vmax.f32 %v977_v46, 0.0  ;;  %v1413_v55 = vmax.f32 %v1233_v47, 0.0  ;;  %v2603_v56 = vpop.f32.mrf.mxu0  ;;  %v2667_v57 = vpop.f32.mrf.mxu1 }
 0x149   : > { %1985 = vst.msk [vmem:[%s2929_s13 + $0xa4] sm:$0xf] %vm1943_vm0, %v2381_v50  ;;  %2049 = vst.msk [vmem:[%s2929_s13 + $0x1a4] sm:$0xf] %vm1943_vm0, %v2445_v51  ;;  %v1347_v58 = vmax.f32 %v969_v52, 0.0  ;;  %v980_v60 = vadd.f32 %v2603_v56, %v2918_v8  ;;  %v1236_v61 = vadd.f32 %v2667_v57, %v2918_v8 }
 0x14a   : > { %v1411_v59 = vmax.f32 %v1225_v53, 0.0  ;;  %v2386_v62 = vpack.c.bf16 %v1349_v54, %v1349_v54  ;;  %v2450_v63 = vpack.c.bf16 %v1413_v55, %v1413_v55  ;;  %v971_v0 = vpop.f32.mrf.mxu0  ;;  %v1227_v1 = vpop.f32.mrf.mxu1 }
 0x14b   : > { %v2384_v2 = vpack.c.bf16 %v1347_v58, %v1347_v58  ;;  %v1350_v4 = vmax.f32 %v980_v60, 0.0  ;;  %v1414_v5 = vmax.f32 %v1236_v61, 0.0  ;;  %v972_v6 = vadd.f32 %v2918_v8, %v971_v0 }
 0x14c   : > { %v2448_v3 = vpack.c.bf16 %v1411_v59, %v1411_v59  ;;  %1990 = vst.msk [vmem:[%s2929_s13 + $0xb8] sm:$0xf] %vm1943_vm0, %v2386_v62  ;;  %2054 = vst.msk [vmem:[%s2929_s13 + $0x1b8] sm:$0xf] %vm1943_vm0, %v2450_v63  ;;  %v1228_v7 = vadd.f32 %v2918_v8, %v1227_v1  ;;  %v2606_v9 = vpop.f32.mrf.mxu0  ;;  %v2670_v10 = vpop.f32.mrf.mxu1 }
 0x14d   : > { %1988 = vst.msk [vmem:[%s2929_s13 + $0xb0] sm:$0xf] %vm1943_vm0, %v2384_v2  ;;  %v2387_v11 = vpack.c.bf16 %v1350_v4, %v1350_v4  ;;  %v2451_v12 = vpack.c.bf16 %v1414_v5, %v1414_v5  ;;  %v993_v13 = vadd.f32 %v2606_v9, %v2918_v8  ;;  %v1249_v14 = vadd.f32 %v2670_v10, %v2918_v8 }
 0x14e   : > { %2052 = vst.msk [vmem:[%s2929_s13 + $0x1b0] sm:$0xf] %vm1943_vm0, %v2448_v3  ;;  %v1348_v15 = vmax.f32 %v972_v6, 0.0  ;;  %v1412_v16 = vmax.f32 %v1228_v7, 0.0  ;;  %v984_v17 = vpop.f32.mrf.mxu0  ;;  %v1240_v18 = vpop.f32.mrf.mxu1 }
 0x14f   : > { %1991 = vst.msk [vmem:[%s2929_s13 + $0xbc] sm:$0xf] %vm1943_vm0, %v2387_v11  ;;  %2055 = vst.msk [vmem:[%s2929_s13 + $0x1bc] sm:$0xf] %vm1943_vm0, %v2451_v12  ;;  %v1353_v19 = vmax.f32 %v993_v13, 0.0  ;;  %v1417_v20 = vmax.f32 %v1249_v14, 0.0  ;;  %v985_v21 = vadd.f32 %v2918_v8, %v984_v17  ;;  %v1241_v22 = vadd.f32 %v2918_v8, %v1240_v18 }
 0x150   : > { %v2385_v23 = vpack.c.bf16 %v1348_v15, %v1348_v15  ;;  %v2449_v24 = vpack.c.bf16 %v1412_v16, %v1412_v16  ;;  %v2607_v25 = vpop.f32.mrf.mxu0  ;;  %v2671_v26 = vpop.f32.mrf.mxu1 }
 0x151   : > { %v2390_v27 = vpack.c.bf16 %v1353_v19, %v1353_v19  ;;  %v2454_v28 = vpack.c.bf16 %v1417_v20, %v1417_v20  ;;  %v1351_v29 = vmax.f32 %v985_v21, 0.0  ;;  %v1415_v30 = vmax.f32 %v1241_v22, 0.0 }
 0x152   : > { %1989 = vst.msk [vmem:[%s2929_s13 + $0xb4] sm:$0xf] %vm1943_vm0, %v2385_v23  ;;  %2053 = vst.msk [vmem:[%s2929_s13 + $0x1b4] sm:$0xf] %vm1943_vm0, %v2449_v24  ;;  %v996_v31 = vadd.f32 %v2607_v25, %v2918_v8  ;;  %v1252_v32 = vadd.f32 %v2671_v26, %v2918_v8  ;;  %v987_v33 = vpop.f32.mrf.mxu0  ;;  %v1243_v34 = vpop.f32.mrf.mxu1 }
 0x153   : > { %1994 = vst.msk [vmem:[%s2929_s13 + $0xc8] sm:$0xf] %vm1943_vm0, %v2390_v27  ;;  %2058 = vst.msk [vmem:[%s2929_s13 + $0x1c8] sm:$0xf] %vm1943_vm0, %v2454_v28  ;;  %v2388_v35 = vpack.c.bf16 %v1351_v29, %v1351_v29  ;;  %v2452_v36 = vpack.c.bf16 %v1415_v30, %v1415_v30  ;;  %v988_v37 = vadd.f32 %v2918_v8, %v987_v33 }
 0x154   : > { %v1244_v38 = vadd.f32 %v2918_v8, %v1243_v34  ;;  %v1354_v39 = vmax.f32 %v996_v31, 0.0  ;;  %v1418_v40 = vmax.f32 %v1252_v32, 0.0  ;;  %v2610_v41 = vpop.f32.mrf.mxu0  ;;  %v2674_v42 = vpop.f32.mrf.mxu1 }
 0x155   : > { %1992 = vst.msk [vmem:[%s2929_s13 + $0xc0] sm:$0xf] %vm1943_vm0, %v2388_v35  ;;  %2056 = vst.msk [vmem:[%s2929_s13 + $0x1c0] sm:$0xf] %vm1943_vm0, %v2452_v36  ;;  %v1352_v43 = vmax.f32 %v988_v37, 0.0  ;;  %v1009_v46 = vadd.f32 %v3234_v45, %v2610_v41  ;;  %v1265_v8 = vadd.f32 %v3234_v45, %v2674_v42 }
 0x156   : > { %v1416_v44 = vmax.f32 %v1244_v38, 0.0  ;;  %v2391_v47 = vpack.c.bf16 %v1354_v39, %v1354_v39  ;;  %v2455_v48 = vpack.c.bf16 %v1418_v40, %v1418_v40  ;;  %v1000_v49 = vpop.f32.mrf.mxu0  ;;  %v1256_v50 = vpop.f32.mrf.mxu1 }
 0x157   : > { %v2389_v51 = vpack.c.bf16 %v1352_v43, %v1352_v43  ;;  %v1357_v53 = vmax.f32 %v1009_v46, 0.0  ;;  %v1421_v54 = vmax.f32 %v1265_v8, 0.0  ;;  %v1001_v55 = vadd.f32 %v3234_v45, %v1000_v49 }
 0x158   : > { %v2453_v52 = vpack.c.bf16 %v1416_v44, %v1416_v44  ;;  %1995 = vst.msk [vmem:[%s2929_s13 + $0xcc] sm:$0xf] %vm1943_vm0, %v2391_v47  ;;  %2059 = vst.msk [vmem:[%s2929_s13 + $0x1cc] sm:$0xf] %vm1943_vm0, %v2455_v48  ;;  %v1257_v56 = vadd.f32 %v3234_v45, %v1256_v50  ;;  %v2611_v57 = vpop.f32.mrf.mxu0  ;;  %v2675_v58 = vpop.f32.mrf.mxu1 }
 0x159   : > { %1993 = vst.msk [vmem:[%s2929_s13 + $0xc4] sm:$0xf] %vm1943_vm0, %v2389_v51  ;;  %v2394_v59 = vpack.c.bf16 %v1357_v53, %v1357_v53  ;;  %v2458_v60 = vpack.c.bf16 %v1421_v54, %v1421_v54  ;;  %v1012_v61 = vadd.f32 %v3234_v45, %v2611_v57  ;;  %v1268_v62 = vadd.f32 %v3234_v45, %v2675_v58 }
 0x15a   : > { %2057 = vst.msk [vmem:[%s2929_s13 + $0x1c4] sm:$0xf] %vm1943_vm0, %v2453_v52  ;;  %v1355_v63 = vmax.f32 %v1001_v55, 0.0  ;;  %v1419_v0 = vmax.f32 %v1257_v56, 0.0  ;;  %v1003_v1 = vpop.f32.mrf.mxu0  ;;  %v1259_v2 = vpop.f32.mrf.mxu1 }
 0x15b   : > { %1998 = vst.msk [vmem:[%s2929_s13 + $0xd8] sm:$0xf] %vm1943_vm0, %v2394_v59  ;;  %2062 = vst.msk [vmem:[%s2929_s13 + $0x1d8] sm:$0xf] %vm1943_vm0, %v2458_v60  ;;  %v1358_v3 = vmax.f32 %v1012_v61, 0.0  ;;  %v1422_v4 = vmax.f32 %v1268_v62, 0.0  ;;  %v1004_v5 = vadd.f32 %v3234_v45, %v1003_v1  ;;  %v1260_v6 = vadd.f32 %v3234_v45, %v1259_v2 }
 0x15c   : > { %v2392_v7 = vpack.c.bf16 %v1355_v63, %v1355_v63  ;;  %v2456_v9 = vpack.c.bf16 %v1419_v0, %v1419_v0  ;;  %v2614_v10 = vpop.f32.mrf.mxu0  ;;  %v2678_v11 = vpop.f32.mrf.mxu1 }
 0x15d   : > { %v2395_v12 = vpack.c.bf16 %v1358_v3, %v1358_v3  ;;  %v2459_v13 = vpack.c.bf16 %v1422_v4, %v1422_v4  ;;  %v1356_v14 = vmax.f32 %v1004_v5, 0.0  ;;  %v1420_v15 = vmax.f32 %v1260_v6, 0.0 }
 0x15e   : > { %1996 = vst.msk [vmem:[%s2929_s13 + $0xd0] sm:$0xf] %vm1943_vm0, %v2392_v7  ;;  %2060 = vst.msk [vmem:[%s2929_s13 + $0x1d0] sm:$0xf] %vm1943_vm0, %v2456_v9  ;;  %v1025_v16 = vadd.f32 %v3234_v45, %v2614_v10  ;;  %v1281_v17 = vadd.f32 %v3234_v45, %v2678_v11  ;;  %v1016_v18 = vpop.f32.mrf.mxu0  ;;  %v1272_v19 = vpop.f32.mrf.mxu1 }
 0x15f   : > { %1999 = vst.msk [vmem:[%s2929_s13 + $0xdc] sm:$0xf] %vm1943_vm0, %v2395_v12  ;;  %2063 = vst.msk [vmem:[%s2929_s13 + $0x1dc] sm:$0xf] %vm1943_vm0, %v2459_v13  ;;  %v2393_v20 = vpack.c.bf16 %v1356_v14, %v1356_v14  ;;  %v2457_v21 = vpack.c.bf16 %v1420_v15, %v1420_v15  ;;  %v1017_v22 = vadd.f32 %v3234_v45, %v1016_v18 }
 0x160   : > { %v1273_v23 = vadd.f32 %v3234_v45, %v1272_v19  ;;  %v1361_v24 = vmax.f32 %v1025_v16, 0.0  ;;  %v1425_v25 = vmax.f32 %v1281_v17, 0.0  ;;  %v2615_v26 = vpop.f32.mrf.mxu0  ;;  %v2679_v27 = vpop.f32.mrf.mxu1 }
 0x161   : > { %1997 = vst.msk [vmem:[%s2929_s13 + $0xd4] sm:$0xf] %vm1943_vm0, %v2393_v20  ;;  %2061 = vst.msk [vmem:[%s2929_s13 + $0x1d4] sm:$0xf] %vm1943_vm0, %v2457_v21  ;;  %v1359_v28 = vmax.f32 %v1017_v22, 0.0  ;;  %v1028_v30 = vadd.f32 %v3234_v45, %v2615_v26  ;;  %v1284_v31 = vadd.f32 %v3234_v45, %v2679_v27 }
 0x162   : > { %v1423_v29 = vmax.f32 %v1273_v23, 0.0  ;;  %v2398_v32 = vpack.c.bf16 %v1361_v24, %v1361_v24  ;;  %v2462_v33 = vpack.c.bf16 %v1425_v25, %v1425_v25  ;;  %v1019_v34 = vpop.f32.mrf.mxu0  ;;  %v1275_v35 = vpop.f32.mrf.mxu1 }
 0x163   : > { %v2396_v36 = vpack.c.bf16 %v1359_v28, %v1359_v28  ;;  %v1362_v38 = vmax.f32 %v1028_v30, 0.0  ;;  %v1426_v39 = vmax.f32 %v1284_v31, 0.0  ;;  %v1020_v40 = vadd.f32 %v3234_v45, %v1019_v34 }
 0x164   : > { %v2460_v37 = vpack.c.bf16 %v1423_v29, %v1423_v29  ;;  %2002 = vst.msk [vmem:[%s2929_s13 + $0xe8] sm:$0xf] %vm1943_vm0, %v2398_v32  ;;  %2066 = vst.msk [vmem:[%s2929_s13 + $0x1e8] sm:$0xf] %vm1943_vm0, %v2462_v33  ;;  %v1276_v41 = vadd.f32 %v3234_v45, %v1275_v35  ;;  %v2618_v42 = vpop.f32.mrf.mxu0  ;;  %v2682_v43 = vpop.f32.mrf.mxu1 }
 0x165   : > { %2000 = vst.msk [vmem:[%s2929_s13 + $0xe0] sm:$0xf] %vm1943_vm0, %v2396_v36  ;;  %v2399_v44 = vpack.c.bf16 %v1362_v38, %v1362_v38  ;;  %v2463_v46 = vpack.c.bf16 %v1426_v39, %v1426_v39  ;;  %v1041_v8 = vadd.f32 %v3234_v45, %v2618_v42  ;;  %v1297_v47 = vadd.f32 %v3234_v45, %v2682_v43 }
 0x166   : > { %2064 = vst.msk [vmem:[%s2929_s13 + $0x1e0] sm:$0xf] %vm1943_vm0, %v2460_v37  ;;  %v1360_v48 = vmax.f32 %v1020_v40, 0.0  ;;  %v1424_v49 = vmax.f32 %v1276_v41, 0.0  ;;  %v1032_v50 = vpop.f32.mrf.mxu0  ;;  %v1288_v51 = vpop.f32.mrf.mxu1 }
 0x167   : > { %2003 = vst.msk [vmem:[%s2929_s13 + $0xec] sm:$0xf] %vm1943_vm0, %v2399_v44  ;;  %2067 = vst.msk [vmem:[%s2929_s13 + $0x1ec] sm:$0xf] %vm1943_vm0, %v2463_v46  ;;  %v1365_v52 = vmax.f32 %v1041_v8, 0.0  ;;  %v1429_v53 = vmax.f32 %v1297_v47, 0.0  ;;  %v1033_v54 = vadd.f32 %v3234_v45, %v1032_v50  ;;  %v1289_v55 = vadd.f32 %v3234_v45, %v1288_v51 }
 0x168   : > { %v2397_v56 = vpack.c.bf16 %v1360_v48, %v1360_v48  ;;  %v2461_v57 = vpack.c.bf16 %v1424_v49, %v1424_v49  ;;  %v2619_v58 = vpop.f32.mrf.mxu0  ;;  %v2683_v59 = vpop.f32.mrf.mxu1 }
 0x169   : > { %v2402_v60 = vpack.c.bf16 %v1365_v52, %v1365_v52  ;;  %v2466_v61 = vpack.c.bf16 %v1429_v53, %v1429_v53  ;;  %v1363_v62 = vmax.f32 %v1033_v54, 0.0  ;;  %v1427_v63 = vmax.f32 %v1289_v55, 0.0 }
 0x16a   : > { %2001 = vst.msk [vmem:[%s2929_s13 + $0xe4] sm:$0xf] %vm1943_vm0, %v2397_v56  ;;  %2065 = vst.msk [vmem:[%s2929_s13 + $0x1e4] sm:$0xf] %vm1943_vm0, %v2461_v57  ;;  %v1044_v0 = vadd.f32 %v3234_v45, %v2619_v58  ;;  %v1300_v1 = vadd.f32 %v3234_v45, %v2683_v59  ;;  %v1035_v2 = vpop.f32.mrf.mxu0  ;;  %v1291_v3 = vpop.f32.mrf.mxu1 }
 0x16b   : > { %2006 = vst.msk [vmem:[%s2929_s13 + $0xf8] sm:$0xf] %vm1943_vm0, %v2402_v60  ;;  %2070 = vst.msk [vmem:[%s2929_s13 + $0x1f8] sm:$0xf] %vm1943_vm0, %v2466_v61  ;;  %v2400_v4 = vpack.c.bf16 %v1363_v62, %v1363_v62  ;;  %v2464_v5 = vpack.c.bf16 %v1427_v63, %v1427_v63  ;;  %v1036_v6 = vadd.f32 %v3234_v45, %v1035_v2 }
 0x16c   : > { %v1292_v7 = vadd.f32 %v3234_v45, %v1291_v3  ;;  %v1366_v9 = vmax.f32 %v1044_v0, 0.0  ;;  %v1430_v10 = vmax.f32 %v1300_v1, 0.0 }
 0x16d   : > { %2004 = vst.msk [vmem:[%s2929_s13 + $0xf0] sm:$0xf] %vm1943_vm0, %v2400_v4  ;;  %2068 = vst.msk [vmem:[%s2929_s13 + $0x1f0] sm:$0xf] %vm1943_vm0, %v2464_v5  ;;  %v1364_v11 = vmax.f32 %v1036_v6, 0.0 }
 0x16e   : > { %v1428_v12 = vmax.f32 %v1292_v7, 0.0  ;;  %v2403_v13 = vpack.c.bf16 %v1366_v9, %v1366_v9  ;;  %v2467_v14 = vpack.c.bf16 %v1430_v10, %v1430_v10 }
 0x16f   : > { %v2401_v15 = vpack.c.bf16 %v1364_v11, %v1364_v11 }
 0x170   : > { %v2465_v16 = vpack.c.bf16 %v1428_v12, %v1428_v12  ;;  %2007 = vst.msk [vmem:[%s2929_s13 + $0xfc] sm:$0xf] %vm1943_vm0, %v2403_v13  ;;  %2071 = vst.msk [vmem:[%s2929_s13 + $0x1fc] sm:$0xf] %vm1943_vm0, %v2467_v14 }
 0x171   : > { %2005 = vst.msk [vmem:[%s2929_s13 + $0xf4] sm:$0xf] %vm1943_vm0, %v2401_v15 }
 0x172   : > { %2069 = vst.msk [vmem:[%s2929_s13 + $0x1f4] sm:$0xf] %vm1943_vm0, %v2465_v16 }
 0x173 PF: > { %s13_s12 = sadd.s32 1, %s2787_s12  }
 0x174   : > { %p10_p4 = scmp.ge.s32.totalorder %s13_s12, 4  }
 0x176   :  { %12 = sbr.rel (!%p10_p4) target bundleno = 1 (0x1), region = 62 }

// kernel: critic_forward.6
= control target key start
LH: loop header
LB: loop body
LE: loop exit
PB: predicated region body
PF: predicated region fallthrough
CT: control target
= control target key end

     0   :  { %s6037_s12 = smov 0   ;;  %s7426_s0 = inlined_call_operand.vmem [shape: bf16[2,4,307,32], index: 0, kind: input, shape index: {}]   ;;  %s7427_s1 = inlined_call_operand.vmem [shape: bf16[9,32,64], index: 1, kind: input, shape index: {}]   ;;  %s7428_s2 = inlined_call_operand.vmem [shape: f32[1,64], index: 2, kind: input, shape index: {}]   ;;  %s7429_s3 = inlined_call_operand.vmem [shape: bf16[2,272,64], index: 3, kind: output, shape index: {}]  }
   0x1 LB: > { %s4416_s13 = sadd.s32 4294967295, %s6013_s12   ;;  %p4420_p0 = scmp.ge.s32.totalorder %s6013_s12, 1  ;;  %s6013_s12 = sphi %s6037_s12, %s13_s12  }
   0x2   : > { %p137_p1 = scmp.lt.s32.totalorder %s6013_s12, 3 }
   0x4   : > { %p138_p2 = pnand %p4420_p0, %p137_p1 }
   0x6   : > { %141 = sbr.rel (%p138_p2) target bundleno = 834 (0x342), region = 32 }
   0xb   : > { %v5845_v0 = vld [vmem:[%s7427_s1 + $0x18] sm:$0xff]   ;;  %v7430_v1 = vmov 0.0   ;;  %v5846_v2 = vld [vmem:[%s7427_s1 + $0x10] sm:$0xff]   ;;  %p161_p3 = scmp.lt.s32.totalorder %s4416_s13, 1  ;;  %vm6016_vm0 = vmmov 0   ;;  %vm347_vm1 = vcmask 261120  }
   0xc   : > { %5181 = vmatprep.subr.bf16.mxu0 %v7430_v1  ;;  %5829 = vmatprep.subr.bf16.mxu1 %v7430_v1  ;;  %v5849_v3 = vld [vmem:[%s7427_s1 + $0x28] sm:$0xff]   ;;  %v5859_v7 = vld [vmem:[%s7427_s1 + $0x20] sm:$0xff]   ;;  %vm1013_vm2 = vsmask.f32 7424  ;;  %v5869_v29 = vld [vmem:[%s7427_s1 + $0x38] sm:$0xff]   ;;  %vm3813_vm3 = vcmask 1046528  }
   0xd   : > { %5182 = vmatpush3.bf16.msra.mxu0 %v5845_v0  ;;  %5831 = vmatpush3.bf16.msra.mxu1 %v5845_v0  ;;  %s7449_s13 = smov (!%p161_p3, %s4416_s13), 1  ;;  %v5850_v4 = vld [vmem:[%s7427_s1 + $0x8] sm:$0xff]   ;;  %v5860_v8 = vld [vmem:[%s7427_s1] sm:$0xff]   ;;  %v5890_v37 = vld [vmem:[%s7427_s1 + $0x30] sm:$0xff]   ;;  %vm4326_vm4 = vcmask 519168  }
   0xe   : > { %5183 = vmatprep.subr.bf16.mxu0 %v7430_v1  ;;  %5830 = vmatprep.subr.bf16.mxu1 %v7430_v1  ;;  %s5833_s18 = smul.u32 624, %s7449_s13  ;;  %v5873_v38 = vld [vmem:[%s7427_s1 + $0x48] sm:$0xff]   ;;  %v5891_v45 = vld [vmem:[%s7427_s1 + $0x40] sm:$0xff]  }
   0xf   : > { %5185 = vmatprep.mubr.msk.bf16.mxu0 %vm6016_vm0, %v7430_v1  ;;  %5221 = vmatprep.mubr.msk.bf16.mxu1 %vm6016_vm0, %v7430_v1  ;;  %s5834_s4 = smul.u32 136, %s7449_s13 }
  0x10   : > { %s6070_s23 = scalar_lea.vmem %s7426_s0, %s5833_s18 }
  0x11   : > { %5184 = vmatpush3.bf16.msra.mxu0 %v5846_v2  ;;  %5832 = vmatpush3.bf16.msra.mxu1 %v5846_v2  ;;  %v5847_v5 = vld [vmem:[%s6070_s23 + $0x9c] sm:$0xff]   ;;  %v5848_v6 = vld [vmem:[%s6070_s23 + $0xe4] sm:$0xff]   ;;  %v5852_v10 = vld [vmem:[%s6070_s23 + $0xec] sm:$0xff]   ;;  %s7288_s7 = scalar_lea.vmem %s7429_s3, %s5834_s4 }
  0x12   : > { %5325 = vmatprep.subr.bf16.mxu0 %v7430_v1  ;;  %5253 = vmatprep.subr.bf16.mxu1 %v7430_v1  ;;  %v5851_v9 = vld [vmem:[%s6070_s23 + $0xa4] sm:$0xff]   ;;  %v5853_v11 = vld [vmem:[%s6070_s23 + $0xac] sm:$0xff]   ;;  %v5854_v12 = vld [vmem:[%s6070_s23 + $0xf4] sm:$0xff]  }
  0x13   : > { %v5855_v13 = vld [vmem:[%s6070_s23 + $0xb4] sm:$0xff]   ;;  %v5856_v14 = vld [vmem:[%s6070_s23 + $0xfc] sm:$0xff]   ;;  %v5858_v16 = vld [vmem:[%s6070_s23 + $0x104] sm:$0xff]  }
  0x14   : > { %5186 = vmatmul.mubr.msk.bf16.vlgmr.msra.gmra.mxu0 %vm347_vm1, %v5847_v5  ;;  %5222 = vmatmul.mubr.msk.bf16.vlgmr.msra.gmra.mxu1 %vm347_vm1, %v5848_v6  ;;  %v5857_v15 = vld [vmem:[%s6070_s23 + $0xbc] sm:$0xff]   ;;  %v5861_v17 = vld [vmem:[%s6070_s23 + $0xc4] sm:$0xff]   ;;  %v5862_v18 = vld [vmem:[%s6070_s23 + $0x10c] sm:$0xff]  }
  0x15   : > { %5326 = vmatpush3.bf16.msra.mxu0 %v5849_v3  ;;  %5189 = vmatprep.mubr.msk.bf16.mxu0 %vm6016_vm0, %v7430_v1  ;;  %v5863_v19 = vld [vmem:[%s6070_s23 + $0xcc] sm:$0xff]   ;;  %v5864_v20 = vld [vmem:[%s6070_s23 + $0x114] sm:$0xff]   ;;  %v5871_v22 = vld [vmem:[%s6070_s23] sm:$0xff]  }
  0x16   : > { %5225 = vmatprep.mubr.msk.bf16.mxu1 %vm6016_vm0, %v7430_v1  ;;  %5254 = vmatpush3.bf16.msra.mxu1 %v5850_v4  ;;  %v5865_v21 = vld [vmem:[%s6070_s23 + $0xd4] sm:$0xff]   ;;  %v5866_v23 = vld [vmem:[%s6070_s23 + $0x11c] sm:$0xff]   ;;  %v5872_v24 = vld [vmem:[%s6070_s23 + $0x8] sm:$0xff]   ;;  %v1017_v25 = vshll.u32 %v5871_v22, 16  ;;  %v1015_v30 = vshrl.u32 %v5871_v22, 16 }
  0x17   : > { %5327 = vmatprep.subr.bf16.mxu0 %v7430_v1  ;;  %5255 = vmatprep.subr.bf16.mxu1 %v7430_v1  ;;  %v5867_v26 = vld [vmem:[%s6070_s23 + $0xdc] sm:$0xff]   ;;  %v1022_v27 = vshll.u32 %v5872_v24, 16  ;;  %v5875_v32 = vld [vmem:[%s6070_s23 + $0x10] sm:$0xff]   ;;  %v5870_v39 = vld [vmem:[%s6070_s23 + $0x8] sm:$0xff]   ;;  %v1026_v40 = vshrl.u32 %v5872_v24, 16 }
  0x18   : > { %v5868_v28 = vld [vmem:[%s6070_s23] sm:$0xff]   ;;  %v1019_v31 = vrot.slane %v1017_v25, 1  ;;  %v1030_v35 = vshll.u32 %v5875_v32, 16  ;;  %v5877_v36 = vld [vmem:[%s6070_s23 + $0x18] sm:$0xff]   ;;  %v1034_v43 = vshrl.u32 %v5875_v32, 16  ;;  %v5874_v47 = vld [vmem:[%s6070_s23 + $0x10] sm:$0xff]  }
  0x19   : > { %5328 = vmatpush3.bf16.msra.mxu0 %v5859_v7  ;;  %v1024_v33 = vrot.slane %v1022_v27, 1  ;;  %v1038_v44 = vshll.u32 %v5877_v36, 16  ;;  %v5879_v48 = vld [vmem:[%s6070_s23 + $0x20] sm:$0xff]   ;;  %v1042_v51 = vshrl.u32 %v5877_v36, 16  ;;  %v5881_v54 = vld [vmem:[%s6070_s23 + $0x28] sm:$0xff]   ;;  %v5876_v55 = vld [vmem:[%s6070_s23 + $0x18] sm:$0xff]  }
  0x1a   : > { %5469 = vmatprep.subr.bf16.mxu0 %v7430_v1  ;;  %5256 = vmatpush3.bf16.msra.mxu1 %v5860_v8  ;;  %v1020_v34 = vor.u32 %v1019_v31, %v1015_v30  ;;  %v1032_v42 = vrot.slane %v1030_v35, 1  ;;  %v1046_v53 = vshll.u32 %v5879_v48, 16  ;;  %v1050_v58 = vshrl.u32 %v5879_v48, 16  ;;  %v5883_v61 = vld [vmem:[%s6070_s23 + $0x30] sm:$0xff]   ;;  %v5878_v62 = vld [vmem:[%s6070_s23 + $0x20] sm:$0xff]   ;;  %v5885_v5 = vld [vmem:[%s6070_s23 + $0x38] sm:$0xff]  }
  0x1b   : > { %5397 = vmatprep.subr.bf16.mxu1 %v7430_v1  ;;  %v1028_v46 = vor.u32 %v1026_v40, %v1024_v33  ;;  %v1040_v50 = vrot.slane %v1038_v44, 1  ;;  %v1054_v59 = vshll.u32 %v5881_v54, 16  ;;  %v1058_v2 = vshrl.u32 %v5881_v54, 16  ;;  %v5880_v6 = vld [vmem:[%s6070_s23 + $0x28] sm:$0xff]   ;;  %v5886_v24 = vld [vmem:[%s6070_s23 + $0x40] sm:$0xff]   ;;  %v5893_v30 = vld [vmem:[%s6070_s23 + $0x50] sm:$0xff]  }
  0x1c   : > { %5190 = vmatmul.mubr.msk.bf16.gmra.mxu0 %vm347_vm1, %v5851_v9  ;;  %5226 = vmatmul.mubr.msk.bf16.gmra.mxu1 %vm347_vm1, %v5852_v10  ;;  %v1025_v41 = vsel %vm1013_vm2, %v1020_v34, %v1024_v33  ;;  %v1036_v52 = vor.u32 %v1034_v43, %v1032_v42  ;;  %v1048_v57 = vrot.slane %v1046_v53, 1  ;;  %v1062_v3 = vshll.u32 %v5883_v61, 16  ;;  %v5889_v22 = vld [vmem:[%s6070_s23 + $0x48] sm:$0xff]   ;;  %v5897_v44 = vld [vmem:[%s6070_s23 + $0x60] sm:$0xff]  }
  0x1d   : > { %5193 = vmatprep.mubr.msk.bf16.mxu0 %vm6016_vm0, %v7430_v1  ;;  %5229 = vmatprep.mubr.msk.bf16.mxu1 %vm6016_vm0, %v7430_v1  ;;  %v1033_v49 = vsel %vm1013_vm2, %v1028_v46, %v1032_v42  ;;  %v1044_v60 = vor.u32 %v1042_v51, %v1040_v50  ;;  %v1056_v0 = vrot.slane %v1054_v59, 1  ;;  %v1066_v9 = vshrl.u32 %v5883_v61, 16  ;;  %v5888_v31 = vld [vmem:[%s6070_s23 + $0x48] sm:$0xff]  }
  0x1e   : > { %v1041_v56 = vsel %vm1013_vm2, %v1036_v52, %v1040_v50  ;;  %v1052_v4 = vor.u32 %v1050_v58, %v1048_v57  ;;  %v1064_v8 = vrot.slane %v1062_v3, 1  ;;  %v1070_v10 = vshll.u32 %v5885_v5, 16  ;;  %v5899_v51 = vld [vmem:[%s6070_s23 + $0x68] sm:$0xff]   ;;  %v5896_v52 = vld [vmem:[%s6070_s23 + $0x60] sm:$0xff]   ;;  %v5901_v58 = vld [vmem:[%s6070_s23 + $0x70] sm:$0xff]  }
  0x1f   : > { %v1049_v63 = vsel %vm1013_vm2, %v1044_v60, %v1048_v57  ;;  %v1086_v27 = vshll.u32 %v5889_v22, 16  ;;  %v1090_v33 = vshrl.u32 %v5889_v22, 16  ;;  %v1094_v34 = vshll.u32 %v5893_v30, 16  ;;  %v5898_v59 = vld [vmem:[%s6070_s23 + $0x68] sm:$0xff]   ;;  %v5900_v3 = vld [vmem:[%s6070_s23 + $0x70] sm:$0xff]  }
  0x20   : > { %v1057_v7 = vsel %vm1013_vm2, %v1052_v4, %v1056_v0  ;;  %v1098_v40 = vshrl.u32 %v5893_v30, 16  ;;  %v1110_v48 = vshll.u32 %v5897_v44, 16  ;;  %v1114_v54 = vshrl.u32 %v5897_v44, 16  ;;  %v5907_v30 = vld [vmem:[%s6070_s23 + $0x138] sm:$0xff]  }
  0x21   : > { %v1096_v36 = vrot.slane %v1094_v34, 1  ;;  %v1122_v61 = vshrl.u32 %v5899_v51, 16 }
  0x22   : > { %v1112_v50 = vrot.slane %v1110_v48, 1  ;;  %v5929_v48 = vld [vmem:[%s7427_s1 + $0x60] sm:$0xff]  }
  0x23   : > { %v1100_v42 = vor.u32 %v1098_v40, %v1096_v36  ;;  %v5910_v40 = vld [vmem:[%s6070_s23 + $0x1d4] sm:$0xff]  }
  0x24   : > { %5194 = vmatmul.mubr.msk.bf16.gmra.mxu0 %vm347_vm1, %v5853_v11  ;;  %5230 = vmatmul.mubr.msk.bf16.gmra.mxu1 %vm347_vm1, %v5854_v12  ;;  %v1060_v11 = vor.u32 %v1058_v2, %v1056_v0  ;;  %v5887_v12 = vld [vmem:[%s6070_s23 + $0x40] sm:$0xff]   ;;  %v5903_v2 = vld [vmem:[%s6070_s23 + $0x78] sm:$0xff]  }
  0x25   : > { %5197 = vmatprep.mubr.msk.bf16.mxu0 %vm6016_vm0, %v7430_v1  ;;  %5233 = vmatprep.mubr.msk.bf16.mxu1 %vm6016_vm0, %v7430_v1 }
  0x2c   : > { %5198 = vmatmul.mubr.msk.bf16.gmra.mxu0 %vm347_vm1, %v5855_v13  ;;  %5234 = vmatmul.mubr.msk.bf16.gmra.mxu1 %vm347_vm1, %v5856_v14  ;;  %v5882_v13 = vld [vmem:[%s6070_s23 + $0x30] sm:$0xff]   ;;  %v1065_v14 = vsel %vm1013_vm2, %v1060_v11, %v1064_v8 }
  0x2d   : > { %5201 = vmatprep.mubr.msk.bf16.mxu0 %vm6016_vm0, %v7430_v1  ;;  %5237 = vmatprep.mubr.msk.bf16.mxu1 %vm6016_vm0, %v7430_v1 }
  0x34   : > { %5202 = vmatmul.mubr.msk.bf16.gmra.mxu0 %vm347_vm1, %v5857_v15  ;;  %5238 = vmatmul.mubr.msk.bf16.gmra.mxu1 %vm347_vm1, %v5858_v16  ;;  %v1072_v15 = vrot.slane %v1070_v10, 1  ;;  %v1074_v16 = vshrl.u32 %v5885_v5, 16  ;;  %v1130_v5 = vshrl.u32 %v5901_v58, 16  ;;  %v5902_v10 = vld [vmem:[%s6070_s23 + $0x78] sm:$0xff]  }
  0x35   : > { %5205 = vmatprep.mubr.msk.bf16.mxu0 %vm6016_vm0, %v7430_v1  ;;  %5241 = vmatprep.mubr.msk.bf16.mxu1 %vm6016_vm0, %v7430_v1 }
  0x3c   : > { %5206 = vmatmul.mubr.msk.bf16.gmra.mxu0 %vm347_vm1, %v5861_v17  ;;  %5242 = vmatmul.mubr.msk.bf16.gmra.mxu1 %vm347_vm1, %v5862_v18  ;;  %v1078_v17 = vshll.u32 %v5887_v12, 16  ;;  %v1068_v18 = vor.u32 %v1066_v9, %v1064_v8  ;;  %v5905_v9 = vld [vmem:[%s6070_s23 + $0x80] sm:$0xff]  }
  0x3d   : > { %5209 = vmatprep.mubr.msk.bf16.mxu0 %vm6016_vm0, %v7430_v1  ;;  %5245 = vmatprep.mubr.msk.bf16.mxu1 %vm6016_vm0, %v7430_v1 }
  0x44   : > { %5210 = vmatmul.mubr.msk.bf16.gmra.mxu0 %vm347_vm1, %v5863_v19  ;;  %5246 = vmatmul.mubr.msk.bf16.gmra.mxu1 %vm347_vm1, %v5864_v20  ;;  %v5884_v19 = vld [vmem:[%s6070_s23 + $0x38] sm:$0xff]   ;;  %v1073_v20 = vsel %vm1013_vm2, %v1068_v18, %v1072_v15 }
  0x45   : > { %5213 = vmatprep.mubr.msk.bf16.mxu0 %vm6016_vm0, %v7430_v1  ;;  %5249 = vmatprep.mubr.msk.bf16.mxu1 %vm6016_vm0, %v7430_v1 }
  0x4c   : > { %5214 = vmatmul.mubr.msk.bf16.gmra.mxu0 %vm347_vm1, %v5865_v21  ;;  %5250 = vmatmul.mubr.msk.bf16.gmra.mxu1 %vm347_vm1, %v5866_v23  ;;  %v1080_v21 = vrot.slane %v1078_v17, 1  ;;  %v1076_v23 = vor.u32 %v1074_v16, %v1072_v15  ;;  %v5906_v16 = vld [vmem:[%s6070_s23 + $0x88] ss:$0 sps:$4 sm:$0x11]   ;;  %v5904_v17 = vld [vmem:[%s6070_s23 + $0x80] sm:$0xff]  }
  0x4d   : > { %5217 = vmatprep.mubr.msk.bf16.mxu0 %vm6016_vm0, %v7430_v1  ;;  %5257 = vmatprep.mubr.msk.bf16.mxu1 %vm6016_vm0, %v7430_v1 }
  0x4e   : > { %v1081_v25 = vsel %vm1013_vm2, %v1076_v23, %v1080_v21 }
  0x54   : > { %5218 = vmatmul.mubr.msk.bf16.gmra.mxu0 %vm347_vm1, %v5867_v26  ;;  %5258 = vmatmul.mubr.msk.bf16.vlgmr.msra.gmra.mxu1 %vm347_vm1, %v5868_v28  ;;  %v1082_v26 = vshrl.u32 %v5887_v12, 16  ;;  %v1138_v12 = vshrl.u32 %v5903_v2, 16 }
  0x55   : > { %5329 = vmatprep.mubr.msk.bf16.mxu0 %vm6016_vm0, %v7430_v1  ;;  %5261 = vmatprep.mubr.msk.bf16.mxu1 %vm6016_vm0, %v7430_v1 }
  0x56   : > { %5398 = vmatpush3.bf16.msra.mxu1 %v5869_v29  ;;  %v1084_v28 = vor.u32 %v1082_v26, %v1080_v21  ;;  %v1088_v29 = vrot.slane %v1086_v27, 1 }
  0x57   : > { %5399 = vmatprep.subr.bf16.mxu1 %v7430_v1 }
  0x58   : > { %v1089_v32 = vsel %vm1013_vm2, %v1084_v28, %v1088_v29  ;;  %v1092_v35 = vor.u32 %v1090_v33, %v1088_v29 }
  0x5a   : > { %5400 = vmatpush3.bf16.msra.mxu1 %v5890_v37  ;;  %v5895_v37 = vld [vmem:[%s6070_s23 + $0x58] sm:$0xff]  }
  0x5b   : > { %5541 = vmatprep.subr.bf16.mxu1 %v7430_v1 }
  0x5c   : > { %5330 = vmatmul.mubr.msk.bf16.vlgmr.msra.gmra.mxu0 %vm347_vm1, %v1025_v41  ;;  %5262 = vmatmul.mubr.msk.bf16.gmra.mxu1 %vm347_vm1, %v5870_v39  ;;  %v1097_v39 = vsel %vm1013_vm2, %v1092_v35, %v1096_v36  ;;  %v1102_v41 = vshll.u32 %v5895_v37, 16 }
  0x5d   : > { %5470 = vmatpush3.bf16.msra.mxu0 %v5873_v38  ;;  %5265 = vmatprep.mubr.msk.bf16.mxu1 %vm6016_vm0, %v7430_v1  ;;  %v5892_v38 = vld [vmem:[%s6070_s23 + $0x50] sm:$0xff]  }
  0x5e   : > { %5333 = vmatprep.mubr.msk.bf16.mxu0 %vm6016_vm0, %v7430_v1  ;;  %5471 = vmatprep.subr.bf16.mxu0 %v7430_v1  ;;  %v1104_v43 = vrot.slane %v1102_v41, 1 }
  0x60   : > { %v1105_v46 = vsel %vm1013_vm2, %v1100_v42, %v1104_v43  ;;  %v5909_v42 = vld [vmem:[%s6070_s23 + $0x140] sm:$0xff]  }
  0x61   : > { %5472 = vmatpush3.bf16.msra.mxu0 %v5891_v45  ;;  %v5894_v45 = vld [vmem:[%s6070_s23 + $0x58] sm:$0xff]  }
  0x62   : > { %5613 = vmatprep.subr.bf16.mxu0 %v7430_v1 }
  0x64   : > { %5334 = vmatmul.mubr.msk.bf16.gmra.mxu0 %vm347_vm1, %v1033_v49  ;;  %5266 = vmatmul.mubr.msk.bf16.gmra.mxu1 %vm347_vm1, %v5874_v47  ;;  %v1106_v47 = vshrl.u32 %v5895_v37, 16  ;;  %v5928_v37 = vld [vmem:[%s7427_s1 + $0x50] sm:$0xff]  }
  0x65   : > { %5337 = vmatprep.mubr.msk.bf16.mxu0 %vm6016_vm0, %v7430_v1  ;;  %5269 = vmatprep.mubr.msk.bf16.mxu1 %vm6016_vm0, %v7430_v1 }
  0x66   : > { %v1108_v49 = vor.u32 %v1106_v47, %v1104_v43  ;;  %v5911_v43 = vld [vmem:[%s7427_s1 + $0x68] sm:$0xff]  }
  0x68   : > { %v1113_v53 = vsel %vm1013_vm2, %v1108_v49, %v1112_v50 }
  0x6c   : > { %5338 = vmatmul.mubr.msk.bf16.gmra.mxu0 %vm347_vm1, %v1041_v56  ;;  %5270 = vmatmul.mubr.msk.bf16.gmra.mxu1 %vm347_vm1, %v5876_v55  ;;  %v1118_v55 = vshll.u32 %v5899_v51, 16  ;;  %v1116_v56 = vor.u32 %v1114_v54, %v1112_v50  ;;  %v5912_v54 = vld [vmem:[%s6070_s23 + $0x148] sm:$0xff]  }
  0x6d   : > { %5341 = vmatprep.mubr.msk.bf16.mxu0 %vm6016_vm0, %v7430_v1  ;;  %5273 = vmatprep.mubr.msk.bf16.mxu1 %vm6016_vm0, %v7430_v1 }
  0x6e   : > { %v1120_v57 = vrot.slane %v1118_v55, 1 }
  0x70   : > { %v1121_v60 = vsel %vm1013_vm2, %v1116_v56, %v1120_v57 }
  0x74   : > { %5342 = vmatmul.mubr.msk.bf16.gmra.mxu0 %vm347_vm1, %v1049_v63  ;;  %5274 = vmatmul.mubr.msk.bf16.gmra.mxu1 %vm347_vm1, %v5878_v62  ;;  %v1126_v62 = vshll.u32 %v5901_v58, 16  ;;  %v1124_v63 = vor.u32 %v1122_v61, %v1120_v57 }
  0x75   : > { %5345 = vmatprep.mubr.msk.bf16.mxu0 %vm6016_vm0, %v7430_v1  ;;  %5277 = vmatprep.mubr.msk.bf16.mxu1 %vm6016_vm0, %v7430_v1 }
  0x76   : > { %v1128_v0 = vrot.slane %v1126_v62, 1  ;;  %v5915_v62 = vld [vmem:[%s6070_s23 + $0x1e4] sm:$0xff]  }
  0x78   : > { %v1129_v4 = vsel %vm1013_vm2, %v1124_v63, %v1128_v0 }
  0x7c   : > { %5346 = vmatmul.mubr.msk.bf16.gmra.mxu0 %vm347_vm1, %v1057_v7  ;;  %5278 = vmatmul.mubr.msk.bf16.gmra.mxu1 %vm347_vm1, %v5880_v6  ;;  %v1134_v6 = vshll.u32 %v5903_v2, 16  ;;  %v1132_v7 = vor.u32 %v1130_v5, %v1128_v0  ;;  %v5914_v0 = vld [vmem:[%s6070_s23 + $0x150] sm:$0xff]  }
  0x7d   : > { %5349 = vmatprep.mubr.msk.bf16.mxu0 %vm6016_vm0, %v7430_v1  ;;  %5281 = vmatprep.mubr.msk.bf16.mxu1 %vm6016_vm0, %v7430_v1 }
  0x7e   : > { %v1136_v8 = vrot.slane %v1134_v6, 1 }
  0x80   : > { %v1137_v11 = vsel %vm1013_vm2, %v1132_v7, %v1136_v8 }
  0x84   : > { %5350 = vmatmul.mubr.msk.bf16.gmra.mxu0 %vm347_vm1, %v1065_v14  ;;  %5282 = vmatmul.mubr.msk.bf16.gmra.mxu1 %vm347_vm1, %v5882_v13  ;;  %v1142_v13 = vshll.u32 %v5905_v9, 16  ;;  %v1140_v14 = vor.u32 %v1138_v12, %v1136_v8 }
  0x85   : > { %5353 = vmatprep.mubr.msk.bf16.mxu0 %vm6016_vm0, %v7430_v1  ;;  %5285 = vmatprep.mubr.msk.bf16.mxu1 %vm6016_vm0, %v7430_v1 }
  0x86   : > { %v1144_v15 = vrot.slane %v1142_v13, 1 }
  0x88   : > { %v1145_v18 = vsel %vm1013_vm2, %v1140_v14, %v1144_v15 }
  0x8c   : > { %5354 = vmatmul.mubr.msk.bf16.gmra.mxu0 %vm347_vm1, %v1073_v20  ;;  %5286 = vmatmul.mubr.msk.bf16.gmra.mxu1 %vm347_vm1, %v5884_v19  ;;  %v1146_v19 = vshrl.u32 %v5905_v9, 16  ;;  %v1150_v20 = vshll.u32 %v5906_v16, 16  ;;  %v5917_v9 = vld [vmem:[%s6070_s23 + $0x1ec] sm:$0xff]  }
  0x8d   : > { %5357 = vmatprep.mubr.msk.bf16.mxu0 %vm6016_vm0, %v7430_v1  ;;  %5289 = vmatprep.mubr.msk.bf16.mxu1 %vm6016_vm0, %v7430_v1 }
  0x8e   : > { %v1148_v23 = vor.u32 %v1146_v19, %v1144_v15  ;;  %v5919_v19 = vld [vmem:[%s6070_s23 + $0x1f4] sm:$0xff]  }
  0x94   : > { %5358 = vmatmul.mubr.msk.bf16.gmra.mxu0 %vm347_vm1, %v1081_v25  ;;  %5290 = vmatmul.mubr.msk.bf16.gmra.mxu1 %vm347_vm1, %v5886_v24  ;;  %v1152_v24 = vrot.slane %v1150_v20, 1 }
  0x95   : > { %5361 = vmatprep.mubr.msk.bf16.mxu0 %vm6016_vm0, %v7430_v1  ;;  %5293 = vmatprep.mubr.msk.bf16.mxu1 %vm6016_vm0, %v7430_v1 }
  0x96   : > { %v1153_v29 = vsel %vm1013_vm2, %v1148_v23, %v1152_v24  ;;  %v5918_v23 = vld [vmem:[%s6070_s23 + $0x160] sm:$0xff]  }
  0x9c   : > { %5362 = vmatmul.mubr.msk.bf16.gmra.mxu0 %vm347_vm1, %v1089_v32  ;;  %5294 = vmatmul.mubr.msk.bf16.gmra.mxu1 %vm347_vm1, %v5888_v31  ;;  %v5908_v32 = vld [vmem:[%s7427_s1 + $0x58] sm:$0xff]  }
  0x9d   : > { %5365 = vmatprep.mubr.msk.bf16.mxu0 %vm6016_vm0, %v7430_v1  ;;  %5297 = vmatprep.mubr.msk.bf16.mxu1 %vm6016_vm0, %v7430_v1 }
  0xa4   : > { %5366 = vmatmul.mubr.msk.bf16.gmra.mxu0 %vm347_vm1, %v1097_v39  ;;  %5298 = vmatmul.mubr.msk.bf16.gmra.mxu1 %vm347_vm1, %v5892_v38 }
  0xa5   : > { %5369 = vmatprep.mubr.msk.bf16.mxu0 %vm6016_vm0, %v7430_v1  ;;  %5301 = vmatprep.mubr.msk.bf16.mxu1 %vm6016_vm0, %v7430_v1 }
  0xac   : > { %5370 = vmatmul.mubr.msk.bf16.gmra.mxu0 %vm347_vm1, %v1105_v46  ;;  %5302 = vmatmul.mubr.msk.bf16.gmra.mxu1 %vm347_vm1, %v5894_v45 }
  0xad   : > { %5373 = vmatprep.mubr.msk.bf16.mxu0 %vm6016_vm0, %v7430_v1  ;;  %5305 = vmatprep.mubr.msk.bf16.mxu1 %vm6016_vm0, %v7430_v1 }
  0xb4   : > { %5374 = vmatmul.mubr.msk.bf16.gmra.mxu0 %vm347_vm1, %v1113_v53  ;;  %5306 = vmatmul.mubr.msk.bf16.gmra.mxu1 %vm347_vm1, %v5896_v52  ;;  %v5913_v52 = vld [vmem:[%s6070_s23 + $0x1dc] sm:$0xff]  }
  0xb5   : > { %5377 = vmatprep.mubr.msk.bf16.mxu0 %vm6016_vm0, %v7430_v1  ;;  %5309 = vmatprep.mubr.msk.bf16.mxu1 %vm6016_vm0, %v7430_v1 }
  0xbc   : > { %5378 = vmatmul.mubr.msk.bf16.gmra.mxu0 %vm347_vm1, %v1121_v60  ;;  %5310 = vmatmul.mubr.msk.bf16.gmra.mxu1 %vm347_vm1, %v5898_v59 }
  0xbd   : > { %5381 = vmatprep.mubr.msk.bf16.mxu0 %vm6016_vm0, %v7430_v1  ;;  %5313 = vmatprep.mubr.msk.bf16.mxu1 %vm6016_vm0, %v7430_v1 }
  0xc4   : > { %5382 = vmatmul.mubr.msk.bf16.gmra.mxu0 %vm347_vm1, %v1129_v4  ;;  %5314 = vmatmul.mubr.msk.bf16.gmra.mxu1 %vm347_vm1, %v5900_v3 }
  0xc5   : > { %5385 = vmatprep.mubr.msk.bf16.mxu0 %vm6016_vm0, %v7430_v1  ;;  %5317 = vmatprep.mubr.msk.bf16.mxu1 %vm6016_vm0, %v7430_v1 }
  0xcc   : > { %5386 = vmatmul.mubr.msk.bf16.gmra.mxu0 %vm347_vm1, %v1137_v11  ;;  %5318 = vmatmul.mubr.msk.bf16.gmra.mxu1 %vm347_vm1, %v5902_v10  ;;  %v5916_v11 = vld [vmem:[%s6070_s23 + $0x158] sm:$0xff]  }
  0xcd   : > { %5389 = vmatprep.mubr.msk.bf16.mxu0 %vm6016_vm0, %v7430_v1  ;;  %5321 = vmatprep.mubr.msk.bf16.mxu1 %vm6016_vm0, %v7430_v1 }
  0xd4   : > { %v6313_v21 = vpop.f32.mrf.mxu0  ;;  %5390 = vmatmul.mubr.msk.bf16.gmra.mxu0 %vm347_vm1, %v1145_v18  ;;  %v6316_v22 = vpop.f32.mrf.mxu1  ;;  %5322 = vmatmul.mubr.msk.bf16.gmra.mxu1 %vm347_vm1, %v5904_v17 }
  0xd5   : > { %5393 = vmatprep.mubr.msk.bf16.mxu0 %vm6016_vm0, %v7430_v1  ;;  %5401 = vmatprep.mubr.msk.bf16.mxu1 %vm6016_vm0, %v7430_v1 }
  0xd6   : > { %v5187_v25 = vpop.f32.mrf.mxu0  ;;  %v5223_v26 = vpop.f32.mrf.mxu1 }
  0xd8   : > { %v6323_v27 = vpop.f32.mrf.mxu0  ;;  %v6325_v28 = vpop.f32.mrf.mxu1 }
  0xda   : > { %v5188_v31 = vpop.f32.mrf.mxu0  ;;  %v5224_v33 = vpop.f32.mrf.mxu1 }
  0xdb   : > { %v5921_v33 = vld [vmem:[%s6070_s23 + $0x1fc] sm:$0xff]  }
  0xdc   : > { %v6332_v34 = vpop.f32.mrf.mxu0  ;;  %5394 = vmatmul.mubr.msk.bf16.gmra.mxu0 %vm347_vm1, %v1153_v29  ;;  %v6335_v35 = vpop.f32.mrf.mxu1  ;;  %5402 = vmatmul.mubr.msk.bf16.vlgmr.msra.gmra.mxu1 %vm347_vm1, %v5907_v30 }
  0xdd   : > { %5473 = vmatprep.mubr.msk.bf16.mxu0 %vm6016_vm0, %v7430_v1  ;;  %5405 = vmatprep.mubr.msk.bf16.mxu1 %vm6016_vm0, %v7430_v1 }
  0xde   : > { %v5191_v36 = vpop.f32.mrf.mxu0  ;;  %5542 = vmatpush3.bf16.msra.mxu1 %v5908_v32  ;;  %v5227_v38 = vpop.f32.mrf.mxu1 }
  0xdf   : > { %5543 = vmatprep.subr.bf16.mxu1 %v7430_v1 }
  0xe0   : > { %v6346_v39 = vpop.f32.mrf.mxu0  ;;  %v6349_v41 = vpop.f32.mrf.mxu1 }
  0xe2   : > { %v5192_v44 = vpop.f32.mrf.mxu0  ;;  %5544 = vmatpush3.bf16.msra.mxu1 %v5928_v37  ;;  %v5228_v45 = vpop.f32.mrf.mxu1  ;;  %v5920_v37 = vld [vmem:[%s6070_s23 + $0x168] sm:$0xff]  }
  0xe3   : > { %5685 = vmatprep.subr.bf16.mxu1 %v7430_v1 }
  0xe4   : > { %v6356_v46 = vpop.f32.mrf.mxu0  ;;  %5474 = vmatmul.mubr.msk.bf16.vlgmr.msra.gmra.mxu0 %vm347_vm1, %v5910_v40  ;;  %v6359_v47 = vpop.f32.mrf.mxu1  ;;  %5406 = vmatmul.mubr.msk.bf16.gmra.mxu1 %vm347_vm1, %v5909_v42 }
  0xe5   : > { %5614 = vmatpush3.bf16.msra.mxu0 %v5911_v43  ;;  %5409 = vmatprep.mubr.msk.bf16.mxu1 %vm6016_vm0, %v7430_v1 }
  0xe6   : > { %v5195_v49 = vpop.f32.mrf.mxu0  ;;  %5477 = vmatprep.mubr.msk.bf16.mxu0 %vm6016_vm0, %v7430_v1  ;;  %v5231_v50 = vpop.f32.mrf.mxu1  ;;  %5615 = vmatprep.subr.bf16.mxu0 %v7430_v1 }
  0xe7   : > { %v5923_v49 = vld [vmem:[%s6070_s23 + $0x204] sm:$0xff]  }
  0xe8   : > { %v6370_v51 = vpop.f32.mrf.mxu0  ;;  %v6373_v53 = vpop.f32.mrf.mxu1 }
  0xe9   : > { %5616 = vmatpush3.bf16.msra.mxu0 %v5929_v48 }
  0xea   : > { %v5196_v55 = vpop.f32.mrf.mxu0  ;;  %5757 = vmatprep.subr.bf16.mxu0 %v7430_v1  ;;  %v5232_v56 = vpop.f32.mrf.mxu1 }
  0xec   : > { %v6377_v57 = vpop.f32.mrf.mxu0  ;;  %5478 = vmatmul.mubr.msk.bf16.gmra.mxu0 %vm347_vm1, %v5913_v52  ;;  %v6380_v58 = vpop.f32.mrf.mxu1  ;;  %5410 = vmatmul.mubr.msk.bf16.gmra.mxu1 %vm347_vm1, %v5912_v54  ;;  %v5922_v52 = vld [vmem:[%s6070_s23 + $0x170] sm:$0xff]  }
  0xed   : > { %5481 = vmatprep.mubr.msk.bf16.mxu0 %vm6016_vm0, %v7430_v1  ;;  %5413 = vmatprep.mubr.msk.bf16.mxu1 %vm6016_vm0, %v7430_v1 }
  0xee   : > { %v5199_v59 = vpop.f32.mrf.mxu0  ;;  %v5235_v60 = vpop.f32.mrf.mxu1 }
  0xf0   : > { %v6387_v61 = vpop.f32.mrf.mxu0  ;;  %v6390_v63 = vpop.f32.mrf.mxu1 }
  0xf2   : > { %v5200_v2 = vpop.f32.mrf.mxu0  ;;  %v5236_v3 = vpop.f32.mrf.mxu1 }
  0xf3   : > { %v5925_v3 = vld [vmem:[%s6070_s23 + $0x20c] sm:$0xff]  }
  0xf4   : > { %v6393_v4 = vpop.f32.mrf.mxu0  ;;  %5482 = vmatmul.mubr.msk.bf16.gmra.mxu0 %vm347_vm1, %v5915_v62  ;;  %v6396_v5 = vpop.f32.mrf.mxu1  ;;  %5414 = vmatmul.mubr.msk.bf16.gmra.mxu1 %vm347_vm1, %v5914_v0 }
  0xf5   : > { %5485 = vmatprep.mubr.msk.bf16.mxu0 %vm6016_vm0, %v7430_v1  ;;  %5417 = vmatprep.mubr.msk.bf16.mxu1 %vm6016_vm0, %v7430_v1 }
  0xf6   : > { %v5203_v6 = vpop.f32.mrf.mxu0  ;;  %v5239_v7 = vpop.f32.mrf.mxu1 }
  0xf7   : > { %v5924_v7 = vld [vmem:[%s6070_s23 + $0x178] sm:$0xff]  }
  0xf8   : > { %v6403_v8 = vpop.f32.mrf.mxu0  ;;  %v6406_v10 = vpop.f32.mrf.mxu1 }
  0xfa   : > { %v5204_v12 = vpop.f32.mrf.mxu0  ;;  %v5240_v13 = vpop.f32.mrf.mxu1 }
  0xfc   : > { %v6409_v14 = vpop.f32.mrf.mxu0  ;;  %5486 = vmatmul.mubr.msk.bf16.gmra.mxu0 %vm347_vm1, %v5917_v9  ;;  %v6412_v15 = vpop.f32.mrf.mxu1  ;;  %5418 = vmatmul.mubr.msk.bf16.gmra.mxu1 %vm347_vm1, %v5916_v11 }
  0xfd   : > { %5489 = vmatprep.mubr.msk.bf16.mxu0 %vm6016_vm0, %v7430_v1  ;;  %5421 = vmatprep.mubr.msk.bf16.mxu1 %vm6016_vm0, %v7430_v1 }
  0xfe   : > { %v5207_v16 = vpop.f32.mrf.mxu0  ;;  %v5243_v17 = vpop.f32.mrf.mxu1 }
 0x100   : > { %v6419_v18 = vpop.f32.mrf.mxu0  ;;  %v6422_v20 = vpop.f32.mrf.mxu1 }
 0x102   : > { %v5208_v24 = vpop.f32.mrf.mxu0  ;;  %v5244_v25 = vpop.f32.mrf.mxu1 }
 0x103   : > { %v5927_v24 = vld [vmem:[%s6070_s23 + $0x214] sm:$0xff]  }
 0x104   : > { %v6425_v26 = vpop.f32.mrf.mxu0  ;;  %5490 = vmatmul.mubr.msk.bf16.gmra.mxu0 %vm347_vm1, %v5919_v19  ;;  %v6428_v29 = vpop.f32.mrf.mxu1  ;;  %5422 = vmatmul.mubr.msk.bf16.gmra.mxu1 %vm347_vm1, %v5918_v23 }
 0x105   : > { %5493 = vmatprep.mubr.msk.bf16.mxu0 %vm6016_vm0, %v7430_v1  ;;  %5425 = vmatprep.mubr.msk.bf16.mxu1 %vm6016_vm0, %v7430_v1 }
 0x106   : > { %v5211_v30 = vpop.f32.mrf.mxu0  ;;  %v5247_v31 = vpop.f32.mrf.mxu1 }
 0x107   : > { %v5926_v31 = vld [vmem:[%s6070_s23 + $0x180] sm:$0xff]  }
 0x108   : > { %v6435_v32 = vpop.f32.mrf.mxu0  ;;  %v6438_v36 = vpop.f32.mrf.mxu1 }
 0x10a   : > { %v5212_v38 = vpop.f32.mrf.mxu0  ;;  %v5248_v40 = vpop.f32.mrf.mxu1 }
 0x10c   : > { %v6441_v42 = vpop.f32.mrf.mxu0  ;;  %5494 = vmatmul.mubr.msk.bf16.gmra.mxu0 %vm347_vm1, %v5921_v33  ;;  %v6444_v43 = vpop.f32.mrf.mxu1  ;;  %5426 = vmatmul.mubr.msk.bf16.gmra.mxu1 %vm347_vm1, %v5920_v37 }
 0x10d   : > { %5497 = vmatprep.mubr.msk.bf16.mxu0 %vm6016_vm0, %v7430_v1  ;;  %5429 = vmatprep.mubr.msk.bf16.mxu1 %vm6016_vm0, %v7430_v1 }
 0x10e   : > { %v5215_v44 = vpop.f32.mrf.mxu0  ;;  %v5251_v45 = vpop.f32.mrf.mxu1 }
 0x110   : > { %v6451_v48 = vpop.f32.mrf.mxu0  ;;  %v6454_v50 = vpop.f32.mrf.mxu1 }
 0x112   : > { %v5216_v54 = vpop.f32.mrf.mxu0  ;;  %v5252_v55 = vpop.f32.mrf.mxu1 }
 0x113   : > { %v5931_v54 = vld [vmem:[%s6070_s23 + $0x21c] sm:$0xff]  }
 0x114   : > { %v6457_v56 = vpop.f32.mrf.mxu0  ;;  %5498 = vmatmul.mubr.msk.bf16.gmra.mxu0 %vm347_vm1, %v5923_v49  ;;  %v750_v59 = vpop.f32.mrf.mxu1  ;;  %5430 = vmatmul.mubr.msk.bf16.gmra.mxu1 %vm347_vm1, %v5922_v52 }
 0x115   : > { %5501 = vmatprep.mubr.msk.bf16.mxu0 %vm6016_vm0, %v7430_v1  ;;  %v751_v60 = vadd.f32 %v750_v59, %v6313_v21  ;;  %5433 = vmatprep.mubr.msk.bf16.mxu1 %vm6016_vm0, %v7430_v1 }
 0x116   : > { %v5219_v62 = vpop.f32.mrf.mxu0  ;;  %v5259_v0 = vpop.f32.mrf.mxu1 }
 0x118   : > { %v6466_v2 = vpop.f32.mrf.mxu0  ;;  %v753_v6 = vpop.f32.mrf.mxu1 }
 0x119   : > { %v754_v9 = vadd.f32 %v753_v6, %v6323_v27 }
 0x11a   : > { %v5220_v11 = vpop.f32.mrf.mxu0  ;;  %v5260_v12 = vpop.f32.mrf.mxu1 }
 0x11c   : > { %v1251_v13 = vpop.f32.mrf.mxu0  ;;  %5502 = vmatmul.mubr.msk.bf16.gmra.mxu0 %vm347_vm1, %v5925_v3  ;;  %v758_v21 = vpop.f32.mrf.mxu1  ;;  %5434 = vmatmul.mubr.msk.bf16.gmra.mxu1 %vm347_vm1, %v5924_v7 }
 0x11d   : > { %v6472_v16 = vadd.f32 %v1251_v13, %v751_v60  ;;  %5505 = vmatprep.mubr.msk.bf16.mxu0 %vm6016_vm0, %v7430_v1  ;;  %v759_v17 = vadd.f32 %v758_v21, %v6332_v34  ;;  %5437 = vmatprep.mubr.msk.bf16.mxu1 %vm6016_vm0, %v7430_v1  ;;  %v5930_v60 = vld [vmem:[%s6070_s23 + $0x188] sm:$0xff]  }
 0x11e   : > { %v5331_v19 = vpop.f32.mrf.mxu0  ;;  %v5263_v27 = vpop.f32.mrf.mxu1  ;;  %v5933_v13 = vld [vmem:[%s6070_s23 + $0x224] sm:$0xff]  }
 0x11f   : > { %v5932_v19 = vld [vmem:[%s6070_s23 + $0x190] sm:$0xff]  }
 0x120   : > { %v1254_v23 = vpop.f32.mrf.mxu0  ;;  %v761_v25 = vpop.f32.mrf.mxu1 }
 0x121   : > { %v6481_v30 = vadd.f32 %v1254_v23, %v754_v9  ;;  %v762_v33 = vadd.f32 %v761_v25, %v6346_v39 }
 0x122   : > { %v5332_v37 = vpop.f32.mrf.mxu0  ;;  %v5264_v38 = vpop.f32.mrf.mxu1 }
 0x124   : > { %v1259_v40 = vpop.f32.mrf.mxu0  ;;  %5506 = vmatmul.mubr.msk.bf16.gmra.mxu0 %vm347_vm1, %v5927_v24  ;;  %v766_v34 = vpop.f32.mrf.mxu1  ;;  %5438 = vmatmul.mubr.msk.bf16.gmra.mxu1 %vm347_vm1, %v5926_v31 }
 0x125   : > { %v6486_v44 = vadd.f32 %v1259_v40, %v759_v17  ;;  %5509 = vmatprep.mubr.msk.bf16.mxu0 %vm6016_vm0, %v7430_v1  ;;  %v767_v45 = vadd.f32 %v766_v34, %v6356_v46  ;;  %5441 = vmatprep.mubr.msk.bf16.mxu1 %vm6016_vm0, %v7430_v1  ;;  %v5935_v40 = vld [vmem:[%s6070_s23 + $0x22c] sm:$0xff]  }
 0x126   : > { %v5335_v49 = vpop.f32.mrf.mxu0  ;;  %v5267_v39 = vpop.f32.mrf.mxu1 }
 0x127   : > { %v5934_v49 = vld [vmem:[%s6070_s23 + $0x198] sm:$0xff]  }
 0x128   : > { %v1262_v52 = vpop.f32.mrf.mxu0  ;;  %v769_v55 = vpop.f32.mrf.mxu1 }
 0x129   : > { %v6495_v59 = vadd.f32 %v1262_v52, %v762_v33  ;;  %v770_v62 = vadd.f32 %v769_v55, %v6370_v51 }
 0x12a   : > { %v5336_v0 = vpop.f32.mrf.mxu0  ;;  %v5268_v3 = vpop.f32.mrf.mxu1 }
 0x12c   : > { %v1267_v6 = vpop.f32.mrf.mxu0  ;;  %5510 = vmatmul.mubr.msk.bf16.gmra.mxu0 %vm347_vm1, %v5931_v54  ;;  %v774_v46 = vpop.f32.mrf.mxu1  ;;  %5442 = vmatmul.mubr.msk.bf16.gmra.mxu1 %vm347_vm1, %v5930_v60 }
 0x12d   : > { %v6500_v7 = vadd.f32 %v1267_v6, %v767_v45  ;;  %5513 = vmatprep.mubr.msk.bf16.mxu0 %vm6016_vm0, %v7430_v1  ;;  %v775_v9 = vadd.f32 %v774_v46, %v6377_v57  ;;  %5445 = vmatprep.mubr.msk.bf16.mxu1 %vm6016_vm0, %v7430_v1  ;;  %v5937_v6 = vld [vmem:[%s6070_s23 + $0x234] sm:$0xff]  }
 0x12e   : > { %v5339_v11 = vpop.f32.mrf.mxu0  ;;  %v5271_v51 = vpop.f32.mrf.mxu1 }
 0x12f   : > { %v5936_v11 = vld [vmem:[%s6070_s23 + $0x1a0] sm:$0xff]  }
 0x130   : > { %v1270_v12 = vpop.f32.mrf.mxu0  ;;  %v777_v21 = vpop.f32.mrf.mxu1 }
 0x131   : > { %v6509_v17 = vadd.f32 %v1270_v12, %v770_v62  ;;  %v778_v27 = vadd.f32 %v777_v21, %v6387_v61 }
 0x132   : > { %v5340_v23 = vpop.f32.mrf.mxu0  ;;  %v5272_v24 = vpop.f32.mrf.mxu1 }
 0x134   : > { %v1275_v25 = vpop.f32.mrf.mxu0  ;;  %5514 = vmatmul.mubr.msk.bf16.gmra.mxu0 %vm347_vm1, %v5933_v13  ;;  %v782_v57 = vpop.f32.mrf.mxu1  ;;  %5446 = vmatmul.mubr.msk.bf16.gmra.mxu1 %vm347_vm1, %v5932_v19 }
 0x135   : > { %v6514_v31 = vadd.f32 %v1275_v25, %v775_v9  ;;  %5517 = vmatprep.mubr.msk.bf16.mxu0 %vm6016_vm0, %v7430_v1  ;;  %v783_v33 = vadd.f32 %v782_v57, %v6393_v4  ;;  %5449 = vmatprep.mubr.msk.bf16.mxu1 %vm6016_vm0, %v7430_v1  ;;  %v5939_v25 = vld [vmem:[%s6070_s23 + $0x23c] sm:$0xff]  }
 0x136   : > { %v5343_v37 = vpop.f32.mrf.mxu0  ;;  %v5275_v61 = vpop.f32.mrf.mxu1 }
 0x137   : > { %v5938_v37 = vld [vmem:[%s6070_s23 + $0x1a8] sm:$0xff]  }
 0x138   : > { %v1278_v38 = vpop.f32.mrf.mxu0  ;;  %v785_v34 = vpop.f32.mrf.mxu1 }
 0x139   : > { %v6523_v45 = vadd.f32 %v1278_v38, %v778_v27  ;;  %v786_v39 = vadd.f32 %v785_v34, %v6403_v8 }
 0x13a   : > { %v5344_v52 = vpop.f32.mrf.mxu0  ;;  %v5276_v54 = vpop.f32.mrf.mxu1 }
 0x13c   : > { %v1283_v55 = vpop.f32.mrf.mxu0  ;;  %5518 = vmatmul.mubr.msk.bf16.gmra.mxu0 %vm347_vm1, %v5935_v40  ;;  %v790_v4 = vpop.f32.mrf.mxu1  ;;  %5450 = vmatmul.mubr.msk.bf16.gmra.mxu1 %vm347_vm1, %v5934_v49 }
 0x13d   : > { %v6528_v60 = vadd.f32 %v1283_v55, %v783_v33  ;;  %5521 = vmatprep.mubr.msk.bf16.mxu0 %vm6016_vm0, %v7430_v1  ;;  %v791_v62 = vadd.f32 %v790_v4, %v6409_v14  ;;  %5453 = vmatprep.mubr.msk.bf16.mxu1 %vm6016_vm0, %v7430_v1  ;;  %v5941_v55 = vld [vmem:[%s6070_s23 + $0x244] sm:$0xff]  }
 0x13e   : > { %v5347_v0 = vpop.f32.mrf.mxu0  ;;  %v5279_v8 = vpop.f32.mrf.mxu1 }
 0x13f   : > { %v5940_v0 = vld [vmem:[%s6070_s23 + $0x1b0] sm:$0xff]  }
 0x140   : > { %v1286_v3 = vpop.f32.mrf.mxu0  ;;  %v793_v46 = vpop.f32.mrf.mxu1 }
 0x141   : > { %v6537_v9 = vadd.f32 %v1286_v3, %v786_v39  ;;  %v794_v51 = vadd.f32 %v793_v46, %v6419_v18 }
 0x142   : > { %v5348_v12 = vpop.f32.mrf.mxu0  ;;  %v5280_v13 = vpop.f32.mrf.mxu1 }
 0x143   : > { %v5946_v13 = vld [vmem:[%s6070_s23 + $0x140] sm:$0xff]  }
 0x144   : > { %v1291_v21 = vpop.f32.mrf.mxu0  ;;  %5522 = vmatmul.mubr.msk.bf16.gmra.mxu0 %vm347_vm1, %v5937_v6  ;;  %v798_v14 = vpop.f32.mrf.mxu1  ;;  %5454 = vmatmul.mubr.msk.bf16.gmra.mxu1 %vm347_vm1, %v5936_v11  ;;  %v5945_v6 = vld [vmem:[%s6070_s23 + $0x138] sm:$0xff]  }
 0x145   : > { %v6542_v19 = vadd.f32 %v1291_v21, %v791_v62  ;;  %5525 = vmatprep.mubr.msk.bf16.mxu0 %vm6016_vm0, %v7430_v1  ;;  %v799_v27 = vadd.f32 %v798_v14, %v6425_v26  ;;  %5457 = vmatprep.mubr.msk.bf16.mxu1 %vm6016_vm0, %v7430_v1  ;;  %v2333_v21 = vshll.u32 %v5945_v6, 16  ;;  %v2736_v14 = vld [vmem:[%s6070_s23 + $0x8] sm:$0xf] }
 0x146   : > { %v5351_v23 = vpop.f32.mrf.mxu0  ;;  %v5283_v18 = vpop.f32.mrf.mxu1 }
 0x148   : > { %v1294_v24 = vpop.f32.mrf.mxu0  ;;  %v801_v57 = vpop.f32.mrf.mxu1 }
 0x149   : > { %v6551_v33 = vadd.f32 %v1294_v24, %v794_v51  ;;  %v802_v61 = vadd.f32 %v801_v57, %v6435_v32  ;;  %v5943_v24 = vld [vmem:[%s6070_s23 + $0x24c] sm:$0xff]  }
 0x14a   : > { %v5352_v38 = vpop.f32.mrf.mxu0  ;;  %v5284_v40 = vpop.f32.mrf.mxu1 }
 0x14b   : > { %v2331_v40 = vshrl.u32 %v5945_v6, 16 }
 0x14c   : > { %v1299_v34 = vpop.f32.mrf.mxu0  ;;  %5526 = vmatmul.mubr.msk.bf16.gmra.mxu0 %vm347_vm1, %v5939_v25  ;;  %v806_v26 = vpop.f32.mrf.mxu1  ;;  %5458 = vmatmul.mubr.msk.bf16.gmra.mxu1 %vm347_vm1, %v5938_v37  ;;  %v5942_v37 = vld [vmem:[%s6070_s23 + $0x1b8] sm:$0xff]  }
 0x14d   : > { %v6556_v49 = vadd.f32 %v1299_v34, %v799_v27  ;;  %5529 = vmatprep.mubr.msk.bf16.mxu0 %vm6016_vm0, %v7430_v1  ;;  %v807_v39 = vadd.f32 %v806_v26, %v6441_v42  ;;  %5461 = vmatprep.mubr.msk.bf16.mxu1 %vm6016_vm0, %v7430_v1  ;;  %v2737_v27 = vld [vmem:[%s6070_s23 + $0xc] sm:$0xf]  ;;  %v2335_v34 = vrot.slane %v2333_v21, 1  ;;  %v2338_v26 = vshll.u32 %v5946_v13, 16 }
 0x14e   : > { %v5355_v52 = vpop.f32.mrf.mxu0  ;;  %v5287_v32 = vpop.f32.mrf.mxu1 }
 0x150   : > { %v1302_v54 = vpop.f32.mrf.mxu0  ;;  %v809_v4 = vpop.f32.mrf.mxu1 }
 0x151   : > { %v6565_v62 = vadd.f32 %v1302_v54, %v802_v61  ;;  %v810_v8 = vadd.f32 %v809_v4, %v6451_v48  ;;  %v4802_v61 = vcombine.low %v2736_v14, %v2737_v27 }
 0x152   : > { %v5356_v3 = vpop.f32.mrf.mxu0  ;;  %v5288_v46 = vpop.f32.mrf.mxu1 }
 0x153   : > { %v6597_v3 = vld [vmem:[%s6070_s23 + $0x148] sm:$0xff]  }
 0x154   : > { %v1307_v42 = vpop.f32.mrf.mxu0  ;;  %5530 = vmatmul.mubr.msk.bf16.gmra.mxu0 %vm347_vm1, %v5941_v55  ;;  %v814_v11 = vpop.f32.mrf.mxu1  ;;  %5462 = vmatmul.mubr.msk.bf16.gmra.mxu1 %vm347_vm1, %v5940_v0  ;;  %v5950_v55 = vld [vmem:[%s6070_s23 + $0x10] sm:$0xff]   ;;  %v2336_v0 = vor.u32 %v2335_v34, %v2331_v40 }
 0x155   : > { %v6571_v51 = vadd.f32 %v1307_v42, %v807_v39  ;;  %5533 = vmatprep.mubr.msk.bf16.mxu0 %vm6016_vm0, %v7430_v1  ;;  %v815_v12 = vadd.f32 %v814_v11, %v6457_v56  ;;  %5465 = vmatprep.mubr.msk.bf16.mxu1 %vm6016_vm0, %v7430_v1  ;;  %v5944_v42 = vld [vmem:[%s6070_s23 + $0x254] sm:$0xff]   ;;  %v2872_v14 = vshll.u32 %v5950_v55, 16 }
 0x156   : > { %v5359_v48 = vpop.f32.mrf.mxu0  ;;  %v5291_v23 = vpop.f32.mrf.mxu1 }
 0x157   : > { %v2865_v48 = vshrl.u32 %v4802_v61, 16 }
 0x158   : > { %v1310_v18 = vpop.f32.mrf.mxu0  ;;  %v817_v25 = vpop.f32.mrf.mxu1 }
 0x159   : > { %v6583_v57 = vadd.f32 %v1310_v18, %v810_v8  ;;  %v818_v38 = vadd.f32 %v817_v25, %v6466_v2  ;;  %v2867_v2 = vshll.u32 %v4802_v61, 16  ;;  %v2340_v8 = vrot.slane %v2338_v26, 1  ;;  %v5947_v18 = vld [vmem:[%s7427_s1 + $0x78] sm:$0xff]  }
 0x15a   : > { %v5360_v56 = vpop.f32.mrf.mxu0  ;;  %v5292_v39 = vpop.f32.mrf.mxu1  ;;  %v2346_v25 = vshll.u32 %v6597_v3, 16  ;;  %v2874_v26 = vrot.slane %v2872_v14, 1 }
 0x15b   : > { %v2869_v21 = vrot.slane %v2867_v2, 1  ;;  %v2341_v23 = vsel %vm1013_vm2, %v2336_v0, %v2340_v8  ;;  %v5968_v2 = vld [vmem:[%s7427_s1 + $0x70] sm:$0xff]  }
 0x15c   : > { %v1315_v52 = vpop.f32.mrf.mxu0  ;;  %5534 = vmatmul.mubr.msk.bf16.gmra.mxu0 %vm347_vm1, %v5943_v24  ;;  %v822_v32 = vpop.f32.mrf.mxu1  ;;  %5466 = vmatmul.mubr.msk.bf16.gmra.mxu1 %vm347_vm1, %v5942_v37  ;;  %v2342_v24 = vshrl.u32 %v5946_v13, 16  ;;  %v6615_v13 = vld [vmem:[%s6070_s23 + $0x18] sm:$0xff]  }
 0x15d   : > { %v6588_v54 = vadd.f32 %v1315_v52, %v815_v12  ;;  %5537 = vmatprep.mubr.msk.bf16.mxu0 %vm6016_vm0, %v7430_v1  ;;  %5545 = vmatprep.mubr.msk.bf16.mxu1 %vm6016_vm0, %v7430_v1  ;;  %v823_v37 = vadd.f32 %v822_v32, %v6316_v22  ;;  %v2870_v34 = vor.u32 %v2869_v21, %v2865_v48  ;;  %v2348_v52 = vrot.slane %v2346_v25, 1  ;;  %v6620_v32 = vld [vmem:[%s6070_s23 + $0x150] sm:$0xff]  }
 0x15e   : > { %v5363_v4 = vpop.f32.mrf.mxu0  ;;  %v5295_v6 = vpop.f32.mrf.mxu1  ;;  %v2344_v22 = vor.u32 %v2342_v24, %v2340_v8  ;;  %v5951_v8 = vld [vmem:[%s7427_s1 + $0x88] sm:$0xff]   ;;  %v2876_v21 = vshrl.u32 %v5950_v55, 16  ;;  %v2880_v14 = vshll.u32 %v6615_v13, 16 }
 0x15f   : > { %v2875_v48 = vsel %vm1013_vm2, %v2870_v34, %v2874_v26  ;;  %v6643_v34 = vld [vmem:[%s6070_s23 + $0x20] sm:$0xff]  }
 0x160   : > { %v1318_v46 = vpop.f32.mrf.mxu0  ;;  %v825_v11 = vpop.f32.mrf.mxu1 }
 0x161   : > { %v6600_v12 = vadd.f32 %v1318_v46, %v818_v38  ;;  %v826_v4 = vadd.f32 %v825_v11, %v6325_v28  ;;  %v2349_v28 = vsel %vm1013_vm2, %v2344_v22, %v2348_v52  ;;  %v2350_v11 = vshrl.u32 %v6597_v3, 16  ;;  %v5969_v3 = vld [vmem:[%s7427_s1 + $0x80] sm:$0xff]   ;;  %v5954_v22 = vld [vmem:[%s6070_s23 + $0x158] sm:$0xff]  }
 0x162   : > { %v5364_v27 = vpop.f32.mrf.mxu0  ;;  %v5296_v56 = vpop.f32.mrf.mxu1 }
 0x163   : > { %v2878_v56 = vor.u32 %v2876_v21, %v2874_v26  ;;  %v2888_v21 = vshll.u32 %v6643_v34, 16 }
 0x164   : > { %v1323_v38 = vpop.f32.mrf.mxu0  ;;  %5538 = vmatmul.mubr.msk.bf16.gmra.mxu0 %vm347_vm1, %v5944_v42  ;;  %v830_v61 = vpop.f32.mrf.mxu1  ;;  %5546 = vmatmul.mubr.msk.bf16.vlgmr.msra.gmra.mxu1 %vm347_vm1, %v2341_v23  ;;  %v2354_v23 = vshll.u32 %v6620_v32, 16 }
 0x165   : > { %v6609_v40 = vadd.f32 %v1323_v38, %v823_v37  ;;  %5617 = vmatprep.mubr.msk.bf16.mxu0 %vm6016_vm0, %v7430_v1  ;;  %5549 = vmatprep.mubr.msk.bf16.mxu1 %vm6016_vm0, %v7430_v1  ;;  %v2882_v38 = vrot.slane %v2880_v14, 1 }
 0x166   : > { %v5367_v39 = vpop.f32.mrf.mxu0  ;;  %5686 = vmatpush3.bf16.msra.mxu1 %v5947_v18  ;;  %v5299_v0 = vpop.f32.mrf.mxu1  ;;  %v831_v18 = vadd.f32 %v830_v61, %v6335_v35  ;;  %v2352_v61 = vor.u32 %v2350_v11, %v2348_v52 }
 0x167   : > { %5687 = vmatprep.subr.bf16.mxu1 %v7430_v1  ;;  %v2356_v39 = vrot.slane %v2354_v23, 1 }
 0x168   : > { %v1326_v6 = vpop.f32.mrf.mxu0  ;;  %v833_v46 = vpop.f32.mrf.mxu1 }
 0x169   : > { %v6627_v42 = vadd.f32 %v1326_v6, %v826_v4  ;;  %v2357_v14 = vsel %vm1013_vm2, %v2352_v61, %v2356_v39 }
 0x16a   : > { %v5368_v27 = vpop.f32.mrf.mxu0  ;;  %5688 = vmatpush3.bf16.msra.mxu1 %v5968_v2  ;;  %v5300_v24 = vpop.f32.mrf.mxu1  ;;  %v834_v2 = vadd.f32 %v833_v46, %v6349_v41  ;;  %v2358_v41 = vshrl.u32 %v6620_v32, 16  ;;  %v2362_v46 = vshll.u32 %v5954_v22, 16 }
 0x16b   : > { %v2890_v24 = vrot.slane %v2888_v21, 1 }
 0x16c   : > { %v1331_v25 = vpop.f32.mrf.mxu0  ;;  %5618 = vmatmul.mubr.msk.bf16.vlgmr.msra.gmra.mxu0 %vm347_vm1, %v2875_v48  ;;  %v838_v37 = vpop.f32.mrf.mxu1  ;;  %5550 = vmatmul.mubr.msk.bf16.gmra.mxu1 %vm347_vm1, %v2349_v28  ;;  %v2883_v48 = vsel %vm1013_vm2, %v2878_v56, %v2882_v38  ;;  %v5956_v56 = vld [vmem:[%s6070_s23 + $0x160] sm:$0xff]  }
 0x16d   : > { %v6639_v55 = vadd.f32 %v1331_v25, %v831_v18  ;;  %5758 = vmatpush3.bf16.msra.mxu0 %v5951_v8  ;;  %5553 = vmatprep.mubr.msk.bf16.mxu1 %vm6016_vm0, %v7430_v1  ;;  %v2884_v8 = vshrl.u32 %v6615_v13, 16  ;;  %v839_v27 = vadd.f32 %v838_v37, %v6359_v47  ;;  %v6670_v25 = vld [vmem:[%s6070_s23 + $0x28] sm:$0xff]   ;;  %v2360_v47 = vor.u32 %v2358_v41, %v2356_v39 }
 0x16e   : > { %v5371_v35 = vpop.f32.mrf.mxu0  ;;  %5621 = vmatprep.mubr.msk.bf16.mxu0 %vm6016_vm0, %v7430_v1  ;;  %v5303_v26 = vpop.f32.mrf.mxu1  ;;  %5759 = vmatprep.subr.bf16.mxu0 %v7430_v1  ;;  %v2364_v37 = vrot.slane %v2362_v46, 1  ;;  %v2366_v39 = vshrl.u32 %v5954_v22, 16 }
 0x16f   : > { %v2886_v13 = vor.u32 %v2884_v8, %v2882_v38  ;;  %v2892_v38 = vshrl.u32 %v6643_v34, 16 }
 0x170   : > { %v1334_v4 = vpop.f32.mrf.mxu0  ;;  %v841_v0 = vpop.f32.mrf.mxu1  ;;  %v2365_v21 = vsel %vm1013_vm2, %v2360_v47, %v2364_v37 }
 0x171   : > { %v6655_v6 = vadd.f32 %v1334_v4, %v834_v2  ;;  %5760 = vmatpush3.bf16.msra.mxu0 %v5969_v3  ;;  %v842_v3 = vadd.f32 %v841_v0, %v6373_v53  ;;  %v2891_v4 = vsel %vm1013_vm2, %v2886_v13, %v2890_v24  ;;  %v5958_v13 = vld [vmem:[%s6070_s23 + $0x168] sm:$0xff]  }
 0x172   : > { %v5372_v52 = vpop.f32.mrf.mxu0  ;;  %v5304_v28 = vpop.f32.mrf.mxu1 }
 0x173   : > { %v2370_v52 = vshll.u32 %v5956_v56, 16 }
 0x174   : > { %v1339_v11 = vpop.f32.mrf.mxu0  ;;  %5622 = vmatmul.mubr.msk.bf16.gmra.mxu0 %vm347_vm1, %v2883_v48  ;;  %v846_v23 = vpop.f32.mrf.mxu1  ;;  %5554 = vmatmul.mubr.msk.bf16.gmra.mxu1 %vm347_vm1, %v2357_v14  ;;  %v2896_v48 = vshll.u32 %v6670_v25, 16 }
 0x175   : > { %v6664_v18 = vadd.f32 %v1339_v11, %v839_v27  ;;  %5625 = vmatprep.mubr.msk.bf16.mxu0 %vm6016_vm0, %v7430_v1  ;;  %5557 = vmatprep.mubr.msk.bf16.mxu1 %vm6016_vm0, %v7430_v1  ;;  %v847_v53 = vadd.f32 %v846_v23, %v6380_v58  ;;  %v2894_v27 = vor.u32 %v2892_v38, %v2890_v24  ;;  %v6690_v11 = vld [vmem:[%s6070_s23 + $0x30] sm:$0xff]   ;;  %v2372_v23 = vrot.slane %v2370_v52, 1 }
 0x176   : > { %v5375_v32 = vpop.f32.mrf.mxu0  ;;  %v5307_v35 = vpop.f32.mrf.mxu1  ;;  %v2898_v28 = vrot.slane %v2896_v48, 1  ;;  %v2368_v58 = vor.u32 %v2366_v39, %v2364_v37  ;;  %v2900_v24 = vshrl.u32 %v6670_v25, 16  ;;  %v2904_v38 = vshll.u32 %v6690_v11, 16 }
 0x177   : > { %v2374_v37 = vshrl.u32 %v5956_v56, 16 }
 0x178   : > { %v1342_v61 = vpop.f32.mrf.mxu0  ;;  %v849_v2 = vpop.f32.mrf.mxu1 }
 0x179   : > { %v6676_v26 = vadd.f32 %v1342_v61, %v842_v3  ;;  %v850_v32 = vadd.f32 %v849_v2, %v6390_v63 }
 0x17a   : > { %v5376_v8 = vpop.f32.mrf.mxu0  ;;  %v5308_v0 = vpop.f32.mrf.mxu1 }
 0x17b   : > { %v2373_v8 = vsel %vm1013_vm2, %v2368_v58, %v2372_v23  ;;  %v2902_v0 = vor.u32 %v2900_v24, %v2898_v28 }
 0x17c   : > { %v1347_v14 = vpop.f32.mrf.mxu0  ;;  %5626 = vmatmul.mubr.msk.bf16.gmra.mxu0 %vm347_vm1, %v2891_v4  ;;  %v854_v41 = vpop.f32.mrf.mxu1  ;;  %5558 = vmatmul.mubr.msk.bf16.gmra.mxu1 %vm347_vm1, %v2365_v21  ;;  %v2899_v4 = vsel %vm1013_vm2, %v2894_v27, %v2898_v28  ;;  %v2378_v21 = vshll.u32 %v5958_v13, 16  ;;  %v6710_v27 = vld [vmem:[%s6070_s23 + $0x38] sm:$0xff]   ;;  %v2908_v28 = vshrl.u32 %v6690_v11, 16 }
 0x17d   : > { %v6684_v46 = vadd.f32 %v1347_v14, %v847_v53  ;;  %5629 = vmatprep.mubr.msk.bf16.mxu0 %vm6016_vm0, %v7430_v1  ;;  %5561 = vmatprep.mubr.msk.bf16.mxu1 %vm6016_vm0, %v7430_v1  ;;  %v855_v63 = vadd.f32 %v854_v41, %v6396_v5  ;;  %v2906_v14 = vrot.slane %v2904_v38, 1  ;;  %v2376_v5 = vor.u32 %v2374_v37, %v2372_v23 }
 0x17e   : > { %v5379_v22 = vpop.f32.mrf.mxu0  ;;  %v5311_v47 = vpop.f32.mrf.mxu1  ;;  %v2380_v41 = vrot.slane %v2378_v21, 1  ;;  %v2912_v24 = vshll.u32 %v6710_v27, 16  ;;  %v2382_v23 = vshrl.u32 %v5958_v13, 16 }
 0x17f   : > { %v5960_v22 = vld [vmem:[%s6070_s23 + $0x170] sm:$0xff]  }
 0x180   : > { %v1350_v3 = vpop.f32.mrf.mxu0  ;;  %v857_v35 = vpop.f32.mrf.mxu1  ;;  %v2386_v37 = vshll.u32 %v5960_v22, 16 }
 0x181   : > { %v6696_v61 = vadd.f32 %v1350_v3, %v850_v32  ;;  %v858_v58 = vadd.f32 %v857_v35, %v6406_v10 }
 0x182   : > { %v5380_v48 = vpop.f32.mrf.mxu0  ;;  %v5312_v2 = vpop.f32.mrf.mxu1 }
 0x183   : > { %v2907_v48 = vsel %vm1013_vm2, %v2902_v0, %v2906_v14  ;;  %v2914_v0 = vrot.slane %v2912_v24, 1 }
 0x184   : > { %v1355_v39 = vpop.f32.mrf.mxu0  ;;  %5630 = vmatmul.mubr.msk.bf16.gmra.mxu0 %vm347_vm1, %v2899_v4  ;;  %v862_v52 = vpop.f32.mrf.mxu1  ;;  %5562 = vmatmul.mubr.msk.bf16.gmra.mxu1 %vm347_vm1, %v2373_v8  ;;  %v2381_v8 = vsel %vm1013_vm2, %v2376_v5, %v2380_v41  ;;  %v5962_v5 = vld [vmem:[%s6070_s23 + $0x178] sm:$0xff]  }
 0x185   : > { %v6704_v53 = vadd.f32 %v1355_v39, %v855_v63  ;;  %5633 = vmatprep.mubr.msk.bf16.mxu0 %vm6016_vm0, %v7430_v1  ;;  %5565 = vmatprep.mubr.msk.bf16.mxu1 %vm6016_vm0, %v7430_v1  ;;  %v863_v10 = vadd.f32 %v862_v52, %v6412_v15  ;;  %v2910_v39 = vor.u32 %v2908_v28, %v2906_v14  ;;  %v2388_v52 = vrot.slane %v2386_v37, 1 }
 0x186   : > { %v5383_v56 = vpop.f32.mrf.mxu0  ;;  %v5315_v32 = vpop.f32.mrf.mxu1  ;;  %v2384_v15 = vor.u32 %v2382_v23, %v2380_v41  ;;  %v2916_v14 = vshrl.u32 %v6710_v27, 16  ;;  %v2390_v41 = vshrl.u32 %v5960_v22, 16  ;;  %v2394_v23 = vshll.u32 %v5962_v5, 16 }
 0x187   : > { %v6730_v56 = vld [vmem:[%s6070_s23 + $0x40] sm:$0xff]  }
 0x188   : > { %v1358_v47 = vpop.f32.mrf.mxu0  ;;  %v865_v3 = vpop.f32.mrf.mxu1  ;;  %v2920_v28 = vshll.u32 %v6730_v56, 16 }
 0x189   : > { %v6716_v4 = vadd.f32 %v1358_v47, %v858_v58  ;;  %v866_v58 = vadd.f32 %v865_v3, %v6422_v20 }
 0x18a   : > { %v5384_v38 = vpop.f32.mrf.mxu0  ;;  %v5316_v35 = vpop.f32.mrf.mxu1 }
 0x18c   : > { %v1363_v21 = vpop.f32.mrf.mxu0  ;;  %5634 = vmatmul.mubr.msk.bf16.gmra.mxu0 %vm347_vm1, %v2907_v48  ;;  %v870_v63 = vpop.f32.mrf.mxu1  ;;  %5566 = vmatmul.mubr.msk.bf16.gmra.mxu1 %vm347_vm1, %v2381_v8  ;;  %v2915_v8 = vsel %vm1013_vm2, %v2910_v39, %v2914_v0  ;;  %v2918_v39 = vor.u32 %v2916_v14, %v2914_v0  ;;  %v2924_v0 = vshrl.u32 %v6730_v56, 16 }
 0x18d   : > { %v6724_v2 = vadd.f32 %v1363_v21, %v863_v10  ;;  %5637 = vmatprep.mubr.msk.bf16.mxu0 %vm6016_vm0, %v7430_v1  ;;  %5569 = vmatprep.mubr.msk.bf16.mxu1 %vm6016_vm0, %v7430_v1  ;;  %v2389_v10 = vsel %vm1013_vm2, %v2384_v15, %v2388_v52  ;;  %v871_v20 = vadd.f32 %v870_v63, %v6428_v29  ;;  %v6750_v15 = vld [vmem:[%s6070_s23 + $0x48] sm:$0xff]   ;;  %v2396_v63 = vrot.slane %v2394_v23, 1 }
 0x18e   : > { %v5387_v13 = vpop.f32.mrf.mxu0  ;;  %v5319_v32 = vpop.f32.mrf.mxu1  ;;  %v2392_v29 = vor.u32 %v2390_v41, %v2388_v52  ;;  %v2928_v14 = vshll.u32 %v6750_v15, 16  ;;  %v2398_v52 = vshrl.u32 %v5962_v5, 16 }
 0x18f   : > { %v2922_v13 = vrot.slane %v2920_v28, 1 }
 0x190   : > { %v1366_v47 = vpop.f32.mrf.mxu0  ;;  %v873_v48 = vpop.f32.mrf.mxu1 }
 0x191   : > { %v6736_v38 = vadd.f32 %v1366_v47, %v866_v58  ;;  %v5964_v58 = vld [vmem:[%s6070_s23 + $0x180] sm:$0xff]   ;;  %v874_v32 = vadd.f32 %v873_v48, %v6438_v36 }
 0x192   : > { %v5388_v24 = vpop.f32.mrf.mxu0  ;;  %v5320_v3 = vpop.f32.mrf.mxu1  ;;  %v2402_v41 = vshll.u32 %v5964_v58, 16 }
 0x193   : > { %v2397_v3 = vsel %vm1013_vm2, %v2392_v29, %v2396_v63  ;;  %v6770_v29 = vld [vmem:[%s6070_s23 + $0x50] sm:$0xff]  }
 0x194   : > { %v1371_v37 = vpop.f32.mrf.mxu0  ;;  %5638 = vmatmul.mubr.msk.bf16.gmra.mxu0 %vm347_vm1, %v2915_v8  ;;  %v878_v35 = vpop.f32.mrf.mxu1  ;;  %5570 = vmatmul.mubr.msk.bf16.gmra.mxu1 %vm347_vm1, %v2389_v10 }
 0x195   : > { %v6744_v21 = vadd.f32 %v1371_v37, %v871_v20  ;;  %5641 = vmatprep.mubr.msk.bf16.mxu0 %vm6016_vm0, %v7430_v1  ;;  %5573 = vmatprep.mubr.msk.bf16.mxu1 %vm6016_vm0, %v7430_v1  ;;  %v2923_v20 = vsel %vm1013_vm2, %v2918_v39, %v2922_v13  ;;  %v879_v23 = vadd.f32 %v878_v35, %v6444_v43 }
 0x196   : > { %v5391_v22 = vpop.f32.mrf.mxu0  ;;  %v5323_v47 = vpop.f32.mrf.mxu1  ;;  %v2400_v35 = vor.u32 %v2398_v52, %v2396_v63  ;;  %v2406_v52 = vshrl.u32 %v5964_v58, 16 }
 0x197   : > { %v2926_v22 = vor.u32 %v2924_v0, %v2922_v13  ;;  %v2404_v47 = vrot.slane %v2402_v41, 1  ;;  %v2932_v0 = vshrl.u32 %v6750_v15, 16 }
 0x198   : > { %v1374_v8 = vpop.f32.mrf.mxu0  ;;  %v881_v24 = vpop.f32.mrf.mxu1 }
 0x199   : > { %v6756_v10 = vadd.f32 %v1374_v8, %v874_v32  ;;  %v2930_v32 = vrot.slane %v2928_v14, 1  ;;  %v5966_v8 = vld [vmem:[%s6070_s23 + $0x188] sm:$0xff]   ;;  %v2405_v63 = vsel %vm1013_vm2, %v2400_v35, %v2404_v47 }
 0x19a   : > { %v5392_v28 = vpop.f32.mrf.mxu0  ;;  %v5324_v36 = vpop.f32.mrf.mxu1  ;;  %v2410_v41 = vshll.u32 %v5966_v8, 16 }
 0x19b   : > { %v2931_v13 = vsel %vm1013_vm2, %v2926_v22, %v2930_v32  ;;  %v2934_v22 = vor.u32 %v2932_v0, %v2930_v32  ;;  %v2940_v32 = vshrl.u32 %v6770_v29, 16 }
 0x19c   : > { %v1379_v48 = vpop.f32.mrf.mxu0  ;;  %5642 = vmatmul.mubr.msk.bf16.gmra.mxu0 %vm347_vm1, %v2923_v20  ;;  %v1642_v39 = vpop.f32.mrf.mxu1  ;;  %5574 = vmatmul.mubr.msk.bf16.gmra.mxu1 %vm347_vm1, %v2397_v3  ;;  %v882_v20 = vadd.f32 %v881_v24, %v6454_v50 }
 0x19d   : > { %v6764_v37 = vadd.f32 %v1379_v48, %v879_v23  ;;  %5645 = vmatprep.mubr.msk.bf16.mxu0 %vm6016_vm0, %v7430_v1  ;;  %v1777_v5 = vadd.f32 %v1642_v39, %v6472_v16  ;;  %5577 = vmatprep.mubr.msk.bf16.mxu1 %vm6016_vm0, %v7430_v1  ;;  %v2936_v16 = vshll.u32 %v6770_v29, 16 }
 0x19e   : > { %v5395_v43 = vpop.f32.mrf.mxu0  ;;  %v5403_v28 = vpop.f32.mrf.mxu1 }
 0x19f   : > { %v2408_v28 = vor.u32 %v2406_v52, %v2404_v47  ;;  %v2414_v47 = vshrl.u32 %v5966_v8, 16 }
 0x1a0   : > { %v1382_v3 = vpop.f32.mrf.mxu0  ;;  %v1645_v36 = vpop.f32.mrf.mxu1 }
 0x1a1   : > { %v6777_v23 = vadd.f32 %v1382_v3, %v882_v20  ;;  %v1778_v14 = vadd.f32 %v1645_v36, %v6481_v30  ;;  %v2938_v30 = vrot.slane %v2936_v16, 1  ;;  %v6791_v20 = vld [vmem:[%s6070_s23 + $0x58] sm:$0xff]   ;;  %v2412_v3 = vrot.slane %v2410_v41, 1  ;;  %v5970_v36 = vld [vmem:[%s6070_s23 + $0x190] sm:$0xff]  }
 0x1a2   : > { %v5396_v48 = vpop.f32.mrf.mxu0  ;;  %v5404_v50 = vpop.f32.mrf.mxu1  ;;  %v2944_v0 = vshll.u32 %v6791_v20, 16  ;;  %v2418_v52 = vshll.u32 %v5970_v36, 16 }
 0x1a3   : > { %v2939_v50 = vsel %vm1013_vm2, %v2934_v22, %v2938_v30  ;;  %v2942_v22 = vor.u32 %v2940_v32, %v2938_v30  ;;  %v2948_v30 = vshrl.u32 %v6791_v20, 16 }
 0x1a4   : > { %v2033_v24 = vpop.f32.mrf.mxu0  ;;  %5646 = vmatmul.mubr.msk.bf16.gmra.mxu0 %vm347_vm1, %v2931_v13  ;;  %v1650_v39 = vpop.f32.mrf.mxu1  ;;  %5578 = vmatmul.mubr.msk.bf16.gmra.mxu1 %vm347_vm1, %v2405_v63 }
 0x1a5   : > { %v6785_v43 = vadd.f32 %v2033_v24, %v1777_v5  ;;  %5649 = vmatprep.mubr.msk.bf16.mxu0 %vm6016_vm0, %v7430_v1  ;;  %v1779_v58 = vadd.f32 %v1650_v39, %v6486_v44  ;;  %5581 = vmatprep.mubr.msk.bf16.mxu1 %vm6016_vm0, %v7430_v1  ;;  %v2413_v24 = vsel %vm1013_vm2, %v2408_v28, %v2412_v3 }
 0x1a6   : > { %v5475_v35 = vpop.f32.mrf.mxu0  ;;  %v5407_v5 = vpop.f32.mrf.mxu1 }
 0x1a7   : > { %v6811_v5 = vld [vmem:[%s6070_s23 + $0x60] sm:$0xff]  }
 0x1a8   : > { %v2036_v13 = vpop.f32.mrf.mxu0  ;;  %v1653_v48 = vpop.f32.mrf.mxu1  ;;  %v2952_v32 = vshll.u32 %v6811_v5, 16 }
 0x1a9   : > { %v6797_v63 = vadd.f32 %v2036_v13, %v1778_v14  ;;  %v1780_v44 = vadd.f32 %v1653_v48, %v6495_v59  ;;  %v2946_v59 = vrot.slane %v2944_v0, 1  ;;  %v2416_v13 = vor.u32 %v2414_v47, %v2412_v3 }
 0x1aa   : > { %v5476_v16 = vpop.f32.mrf.mxu0  ;;  %v5408_v41 = vpop.f32.mrf.mxu1  ;;  %v2420_v48 = vrot.slane %v2418_v52, 1  ;;  %v2422_v3 = vshrl.u32 %v5970_v36, 16 }
 0x1ac   : > { %v2041_v39 = vpop.f32.mrf.mxu0  ;;  %5650 = vmatmul.mubr.msk.bf16.gmra.mxu0 %vm347_vm1, %v2939_v50  ;;  %v1658_v14 = vpop.f32.mrf.mxu1  ;;  %5582 = vmatmul.mubr.msk.bf16.gmra.mxu1 %vm347_vm1, %v2413_v24  ;;  %v5972_v50 = vld [vmem:[%s6070_s23 + $0x198] sm:$0xff]  }
 0x1ad   : > { %v6805_v35 = vadd.f32 %v2041_v39, %v1779_v58  ;;  %5653 = vmatprep.mubr.msk.bf16.mxu0 %vm6016_vm0, %v7430_v1  ;;  %v1781_v8 = vadd.f32 %v1658_v14, %v6500_v7  ;;  %5585 = vmatprep.mubr.msk.bf16.mxu1 %vm6016_vm0, %v7430_v1  ;;  %v2947_v39 = vsel %vm1013_vm2, %v2942_v22, %v2946_v59  ;;  %v2426_v47 = vshll.u32 %v5972_v50, 16 }
 0x1ae   : > { %v5479_v28 = vpop.f32.mrf.mxu0  ;;  %v5411_v58 = vpop.f32.mrf.mxu1  ;;  %v2421_v14 = vsel %vm1013_vm2, %v2416_v13, %v2420_v48  ;;  %v2950_v22 = vor.u32 %v2948_v30, %v2946_v59  ;;  %v2956_v59 = vshrl.u32 %v6811_v5, 16 }
 0x1b0   : > { %v2044_v16 = vpop.f32.mrf.mxu0  ;;  %v1661_v41 = vpop.f32.mrf.mxu1 }
 0x1b1   : > { %v6817_v24 = vadd.f32 %v2044_v16, %v1780_v44  ;;  %v1782_v7 = vadd.f32 %v1661_v41, %v6509_v17  ;;  %v2954_v17 = vrot.slane %v2952_v32, 1  ;;  %v6831_v16 = vld [vmem:[%s6070_s23 + $0x68] sm:$0xff]   ;;  %v2424_v41 = vor.u32 %v2422_v3, %v2420_v48 }
 0x1b2   : > { %v5480_v0 = vpop.f32.mrf.mxu0  ;;  %v5412_v52 = vpop.f32.mrf.mxu1  ;;  %v2960_v30 = vshll.u32 %v6831_v16, 16  ;;  %v2430_v48 = vshrl.u32 %v5972_v50, 16 }
 0x1b3   : > { %v5974_v0 = vld [vmem:[%s6070_s23 + $0x1a0] sm:$0xff]  }
 0x1b4   : > { %v2049_v28 = vpop.f32.mrf.mxu0  ;;  %5654 = vmatmul.mubr.msk.bf16.gmra.mxu0 %vm347_vm1, %v2947_v39  ;;  %v1666_v44 = vpop.f32.mrf.mxu1  ;;  %5586 = vmatmul.mubr.msk.bf16.gmra.mxu1 %vm347_vm1, %v2421_v14  ;;  %v2428_v39 = vrot.slane %v2426_v47, 1  ;;  %v2434_v3 = vshll.u32 %v5974_v0, 16 }
 0x1b5   : > { %v6825_v58 = vadd.f32 %v2049_v28, %v1781_v8  ;;  %5657 = vmatprep.mubr.msk.bf16.mxu0 %vm6016_vm0, %v7430_v1  ;;  %v1783_v36 = vadd.f32 %v1666_v44, %v6514_v31  ;;  %5589 = vmatprep.mubr.msk.bf16.mxu1 %vm6016_vm0, %v7430_v1 }
 0x1b6   : > { %v5483_v13 = vpop.f32.mrf.mxu0  ;;  %v5415_v8 = vpop.f32.mrf.mxu1  ;;  %v2429_v44 = vsel %vm1013_vm2, %v2424_v41, %v2428_v39 }
 0x1b7   : > { %7433 = vst [vmem:[#allocation2_spill] sm:$0xff] %v6825_v58  ;;  %v2955_v58 = vsel %vm1013_vm2, %v2950_v22, %v2954_v17  ;;  %v2958_v22 = vor.u32 %v2956_v59, %v2954_v17  ;;  %v2964_v17 = vshrl.u32 %v6831_v16, 16 }
 0x1b8   : > { %v2052_v52 = vpop.f32.mrf.mxu0  ;;  %v1669_v28 = vpop.f32.mrf.mxu1 }
 0x1b9   : > { %v6837_v14 = vadd.f32 %v2052_v52, %v1782_v7  ;;  %v1784_v31 = vadd.f32 %v1669_v28, %v6523_v45  ;;  %v2962_v45 = vrot.slane %v2960_v30, 1  ;;  %v6851_v52 = vld [vmem:[%s6070_s23 + $0x70] sm:$0xff]   ;;  %v2432_v28 = vor.u32 %v2430_v48, %v2428_v39 }
 0x1ba   : > { %v5484_v32 = vpop.f32.mrf.mxu0  ;;  %v5416_v47 = vpop.f32.mrf.mxu1  ;;  %v2968_v59 = vshll.u32 %v6851_v52, 16  ;;  %v2438_v39 = vshrl.u32 %v5974_v0, 16 }
 0x1bb   : > { %v5976_v32 = vld [vmem:[%s6070_s23 + $0x1a8] sm:$0xff]  }
 0x1bc   : > { %v2057_v13 = vpop.f32.mrf.mxu0  ;;  %5658 = vmatmul.mubr.msk.bf16.gmra.mxu0 %vm347_vm1, %v2955_v58  ;;  %v1674_v7 = vpop.f32.mrf.mxu1  ;;  %5590 = vmatmul.mubr.msk.bf16.gmra.mxu1 %vm347_vm1, %v2429_v44  ;;  %v2436_v58 = vrot.slane %v2434_v3, 1  ;;  %v2442_v48 = vshll.u32 %v5976_v32, 16 }
 0x1bd   : > { %v6845_v8 = vadd.f32 %v2057_v13, %v1783_v36  ;;  %5661 = vmatprep.mubr.msk.bf16.mxu0 %vm6016_vm0, %v7430_v1  ;;  %v1785_v50 = vadd.f32 %v1674_v7, %v6528_v60  ;;  %5593 = vmatprep.mubr.msk.bf16.mxu1 %vm6016_vm0, %v7430_v1 }
 0x1be   : > { %v5487_v41 = vpop.f32.mrf.mxu0  ;;  %v5419_v36 = vpop.f32.mrf.mxu1  ;;  %v2437_v7 = vsel %vm1013_vm2, %v2432_v28, %v2436_v58 }
 0x1bf   : > { %7434 = vst [vmem:[#allocation3_spill] sm:$0xff] %v6845_v8  ;;  %v2963_v8 = vsel %vm1013_vm2, %v2958_v22, %v2962_v45  ;;  %v2966_v22 = vor.u32 %v2964_v17, %v2962_v45  ;;  %v2972_v45 = vshrl.u32 %v6851_v52, 16 }
 0x1c0   : > { %v2060_v47 = vpop.f32.mrf.mxu0  ;;  %v1677_v13 = vpop.f32.mrf.mxu1 }
 0x1c1   : > { %v6857_v44 = vadd.f32 %v2060_v47, %v1784_v31  ;;  %v1786_v60 = vadd.f32 %v1677_v13, %v6537_v9  ;;  %v2970_v9 = vrot.slane %v2968_v59, 1  ;;  %v6871_v47 = vld [vmem:[%s6070_s23 + $0x78] sm:$0xff]   ;;  %v2440_v13 = vor.u32 %v2438_v39, %v2436_v58 }
 0x1c2   : > { %v5488_v30 = vpop.f32.mrf.mxu0  ;;  %v5420_v3 = vpop.f32.mrf.mxu1  ;;  %7436 = vst [vmem:[#allocation5_spill] sm:$0xff] %v6871_v47  ;;  %v2976_v17 = vshll.u32 %v6871_v47, 16  ;;  %v2446_v58 = vshrl.u32 %v5976_v32, 16 }
 0x1c3   : > { %v5978_v30 = vld [vmem:[%s6070_s23 + $0x1b0] sm:$0xff]  }
 0x1c4   : > { %v2065_v41 = vpop.f32.mrf.mxu0  ;;  %5662 = vmatmul.mubr.msk.bf16.gmra.mxu0 %vm347_vm1, %v2963_v8  ;;  %v1682_v31 = vpop.f32.mrf.mxu1  ;;  %5594 = vmatmul.mubr.msk.bf16.gmra.mxu1 %vm347_vm1, %v2437_v7  ;;  %v2444_v8 = vrot.slane %v2442_v48, 1  ;;  %v2450_v39 = vshll.u32 %v5978_v30, 16 }
 0x1c5   : > { %v6865_v36 = vadd.f32 %v2065_v41, %v1785_v50  ;;  %5665 = vmatprep.mubr.msk.bf16.mxu0 %vm6016_vm0, %v7430_v1  ;;  %v1787_v0 = vadd.f32 %v1682_v31, %v6542_v19  ;;  %5597 = vmatprep.mubr.msk.bf16.mxu1 %vm6016_vm0, %v7430_v1 }
 0x1c6   : > { %v5491_v28 = vpop.f32.mrf.mxu0  ;;  %v5423_v50 = vpop.f32.mrf.mxu1  ;;  %v2445_v31 = vsel %vm1013_vm2, %v2440_v13, %v2444_v8 }
 0x1c7   : > { %7435 = vst [vmem:[#allocation4_spill] sm:$0xff] %v6865_v36  ;;  %v2971_v36 = vsel %vm1013_vm2, %v2966_v22, %v2970_v9  ;;  %v2974_v22 = vor.u32 %v2972_v45, %v2970_v9  ;;  %v2980_v45 = vshrl.u32 %v6871_v47, 16 }
 0x1c8   : > { %v2068_v3 = vpop.f32.mrf.mxu0  ;;  %v1685_v41 = vpop.f32.mrf.mxu1 }
 0x1c9   : > { %v6877_v7 = vadd.f32 %v2068_v3, %v1786_v60  ;;  %v1788_v19 = vadd.f32 %v1685_v41, %v6551_v33  ;;  %v2978_v33 = vrot.slane %v2976_v17, 1  ;;  %v6891_v3 = vld [vmem:[%s6070_s23 + $0x80] sm:$0xff]   ;;  %v2448_v41 = vor.u32 %v2446_v58, %v2444_v8 }
 0x1ca   : > { %v5492_v59 = vpop.f32.mrf.mxu0  ;;  %v5424_v48 = vpop.f32.mrf.mxu1  ;;  %v2984_v17 = vshll.u32 %v6891_v3, 16  ;;  %v2454_v58 = vshrl.u32 %v5978_v30, 16 }
 0x1cb   : > { %v5980_v59 = vld [vmem:[%s6070_s23 + $0x1b8] sm:$0xff]   ;;  %v2979_v9 = vsel %vm1013_vm2, %v2974_v22, %v2978_v33  ;;  %v7439_v22 = vmov 0.0   ;;  %v2982_v47 = vor.u32 %v2980_v45, %v2978_v33  ;;  %v2988_v45 = vshrl.u32 %v6891_v3, 16 }
 0x1cc   : > { %v2073_v28 = vpop.f32.mrf.mxu0  ;;  %5666 = vmatmul.mubr.msk.bf16.gmra.mxu0 %vm347_vm1, %v2971_v36  ;;  %v1690_v60 = vpop.f32.mrf.mxu1  ;;  %5598 = vmatmul.mubr.msk.bf16.gmra.mxu1 %vm347_vm1, %v2445_v31  ;;  %v2452_v36 = vrot.slane %v2450_v39, 1  ;;  %v2458_v39 = vshll.u32 %v5980_v59, 16 }
 0x1cd   : > { %v6885_v50 = vadd.f32 %v2073_v28, %v1787_v0  ;;  %5669 = vmatprep.mubr.msk.bf16.mxu0 %vm6016_vm0, %v7430_v1  ;;  %v1789_v32 = vadd.f32 %v1690_v60, %v6556_v49  ;;  %5601 = vmatprep.mubr.msk.bf16.mxu1 %vm6016_vm0, %v7430_v1 }
 0x1ce   : > { %v5495_v13 = vpop.f32.mrf.mxu0  ;;  %v5427_v0 = vpop.f32.mrf.mxu1  ;;  %v2453_v8 = vsel %vm1013_vm2, %v2448_v41, %v2452_v36 }
 0x1d0   : > { %v2076_v48 = vpop.f32.mrf.mxu0  ;;  %v1693_v31 = vpop.f32.mrf.mxu1 }
 0x1d1   : > { %v6897_v28 = vadd.f32 %v2076_v48, %v1788_v19  ;;  %v1790_v49 = vadd.f32 %v1693_v31, %v6565_v62  ;;  %v5982_v19 = vld [vmem:[%s6070_s23 + $0x1c0] ss:$0 sps:$4 sm:$0x11]   ;;  %v2986_v62 = vrot.slane %v2984_v17, 1  ;;  %v6912_v31 = vld [vmem:[%s6070_s23 + $0x88] sm:$0xff]  }
 0x1d2   : > { %v5496_v60 = vpop.f32.mrf.mxu0  ;;  %v5428_v13 = vpop.f32.mrf.mxu1 }
 0x1d3   : > { %7437 = vst [vmem:[#allocation6_spill] sm:$0xff] %v6897_v28  ;;  %v2460_v60 = vrot.slane %v2458_v39, 1  ;;  %v2987_v33 = vsel %vm1013_vm2, %v2982_v47, %v2986_v62 }
 0x1d4   : > { %v2081_v0 = vpop.f32.mrf.mxu0  ;;  %5670 = vmatmul.mubr.msk.bf16.gmra.mxu0 %vm347_vm1, %v2979_v9  ;;  %v1698_v48 = vpop.f32.mrf.mxu1  ;;  %5602 = vmatmul.mubr.msk.bf16.gmra.mxu1 %vm347_vm1, %v2453_v8  ;;  %v2456_v9 = vor.u32 %v2454_v58, %v2452_v36  ;;  %v2466_v8 = vshll.u32 %v5982_v19, 16  ;;  %v5985_v58 = vld [vmem:[%s6070_s23 + $0xa4] sm:$0xff]  }
 0x1d5   : > { %v6906_v1 = vadd.f32 %v2081_v0, %v1789_v32  ;;  %5673 = vmatprep.mubr.msk.bf16.mxu0 %vm6016_vm0, %v7439_v22  ;;  %v1791_v30 = vadd.f32 %v1698_v48, %v6571_v51  ;;  %5605 = vmatprep.mubr.msk.bf16.mxu1 %vm6016_vm0, %v7439_v22  ;;  %v2462_v0 = vshrl.u32 %v5980_v59, 16  ;;  %v2992_v51 = vshll.u32 %v6912_v31, 16 }
 0x1d6   : > { %v5499_v41 = vpop.f32.mrf.mxu0  ;;  %v5431_v32 = vpop.f32.mrf.mxu1  ;;  %v2461_v36 = vsel %vm1013_vm2, %v2456_v9, %v2460_v60  ;;  %v2468_v19 = vrot.slane %v2466_v8, 1 }
 0x1d7   : > { %7438 = vst [vmem:[#allocation7_spill] sm:$0xff] %v6906_v1  ;;  %v6932_v32 = vld [vmem:[%s6070_s23 + $0x90] ss:$0 sps:$4 sm:$0x11]  }
 0x1d8   : > { %v2084_v13 = vpop.f32.mrf.mxu0  ;;  %v1701_v1 = vpop.f32.mrf.mxu1 }
 0x1d9   : > { %v6917_v28 = vadd.f32 %v2084_v13, %v1790_v49  ;;  %v1792_v17 = vadd.f32 %v1701_v1, %v6583_v57  ;;  %v2464_v49 = vor.u32 %v2462_v0, %v2460_v60  ;;  %v2990_v1 = vor.u32 %v2988_v45, %v2986_v62  ;;  %v5986_v60 = vld [vmem:[%s6070_s23 + $0xac] sm:$0xff]  }
 0x1da   : > { %v5500_v48 = vpop.f32.mrf.mxu0  ;;  %v5432_v39 = vpop.f32.mrf.mxu1  ;;  %v2994_v57 = vrot.slane %v2992_v51, 1  ;;  %v3401_v0 = vshll.u32 %v5985_v58, 16  ;;  %v2996_v45 = vshrl.u32 %v6912_v31, 16  ;;  %v3000_v51 = vshll.u32 %v6932_v32, 16 }
 0x1dc   : > { %v2089_v59 = vpop.f32.mrf.mxu0  ;;  %5674 = vmatmul.mubr.msk.bf16.gmra.mxu0 %vm347_vm1, %v2987_v33  ;;  %v1706_v41 = vpop.f32.mrf.mxu1  ;;  %5606 = vmatmul.mubr.msk.bf16.gmra.mxu1 %vm347_vm1, %v2461_v36  ;;  %v2469_v33 = vsel %vm1013_vm2, %v2464_v49, %v2468_v19  ;;  %v2995_v62 = vsel %vm1013_vm2, %v2990_v1, %v2994_v57  ;;  %v3002_v19 = vrot.slane %v3000_v51, 1 }
 0x1dd   : > { %v6926_v47 = vadd.f32 %v2089_v59, %v1791_v30  ;;  %5677 = vmatprep.mubr.msk.bf16.mxu0 %vm6016_vm0, %v7439_v22  ;;  %v1793_v9 = vadd.f32 %v1706_v41, %v6588_v54  ;;  %5609 = vmatprep.mubr.msk.bf16.mxu1 %vm6016_vm0, %v7439_v22  ;;  %v3399_v59 = vshrl.u32 %v5985_v58, 16  ;;  %v3403_v41 = vrot.slane %v3401_v0, 1 }
 0x1de   : > { %v5503_v13 = vpop.f32.mrf.mxu0  ;;  %v5435_v8 = vpop.f32.mrf.mxu1 }
 0x1df   : > { %7440 = vst [vmem:[#allocation8_spill] sm:$0xff] %v6926_v47  ;;  %v3406_v13 = vshll.u32 %v5986_v60, 16  ;;  %v3404_v0 = vor.u32 %v3403_v41, %v3399_v59 }
 0x1e0   : > { %v2092_v30 = vpop.f32.mrf.mxu0  ;;  %v1709_v48 = vpop.f32.mrf.mxu1 }
 0x1e1   : > { %v6939_v36 = vadd.f32 %v2092_v30, %v1792_v17  ;;  %v1794_v54 = vadd.f32 %v1709_v48, %v6600_v12  ;;  %v2998_v12 = vor.u32 %v2996_v45, %v2994_v57  ;;  %v3408_v30 = vrot.slane %v3406_v13, 1  ;;  %v5987_v48 = vld [vmem:[%s6070_s23 + $0xb4] sm:$0xff]   ;;  %v6004_v57 = vld [vmem:[%s6070_s23 + $0xc] sm:$0xf] }
 0x1e2   : > { %v5504_v39 = vpop.f32.mrf.mxu0  ;;  %v5436_v8 = vpop.f32.mrf.mxu1  ;;  %v3414_v59 = vshll.u32 %v5987_v48, 16 }
 0x1e3   : > { %v3003_v8 = vsel %vm1013_vm2, %v2998_v12, %v3002_v19 }
 0x1e4   : > { %v2097_v47 = vpop.f32.mrf.mxu0  ;;  %5678 = vmatmul.mubr.msk.bf16.gmra.mxu0 %vm347_vm1, %v2995_v62  ;;  %v1714_v17 = vpop.f32.mrf.mxu1  ;;  %5610 = vmatmul.mubr.msk.bf16.gmra.mxu1 %vm347_vm1, %v2469_v33  ;;  %v3804_v62 = vld [vmem:[%s6070_s23 + $0x8] sm:$0xe] }
 0x1e5   : > { %v6946_v49 = vadd.f32 %v2097_v47, %v1793_v9  ;;  %5681 = vmatprep.mubr.msk.bf16.mxu0 %vm6016_vm0, %v7439_v22  ;;  %v1795_v58 = vadd.f32 %v1714_v17, %v6609_v40  ;;  %5689 = vmatprep.mubr.msk.bf16.mxu1 %vm6016_vm0, %v7439_v22  ;;  %v4919_v45 = vcombine.low %v3804_v62, %v6004_v57 }
 0x1e6   : > { %v5507_v1 = vpop.f32.mrf.mxu0  ;;  %v5439_v47 = vpop.f32.mrf.mxu1  ;;  %v3409_v17 = vsel %vm1013_vm2, %v3404_v0, %v3408_v30 }
 0x1e7   : > { %v3410_v1 = vshrl.u32 %v5986_v60, 16  ;;  %v3814_v12 = vrot.slane %v4919_v45, 1 }
 0x1e8   : > { %v2100_v9 = vpop.f32.mrf.mxu0  ;;  %v1717_v39 = vpop.f32.mrf.mxu1 }
 0x1e9   : > { %v6956_v33 = vadd.f32 %v2100_v9, %v1794_v54  ;;  %v1796_v40 = vadd.f32 %v1717_v39, %v6627_v42  ;;  %v6005_v42 = vld [vmem:[%s6070_s23 + $0x10] sm:$0xff]   ;;  %v3412_v62 = vor.u32 %v3410_v1, %v3408_v30  ;;  %v3416_v9 = vrot.slane %v3414_v59, 1  ;;  %v5989_v39 = vld [vmem:[%s6070_s23 + $0xbc] sm:$0xff]  }
 0x1ea   : > { %v5508_v51 = vpop.f32.mrf.mxu0  ;;  %v5440_v41 = vpop.f32.mrf.mxu1  ;;  %v3815_v19 = vrot.slane %v6005_v42, 1 }
 0x1ec   : > { %v2105_v13 = vpop.f32.mrf.mxu0  ;;  %5682 = vmatmul.mubr.msk.bf16.gmra.mxu0 %vm347_vm1, %v3003_v8  ;;  %v1722_v47 = vpop.f32.mrf.mxu1  ;;  %5690 = vmatmul.mubr.msk.bf16.vlgmr.msra.gmra.mxu1 %vm347_vm1, %v3409_v17  ;;  %v3816_v45 = vsel %vm3813_vm3, %v3814_v12, %v3815_v19 }
 0x1ed   : > { %v6963_v54 = vadd.f32 %v2105_v13, %v1795_v58  ;;  %5761 = vmatprep.mubr.msk.bf16.mxu0 %vm6016_vm0, %v7439_v22  ;;  %v1797_v0 = vadd.f32 %v1722_v47, %v6639_v55  ;;  %5693 = vmatprep.mubr.msk.bf16.mxu1 %vm6016_vm0, %v7439_v22  ;;  %v3417_v55 = vsel %vm1013_vm2, %v3412_v62, %v3416_v9  ;;  %v3418_v13 = vshrl.u32 %v5987_v48, 16 }
 0x1ee   : > { %v5511_v60 = vpop.f32.mrf.mxu0  ;;  %v5443_v58 = vpop.f32.mrf.mxu1  ;;  %v3422_v47 = vshll.u32 %v5989_v39, 16 }
 0x1ef   : > { %v3420_v48 = vor.u32 %v3418_v13, %v3416_v9  ;;  %v5990_v58 = vld [vmem:[%s6070_s23 + $0xc4] sm:$0xff]  }
 0x1f0   : > { %v2108_v8 = vpop.f32.mrf.mxu0  ;;  %v1725_v57 = vpop.f32.mrf.mxu1  ;;  %v3424_v62 = vrot.slane %v3422_v47, 1 }
 0x1f1   : > { %v6973_v51 = vadd.f32 %v2108_v8, %v1796_v40  ;;  %v1798_v17 = vadd.f32 %v1725_v57, %v6655_v6  ;;  %v6006_v40 = vld [vmem:[%s6070_s23 + $0x18] sm:$0xff]  }
 0x1f2   : > { %v5512_v41 = vpop.f32.mrf.mxu0  ;;  %v5444_v30 = vpop.f32.mrf.mxu1  ;;  %v3817_v6 = vrot.slane %v6006_v40, 1 }
 0x1f4   : > { %v2113_v1 = vpop.f32.mrf.mxu0  ;;  %5762 = vmatmul.mubr.msk.bf16.vlgmr.msra.gmra.mxu0 %vm347_vm1, %v3816_v45  ;;  %v1730_v59 = vpop.f32.mrf.mxu1  ;;  %5694 = vmatmul.mubr.msk.bf16.gmra.mxu1 %vm347_vm1, %v3417_v55  ;;  %v3818_v41 = vsel %vm3813_vm3, %v3815_v19, %v3817_v6 }
 0x1f5   : > { %v6979_v42 = vadd.f32 %v2113_v1, %v1797_v0  ;;  %5765 = vmatprep.mubr.msk.bf16.mxu0 %vm6016_vm0, %v7439_v22  ;;  %v1799_v12 = vadd.f32 %v1730_v59, %v6664_v18  ;;  %5697 = vmatprep.mubr.msk.bf16.mxu1 %vm6016_vm0, %v7439_v22  ;;  %v3425_v1 = vsel %vm1013_vm2, %v3420_v48, %v3424_v62  ;;  %v3426_v18 = vshrl.u32 %v5989_v39, 16  ;;  %v5991_v48 = vld [vmem:[%s6070_s23 + $0xcc] sm:$0xff]  }
 0x1f6   : > { %v5515_v60 = vpop.f32.mrf.mxu0  ;;  %v5447_v8 = vpop.f32.mrf.mxu1  ;;  %v3430_v59 = vshll.u32 %v5990_v58, 16 }
 0x1f7   : > { %v3428_v39 = vor.u32 %v3426_v18, %v3424_v62 }
 0x1f8   : > { %v2116_v57 = vpop.f32.mrf.mxu0  ;;  %v1733_v0 = vpop.f32.mrf.mxu1  ;;  %v3432_v47 = vrot.slane %v3430_v59, 1 }
 0x1f9   : > { %v6989_v45 = vadd.f32 %v2116_v57, %v1798_v17  ;;  %v1800_v55 = vadd.f32 %v1733_v0, %v6676_v26  ;;  %v3819_v26 = vrot.slane %v6643_v34, 1 }
 0x1fa   : > { %v5516_v30 = vpop.f32.mrf.mxu0  ;;  %v5448_v40 = vpop.f32.mrf.mxu1  ;;  %v3433_v34 = vsel %vm1013_vm2, %v3428_v39, %v3432_v47 }
 0x1fb   : > { %v3438_v40 = vshll.u32 %v5991_v48, 16 }
 0x1fc   : > { %v2121_v60 = vpop.f32.mrf.mxu0  ;;  %5766 = vmatmul.mubr.msk.bf16.gmra.mxu0 %vm347_vm1, %v3818_v41  ;;  %v1738_v9 = vpop.f32.mrf.mxu1  ;;  %5698 = vmatmul.mubr.msk.bf16.gmra.mxu1 %vm347_vm1, %v3425_v1  ;;  %v3820_v41 = vsel %vm3813_vm3, %v3817_v6, %v3819_v26 }
 0x1fd   : > { %v6995_v13 = vadd.f32 %v2121_v60, %v1799_v12  ;;  %5769 = vmatprep.mubr.msk.bf16.mxu0 %vm6016_vm0, %v7439_v22  ;;  %v1801_v19 = vadd.f32 %v1738_v9, %v6684_v46  ;;  %5701 = vmatprep.mubr.msk.bf16.mxu1 %vm6016_vm0, %v7439_v22  ;;  %v3434_v46 = vshrl.u32 %v5990_v58, 16  ;;  %v3440_v59 = vrot.slane %v3438_v40, 1 }
 0x1fe   : > { %v5519_v17 = vpop.f32.mrf.mxu0  ;;  %v5451_v8 = vpop.f32.mrf.mxu1 }
 0x1ff   : > { %v3436_v58 = vor.u32 %v3434_v46, %v3432_v47  ;;  %v5992_v17 = vld [vmem:[%s6070_s23 + $0xd4] sm:$0xff]  }
 0x200   : > { %v2124_v57 = vpop.f32.mrf.mxu0  ;;  %v1741_v12 = vpop.f32.mrf.mxu1 }
 0x201   : > { %v7005_v0 = vadd.f32 %v2124_v57, %v1800_v55  ;;  %v1802_v30 = vadd.f32 %v1741_v12, %v6696_v61  ;;  %v3821_v61 = vrot.slane %v6670_v25, 1  ;;  %v3441_v25 = vsel %vm1013_vm2, %v3436_v58, %v3440_v59 }
 0x202   : > { %v5520_v1 = vpop.f32.mrf.mxu0  ;;  %v5452_v60 = vpop.f32.mrf.mxu1 }
 0x203   : > { %v3822_v12 = vsel %vm3813_vm3, %v3819_v26, %v3821_v61 }
 0x204   : > { %v2129_v9 = vpop.f32.mrf.mxu0  ;;  %5770 = vmatmul.mubr.msk.bf16.gmra.mxu0 %vm347_vm1, %v3820_v41  ;;  %v1746_v62 = vpop.f32.mrf.mxu1  ;;  %5702 = vmatmul.mubr.msk.bf16.gmra.mxu1 %vm347_vm1, %v3433_v34  ;;  %v3446_v34 = vshll.u32 %v5992_v17, 16 }
 0x205   : > { %v7011_v18 = vadd.f32 %v2129_v9, %v1801_v19  ;;  %5773 = vmatprep.mubr.msk.bf16.mxu0 %vm6016_vm0, %v7439_v22  ;;  %v1803_v6 = vadd.f32 %v1746_v62, %v6704_v53  ;;  %5705 = vmatprep.mubr.msk.bf16.mxu1 %vm6016_vm0, %v7439_v22  ;;  %v3442_v53 = vshrl.u32 %v5991_v48, 16  ;;  %v5993_v62 = vld [vmem:[%s6070_s23 + $0xdc] sm:$0xff]  }
 0x206   : > { %v5523_v55 = vpop.f32.mrf.mxu0  ;;  %v5455_v39 = vpop.f32.mrf.mxu1  ;;  %v3448_v40 = vrot.slane %v3446_v34, 1 }
 0x207   : > { %v3444_v48 = vor.u32 %v3442_v53, %v3440_v59 }
 0x208   : > { %v2132_v8 = vpop.f32.mrf.mxu0  ;;  %v1749_v19 = vpop.f32.mrf.mxu1 }
 0x209   : > { %v7021_v57 = vadd.f32 %v2132_v8, %v1802_v30  ;;  %v1804_v41 = vadd.f32 %v1749_v19, %v6716_v4  ;;  %v3823_v4 = vrot.slane %v6690_v11, 1  ;;  %v3449_v11 = vsel %vm1013_vm2, %v3444_v48, %v3448_v40 }
 0x20a   : > { %v5524_v1 = vpop.f32.mrf.mxu0  ;;  %v5456_v60 = vpop.f32.mrf.mxu1 }
 0x20b   : > { %v3824_v8 = vsel %vm3813_vm3, %v3821_v61, %v3823_v4  ;;  %v3454_v1 = vshll.u32 %v5993_v62, 16 }
 0x20c   : > { %v2137_v9 = vpop.f32.mrf.mxu0  ;;  %5774 = vmatmul.mubr.msk.bf16.gmra.mxu0 %vm347_vm1, %v3822_v12  ;;  %v1754_v47 = vpop.f32.mrf.mxu1  ;;  %5706 = vmatmul.mubr.msk.bf16.gmra.mxu1 %vm347_vm1, %v3441_v25 }
 0x20d   : > { %v7027_v46 = vadd.f32 %v2137_v9, %v1803_v6  ;;  %5777 = vmatprep.mubr.msk.bf16.mxu0 %vm6016_vm0, %v7439_v22  ;;  %v1805_v26 = vadd.f32 %v1754_v47, %v6724_v2  ;;  %5709 = vmatprep.mubr.msk.bf16.mxu1 %vm6016_vm0, %v7439_v22  ;;  %v3450_v2 = vshrl.u32 %v5992_v17, 16  ;;  %v3456_v34 = vrot.slane %v3454_v1, 1  ;;  %v5994_v9 = vld [vmem:[%s6070_s23 + $0xe4] sm:$0xff]  }
 0x20e   : > { %v5527_v30 = vpop.f32.mrf.mxu0  ;;  %v5459_v55 = vpop.f32.mrf.mxu1 }
 0x20f   : > { %v3452_v17 = vor.u32 %v3450_v2, %v3448_v40 }
 0x210   : > { %v2140_v58 = vpop.f32.mrf.mxu0  ;;  %v1757_v6 = vpop.f32.mrf.mxu1 }
 0x211   : > { %v7037_v39 = vadd.f32 %v2140_v58, %v1804_v41  ;;  %v1806_v19 = vadd.f32 %v1757_v6, %v6736_v38  ;;  %v3825_v38 = vrot.slane %v6710_v27, 1  ;;  %v3457_v27 = vsel %vm1013_vm2, %v3452_v17, %v3456_v34 }
 0x212   : > { %v5528_v12 = vpop.f32.mrf.mxu0  ;;  %v5460_v25 = vpop.f32.mrf.mxu1 }
 0x213   : > { %v3826_v55 = vsel %vm3813_vm3, %v3823_v4, %v3825_v38  ;;  %v5995_v25 = vld [vmem:[%s6070_s23 + $0xec] sm:$0xff]  }
 0x214   : > { %v2145_v60 = vpop.f32.mrf.mxu0  ;;  %5778 = vmatmul.mubr.msk.bf16.gmra.mxu0 %vm347_vm1, %v3824_v8  ;;  %v1762_v59 = vpop.f32.mrf.mxu1  ;;  %5710 = vmatmul.mubr.msk.bf16.gmra.mxu1 %vm347_vm1, %v3449_v11  ;;  %v3462_v8 = vshll.u32 %v5994_v9, 16 }
 0x215   : > { %v7043_v53 = vadd.f32 %v2145_v60, %v1805_v26  ;;  %5781 = vmatprep.mubr.msk.bf16.mxu0 %vm6016_vm0, %v7439_v22  ;;  %v1807_v61 = vadd.f32 %v1762_v59, %v6744_v21  ;;  %5713 = vmatprep.mubr.msk.bf16.mxu1 %vm6016_vm0, %v7439_v22  ;;  %v3458_v21 = vshrl.u32 %v5993_v62, 16 }
 0x216   : > { %v5531_v41 = vpop.f32.mrf.mxu0  ;;  %v5463_v47 = vpop.f32.mrf.mxu1  ;;  %v3464_v1 = vrot.slane %v3462_v8, 1  ;;  %v5996_v8 = vld [vmem:[%s6070_s23 + $0xf4] sm:$0xff]  }
 0x217   : > { %v3460_v62 = vor.u32 %v3458_v21, %v3456_v34 }
 0x218   : > { %v2148_v30 = vpop.f32.mrf.mxu0  ;;  %v1765_v26 = vpop.f32.mrf.mxu1 }
 0x219   : > { %v7053_v48 = vadd.f32 %v2148_v30, %v1806_v19  ;;  %v1808_v58 = vadd.f32 %v1765_v26, %v6756_v10  ;;  %v3827_v10 = vrot.slane %v6730_v56, 1  ;;  %v3465_v56 = vsel %vm1013_vm2, %v3460_v62, %v3464_v1 }
 0x21a   : > { %v5532_v6 = vpop.f32.mrf.mxu0  ;;  %v5464_v12 = vpop.f32.mrf.mxu1  ;;  %v3470_v26 = vshll.u32 %v5995_v25, 16 }
 0x21b   : > { %v3828_v17 = vsel %vm3813_vm3, %v3825_v38, %v3827_v10 }
 0x21c   : > { %v2153_v11 = vpop.f32.mrf.mxu0  ;;  %5782 = vmatmul.mubr.msk.bf16.gmra.mxu0 %vm347_vm1, %v3826_v55  ;;  %v1770_v40 = vpop.f32.mrf.mxu1  ;;  %5714 = vmatmul.mubr.msk.bf16.gmra.mxu1 %vm347_vm1, %v3457_v27  ;;  %v3472_v21 = vrot.slane %v3470_v26, 1 }
 0x21d   : > { %v7059_v2 = vadd.f32 %v2153_v11, %v1807_v61  ;;  %5785 = vmatprep.mubr.msk.bf16.mxu0 %vm6016_vm0, %v7439_v22  ;;  %v1809_v4 = vadd.f32 %v1770_v40, %v6764_v37  ;;  %5717 = vmatprep.mubr.msk.bf16.mxu1 %vm6016_vm0, %v7439_v22  ;;  %v3466_v37 = vshrl.u32 %v5994_v9, 16 }
 0x21e   : > { %v5535_v19 = vpop.f32.mrf.mxu0  ;;  %v5467_v60 = vpop.f32.mrf.mxu1 }
 0x21f   : > { %v3468_v9 = vor.u32 %v3466_v37, %v3464_v1  ;;  %v5997_v37 = vld [vmem:[%s6070_s23 + $0xfc] sm:$0xff]  }
 0x220   : > { %v2156_v59 = vpop.f32.mrf.mxu0  ;;  %v1773_v61 = vpop.f32.mrf.mxu1 }
 0x221   : > { %v7069_v41 = vadd.f32 %v2156_v59, %v1808_v58  ;;  %v1810_v47 = vadd.f32 %v1773_v61, %v6777_v23  ;;  %v3829_v23 = vrot.slane %v6750_v15, 1  ;;  %v3473_v15 = vsel %vm1013_vm2, %v3468_v9, %v3472_v21 }
 0x222   : > { %v5536_v30 = vpop.f32.mrf.mxu0  ;;  %v5468_v55 = vpop.f32.mrf.mxu1  ;;  %v3478_v59 = vshll.u32 %v5996_v8, 16 }
 0x223   : > { %v3830_v19 = vsel %vm3813_vm3, %v3827_v10, %v3829_v23 }
 0x224   : > { %v2161_v6 = vpop.f32.mrf.mxu0  ;;  %5786 = vmatmul.mubr.msk.bf16.gmra.mxu0 %vm347_vm1, %v3828_v17  ;;  %v2567_v27 = vpop.f32.mrf.mxu1  ;;  %5718 = vmatmul.mubr.msk.bf16.gmra.mxu1 %vm347_vm1, %v3465_v56  ;;  %v3480_v56 = vrot.slane %v3478_v59, 1 }
 0x225   : > { %v7075_v34 = vadd.f32 %v2161_v6, %v1809_v4  ;;  %5789 = vmatprep.mubr.msk.bf16.mxu0 %vm6016_vm0, %v7439_v22  ;;  %v2702_v38 = vadd.f32 %v2567_v27, %v6785_v43  ;;  %5721 = vmatprep.mubr.msk.bf16.mxu1 %vm6016_vm0, %v7439_v22  ;;  %v3474_v43 = vshrl.u32 %v5995_v25, 16 }
 0x226   : > { %v5539_v58 = vpop.f32.mrf.mxu0  ;;  %v5547_v12 = vpop.f32.mrf.mxu1 }
 0x227   : > { %v3476_v25 = vor.u32 %v3474_v43, %v3472_v21  ;;  %v3486_v12 = vshll.u32 %v5997_v37, 16  ;;  %v5998_v43 = vld [vmem:[%s6070_s23 + $0x104] sm:$0xff]  }
 0x228   : > { %v2164_v11 = vpop.f32.mrf.mxu0  ;;  %v2570_v4 = vpop.f32.mrf.mxu1 }
 0x229   : > { %v7085_v40 = vadd.f32 %v2164_v11, %v1810_v47  ;;  %v2703_v62 = vadd.f32 %v2570_v4, %v6797_v63  ;;  %v3831_v63 = vrot.slane %v6770_v29, 1  ;;  %v3481_v29 = vsel %vm1013_vm2, %v3476_v25, %v3480_v56 }
 0x22a   : > { %v5540_v60 = vpop.f32.mrf.mxu0  ;;  %v5548_v61 = vpop.f32.mrf.mxu1 }
 0x22c   : > { %v3101_v17 = vpop.f32.mrf.mxu0  ;;  %5790 = vmatmul.mubr.msk.bf16.gmra.mxu0 %vm347_vm1, %v3830_v19  ;;  %v2575_v1 = vpop.f32.mrf.mxu1  ;;  %5722 = vmatmul.mubr.msk.bf16.gmra.mxu1 %vm347_vm1, %v3473_v15  ;;  %v3488_v15 = vrot.slane %v3486_v12, 1  ;;  %v5999_v12 = vld [vmem:[%s6070_s23 + $0x10c] sm:$0xff]  }
 0x22d   : > { %v7091_v30 = vadd.f32 %v3101_v17, %v2702_v38  ;;  %5793 = vmatprep.mubr.msk.bf16.mxu0 %vm6016_vm0, %v7439_v22  ;;  %v2704_v10 = vadd.f32 %v2575_v1, %v6805_v35  ;;  %5725 = vmatprep.mubr.msk.bf16.mxu1 %vm6016_vm0, %v7439_v22  ;;  %v3832_v38 = vsel %vm3813_vm3, %v3829_v23, %v3831_v63  ;;  %v3482_v35 = vshrl.u32 %v5996_v8, 16  ;;  %v7441_v23 = vld [vmem:[#allocation2_spill] sm:$0xff] }
 0x22e   : > { %v5619_v47 = vpop.f32.mrf.mxu0  ;;  %v5551_v26 = vpop.f32.mrf.mxu1 }
 0x22f   : > { %v3484_v8 = vor.u32 %v3482_v35, %v3480_v56  ;;  %v3490_v26 = vshrl.u32 %v5997_v37, 16 }
 0x230   : > { %v3104_v55 = vpop.f32.mrf.mxu0  ;;  %v2578_v6 = vpop.f32.mrf.mxu1 }
 0x231   : > { %v7101_v27 = vadd.f32 %v3104_v55, %v2703_v62  ;;  %v2705_v58 = vadd.f32 %v2578_v6, %v6817_v24  ;;  %v3833_v24 = vrot.slane %v6791_v20, 1  ;;  %v3489_v20 = vsel %vm1013_vm2, %v3484_v8, %v3488_v15 }
 0x232   : > { %v5620_v9 = vpop.f32.mrf.mxu0  ;;  %v5552_v11 = vpop.f32.mrf.mxu1  ;;  %v3494_v55 = vshll.u32 %v5998_v43, 16  ;;  %v3492_v37 = vor.u32 %v3490_v26, %v3488_v15 }
 0x234   : > { %v3109_v4 = vpop.f32.mrf.mxu0  ;;  %5794 = vmatmul.mubr.msk.bf16.gmra.mxu0 %vm347_vm1, %v3832_v38  ;;  %v2583_v21 = vpop.f32.mrf.mxu1  ;;  %5726 = vmatmul.mubr.msk.bf16.gmra.mxu1 %vm347_vm1, %v3481_v29  ;;  %v3496_v35 = vrot.slane %v3494_v55, 1  ;;  %v6000_v55 = vld [vmem:[%s6070_s23 + $0x114] sm:$0xff]  }
 0x235   : > { %v7107_v19 = vadd.f32 %v3109_v4, %v2704_v10  ;;  %5797 = vmatprep.mubr.msk.bf16.mxu0 %vm6016_vm0, %v7439_v22  ;;  %v2706_v62 = vadd.f32 %v2583_v21, %v7441_v23  ;;  %5729 = vmatprep.mubr.msk.bf16.mxu1 %vm6016_vm0, %v7439_v22  ;;  %v3834_v10 = vsel %vm3813_vm3, %v3831_v63, %v3833_v24  ;;  %v7442_v63 = vld [vmem:[#allocation3_spill] sm:$0xff] }
 0x236   : > { %v5623_v60 = vpop.f32.mrf.mxu0  ;;  %v5555_v59 = vpop.f32.mrf.mxu1 }
 0x237   : > { %v3498_v59 = vshrl.u32 %v5998_v43, 16 }
 0x238   : > { %v3112_v61 = vpop.f32.mrf.mxu0  ;;  %v2586_v17 = vpop.f32.mrf.mxu1 }
 0x239   : > { %v7117_v1 = vadd.f32 %v3112_v61, %v2705_v58  ;;  %v2707_v47 = vadd.f32 %v2586_v17, %v6837_v14  ;;  %v3835_v14 = vrot.slane %v6811_v5, 1  ;;  %v3497_v5 = vsel %vm1013_vm2, %v3492_v37, %v3496_v35 }
 0x23a   : > { %v5624_v25 = vpop.f32.mrf.mxu0  ;;  %v5556_v6 = vpop.f32.mrf.mxu1  ;;  %v3502_v61 = vshll.u32 %v5999_v12, 16  ;;  %v3500_v43 = vor.u32 %v3498_v59, %v3496_v35  ;;  %v6001_v59 = vld [vmem:[%s6070_s23 + $0x11c] sm:$0xff]  }
 0x23c   : > { %v3117_v38 = vpop.f32.mrf.mxu0  ;;  %5798 = vmatmul.mubr.msk.bf16.gmra.mxu0 %vm347_vm1, %v3834_v10  ;;  %v2591_v56 = vpop.f32.mrf.mxu1  ;;  %5730 = vmatmul.mubr.msk.bf16.gmra.mxu1 %vm347_vm1, %v3489_v20  ;;  %v3504_v26 = vrot.slane %v3502_v61, 1 }
 0x23d   : > { %v7123_v9 = vadd.f32 %v3117_v38, %v2706_v62  ;;  %5801 = vmatprep.mubr.msk.bf16.mxu0 %vm6016_vm0, %v7439_v22  ;;  %v2708_v58 = vadd.f32 %v2591_v56, %v7442_v63  ;;  %5733 = vmatprep.mubr.msk.bf16.mxu1 %vm6016_vm0, %v7439_v22  ;;  %v3836_v62 = vsel %vm3813_vm3, %v3833_v24, %v3835_v14  ;;  %v7443_v24 = vld [vmem:[#allocation4_spill] sm:$0xff] }
 0x23e   : > { %v5627_v29 = vpop.f32.mrf.mxu0  ;;  %v5559_v11 = vpop.f32.mrf.mxu1 }
 0x23f   : > { %v3506_v11 = vshrl.u32 %v5999_v12, 16 }
 0x240   : > { %v3120_v4 = vpop.f32.mrf.mxu0  ;;  %v2594_v21 = vpop.f32.mrf.mxu1 }
 0x241   : > { %v7133_v23 = vadd.f32 %v3120_v4, %v2707_v47  ;;  %v2709_v60 = vadd.f32 %v2594_v21, %v6857_v44  ;;  %v3837_v44 = vrot.slane %v6831_v16, 1  ;;  %v3505_v16 = vsel %vm1013_vm2, %v3500_v43, %v3504_v26 }
 0x242   : > { %v5628_v8 = vpop.f32.mrf.mxu0  ;;  %v5560_v17 = vpop.f32.mrf.mxu1  ;;  %v3510_v4 = vshll.u32 %v6000_v55, 16  ;;  %v3508_v12 = vor.u32 %v3506_v11, %v3504_v26 }
 0x244   : > { %v3125_v10 = vpop.f32.mrf.mxu0  ;;  %5802 = vmatmul.mubr.msk.bf16.gmra.mxu0 %vm347_vm1, %v3836_v62  ;;  %v2599_v15 = vpop.f32.mrf.mxu1  ;;  %5734 = vmatmul.mubr.msk.bf16.gmra.mxu1 %vm347_vm1, %v3497_v5  ;;  %v3512_v5 = vrot.slane %v3510_v4, 1 }
 0x245   : > { %v7139_v25 = vadd.f32 %v3125_v10, %v2708_v58  ;;  %5805 = vmatprep.mubr.msk.bf16.mxu0 %vm6016_vm0, %v7439_v22  ;;  %v2710_v47 = vadd.f32 %v2599_v15, %v7443_v24  ;;  %5737 = vmatprep.mubr.msk.bf16.mxu1 %vm6016_vm0, %v7439_v22  ;;  %v3838_v58 = vsel %vm3813_vm3, %v3835_v14, %v3837_v44 }
 0x246   : > { %v5631_v20 = vpop.f32.mrf.mxu0  ;;  %v5563_v6 = vpop.f32.mrf.mxu1 }
 0x247   : > { %v3518_v6 = vshll.u32 %v6001_v59, 16 }
 0x248   : > { %v3128_v38 = vpop.f32.mrf.mxu0  ;;  %v2602_v56 = vpop.f32.mrf.mxu1 }
 0x249   : > { %v7149_v63 = vadd.f32 %v3128_v38, %v2709_v60  ;;  %v2711_v29 = vadd.f32 %v2602_v56, %v6877_v7  ;;  %v3839_v7 = vrot.slane %v6851_v52, 1  ;;  %v3513_v52 = vsel %vm1013_vm2, %v3508_v12, %v3512_v5 }
 0x24a   : > { %v5632_v37 = vpop.f32.mrf.mxu0  ;;  %v5564_v21 = vpop.f32.mrf.mxu1  ;;  %v3520_v4 = vrot.slane %v3518_v6, 1 }
 0x24b   : > { %v3840_v24 = vsel %vm3813_vm3, %v3837_v44, %v3839_v7  ;;  %v7445_v44 = vld [vmem:[#allocation5_spill] sm:$0xff]  ;;  %v7446_v37 = vld [vmem:[#allocation7_spill] sm:$0xff] }
 0x24c   : > { %v3133_v62 = vpop.f32.mrf.mxu0  ;;  %5806 = vmatmul.mubr.msk.bf16.gmra.mxu0 %vm347_vm1, %v3838_v58  ;;  %v2607_v35 = vpop.f32.mrf.mxu1  ;;  %5738 = vmatmul.mubr.msk.bf16.gmra.mxu1 %vm347_vm1, %v3505_v16  ;;  %v6002_v21 = vld [vmem:[%s6070_s23 + $0x124] sm:$0xff]  }
 0x24d   : > { %v7155_v8 = vadd.f32 %v3133_v62, %v2710_v47  ;;  %5809 = vmatprep.mubr.msk.bf16.mxu0 %vm6016_vm0, %v7439_v22  ;;  %v2712_v14 = vadd.f32 %v2607_v35, %v6885_v50  ;;  %5741 = vmatprep.mubr.msk.bf16.mxu1 %vm6016_vm0, %v7439_v22  ;;  %v7444_v47 = vld [vmem:[#allocation6_spill] sm:$0xff]  ;;  %v3514_v50 = vshrl.u32 %v6000_v55, 16 }
 0x24e   : > { %v5635_v60 = vpop.f32.mrf.mxu0  ;;  %v5567_v61 = vpop.f32.mrf.mxu1 }
 0x24f   : > { %v3516_v55 = vor.u32 %v3514_v50, %v3512_v5 }
 0x250   : > { %v3136_v17 = vpop.f32.mrf.mxu0  ;;  %v2610_v10 = vpop.f32.mrf.mxu1 }
 0x251   : > { %v7165_v15 = vadd.f32 %v3136_v17, %v2711_v29  ;;  %v2713_v20 = vadd.f32 %v2610_v10, %v7444_v47  ;;  %v3841_v29 = vrot.slane %v7445_v44, 1  ;;  %v3521_v10 = vsel %vm1013_vm2, %v3516_v55, %v3520_v4 }
 0x252   : > { %v5636_v43 = vpop.f32.mrf.mxu0  ;;  %v5568_v38 = vpop.f32.mrf.mxu1  ;;  %v3526_v47 = vshll.u32 %v6002_v21, 16 }
 0x253   : > { %v3842_v12 = vsel %vm3813_vm3, %v3839_v7, %v3841_v29  ;;  %v7447_v7 = vld [vmem:[#allocation8_spill] sm:$0xff] }
 0x254   : > { %v3141_v56 = vpop.f32.mrf.mxu0  ;;  %5810 = vmatmul.mubr.msk.bf16.gmra.mxu0 %vm347_vm1, %v3840_v24  ;;  %v2615_v26 = vpop.f32.mrf.mxu1  ;;  %5742 = vmatmul.mubr.msk.bf16.gmra.mxu1 %vm347_vm1, %v3513_v52  ;;  %v3522_v24 = vshrl.u32 %v6001_v59, 16  ;;  %v3528_v38 = vrot.slane %v3526_v47, 1 }
 0x255   : > { %v7171_v58 = vadd.f32 %v3141_v56, %v2712_v14  ;;  %5813 = vmatprep.mubr.msk.bf16.mxu0 %vm6016_vm0, %v7439_v22  ;;  %v2714_v16 = vadd.f32 %v2615_v26, %v7446_v37  ;;  %5745 = vmatprep.mubr.msk.bf16.mxu1 %vm6016_vm0, %v7439_v22  ;;  %v6003_v56 = vld [vmem:[%s6070_s23 + $0x12c] ss:$0 sps:$4 sm:$0x11]  }
 0x256   : > { %v5639_v11 = vpop.f32.mrf.mxu0  ;;  %v5571_v62 = vpop.f32.mrf.mxu1  ;;  %v3524_v59 = vor.u32 %v3522_v24, %v3520_v4 }
 0x258   : > { %v3144_v35 = vpop.f32.mrf.mxu0  ;;  %v2618_v14 = vpop.f32.mrf.mxu1 }
 0x259   : > { %v7181_v60 = vadd.f32 %v3144_v35, %v2713_v20  ;;  %v2715_v61 = vadd.f32 %v2618_v14, %v6917_v28  ;;  %v3843_v28 = vrot.slane %v6891_v3, 1  ;;  %v3529_v3 = vsel %vm1013_vm2, %v3524_v59, %v3528_v38 }
 0x25a   : > { %v5640_v17 = vpop.f32.mrf.mxu0  ;;  %v5572_v43 = vpop.f32.mrf.mxu1  ;;  %v3530_v35 = vshrl.u32 %v6002_v21, 16  ;;  %v3534_v14 = vshll.u32 %v6003_v56, 16 }
 0x25b   : > { %v3844_v11 = vsel %vm3813_vm3, %v3841_v29, %v3843_v28  ;;  %v3845_v29 = vrot.slane %v6912_v31, 1 }
 0x25c   : > { %v3149_v52 = vpop.f32.mrf.mxu0  ;;  %5814 = vmatmul.mubr.msk.bf16.gmra.mxu0 %vm347_vm1, %v3842_v12  ;;  %v2623_v5 = vpop.f32.mrf.mxu1  ;;  %5746 = vmatmul.mubr.msk.bf16.gmra.mxu1 %vm347_vm1, %v3521_v10  ;;  %v3532_v21 = vor.u32 %v3530_v35, %v3528_v38  ;;  %v3536_v24 = vrot.slane %v3534_v14, 1  ;;  %v3847_v38 = vrot.slane %v6932_v32, 1 }
 0x25d   : > { %v7187_v50 = vadd.f32 %v3149_v52, %v2714_v16  ;;  %5817 = vmatprep.mubr.msk.bf16.mxu0 %vm6016_vm0, %v7439_v22  ;;  %v2716_v20 = vadd.f32 %v2623_v5, %v7447_v7  ;;  %5749 = vmatprep.mubr.msk.bf16.mxu1 %vm6016_vm0, %v7439_v22  ;;  %v3846_v7 = vsel %vm3813_vm3, %v3843_v28, %v3845_v29 }
 0x25e   : > { %v5643_v6 = vpop.f32.mrf.mxu0  ;;  %v5575_v26 = vpop.f32.mrf.mxu1  ;;  %v3537_v31 = vsel %vm1013_vm2, %v3532_v21, %v3536_v24 }
 0x260   : > { %v3152_v44 = vpop.f32.mrf.mxu0  ;;  %v2626_v37 = vpop.f32.mrf.mxu1 }
 0x261   : > { %v7197_v16 = vadd.f32 %v3152_v44, %v2715_v61  ;;  %v2717_v55 = vadd.f32 %v2626_v37, %v6939_v36 }
 0x262   : > { %v5644_v62 = vpop.f32.mrf.mxu0  ;;  %v5576_v12 = vpop.f32.mrf.mxu1 }
 0x263   : > { %v3848_v62 = vsel %vm3813_vm3, %v3845_v29, %v3847_v38 }
 0x264   : > { %v3157_v17 = vpop.f32.mrf.mxu0  ;;  %5818 = vmatmul.mubr.msk.bf16.gmra.mxu0 %vm347_vm1, %v3844_v11  ;;  %v2631_v4 = vpop.f32.mrf.mxu1  ;;  %5750 = vmatmul.mubr.msk.bf16.gmra.mxu1 %vm347_vm1, %v3529_v3 }
 0x265   : > { %v7203_v10 = vadd.f32 %v3157_v17, %v2716_v20  ;;  %5821 = vmatprep.mubr.msk.bf16.mxu0 %vm6016_vm0, %v7439_v22  ;;  %v2718_v36 = vadd.f32 %v2631_v4, %v6946_v49  ;;  %5753 = vmatprep.mubr.msk.bf16.mxu1 %vm6016_vm0, %v7439_v22 }
 0x266   : > { %v5647_v61 = vpop.f32.mrf.mxu0  ;;  %v5579_v47 = vpop.f32.mrf.mxu1 }
 0x268   : > { %v3160_v43 = vpop.f32.mrf.mxu0  ;;  %v2634_v52 = vpop.f32.mrf.mxu1 }
 0x269   : > { %v7212_v5 = vadd.f32 %v3160_v43, %v2717_v55  ;;  %v2719_v20 = vadd.f32 %v2634_v52, %v6956_v33 }
 0x26a   : > { %v5648_v6 = vpop.f32.mrf.mxu0  ;;  %v5580_v59 = vpop.f32.mrf.mxu1 }
 0x26c   : > { %v3165_v49 = vpop.f32.mrf.mxu0  ;;  %5822 = vmatmul.mubr.msk.bf16.gmra.mxu0 %vm347_vm1, %v3846_v7  ;;  %v2639_v56 = vpop.f32.mrf.mxu1  ;;  %5754 = vmatmul.mubr.msk.bf16.gmra.mxu1 %vm347_vm1, %v3537_v31 }
 0x26d   : > { %v7218_v26 = vadd.f32 %v3165_v49, %v2718_v36  ;;  %5825 = vmatprep.mubr.msk.bf16.mxu0 %vm6016_vm0, %v7439_v22  ;;  %v2720_v28 = vadd.f32 %v2639_v56, %v6963_v54 }
 0x26e   : > { %v5651_v33 = vpop.f32.mrf.mxu0  ;;  %v5583_v44 = vpop.f32.mrf.mxu1 }
 0x270   : > { %v3168_v37 = vpop.f32.mrf.mxu0  ;;  %v2642_v11 = vpop.f32.mrf.mxu1 }
 0x271   : > { %v7225_v55 = vadd.f32 %v3168_v37, %v2719_v20  ;;  %v2721_v3 = vadd.f32 %v2642_v11, %v6973_v51 }
 0x272   : > { %v5652_v35 = vpop.f32.mrf.mxu0  ;;  %v5584_v14 = vpop.f32.mrf.mxu1 }
 0x274   : > { %v3173_v12 = vpop.f32.mrf.mxu0  ;;  %5826 = vmatmul.mubr.msk.bf16.gmra.mxu0 %vm347_vm1, %v3848_v62  ;;  %v2647_v22 = vpop.f32.mrf.mxu1 }
 0x275   : > { %v7230_v17 = vadd.f32 %v3173_v12, %v2720_v28  ;;  %v2722_v32 = vadd.f32 %v2647_v22, %v6979_v42 }
 0x276   : > { %v5655_v54 = vpop.f32.mrf.mxu0  ;;  %v5587_v4 = vpop.f32.mrf.mxu1 }
 0x278   : > { %v3176_v36 = vpop.f32.mrf.mxu0  ;;  %v2650_v61 = vpop.f32.mrf.mxu1 }
 0x279   : > { %v7233_v21 = vadd.f32 %v3176_v36, %v2721_v3  ;;  %v2723_v29 = vadd.f32 %v2650_v61, %v6989_v45 }
 0x27a   : > { %v5656_v24 = vpop.f32.mrf.mxu0  ;;  %v5588_v51 = vpop.f32.mrf.mxu1 }
 0x27c   : > { %v3181_v47 = vpop.f32.mrf.mxu0  ;;  %v2655_v43 = vpop.f32.mrf.mxu1 }
 0x27d   : > { %v7236_v52 = vadd.f32 %v3181_v47, %v2722_v32  ;;  %v2724_v7 = vadd.f32 %v2655_v43, %v6995_v13 }
 0x27e   : > { %v5659_v20 = vpop.f32.mrf.mxu0  ;;  %v5591_v6 = vpop.f32.mrf.mxu1 }
 0x280   : > { %v3184_v31 = vpop.f32.mrf.mxu0  ;;  %v2658_v42 = vpop.f32.mrf.mxu1 }
 0x281   : > { %v7239_v59 = vadd.f32 %v3184_v31, %v2723_v29  ;;  %v2725_v49 = vadd.f32 %v2658_v42, %v7005_v0 }
 0x282   : > { %v5660_v56 = vpop.f32.mrf.mxu0  ;;  %v5592_v38 = vpop.f32.mrf.mxu1 }
 0x284   : > { %v3189_v28 = vpop.f32.mrf.mxu0  ;;  %v2663_v45 = vpop.f32.mrf.mxu1 }
 0x285   : > { %v7242_v33 = vadd.f32 %v3189_v28, %v2724_v7  ;;  %v2726_v44 = vadd.f32 %v2663_v45, %v7011_v18 }
 0x286   : > { %v5663_v37 = vpop.f32.mrf.mxu0  ;;  %v5595_v11 = vpop.f32.mrf.mxu1 }
 0x288   : > { %v3192_v62 = vpop.f32.mrf.mxu0  ;;  %v2666_v13 = vpop.f32.mrf.mxu1 }
 0x289   : > { %v7245_v3 = vadd.f32 %v3192_v62, %v2725_v49  ;;  %v2727_v35 = vadd.f32 %v2666_v13, %v7021_v57 }
 0x28a   : > { %v5664_v14 = vpop.f32.mrf.mxu0  ;;  %v5596_v12 = vpop.f32.mrf.mxu1 }
 0x28c   : > { %v3197_v22 = vpop.f32.mrf.mxu0  ;;  %v2671_v0 = vpop.f32.mrf.mxu1 }
 0x28d   : > { %v7248_v32 = vadd.f32 %v3197_v22, %v2726_v44  ;;  %v2728_v54 = vadd.f32 %v2671_v0, %v7027_v46 }
 0x28e   : > { %v5667_v4 = vpop.f32.mrf.mxu0  ;;  %v5599_v36 = vpop.f32.mrf.mxu1 }
 0x290   : > { %v3200_v61 = vpop.f32.mrf.mxu0  ;;  %v2674_v18 = vpop.f32.mrf.mxu1 }
 0x291   : > { %v7251_v29 = vadd.f32 %v3200_v61, %v2727_v35  ;;  %v2729_v24 = vadd.f32 %v2674_v18, %v7037_v39 }
 0x292   : > { %v5668_v51 = vpop.f32.mrf.mxu0  ;;  %v5600_v47 = vpop.f32.mrf.mxu1 }
 0x294   : > { %v3205_v43 = vpop.f32.mrf.mxu0  ;;  %v2679_v57 = vpop.f32.mrf.mxu1 }
 0x295   : > { %v7254_v7 = vadd.f32 %v3205_v43, %v2728_v54  ;;  %v2730_v20 = vadd.f32 %v2679_v57, %v7043_v53 }
 0x296   : > { %v5671_v6 = vpop.f32.mrf.mxu0  ;;  %v5603_v31 = vpop.f32.mrf.mxu1 }
 0x298   : > { %v3208_v42 = vpop.f32.mrf.mxu0  ;;  %v2682_v46 = vpop.f32.mrf.mxu1 }
 0x299   : > { %v7257_v49 = vadd.f32 %v3208_v42, %v2729_v24  ;;  %v2731_v56 = vadd.f32 %v2682_v46, %v7053_v48 }
 0x29a   : > { %v5672_v38 = vpop.f32.mrf.mxu0  ;;  %v5604_v28 = vpop.f32.mrf.mxu1 }
 0x29c   : > { %v3213_v45 = vpop.f32.mrf.mxu0  ;;  %v2687_v39 = vpop.f32.mrf.mxu1 }
 0x29d   : > { %v7260_v44 = vadd.f32 %v3213_v45, %v2730_v20  ;;  %v2732_v37 = vadd.f32 %v2687_v39, %v7059_v2 }
 0x29e   : > { %v5675_v11 = vpop.f32.mrf.mxu0  ;;  %v5607_v62 = vpop.f32.mrf.mxu1 }
 0x2a0   : > { %v3216_v13 = vpop.f32.mrf.mxu0  ;;  %v2690_v53 = vpop.f32.mrf.mxu1 }
 0x2a1   : > { %v7263_v35 = vadd.f32 %v3216_v13, %v2731_v56  ;;  %v2733_v14 = vadd.f32 %v2690_v53, %v7069_v41 }
 0x2a2   : > { %v5676_v12 = vpop.f32.mrf.mxu0  ;;  %v5608_v22 = vpop.f32.mrf.mxu1 }
 0x2a4   : > { %v3221_v0 = vpop.f32.mrf.mxu0  ;;  %v2695_v48 = vpop.f32.mrf.mxu1 }
 0x2a5   : > { %v7266_v54 = vadd.f32 %v3221_v0, %v2732_v37  ;;  %v2734_v4 = vadd.f32 %v2695_v48, %v7075_v34 }
 0x2a6   : > { %v5679_v36 = vpop.f32.mrf.mxu0  ;;  %v5611_v61 = vpop.f32.mrf.mxu1 }
 0x2a8   : > { %v3224_v18 = vpop.f32.mrf.mxu0  ;;  %v2698_v2 = vpop.f32.mrf.mxu1 }
 0x2a9   : > { %v7269_v24 = vadd.f32 %v3224_v18, %v2733_v14  ;;  %v2735_v51 = vadd.f32 %v2698_v2, %v7085_v40  ;;  %v7280_v40 = vld [vmem:[%s7428_s2] ss:$0 sm:$0xff] }
 0x2aa   : > { %v5680_v47 = vpop.f32.mrf.mxu0  ;;  %v5612_v43 = vpop.f32.mrf.mxu1 }
 0x2ac   : > { %v3229_v41 = vpop.f32.mrf.mxu0  ;;  %v3635_v20 = vpop.f32.mrf.mxu1 }
 0x2ad   : > { %v7272_v57 = vadd.f32 %v3229_v41, %v2734_v4  ;;  %v3770_v38 = vadd.f32 %v3635_v20, %v7091_v30 }
 0x2ae   : > { %v5683_v6 = vpop.f32.mrf.mxu0  ;;  %v5691_v31 = vpop.f32.mrf.mxu1 }
 0x2b0   : > { %v3232_v42 = vpop.f32.mrf.mxu0  ;;  %v3638_v34 = vpop.f32.mrf.mxu1 }
 0x2b1   : > { %v7274_v46 = vadd.f32 %v3232_v42, %v2735_v51  ;;  %v3771_v62 = vadd.f32 %v3638_v34, %v7101_v27 }
 0x2b2   : > { %v5684_v56 = vpop.f32.mrf.mxu0  ;;  %v5692_v28 = vpop.f32.mrf.mxu1 }
 0x2b4   : > { %v3946_v45 = vpop.f32.mrf.mxu0  ;;  %v3643_v39 = vpop.f32.mrf.mxu1 }
 0x2b5   : > { %v4081_v37 = vadd.f32 %v3946_v45, %v3770_v38  ;;  %v3772_v48 = vadd.f32 %v3643_v39, %v7107_v19 }
 0x2b6   : > { %v5763_v11 = vpop.f32.mrf.mxu0  ;;  %v5695_v53 = vpop.f32.mrf.mxu1 }
 0x2b7   : > { %v4122_v13 = vadd.f32 %v7280_v40, %v4081_v37 }
 0x2b8   : > { %v3949_v14 = vpop.f32.mrf.mxu0  ;;  %v3646_v22 = vpop.f32.mrf.mxu1 }
 0x2b9   : > { %v4156_v12 = vmax.f32 %v4122_v13, 0.0  ;;  %v4082_v30 = vadd.f32 %v3949_v14, %v3771_v62  ;;  %v3773_v43 = vadd.f32 %v3646_v22, %v7117_v1 }
 0x2ba   : > { %v5764_v0 = vpop.f32.mrf.mxu0  ;;  %v5696_v36 = vpop.f32.mrf.mxu1 }
 0x2bb   : > { %v4976_v4 = vpack.c.bf16 %v4156_v12, %v4156_v12  ;;  %v4123_v27 = vadd.f32 %v7280_v40, %v4082_v30 }
 0x2bc   : > { %v3954_v61 = vpop.f32.mrf.mxu0  ;;  %v3651_v2 = vpop.f32.mrf.mxu1 }
 0x2bd   : > { %4327 = vst.msk [vmem:[%s7288_s7] sm:$0xf] %vm4326_vm4, %v4976_v4  ;;  %v4157_v18 = vmax.f32 %v4123_v27, 0.0  ;;  %v4083_v51 = vadd.f32 %v3954_v61, %v3772_v48  ;;  %v3774_v38 = vadd.f32 %v3651_v2, %v7123_v9 }
 0x2be   : > { %v5767_v47 = vpop.f32.mrf.mxu0  ;;  %v5699_v6 = vpop.f32.mrf.mxu1 }
 0x2bf   : > { %v4977_v41 = vpack.c.bf16 %v4157_v18, %v4157_v18  ;;  %v4124_v20 = vadd.f32 %v7280_v40, %v4083_v51 }
 0x2c0   : > { %v3957_v31 = vpop.f32.mrf.mxu0  ;;  %v3654_v42 = vpop.f32.mrf.mxu1 }
 0x2c1   : > { %4328 = vst.msk [vmem:[%s7288_s7 + $0x4] sm:$0xf] %vm4326_vm4, %v4977_v41  ;;  %v4158_v19 = vmax.f32 %v4124_v20, 0.0  ;;  %v4084_v34 = vadd.f32 %v3957_v31, %v3773_v43  ;;  %v3775_v53 = vadd.f32 %v3654_v42, %v7133_v23 }
 0x2c2   : > { %v5768_v56 = vpop.f32.mrf.mxu0  ;;  %v5700_v39 = vpop.f32.mrf.mxu1 }
 0x2c3   : > { %v4978_v28 = vpack.c.bf16 %v4158_v19, %v4158_v19  ;;  %v4125_v45 = vadd.f32 %v7280_v40, %v4084_v34 }
 0x2c4   : > { %v3962_v37 = vpop.f32.mrf.mxu0  ;;  %v3659_v11 = vpop.f32.mrf.mxu1 }
 0x2c5   : > { %4329 = vst.msk [vmem:[%s7288_s7 + $0x8] sm:$0xf] %vm4326_vm4, %v4978_v28  ;;  %v4159_v1 = vmax.f32 %v4125_v45, 0.0  ;;  %v4085_v62 = vadd.f32 %v3962_v37, %v3774_v38  ;;  %v3776_v27 = vadd.f32 %v3659_v11, %v7139_v25 }
 0x2c6   : > { %v5771_v13 = vpop.f32.mrf.mxu0  ;;  %v5703_v22 = vpop.f32.mrf.mxu1 }
 0x2c7   : > { %v4979_v14 = vpack.c.bf16 %v4159_v1, %v4159_v1  ;;  %v4126_v12 = vadd.f32 %v7280_v40, %v4085_v62 }
 0x2c8   : > { %v3965_v30 = vpop.f32.mrf.mxu0  ;;  %v3662_v0 = vpop.f32.mrf.mxu1 }
 0x2c9   : > { %4330 = vst.msk [vmem:[%s7288_s7 + $0xc] sm:$0xf] %vm4326_vm4, %v4979_v14  ;;  %v4160_v9 = vmax.f32 %v4126_v12, 0.0  ;;  %v4086_v48 = vadd.f32 %v3965_v30, %v3775_v53  ;;  %v3777_v41 = vadd.f32 %v3662_v0, %v7149_v63 }
 0x2ca   : > { %v5772_v4 = vpop.f32.mrf.mxu0  ;;  %v5704_v18 = vpop.f32.mrf.mxu1 }
 0x2cb   : > { %v4980_v36 = vpack.c.bf16 %v4160_v9, %v4160_v9  ;;  %v4127_v61 = vadd.f32 %v7280_v40, %v4086_v48 }
 0x2cc   : > { %v3970_v2 = vpop.f32.mrf.mxu0  ;;  %v3667_v51 = vpop.f32.mrf.mxu1 }
 0x2cd   : > { %4331 = vst.msk [vmem:[%s7288_s7 + $0x10] sm:$0xf] %vm4326_vm4, %v4980_v36  ;;  %v4161_v23 = vmax.f32 %v4127_v61, 0.0  ;;  %v4087_v47 = vadd.f32 %v3970_v2, %v3776_v27  ;;  %v3778_v38 = vadd.f32 %v3667_v51, %v7155_v8 }
 0x2ce   : > { %v5775_v43 = vpop.f32.mrf.mxu0  ;;  %v5707_v31 = vpop.f32.mrf.mxu1 }
 0x2cf   : > { %v4981_v20 = vpack.c.bf16 %v4161_v23, %v4161_v23  ;;  %v4128_v6 = vadd.f32 %v7280_v40, %v4087_v47 }
 0x2d0   : > { %v3973_v19 = vpop.f32.mrf.mxu0  ;;  %v3670_v42 = vpop.f32.mrf.mxu1 }
 0x2d1   : > { %4332 = vst.msk [vmem:[%s7288_s7 + $0x14] sm:$0xf] %vm4326_vm4, %v4981_v20  ;;  %v4162_v25 = vmax.f32 %v4128_v6, 0.0  ;;  %v4088_v34 = vadd.f32 %v3973_v19, %v3777_v41  ;;  %v3779_v13 = vadd.f32 %v3670_v42, %v7165_v15 }
 0x2d2   : > { %v5776_v56 = vpop.f32.mrf.mxu0  ;;  %v5708_v39 = vpop.f32.mrf.mxu1 }
 0x2d3   : > { %v4982_v28 = vpack.c.bf16 %v4162_v25, %v4162_v25  ;;  %v4129_v45 = vadd.f32 %v7280_v40, %v4088_v34 }
 0x2d4   : > { %v3978_v37 = vpop.f32.mrf.mxu0  ;;  %v3675_v1 = vpop.f32.mrf.mxu1 }
 0x2d5   : > { %4333 = vst.msk [vmem:[%s7288_s7 + $0x18] sm:$0xf] %vm4326_vm4, %v4982_v28  ;;  %v4163_v63 = vmax.f32 %v4129_v45, 0.0  ;;  %v4089_v11 = vadd.f32 %v3978_v37, %v3778_v38  ;;  %v3780_v48 = vadd.f32 %v3675_v1, %v7171_v58 }
 0x2d6   : > { %v5779_v62 = vpop.f32.mrf.mxu0  ;;  %v5711_v12 = vpop.f32.mrf.mxu1 }
 0x2d7   : > { %v4983_v53 = vpack.c.bf16 %v4163_v63, %v4163_v63  ;;  %v4130_v14 = vadd.f32 %v7280_v40, %v4089_v11 }
 0x2d8   : > { %v3981_v22 = vpop.f32.mrf.mxu0  ;;  %v3678_v30 = vpop.f32.mrf.mxu1 }
 0x2d9   : > { %4334 = vst.msk [vmem:[%s7288_s7 + $0x1c] sm:$0xf] %vm4326_vm4, %v4983_v53  ;;  %v4164_v8 = vmax.f32 %v4130_v14, 0.0  ;;  %v4090_v9 = vadd.f32 %v3981_v22, %v3779_v13  ;;  %v3781_v51 = vadd.f32 %v3678_v30, %v7181_v60 }
 0x2da   : > { %v5780_v0 = vpop.f32.mrf.mxu0  ;;  %v5712_v36 = vpop.f32.mrf.mxu1 }
 0x2db   : > { %v4984_v4 = vpack.c.bf16 %v4164_v8, %v4164_v8  ;;  %v4131_v27 = vadd.f32 %v7280_v40, %v4090_v9 }
 0x2dc   : > { %v3986_v61 = vpop.f32.mrf.mxu0  ;;  %v3683_v18 = vpop.f32.mrf.mxu1 }
 0x2dd   : > { %4335 = vst.msk [vmem:[%s7288_s7 + $0x20] sm:$0xf] %vm4326_vm4, %v4984_v4  ;;  %v4165_v15 = vmax.f32 %v4131_v27, 0.0  ;;  %v4091_v2 = vadd.f32 %v3986_v61, %v3780_v48  ;;  %v3782_v25 = vadd.f32 %v3683_v18, %v7187_v50 }
 0x2de   : > { %v5783_v23 = vpop.f32.mrf.mxu0  ;;  %v5715_v41 = vpop.f32.mrf.mxu1 }
 0x2df   : > { %v4985_v47 = vpack.c.bf16 %v4165_v15, %v4165_v15  ;;  %v4132_v43 = vadd.f32 %v7280_v40, %v4091_v2 }
 0x2e0   : > { %v3989_v20 = vpop.f32.mrf.mxu0  ;;  %v3686_v6 = vpop.f32.mrf.mxu1 }
 0x2e1   : > { %4336 = vst.msk [vmem:[%s7288_s7 + $0x24] sm:$0xf] %vm4326_vm4, %v4985_v47  ;;  %v4166_v58 = vmax.f32 %v4132_v43, 0.0  ;;  %v4092_v31 = vadd.f32 %v3989_v20, %v3781_v51  ;;  %v3783_v37 = vadd.f32 %v3686_v6, %v7197_v16 }
 0x2e2   : > { %v5784_v19 = vpop.f32.mrf.mxu0  ;;  %v5716_v56 = vpop.f32.mrf.mxu1 }
 0x2e3   : > { %v4986_v42 = vpack.c.bf16 %v4166_v58, %v4166_v58  ;;  %v4133_v34 = vadd.f32 %v7280_v40, %v4092_v31 }
 0x2e4   : > { %v3994_v38 = vpop.f32.mrf.mxu0  ;;  %v3691_v28 = vpop.f32.mrf.mxu1 }
 0x2e5   : > { %4337 = vst.msk [vmem:[%s7288_s7 + $0x28] sm:$0xf] %vm4326_vm4, %v4986_v42  ;;  %v4167_v60 = vmax.f32 %v4133_v34, 0.0  ;;  %v4093_v45 = vadd.f32 %v3994_v38, %v3782_v25  ;;  %v3784_v12 = vadd.f32 %v3691_v28, %v7203_v10 }
 0x2e6   : > { %v5787_v39 = vpop.f32.mrf.mxu0  ;;  %v5719_v11 = vpop.f32.mrf.mxu1 }
 0x2e7   : > { %v4987_v63 = vpack.c.bf16 %v4167_v60, %v4167_v60  ;;  %v4134_v1 = vadd.f32 %v7280_v40, %v4093_v45 }
 0x2e8   : > { %v3997_v62 = vpop.f32.mrf.mxu0  ;;  %v3694_v13 = vpop.f32.mrf.mxu1 }
 0x2e9   : > { %4338 = vst.msk [vmem:[%s7288_s7 + $0x2c] sm:$0xf] %vm4326_vm4, %v4987_v63  ;;  %v4168_v50 = vmax.f32 %v4134_v1, 0.0  ;;  %v4094_v53 = vadd.f32 %v3997_v62, %v3783_v37  ;;  %v3785_v27 = vadd.f32 %v3694_v13, %v7212_v5 }
 0x2ea   : > { %v5788_v14 = vpop.f32.mrf.mxu0  ;;  %v5720_v30 = vpop.f32.mrf.mxu1 }
 0x2eb   : > { %v4988_v22 = vpack.c.bf16 %v4168_v50, %v4168_v50  ;;  %v4135_v8 = vadd.f32 %v7280_v40, %v4094_v53 }
 0x2ec   : > { %v4002_v9 = vpop.f32.mrf.mxu0  ;;  %v3699_v0 = vpop.f32.mrf.mxu1 }
 0x2ed   : > { %4339 = vst.msk [vmem:[%s7288_s7 + $0x30] sm:$0xf] %vm4326_vm4, %v4988_v22  ;;  %v4169_v16 = vmax.f32 %v4135_v8, 0.0  ;;  %v4095_v48 = vadd.f32 %v4002_v9, %v3784_v12  ;;  %v3786_v47 = vadd.f32 %v3699_v0, %v7218_v26 }
 0x2ee   : > { %v5791_v4 = vpop.f32.mrf.mxu0  ;;  %v5723_v15 = vpop.f32.mrf.mxu1 }
 0x2ef   : > { %v4989_v36 = vpack.c.bf16 %v4169_v16, %v4169_v16  ;;  %v4136_v61 = vadd.f32 %v7280_v40, %v4095_v48 }
 0x2f0   : > { %v4005_v18 = vpop.f32.mrf.mxu0  ;;  %v3702_v2 = vpop.f32.mrf.mxu1 }
 0x2f1   : > { %4340 = vst.msk [vmem:[%s7288_s7 + $0x34] sm:$0xf] %vm4326_vm4, %v4989_v36  ;;  %v4170_v10 = vmax.f32 %v4136_v61, 0.0  ;;  %v4096_v23 = vadd.f32 %v4005_v18, %v3785_v27  ;;  %v3787_v25 = vadd.f32 %v3702_v2, %v7225_v55 }
 0x2f2   : > { %v5792_v51 = vpop.f32.mrf.mxu0  ;;  %v5724_v20 = vpop.f32.mrf.mxu1 }
 0x2f3   : > { %v4990_v43 = vpack.c.bf16 %v4170_v10, %v4170_v10  ;;  %v4137_v41 = vadd.f32 %v7280_v40, %v4096_v23 }
 0x2f4   : > { %v4010_v58 = vpop.f32.mrf.mxu0  ;;  %v3707_v6 = vpop.f32.mrf.mxu1 }
 0x2f5   : > { %4341 = vst.msk [vmem:[%s7288_s7 + $0x38] sm:$0xf] %vm4326_vm4, %v4990_v43  ;;  %v4171_v5 = vmax.f32 %v4137_v41, 0.0  ;;  %v4097_v31 = vadd.f32 %v4010_v58, %v3786_v47  ;;  %v3788_v39 = vadd.f32 %v3707_v6, %v7230_v17 }
 0x2f6   : > { %v5795_v19 = vpop.f32.mrf.mxu0  ;;  %v5727_v56 = vpop.f32.mrf.mxu1 }
 0x2f7   : > { %v4991_v42 = vpack.c.bf16 %v4171_v5, %v4171_v5  ;;  %v4138_v34 = vadd.f32 %v7280_v40, %v4097_v31 }
 0x2f8   : > { %v4013_v38 = vpop.f32.mrf.mxu0  ;;  %v3710_v60 = vpop.f32.mrf.mxu1 }
 0x2f9   : > { %4342 = vst.msk [vmem:[%s7288_s7 + $0x3c] sm:$0xf] %vm4326_vm4, %v4991_v42  ;;  %v4172_v26 = vmax.f32 %v4138_v34, 0.0  ;;  %v4098_v28 = vadd.f32 %v4013_v38, %v3787_v25  ;;  %v3789_v53 = vadd.f32 %v3710_v60, %v7233_v21 }
 0x2fa   : > { %v5796_v45 = vpop.f32.mrf.mxu0  ;;  %v5728_v1 = vpop.f32.mrf.mxu1 }
 0x2fb   : > { %v4992_v37 = vpack.c.bf16 %v4172_v26, %v4172_v26  ;;  %v4139_v63 = vadd.f32 %v7280_v40, %v4098_v28 }
 0x2fc   : > { %v4018_v11 = vpop.f32.mrf.mxu0  ;;  %v3715_v62 = vpop.f32.mrf.mxu1 }
 0x2fd   : > { %4343 = vst.msk [vmem:[%s7288_s7 + $0x40] sm:$0xf] %vm4326_vm4, %v4992_v37  ;;  %v4173_v55 = vmax.f32 %v4139_v63, 0.0  ;;  %v4099_v50 = vadd.f32 %v4018_v11, %v3788_v39  ;;  %v3790_v0 = vadd.f32 %v3715_v62, %v7236_v52 }
 0x2fe   : > { %v5799_v13 = vpop.f32.mrf.mxu0  ;;  %v5731_v22 = vpop.f32.mrf.mxu1 }
 0x2ff   : > { %v4993_v14 = vpack.c.bf16 %v4173_v55, %v4173_v55  ;;  %v4140_v12 = vadd.f32 %v7280_v40, %v4099_v50 }
 0x300   : > { %v4021_v8 = vpop.f32.mrf.mxu0  ;;  %v3718_v30 = vpop.f32.mrf.mxu1 }
 0x301   : > { %4344 = vst.msk [vmem:[%s7288_s7 + $0x44] sm:$0xf] %vm4326_vm4, %v4993_v14  ;;  %v4174_v17 = vmax.f32 %v4140_v12, 0.0  ;;  %v4100_v9 = vadd.f32 %v4021_v8, %v3789_v53  ;;  %v3791_v10 = vadd.f32 %v3718_v30, %v7239_v59 }
 0x302   : > { %v5800_v16 = vpop.f32.mrf.mxu0  ;;  %v5732_v27 = vpop.f32.mrf.mxu1 }
 0x303   : > { %v4994_v48 = vpack.c.bf16 %v4174_v17, %v4174_v17  ;;  %v4141_v4 = vadd.f32 %v7280_v40, %v4100_v9 }
 0x304   : > { %v4026_v36 = vpop.f32.mrf.mxu0  ;;  %v3723_v61 = vpop.f32.mrf.mxu1 }
 0x305   : > { %4345 = vst.msk [vmem:[%s7288_s7 + $0x48] sm:$0xf] %vm4326_vm4, %v4994_v48  ;;  %v4175_v21 = vmax.f32 %v4141_v4, 0.0  ;;  %v4101_v15 = vadd.f32 %v4026_v36, %v3790_v0  ;;  %v3792_v58 = vadd.f32 %v3723_v61, %v7242_v33 }
 0x306   : > { %v5803_v18 = vpop.f32.mrf.mxu0  ;;  %v5735_v51 = vpop.f32.mrf.mxu1 }
 0x307   : > { %v4995_v2 = vpack.c.bf16 %v4175_v21, %v4175_v21  ;;  %v4142_v23 = vadd.f32 %v7280_v40, %v4101_v15 }
 0x308   : > { %v4029_v47 = vpop.f32.mrf.mxu0  ;;  %v3726_v43 = vpop.f32.mrf.mxu1 }
 0x309   : > { %4346 = vst.msk [vmem:[%s7288_s7 + $0x4c] sm:$0xf] %vm4326_vm4, %v4995_v2  ;;  %v4176_v52 = vmax.f32 %v4142_v23, 0.0  ;;  %v4102_v41 = vadd.f32 %v4029_v47, %v3791_v10  ;;  %v3793_v56 = vadd.f32 %v3726_v43, %v7245_v3 }
 0x30a   : > { %v5804_v20 = vpop.f32.mrf.mxu0  ;;  %v5736_v31 = vpop.f32.mrf.mxu1 }
 0x30b   : > { %v4996_v5 = vpack.c.bf16 %v4176_v52, %v4176_v52  ;;  %v4143_v6 = vadd.f32 %v7280_v40, %v4102_v41 }
 0x30c   : > { %v4034_v19 = vpop.f32.mrf.mxu0  ;;  %v3731_v25 = vpop.f32.mrf.mxu1 }
 0x30d   : > { %4347 = vst.msk [vmem:[%s7288_s7 + $0x50] sm:$0xf] %vm4326_vm4, %v4996_v5  ;;  %v4177_v59 = vmax.f32 %v4143_v6, 0.0  ;;  %v4103_v42 = vadd.f32 %v4034_v19, %v3792_v58  ;;  %v3794_v63 = vadd.f32 %v3731_v25, %v7248_v32 }
 0x30e   : > { %v5807_v34 = vpop.f32.mrf.mxu0  ;;  %v5739_v60 = vpop.f32.mrf.mxu1 }
 0x30f   : > { %v4997_v38 = vpack.c.bf16 %v4177_v59, %v4177_v59  ;;  %v4144_v26 = vadd.f32 %v7280_v40, %v4103_v42 }
 0x310   : > { %v4037_v28 = vpop.f32.mrf.mxu0  ;;  %v3734_v45 = vpop.f32.mrf.mxu1 }
 0x311   : > { %4348 = vst.msk [vmem:[%s7288_s7 + $0x54] sm:$0xf] %vm4326_vm4, %v4997_v38  ;;  %v4178_v33 = vmax.f32 %v4144_v26, 0.0  ;;  %v4104_v39 = vadd.f32 %v4037_v28, %v3793_v56  ;;  %v3795_v14 = vadd.f32 %v3734_v45, %v7251_v29 }
 0x312   : > { %v5808_v37 = vpop.f32.mrf.mxu0  ;;  %v5740_v55 = vpop.f32.mrf.mxu1 }
 0x313   : > { %v4998_v1 = vpack.c.bf16 %v4178_v33, %v4178_v33  ;;  %v4145_v11 = vadd.f32 %v7280_v40, %v4104_v39 }
 0x314   : > { %v4042_v62 = vpop.f32.mrf.mxu0  ;;  %v3739_v50 = vpop.f32.mrf.mxu1 }
 0x315   : > { %4349 = vst.msk [vmem:[%s7288_s7 + $0x58] sm:$0xf] %vm4326_vm4, %v4998_v1  ;;  %v4179_v3 = vmax.f32 %v4145_v11, 0.0  ;;  %v4105_v13 = vadd.f32 %v4042_v62, %v3794_v63  ;;  %v3796_v0 = vadd.f32 %v3739_v50, %v7254_v7 }
 0x316   : > { %v5811_v53 = vpop.f32.mrf.mxu0  ;;  %v5743_v8 = vpop.f32.mrf.mxu1 }
 0x317   : > { %v4999_v12 = vpack.c.bf16 %v4179_v3, %v4179_v3  ;;  %v4146_v22 = vadd.f32 %v7280_v40, %v4105_v13 }
 0x318   : > { %v4045_v17 = vpop.f32.mrf.mxu0  ;;  %v3742_v30 = vpop.f32.mrf.mxu1 }
 0x319   : > { %4350 = vst.msk [vmem:[%s7288_s7 + $0x5c] sm:$0xf] %vm4326_vm4, %v4999_v12  ;;  %v4180_v32 = vmax.f32 %v4146_v22, 0.0  ;;  %v4106_v9 = vadd.f32 %v4045_v17, %v3795_v14  ;;  %v3797_v18 = vadd.f32 %v3742_v30, %v7257_v49 }
 0x31a   : > { %v5812_v16 = vpop.f32.mrf.mxu0  ;;  %v5744_v27 = vpop.f32.mrf.mxu1 }
 0x31b   : > { %v5000_v48 = vpack.c.bf16 %v4180_v32, %v4180_v32  ;;  %v4147_v4 = vadd.f32 %v7280_v40, %v4106_v9 }
 0x31c   : > { %v4050_v36 = vpop.f32.mrf.mxu0  ;;  %v3747_v21 = vpop.f32.mrf.mxu1 }
 0x31d   : > { %4351 = vst.msk [vmem:[%s7288_s7 + $0x60] sm:$0xf] %vm4326_vm4, %v5000_v48  ;;  %v4181_v29 = vmax.f32 %v4147_v4, 0.0  ;;  %v4107_v61 = vadd.f32 %v4050_v36, %v3796_v0  ;;  %v3798_v41 = vadd.f32 %v3747_v21, %v7260_v44 }
 0x31e   : > { %v5815_v15 = vpop.f32.mrf.mxu0  ;;  %v5747_v23 = vpop.f32.mrf.mxu1 }
 0x31f   : > { %v5001_v10 = vpack.c.bf16 %v4181_v29, %v4181_v29  ;;  %v4148_v2 = vadd.f32 %v7280_v40, %v4107_v61 }
 0x320   : > { %v4053_v51 = vpop.f32.mrf.mxu0  ;;  %v3750_v47 = vpop.f32.mrf.mxu1 }
 0x321   : > { %4352 = vst.msk [vmem:[%s7288_s7 + $0x64] sm:$0xf] %vm4326_vm4, %v5001_v10  ;;  %v4182_v7 = vmax.f32 %v4148_v2, 0.0  ;;  %v4108_v52 = vadd.f32 %v4053_v51, %v3797_v18  ;;  %v3799_v25 = vadd.f32 %v3750_v47, %v7263_v35 }
 0x322   : > { %v5816_v43 = vpop.f32.mrf.mxu0  ;;  %v5748_v5 = vpop.f32.mrf.mxu1 }
 0x323   : > { %v5002_v20 = vpack.c.bf16 %v4182_v7, %v4182_v7  ;;  %v4149_v58 = vadd.f32 %v7280_v40, %v4108_v52 }
 0x324   : > { %v4058_v6 = vpop.f32.mrf.mxu0  ;;  %v3755_v31 = vpop.f32.mrf.mxu1 }
 0x325   : > { %4353 = vst.msk [vmem:[%s7288_s7 + $0x68] sm:$0xf] %vm4326_vm4, %v5002_v20  ;;  %v4183_v49 = vmax.f32 %v4149_v58, 0.0  ;;  %v4109_v19 = vadd.f32 %v4058_v6, %v3798_v41  ;;  %v3800_v33 = vadd.f32 %v3755_v31, %v7266_v54 }
 0x326   : > { %v5819_v59 = vpop.f32.mrf.mxu0  ;;  %v5751_v56 = vpop.f32.mrf.mxu1 }
 0x327   : > { %v5003_v42 = vpack.c.bf16 %v4183_v49, %v4183_v49  ;;  %v4150_v34 = vadd.f32 %v7280_v40, %v4109_v19 }
 0x328   : > { %v4061_v38 = vpop.f32.mrf.mxu0  ;;  %v3758_v26 = vpop.f32.mrf.mxu1 }
 0x329   : > { %4354 = vst.msk [vmem:[%s7288_s7 + $0x6c] sm:$0xf] %vm4326_vm4, %v5003_v42  ;;  %v4184_v44 = vmax.f32 %v4150_v34, 0.0  ;;  %v4110_v60 = vadd.f32 %v4061_v38, %v3799_v25  ;;  %v3801_v62 = vadd.f32 %v3758_v26, %v7269_v24 }
 0x32a   : > { %v5820_v28 = vpop.f32.mrf.mxu0  ;;  %v5752_v37 = vpop.f32.mrf.mxu1 }
 0x32b   : > { %v5004_v45 = vpack.c.bf16 %v4184_v44, %v4184_v44  ;;  %v4151_v39 = vadd.f32 %v7280_v40, %v4110_v60 }
 0x32c   : > { %v4066_v63 = vpop.f32.mrf.mxu0  ;;  %v3763_v1 = vpop.f32.mrf.mxu1 }
 0x32d   : > { %4355 = vst.msk [vmem:[%s7288_s7 + $0x70] sm:$0xf] %vm4326_vm4, %v5004_v45  ;;  %v4185_v35 = vmax.f32 %v4151_v39, 0.0  ;;  %v4111_v11 = vadd.f32 %v4066_v63, %v3800_v33  ;;  %v3802_v8 = vadd.f32 %v3763_v1, %v7272_v57 }
 0x32e   : > { %v5823_v55 = vpop.f32.mrf.mxu0  ;;  %v5755_v13 = vpop.f32.mrf.mxu1 }
 0x32f   : > { %v5005_v3 = vpack.c.bf16 %v4185_v35, %v4185_v35  ;;  %v4152_v50 = vadd.f32 %v7280_v40, %v4111_v11 }
 0x330   : > { %v4069_v53 = vpop.f32.mrf.mxu0  ;;  %v3766_v14 = vpop.f32.mrf.mxu1 }
 0x331   : > { %4356 = vst.msk [vmem:[%s7288_s7 + $0x74] sm:$0xf] %vm4326_vm4, %v5005_v3  ;;  %v4186_v54 = vmax.f32 %v4152_v50, 0.0  ;;  %v4112_v12 = vadd.f32 %v4069_v53, %v3801_v62  ;;  %v3803_v48 = vadd.f32 %v3766_v14, %v7274_v46 }
 0x332   : > { %v5824_v22 = vpop.f32.mrf.mxu0  ;;  %v5756_v30 = vpop.f32.mrf.mxu1 }
 0x333   : > { %v5006_v17 = vpack.c.bf16 %v4186_v54, %v4186_v54  ;;  %v4153_v32 = vadd.f32 %v7280_v40, %v4112_v12 }
 0x334   : > { %v4074_v24 = vpop.f32.mrf.mxu0 }
 0x335   : > { %4357 = vst.msk [vmem:[%s7288_s7 + $0x78] sm:$0xf] %vm4326_vm4, %v5006_v17  ;;  %v4187_v9 = vmax.f32 %v4153_v32, 0.0  ;;  %v4113_v16 = vadd.f32 %v4074_v24, %v3802_v8 }
 0x336   : > { %v5827_v0 = vpop.f32.mrf.mxu0 }
 0x337   : > { %v5007_v4 = vpack.c.bf16 %v4187_v9, %v4187_v9  ;;  %v4154_v27 = vadd.f32 %v7280_v40, %v4113_v16 }
 0x338   : > { %v4077_v36 = vpop.f32.mrf.mxu0 }
 0x339   : > { %4358 = vst.msk [vmem:[%s7288_s7 + $0x7c] sm:$0xf] %vm4326_vm4, %v5007_v4  ;;  %v4188_v57 = vmax.f32 %v4154_v27, 0.0  ;;  %v4114_v29 = vadd.f32 %v4077_v36, %v3803_v48 }
 0x33a   : > { %v5828_v21 = vpop.f32.mrf.mxu0 }
 0x33b   : > { %v5008_v61 = vpack.c.bf16 %v4188_v57, %v4188_v57  ;;  %v4155_v15 = vadd.f32 %v7280_v40, %v4114_v29 }
 0x33d   : > { %4359 = vst.msk [vmem:[%s7288_s7 + $0x80] sm:$0xf] %vm4326_vm4, %v5008_v61  ;;  %v4189_v18 = vmax.f32 %v4155_v15, 0.0 }
 0x33f   : > { %v5009_v10 = vpack.c.bf16 %v4189_v18, %v4189_v18 }
 0x341   : > { %4360 = vst.msk [vmem:[%s7288_s7 + $0x84] sm:$0xf] %vm4326_vm4, %v5009_v10 }
 0x342 PF: > { %s13_s12 = sadd.s32 1, %s6013_s12  }
 0x343   : > { %p10_p4 = scmp.ge.s32.totalorder %s13_s12, 4  }
 0x345   :  { %12 = sbr.rel (!%p10_p4) target bundleno = 1 (0x1), region = 73 }

// kernel: critic_forward.7
= control target key start
LH: loop header
LB: loop body
LE: loop exit
PB: predicated region body
PF: predicated region fallthrough
CT: control target
= control target key end

     0   :  { %s2605_s12 = smov 0   ;;  %s3088_s0 = inlined_call_operand.vmem [shape: bf16[2,4,91,64], index: 0, kind: input, shape index: {}]   ;;  %s3089_s1 = inlined_call_operand.vmem [shape: bf16[9,64,64], index: 1, kind: input, shape index: {}]   ;;  %s3090_s2 = inlined_call_operand.vmem [shape: f32[1,64], index: 2, kind: input, shape index: {}]   ;;  %s3091_s3 = inlined_call_operand.vmem [shape: bf16[2,72,64], index: 3, kind: output, shape index: {}]  }
   0x1 LB: > { %s1884_s13 = sadd.s32 4294967295, %s2581_s12   ;;  %p1888_p0 = scmp.ge.s32.totalorder %s2581_s12, 1  ;;  %s2581_s12 = sphi %s2605_s12, %s13_s12  }
   0x2   : > { %p137_p1 = scmp.lt.s32.totalorder %s2581_s12, 3 }
   0x4   : > { %p138_p2 = pnand %p1888_p0, %p137_p1 }
   0x5   : > { %p161_p3 = scmp.lt.s32.totalorder (!%p138_p2), %s1884_s13, 1 }
   0x6   : > { %141 = sbr.rel (%p138_p2) target bundleno = 408 (0x198), region = 32 }
   0xb   : > { %v2498_v0 = vld [vmem:[%s3089_s1 + $0x38] sm:$0xff]   ;;  %v2583_v1 = vmov 0.0   ;;  %v2499_v2 = vld [vmem:[%s3089_s1 + $0x30] sm:$0xff]   ;;  %vm2584_vm0 = vmmov 0   ;;  %s3093_s13 = smov (!%p161_p3, %s1884_s13), 1  ;;  %v2500_v3 = vld [vmem:[%s3089_s1 + $0x28] sm:$0xff]  }
   0xc   : > { %2478 = vmatprep.subr.bf16.mxu1 %v2583_v1  ;;  %2226 = vmatprep.subr.bf16.mxu0 %v2583_v1  ;;  %s2486_s20 = smul.u32 192, %s3093_s13  ;;  %v2501_v4 = vld [vmem:[%s3089_s1 + $0x20] sm:$0xff]   ;;  %v2503_v6 = vld [vmem:[%s3089_s1 + $0x18] sm:$0xff]   ;;  %vm255_vm1 = vcmask 523264   ;;  %v2506_v9 = vld [vmem:[%s3089_s1 + $0x10] sm:$0xff]   ;;  %vm1627_vm3 = vcmask 1046528  }
   0xd   : > { %2482 = vmatpush3.bf16.msra.mxu1 %v2498_v0  ;;  %2227 = vmatpush3.bf16.msra.mxu0 %v2498_v0  ;;  %v2505_v8 = vld [vmem:[%s3089_s1 + $0x58] sm:$0xff]   ;;  %v2508_v10 = vld [vmem:[%s3089_s1 + $0x50] sm:$0xff]   ;;  %v2510_v15 = vld [vmem:[%s3089_s1 + $0x8] sm:$0xff]   ;;  %vm521_vm2 = vsmask.f32 7424  ;;  %s2487_s18 = smul.u32 36, %s3093_s13 }
   0xe   : > { %2479 = vmatprep.subr.bf16.mxu1 %v2583_v1  ;;  %2228 = vmatprep.subr.bf16.mxu0 %v2583_v1  ;;  %s2638_s23 = scalar_lea.vmem %s3088_s0, %s2486_s20  ;;  %v2511_v17 = vld [vmem:[%s3089_s1 + $0x48] sm:$0xff]   ;;  %v2513_v21 = vld [vmem:[%s3089_s1 + $0x40] sm:$0xff]   ;;  %v2519_v27 = vld [vmem:[%s3089_s1 + $0x98] sm:$0xff]   ;;  %vm1819_vm4 = vcmask 519168  }
   0xf   : > { %2242 = vmatprep.mubr.msk.bf16.mxu1 %vm2584_vm0, %v2583_v1  ;;  %2234 = vmatprep.mubr.msk.bf16.mxu0 %vm2584_vm0, %v2583_v1  ;;  %v2502_v5 = vld [vmem:[%s2638_s23 + $0x40] sm:$0xff]   ;;  %v2504_v7 = vld [vmem:[%s2638_s23 + $0x30] sm:$0xff]   ;;  %v2516_v12 = vld [vmem:[%s2638_s23 + $0x8] sm:$0xff]   ;;  %s3042_s21 = scalar_lea.vmem %s3091_s3, %s2487_s18 }
  0x10   : > { %v2515_v11 = vld [vmem:[%s2638_s23] sm:$0xff]   ;;  %v2507_v13 = vld [vmem:[%s2638_s23 + $0x48] sm:$0xff]   ;;  %v2509_v14 = vld [vmem:[%s2638_s23 + $0x38] sm:$0xff]   ;;  %v530_v20 = vshll.u32 %v2516_v12, 16  ;;  %v534_v29 = vshrl.u32 %v2516_v12, 16 }
  0x11   : > { %2483 = vmatpush3.bf16.msra.mxu1 %v2499_v2  ;;  %2229 = vmatpush3.bf16.msra.mxu0 %v2499_v2  ;;  %v525_v16 = vshll.u32 %v2515_v11, 16  ;;  %v523_v18 = vshrl.u32 %v2515_v11, 16  ;;  %v2514_v22 = vld [vmem:[%s3089_s1] sm:$0xff]   ;;  %v2520_v25 = vld [vmem:[%s2638_s23 + $0x10] sm:$0xff]   ;;  %v2523_v31 = vld [vmem:[%s2638_s23 + $0x18] sm:$0xff]  }
  0x12   : > { %2480 = vmatprep.subr.bf16.mxu1 %v2583_v1  ;;  %2230 = vmatprep.subr.bf16.mxu0 %v2583_v1  ;;  %v532_v24 = vrot.slane %v530_v20, 1  ;;  %v2512_v26 = vld [vmem:[%s2638_s23 + $0x50] ss:$0 sps:$4 sm:$0xff]   ;;  %v538_v30 = vshll.u32 %v2520_v25, 16  ;;  %v2517_v35 = vld [vmem:[%s2638_s23] sm:$0xff]   ;;  %v2518_v36 = vld [vmem:[%s3089_s1 + $0x78] sm:$0xff]  }
  0x13   : > { %v527_v19 = vrot.slane %v525_v16, 1  ;;  %v2524_v34 = vld [vmem:[%s3089_s1 + $0x90] sm:$0xff]   ;;  %v542_v38 = vshrl.u32 %v2520_v25, 16  ;;  %v546_v39 = vshll.u32 %v2523_v31, 16  ;;  %v2528_v40 = vld [vmem:[%s3089_s1 + $0x88] sm:$0xff]   ;;  %v2532_v45 = vld [vmem:[%s3089_s1 + $0x80] sm:$0xff]  }
  0x14   : > { %v536_v32 = vor.u32 %v534_v29, %v532_v24  ;;  %v540_v33 = vrot.slane %v538_v30, 1  ;;  %v2526_v41 = vld [vmem:[%s2638_s23 + $0x20] sm:$0x1f]   ;;  %v2522_v42 = vld [vmem:[%s3089_s1 + $0x70] sm:$0xff]   ;;  %v2521_v46 = vld [vmem:[%s2638_s23 + $0x8] sm:$0xff]   ;;  %v550_v48 = vshrl.u32 %v2523_v31, 16 }
  0x15   : > { %2484 = vmatpush3.bf16.msra.mxu1 %v2500_v3  ;;  %2231 = vmatpush3.bf16.msra.mxu0 %v2500_v3  ;;  %v528_v23 = vor.u32 %v527_v19, %v523_v18  ;;  %v548_v44 = vrot.slane %v546_v39, 1  ;;  %v554_v49 = vshll.u32 %v2526_v41, 16  ;;  %v2527_v50 = vld [vmem:[%s3089_s1 + $0x68] sm:$0xff]   ;;  %v2530_v53 = vld [vmem:[%s3089_s1 + $0x60] sm:$0xff]   ;;  %v2525_v54 = vld [vmem:[%s2638_s23 + $0x10] sm:$0xff]   ;;  %v558_v56 = vshrl.u32 %v2526_v41, 16 }
  0x16   : > { %2481 = vmatprep.subr.bf16.mxu1 %v2583_v1  ;;  %2232 = vmatprep.subr.bf16.mxu0 %v2583_v1  ;;  %v541_v37 = vsel %vm521_vm2, %v536_v32, %v540_v33  ;;  %v544_v43 = vor.u32 %v542_v38, %v540_v33  ;;  %v2529_v57 = vld [vmem:[%s2638_s23 + $0x18] sm:$0xff]   ;;  %v2531_v59 = vld [vmem:[%s2638_s23 + $0x20] ss:$0 sps:$4 sm:$0xff]   ;;  %v2533_v60 = vld [vmem:[%s2638_s23 + $0x90] sm:$0xff]  }
  0x17   : > { %v533_v28 = vsel %vm521_vm2, %v528_v23, %v532_v24  ;;  %v552_v51 = vor.u32 %v550_v48, %v548_v44  ;;  %v556_v52 = vrot.slane %v554_v49, 1  ;;  %v2536_v61 = vld [vmem:[%s3089_s1 + $0xd8] sm:$0xff]   ;;  %v2541_v62 = vld [vmem:[%s3089_s1 + $0xd0] sm:$0xff]   ;;  %v2534_v63 = vld [vmem:[%s2638_s23 + $0x60] sm:$0xff]  }
  0x18   : > { %v549_v47 = vsel %vm521_vm2, %v544_v43, %v548_v44  ;;  %v2537_v0 = vld [vmem:[%s2638_s23 + $0x98] sm:$0xff]   ;;  %v2545_v3 = vld [vmem:[%s3089_s1 + $0xc8] sm:$0xff]   ;;  %v2542_v12 = vld [vmem:[%s2638_s23 + $0x70] sm:$0xff]  }
  0x19   : > { %2485 = vmatpush3.bf16.msra.mxu1 %v2501_v4  ;;  %2233 = vmatpush3.bf16.msra.mxu0 %v2501_v4  ;;  %v557_v55 = vsel %vm521_vm2, %v552_v51, %v556_v52  ;;  %v560_v58 = vor.u32 %v558_v56, %v556_v52  ;;  %v2535_v2 = vld [vmem:[%s3089_s1 + $0xb8] sm:$0xff]   ;;  %v2539_v4 = vld [vmem:[%s3089_s1 + $0xb0] sm:$0xff]   ;;  %v2826_v11 = vld [vmem:[%s2638_s23 + $0x8] sm:$0xf] }
  0x1a   : > { %2254 = vmatprep.subr.bf16.mxu1 %v2583_v1  ;;  %2282 = vmatprep.subr.bf16.mxu0 %v2583_v1  ;;  %v2547_v18 = vld [vmem:[%s2638_s23 + $0xb0] ss:$0 sps:$4 sm:$0xff]   ;;  %v2554_v25 = vld [vmem:[%s2638_s23 + $0x68] sm:$0xff]   ;;  %v2870_v41 = vld [vmem:[%s2638_s23 + $0x1c] sm:$0xff]  }
  0x1b   : > { %v1057_v33 = vshll.u32 %v2554_v25, 16  ;;  %v1061_v43 = vshrl.u32 %v2554_v25, 16  ;;  %v1276_v49 = vshll.u32 %v2870_v41, 16  ;;  %v2562_v56 = vld [vmem:[%s2638_s23 + $0x78] sm:$0xff]  }
  0x1c   : > { %2243 = vmatmul.mubr.msk.bf16.vlgmr.msra.gmra.mxu1 %vm255_vm1, %v2502_v5  ;;  %2235 = vmatmul.mubr.msk.bf16.vlgmr.msra.gmra.mxu0 %vm255_vm1, %v2504_v7  ;;  %v2550_v5 = vld [vmem:[%s3089_s1 + $0xc0] sm:$0xff]  }
  0x1d   : > { %2255 = vmatpush3.bf16.msra.mxu1 %v2503_v6  ;;  %2283 = vmatpush3.bf16.msra.mxu0 %v2505_v8  ;;  %v2538_v6 = vld [vmem:[%s2638_s23 + $0x68] sm:$0xff]   ;;  %v2540_v7 = vld [vmem:[%s2638_s23 + $0xa0] sm:$0xff]   ;;  %v1059_v38 = vrot.slane %v1057_v33, 1 }
  0x1e   : > { %2256 = vmatprep.subr.bf16.mxu1 %v2583_v1  ;;  %2246 = vmatprep.mubr.msk.bf16.mxu1 %vm2584_vm0, %v2583_v1  ;;  %v2544_v8 = vld [vmem:[%s3089_s1 + $0xa8] sm:$0xff]  }
  0x1f   : > { %2284 = vmatprep.subr.bf16.mxu0 %v2583_v1  ;;  %2238 = vmatprep.mubr.msk.bf16.mxu0 %vm2584_vm0, %v2583_v1  ;;  %v1063_v51 = vor.u32 %v1061_v43, %v1059_v38  ;;  %v2573_v43 = vld [vmem:[%s2638_s23 + $0x4c] sm:$0xff]  }
  0x21   : > { %2257 = vmatpush3.bf16.msra.mxu1 %v2506_v9  ;;  %2285 = vmatpush3.bf16.msra.mxu0 %v2508_v10  ;;  %v2548_v9 = vld [vmem:[%s3089_s1 + $0xa0] sm:$0xff]  }
  0x22   : > { %2258 = vmatprep.subr.bf16.mxu1 %v2583_v1  ;;  %2286 = vmatprep.subr.bf16.mxu0 %v2583_v1  ;;  %v1208_v10 = vld [vmem:[%s2638_s23 + $0x4] sm:$0xf] }
  0x24   : > { %2247 = vmatmul.mubr.msk.bf16.gmra.mxu1 %vm255_vm1, %v2507_v13  ;;  %2239 = vmatmul.mubr.msk.bf16.gmra.mxu0 %vm255_vm1, %v2509_v14  ;;  %v2543_v13 = vld [vmem:[%s2638_s23 + $0xa8] sm:$0xff]   ;;  %v2060_v14 = vcombine.low %v1208_v10, %v2826_v11 }
  0x25   : > { %2259 = vmatpush3.bf16.msra.mxu1 %v2510_v15  ;;  %2287 = vmatpush3.bf16.msra.mxu0 %v2511_v17  ;;  %v2841_v15 = vld [vmem:[%s2638_s23 + $0xc] sm:$0xff]   ;;  %v2546_v17 = vld [vmem:[%s2638_s23 + $0x78] sm:$0xff]  }
  0x26   : > { %2250 = vmatprep.mubr.msk.bf16.mxu1 %vm2584_vm0, %v2583_v1  ;;  %2288 = vmatprep.subr.bf16.mxu0 %v2583_v1  ;;  %v1255_v16 = vshll.u32 %v2060_v14, 16  ;;  %v1253_v19 = vshrl.u32 %v2060_v14, 16  ;;  %v1264_v30 = vshrl.u32 %v2841_v15, 16  ;;  %v1629_v25 = vrot.slane %v2841_v15, 1 }
  0x27   : > { %2260 = vmatprep.subr.bf16.mxu1 %v2583_v1  ;;  %2290 = vmatprep.mubr.msk.bf16.mxu0 %vm2584_vm0, %v2583_v1 }
  0x28   : > { %v1257_v20 = vrot.slane %v1255_v16, 1 }
  0x29   : > { %2289 = vmatpush3.bf16.msra.mxu0 %v2513_v21  ;;  %2261 = vmatpush3.bf16.msra.mxu1 %v2514_v22  ;;  %v1260_v21 = vshll.u32 %v2841_v15, 16  ;;  %v2553_v22 = vld [vmem:[%s2638_s23 + $0x60] sm:$0xff]  }
  0x2a   : > { %2310 = vmatprep.subr.bf16.mxu1 %v2583_v1  ;;  %2338 = vmatprep.subr.bf16.mxu0 %v2583_v1  ;;  %v1258_v23 = vor.u32 %v1257_v20, %v1253_v19  ;;  %v1050_v29 = vshrl.u32 %v2553_v22, 16 }
  0x2b   : > { %v1262_v24 = vrot.slane %v1260_v21, 1 }
  0x2c   : > { %2251 = vmatmul.mubr.msk.bf16.gmra.mxu1 %vm255_vm1, %v2512_v26  ;;  %2291 = vmatmul.mubr.msk.bf16.vlgmr.msra.gmra.mxu0 %vm255_vm1, %v533_v28  ;;  %v1052_v26 = vshll.u32 %v2553_v22, 16  ;;  %v2549_v28 = vld [vmem:[%s2638_s23 + $0x80] ss:$0 sps:$4 sm:$0xff]   ;;  %v2570_v22 = vld [vmem:[%s2638_s23 + $0x34] sm:$0xff]  }
  0x2d   : > { %2262 = vmatprep.mubr.msk.bf16.mxu1 %vm2584_vm0, %v2583_v1  ;;  %2339 = vmatpush3.bf16.msra.mxu0 %v2519_v27  ;;  %v2855_v27 = vld [vmem:[%s2638_s23 + $0x14] sm:$0xff]   ;;  %v1263_v31 = vsel %vm521_vm2, %v1258_v23, %v1262_v24  ;;  %v1266_v39 = vor.u32 %v1264_v30, %v1262_v24  ;;  %v1456_v30 = vshrl.u32 %v2570_v22, 16 }
  0x2e   : > { %2294 = vmatprep.mubr.msk.bf16.mxu0 %vm2584_vm0, %v2583_v1  ;;  %2340 = vmatprep.subr.bf16.mxu0 %v2583_v1  ;;  %v1054_v32 = vrot.slane %v1052_v26, 1  ;;  %v1272_v48 = vshrl.u32 %v2855_v27, 16  ;;  %v2571_v26 = vld [vmem:[%s2638_s23 + $0x3c] sm:$0xff]  }
  0x31   : > { %2341 = vmatpush3.bf16.msra.mxu0 %v2524_v34  ;;  %v2556_v34 = vld [vmem:[%s3089_s1 + $0x118] sm:$0xff]  }
  0x32   : > { %2342 = vmatprep.subr.bf16.mxu0 %v2583_v1 }
  0x34   : > { %2263 = vmatmul.mubr.msk.bf16.vlgmr.msra.gmra.mxu1 %vm255_vm1, %v2517_v35  ;;  %2295 = vmatmul.mubr.msk.bf16.gmra.mxu0 %vm255_vm1, %v541_v37  ;;  %v1268_v35 = vshll.u32 %v2855_v27, 16  ;;  %v1055_v37 = vor.u32 %v1054_v32, %v1050_v29  ;;  %v1463_v32 = vshll.u32 %v2571_v26, 16 }
  0x35   : > { %2311 = vmatpush3.bf16.msra.mxu1 %v2518_v36  ;;  %2266 = vmatprep.mubr.msk.bf16.mxu1 %vm2584_vm0, %v2583_v1  ;;  %v2558_v36 = vld [vmem:[%s2638_s23 + $0x70] sm:$0xff]  }
  0x36   : > { %2312 = vmatprep.subr.bf16.mxu1 %v2583_v1  ;;  %2298 = vmatprep.mubr.msk.bf16.mxu0 %vm2584_vm0, %v2583_v1  ;;  %v1065_v44 = vshll.u32 %v2558_v36, 16  ;;  %v1465_v15 = vrot.slane %v1463_v32, 1 }
  0x37   : > { %2343 = vmatpush3.bf16.msra.mxu0 %v2528_v40  ;;  %v1270_v40 = vrot.slane %v1268_v35, 1  ;;  %v2572_v35 = vld [vmem:[%s2638_s23 + $0x44] sm:$0xff]  }
  0x38   : > { %2344 = vmatprep.subr.bf16.mxu0 %v2583_v1  ;;  %v1067_v52 = vrot.slane %v1065_v44, 1 }
  0x39   : > { %2313 = vmatpush3.bf16.msra.mxu1 %v2522_v42  ;;  %v2561_v42 = vld [vmem:[%s3089_s1 + $0x110] sm:$0xff]  }
  0x3a   : > { %2314 = vmatprep.subr.bf16.mxu1 %v2583_v1 }
  0x3b   : > { %2345 = vmatpush3.bf16.msra.mxu0 %v2532_v45  ;;  %v1060_v45 = vsel %vm521_vm2, %v1055_v37, %v1059_v38  ;;  %v1467_v38 = vshrl.u32 %v2571_v26, 16 }
  0x3c   : > { %2267 = vmatmul.mubr.msk.bf16.gmra.mxu1 %vm255_vm1, %v2521_v46  ;;  %2299 = vmatmul.mubr.msk.bf16.gmra.mxu0 %vm255_vm1, %v549_v47  ;;  %v2555_v46 = vld [vmem:[%s3089_s1 + $0xf8] sm:$0xff]   ;;  %v1271_v47 = vsel %vm521_vm2, %v1266_v39, %v1270_v40  ;;  %v1471_v39 = vshll.u32 %v2572_v35, 16 }
  0x3d   : > { %2270 = vmatprep.mubr.msk.bf16.mxu1 %vm2584_vm0, %v2583_v1  ;;  %2302 = vmatprep.mubr.msk.bf16.mxu0 %vm2584_vm0, %v2583_v1 }
  0x3e   : > { %2315 = vmatpush3.bf16.msra.mxu1 %v2527_v50  ;;  %2394 = vmatprep.subr.bf16.mxu0 %v2583_v1  ;;  %v2565_v50 = vld [vmem:[%s3089_s1 + $0x108] sm:$0xff]  }
  0x3f   : > { %2316 = vmatprep.subr.bf16.mxu1 %v2583_v1 }
  0x42   : > { %2317 = vmatpush3.bf16.msra.mxu1 %v2530_v53  ;;  %v2559_v53 = vld [vmem:[%s3089_s1 + $0xf0] sm:$0xff]  }
  0x43   : > { %2366 = vmatprep.subr.bf16.mxu1 %v2583_v1 }
  0x44   : > { %2271 = vmatmul.mubr.msk.bf16.gmra.mxu1 %vm255_vm1, %v2525_v54  ;;  %2303 = vmatmul.mubr.msk.bf16.gmra.mxu0 %vm255_vm1, %v557_v55  ;;  %v1274_v54 = vor.u32 %v1272_v48, %v1270_v40  ;;  %v1278_v55 = vrot.slane %v1276_v49, 1  ;;  %v1469_v40 = vor.u32 %v1467_v38, %v1465_v15 }
  0x45   : > { %2274 = vmatprep.mubr.msk.bf16.mxu1 %vm2584_vm0, %v2583_v1  ;;  %2306 = vmatprep.mubr.msk.bf16.mxu0 %vm2584_vm0, %v2583_v1 }
  0x4c   : > { %2275 = vmatmul.mubr.msk.bf16.gmra.mxu1 %vm255_vm1, %v2529_v57  ;;  %2307 = vmatmul.mubr.msk.bf16.gmra.mxu0 %vm255_vm1, %v560_v58  ;;  %v2898_v57 = vld [vmem:[%s2638_s23 + $0x24] sm:$0x1f]  }
  0x4d   : > { %2278 = vmatprep.mubr.msk.bf16.mxu1 %vm2584_vm0, %v2583_v1  ;;  %2346 = vmatprep.mubr.msk.bf16.mxu0 %vm2584_vm0, %v2583_v1  ;;  %v2568_v58 = vld [vmem:[%s3089_s1 + $0x100] sm:$0xff]   ;;  %v1288_v14 = vshrl.u32 %v2898_v57, 16 }
  0x54   : > { %2279 = vmatmul.mubr.msk.bf16.gmra.mxu1 %vm255_vm1, %v2531_v59  ;;  %2347 = vmatmul.mubr.msk.bf16.vlgmr.msra.gmra.mxu0 %vm255_vm1, %v2533_v60  ;;  %v1068_v59 = vsel %vm521_vm2, %v1063_v51, %v1067_v52  ;;  %v1069_v60 = vshrl.u32 %v2558_v36, 16 }
  0x55   : > { %2318 = vmatprep.mubr.msk.bf16.mxu1 %vm2584_vm0, %v2583_v1  ;;  %2395 = vmatpush3.bf16.msra.mxu0 %v2536_v61  ;;  %v1279_v61 = vsel %vm521_vm2, %v1274_v54, %v1278_v55 }
  0x56   : > { %2350 = vmatprep.mubr.msk.bf16.mxu0 %vm2584_vm0, %v2583_v1  ;;  %2396 = vmatprep.subr.bf16.mxu0 %v2583_v1 }
  0x59   : > { %2397 = vmatpush3.bf16.msra.mxu0 %v2541_v62  ;;  %v1073_v62 = vshll.u32 %v2562_v56, 16 }
  0x5a   : > { %2398 = vmatprep.subr.bf16.mxu0 %v2583_v1 }
  0x5c   : > { %2319 = vmatmul.mubr.msk.bf16.vlgmr.msra.gmra.mxu1 %vm255_vm1, %v2534_v63  ;;  %2351 = vmatmul.mubr.msk.bf16.gmra.mxu0 %vm255_vm1, %v2537_v0  ;;  %v1280_v63 = vshrl.u32 %v2870_v41, 16  ;;  %v1284_v0 = vshll.u32 %v2898_v57, 16 }
  0x5d   : > { %2367 = vmatpush3.bf16.msra.mxu1 %v2535_v2  ;;  %2322 = vmatprep.mubr.msk.bf16.mxu1 %vm2584_vm0, %v2583_v1  ;;  %v2564_v2 = vld [vmem:[%s3089_s1 + $0xe8] sm:$0xff]  }
  0x5e   : > { %2368 = vmatprep.subr.bf16.mxu1 %v2583_v1  ;;  %2354 = vmatprep.mubr.msk.bf16.mxu0 %vm2584_vm0, %v2583_v1 }
  0x5f   : > { %2399 = vmatpush3.bf16.msra.mxu0 %v2545_v3  ;;  %v1071_v3 = vor.u32 %v1069_v60, %v1067_v52 }
  0x60   : > { %2400 = vmatprep.subr.bf16.mxu0 %v2583_v1 }
  0x61   : > { %2369 = vmatpush3.bf16.msra.mxu1 %v2539_v4  ;;  %v1075_v4 = vrot.slane %v1073_v62, 1 }
  0x62   : > { %2370 = vmatprep.subr.bf16.mxu1 %v2583_v1 }
  0x63   : > { %2401 = vmatpush3.bf16.msra.mxu0 %v2550_v5  ;;  %v1282_v5 = vor.u32 %v1280_v63, %v1278_v55 }
  0x64   : > { %2323 = vmatmul.mubr.msk.bf16.gmra.mxu1 %vm255_vm1, %v2538_v6  ;;  %2355 = vmatmul.mubr.msk.bf16.gmra.mxu0 %vm255_vm1, %v2540_v7  ;;  %v1286_v6 = vrot.slane %v1284_v0, 1  ;;  %v2566_v7 = vld [vmem:[%s2638_s23 + $0x80] sm:$0x1f]  }
  0x65   : > { %2326 = vmatprep.mubr.msk.bf16.mxu1 %vm2584_vm0, %v2583_v1  ;;  %2358 = vmatprep.mubr.msk.bf16.mxu0 %vm2584_vm0, %v2583_v1  ;;  %v1085_v23 = vshrl.u32 %v2566_v7, 16 }
  0x66   : > { %2371 = vmatpush3.bf16.msra.mxu1 %v2544_v8  ;;  %2450 = vmatprep.subr.bf16.mxu0 %v2583_v1  ;;  %v2567_v8 = vld [vmem:[%s3089_s1 + $0xe0] sm:$0xff]   ;;  %v1287_v10 = vsel %vm521_vm2, %v1282_v5, %v1286_v6  ;;  %v1290_v19 = vor.u32 %v1288_v14, %v1286_v6 }
  0x67   : > { %2372 = vmatprep.subr.bf16.mxu1 %v2583_v1 }
  0x6a   : > { %2373 = vmatpush3.bf16.msra.mxu1 %v2548_v9  ;;  %v1076_v9 = vsel %vm521_vm2, %v1071_v3, %v1075_v4 }
  0x6b   : > { %2422 = vmatprep.subr.bf16.mxu1 %v2583_v1 }
  0x6c   : > { %2327 = vmatmul.mubr.msk.bf16.gmra.mxu1 %vm255_vm1, %v2542_v12  ;;  %2359 = vmatmul.mubr.msk.bf16.gmra.mxu0 %vm255_vm1, %v2543_v13  ;;  %v1077_v12 = vshrl.u32 %v2562_v56, 16  ;;  %v1081_v13 = vshll.u32 %v2566_v7, 16 }
  0x6d   : > { %2330 = vmatprep.mubr.msk.bf16.mxu1 %vm2584_vm0, %v2583_v1  ;;  %2362 = vmatprep.mubr.msk.bf16.mxu0 %vm2584_vm0, %v2583_v1 }
  0x6e   : > { %v1079_v16 = vor.u32 %v1077_v12, %v1075_v4 }
  0x74   : > { %2331 = vmatmul.mubr.msk.bf16.gmra.mxu1 %vm255_vm1, %v2546_v17  ;;  %2363 = vmatmul.mubr.msk.bf16.gmra.mxu0 %vm255_vm1, %v2547_v18  ;;  %v1083_v17 = vrot.slane %v1081_v13, 1  ;;  %v1614_v18 = vld [vmem:[%s2638_s23 + $0x4] sm:$0xe] }
  0x75   : > { %2334 = vmatprep.mubr.msk.bf16.mxu1 %vm2584_vm0, %v2583_v1  ;;  %2402 = vmatprep.mubr.msk.bf16.mxu0 %vm2584_vm0, %v2583_v1  ;;  %v2114_v21 = vcombine.low %v1614_v18, %v2826_v11 }
  0x76   : > { %v1084_v20 = vsel %vm521_vm2, %v1079_v16, %v1083_v17  ;;  %v1087_v11 = vor.u32 %v1085_v23, %v1083_v17 }
  0x77   : > { %v1628_v24 = vrot.slane %v2114_v21, 1 }
  0x79   : > { %v1630_v29 = vsel %vm1627_vm3, %v1628_v24, %v1629_v25 }
  0x7c   : > { %2335 = vmatmul.mubr.msk.bf16.gmra.mxu1 %vm255_vm1, %v2549_v28  ;;  %2403 = vmatmul.mubr.msk.bf16.vlgmr.msra.gmra.mxu0 %vm255_vm1, %v1263_v31  ;;  %v1458_v28 = vshll.u32 %v2570_v22, 16 }
  0x7d   : > { %2374 = vmatprep.mubr.msk.bf16.mxu1 %vm2584_vm0, %v2583_v1  ;;  %2451 = vmatpush3.bf16.msra.mxu0 %v2556_v34  ;;  %v1631_v34 = vrot.slane %v2855_v27, 1  ;;  %v1633_v27 = vrot.slane %v2870_v41, 1  ;;  %v1635_v41 = vrot.slane %v2898_v57, 1 }
  0x7e   : > { %2406 = vmatprep.mubr.msk.bf16.mxu0 %vm2584_vm0, %v2583_v1  ;;  %2452 = vmatprep.subr.bf16.mxu0 %v2583_v1  ;;  %v1460_v31 = vrot.slane %v1458_v28, 1 }
  0x7f   : > { %v1632_v37 = vsel %vm1627_vm3, %v1629_v25, %v1631_v34  ;;  %v1636_v52 = vsel %vm1627_vm3, %v1633_v27, %v1635_v41 }
  0x80   : > { %v1461_v33 = vor.u32 %v1460_v31, %v1456_v30 }
  0x81   : > { %2453 = vmatpush3.bf16.msra.mxu0 %v2561_v42  ;;  %v1473_v42 = vrot.slane %v1471_v39, 1 }
  0x82   : > { %2454 = vmatprep.subr.bf16.mxu0 %v2583_v1  ;;  %v1466_v36 = vsel %vm521_vm2, %v1461_v33, %v1465_v15 }
  0x83   : > { %v1474_v44 = vsel %vm521_vm2, %v1469_v40, %v1473_v42 }
  0x84   : > { %2375 = vmatmul.mubr.msk.bf16.vlgmr.msra.gmra.mxu1 %vm255_vm1, %v1060_v45  ;;  %2407 = vmatmul.mubr.msk.bf16.gmra.mxu0 %vm255_vm1, %v1271_v47  ;;  %v1634_v45 = vsel %vm1627_vm3, %v1631_v34, %v1633_v27  ;;  %v1479_v47 = vshll.u32 %v2573_v43, 16 }
  0x85   : > { %2423 = vmatpush3.bf16.msra.mxu1 %v2555_v46  ;;  %2378 = vmatprep.mubr.msk.bf16.mxu1 %vm2584_vm0, %v2583_v1  ;;  %v1475_v46 = vshrl.u32 %v2572_v35, 16 }
  0x86   : > { %2424 = vmatprep.subr.bf16.mxu1 %v2583_v1  ;;  %2410 = vmatprep.mubr.msk.bf16.mxu0 %vm2584_vm0, %v2583_v1  ;;  %v1481_v49 = vrot.slane %v1479_v47, 1 }
  0x87   : > { %2455 = vmatpush3.bf16.msra.mxu0 %v2565_v50  ;;  %v1477_v48 = vor.u32 %v1475_v46, %v1473_v42  ;;  %v2574_v50 = vld [vmem:[%s2638_s23 + $0x54] sm:$0x1f]  }
  0x88   : > { %2456 = vmatprep.subr.bf16.mxu0 %v2583_v1  ;;  %v1487_v54 = vshll.u32 %v2574_v50, 16 }
  0x89   : > { %2425 = vmatpush3.bf16.msra.mxu1 %v2559_v53  ;;  %v1482_v51 = vsel %vm521_vm2, %v1477_v48, %v1481_v49  ;;  %v1483_v53 = vshrl.u32 %v2573_v43, 16 }
  0x8a   : > { %2426 = vmatprep.subr.bf16.mxu1 %v2583_v1  ;;  %v1489_v56 = vrot.slane %v1487_v54, 1 }
  0x8b   : > { %2457 = vmatpush3.bf16.msra.mxu0 %v2568_v58  ;;  %v1485_v55 = vor.u32 %v1483_v53, %v1481_v49  ;;  %v1491_v58 = vshrl.u32 %v2574_v50, 16 }
  0x8c   : > { %2379 = vmatmul.mubr.msk.bf16.gmra.mxu1 %vm255_vm1, %v1068_v59  ;;  %2411 = vmatmul.mubr.msk.bf16.gmra.mxu0 %vm255_vm1, %v1279_v61 }
  0x8d   : > { %2382 = vmatprep.mubr.msk.bf16.mxu1 %vm2584_vm0, %v2583_v1  ;;  %2414 = vmatprep.mubr.msk.bf16.mxu0 %vm2584_vm0, %v2583_v1  ;;  %v1490_v57 = vsel %vm521_vm2, %v1485_v55, %v1489_v56  ;;  %v1493_v59 = vor.u32 %v1491_v58, %v1489_v56 }
  0x8e   : > { %2427 = vmatpush3.bf16.msra.mxu1 %v2564_v2 }
  0x8f   : > { %2428 = vmatprep.subr.bf16.mxu1 %v2583_v1 }
  0x92   : > { %2429 = vmatpush3.bf16.msra.mxu1 %v2567_v8 }
  0x94   : > { %2383 = vmatmul.mubr.msk.bf16.gmra.mxu1 %vm255_vm1, %v1076_v9  ;;  %2415 = vmatmul.mubr.msk.bf16.gmra.mxu0 %vm255_vm1, %v1287_v10 }
  0x95   : > { %2386 = vmatprep.mubr.msk.bf16.mxu1 %vm2584_vm0, %v2583_v1  ;;  %2418 = vmatprep.mubr.msk.bf16.mxu0 %vm2584_vm0, %v2583_v1 }
  0x9c   : > { %2387 = vmatmul.mubr.msk.bf16.gmra.mxu1 %vm255_vm1, %v1084_v20  ;;  %2419 = vmatmul.mubr.msk.bf16.gmra.mxu0 %vm255_vm1, %v1290_v19 }
  0x9d   : > { %2390 = vmatprep.mubr.msk.bf16.mxu1 %vm2584_vm0, %v2583_v1  ;;  %2458 = vmatprep.mubr.msk.bf16.mxu0 %vm2584_vm0, %v2583_v1 }
  0xa4   : > { %2391 = vmatmul.mubr.msk.bf16.gmra.mxu1 %vm255_vm1, %v1087_v11  ;;  %2459 = vmatmul.mubr.msk.bf16.vlgmr.msra.gmra.mxu0 %vm255_vm1, %v1630_v29 }
  0xa5   : > { %2430 = vmatprep.mubr.msk.bf16.mxu1 %vm2584_vm0, %v2583_v1  ;;  %2462 = vmatprep.mubr.msk.bf16.mxu0 %vm2584_vm0, %v2583_v1 }
  0xac   : > { %2431 = vmatmul.mubr.msk.bf16.vlgmr.msra.gmra.mxu1 %vm255_vm1, %v1466_v36  ;;  %2463 = vmatmul.mubr.msk.bf16.gmra.mxu0 %vm255_vm1, %v1632_v37 }
  0xad   : > { %2434 = vmatprep.mubr.msk.bf16.mxu1 %vm2584_vm0, %v2583_v1  ;;  %2466 = vmatprep.mubr.msk.bf16.mxu0 %vm2584_vm0, %v2583_v1 }
  0xb4   : > { %2435 = vmatmul.mubr.msk.bf16.gmra.mxu1 %vm255_vm1, %v1474_v44  ;;  %2467 = vmatmul.mubr.msk.bf16.gmra.mxu0 %vm255_vm1, %v1634_v45 }
  0xb5   : > { %2438 = vmatprep.mubr.msk.bf16.mxu1 %vm2584_vm0, %v2583_v1  ;;  %2470 = vmatprep.mubr.msk.bf16.mxu0 %vm2584_vm0, %v2583_v1 }
  0xbc   : > { %2439 = vmatmul.mubr.msk.bf16.gmra.mxu1 %vm255_vm1, %v1482_v51  ;;  %2471 = vmatmul.mubr.msk.bf16.gmra.mxu0 %vm255_vm1, %v1636_v52 }
  0xbd   : > { %2442 = vmatprep.mubr.msk.bf16.mxu1 %vm2584_vm0, %v2583_v1  ;;  %2474 = vmatprep.mubr.msk.bf16.mxu0 %vm2584_vm0, %v2583_v1 }
  0xc4   : > { %2443 = vmatmul.mubr.msk.bf16.gmra.mxu1 %vm255_vm1, %v1490_v57  ;;  %2475 = vmatmul.mubr.msk.bf16.gmra.mxu0 %vm255_vm1, %v1635_v41 }
  0xc5   : > { %2446 = vmatprep.mubr.msk.bf16.mxu1 %vm2584_vm0, %v2583_v1 }
  0xcc   : > { %2447 = vmatmul.mubr.msk.bf16.gmra.mxu1 %vm255_vm1, %v1493_v59 }
  0xdc   : > { %v321_v60 = vpop.f32.mrf.mxu1  ;;  %v305_v61 = vpop.f32.mrf.mxu0 }
  0xde   : > { %v2244_v62 = vpop.f32.mrf.mxu1  ;;  %v2236_v63 = vpop.f32.mrf.mxu0 }
  0xe0   : > { %v324_v0 = vpop.f32.mrf.mxu1  ;;  %v308_v2 = vpop.f32.mrf.mxu0 }
  0xe2   : > { %v2245_v3 = vpop.f32.mrf.mxu1  ;;  %v2237_v4 = vpop.f32.mrf.mxu0 }
  0xe4   : > { %v329_v5 = vpop.f32.mrf.mxu1  ;;  %v313_v6 = vpop.f32.mrf.mxu0 }
  0xe6   : > { %v2248_v7 = vpop.f32.mrf.mxu1  ;;  %v2240_v8 = vpop.f32.mrf.mxu0 }
  0xe8   : > { %v332_v9 = vpop.f32.mrf.mxu1  ;;  %v316_v10 = vpop.f32.mrf.mxu0 }
  0xea   : > { %v2249_v12 = vpop.f32.mrf.mxu1  ;;  %v2241_v13 = vpop.f32.mrf.mxu0 }
  0xec   : > { %v337_v1 = vpop.f32.mrf.mxu1  ;;  %v634_v14 = vpop.f32.mrf.mxu0 }
  0xee   : > { %v2252_v16 = vpop.f32.mrf.mxu1  ;;  %v2292_v17 = vpop.f32.mrf.mxu0 }
  0xf0   : > { %v340_v18 = vpop.f32.mrf.mxu1  ;;  %v637_v19 = vpop.f32.mrf.mxu0 }
  0xf2   : > { %v2253_v20 = vpop.f32.mrf.mxu1  ;;  %v2293_v21 = vpop.f32.mrf.mxu0 }
  0xf4   : > { %v439_v22 = vpop.f32.mrf.mxu1  ;;  %v642_v23 = vpop.f32.mrf.mxu0 }
  0xf5   : > { %v440_v24 = vadd.f32 %v439_v22, %v305_v61 }
  0xf6   : > { %v2264_v25 = vpop.f32.mrf.mxu1  ;;  %v2296_v26 = vpop.f32.mrf.mxu0 }
  0xf7   : > { %v672_v28 = vadd.f32 %v634_v14, %v440_v24 }
  0xf8   : > { %v442_v11 = vpop.f32.mrf.mxu1  ;;  %v645_v29 = vpop.f32.mrf.mxu0 }
  0xf9   : > { %v443_v30 = vadd.f32 %v442_v11, %v308_v2 }
  0xfa   : > { %v2265_v31 = vpop.f32.mrf.mxu1  ;;  %v2297_v32 = vpop.f32.mrf.mxu0 }
  0xfb   : > { %v673_v33 = vadd.f32 %v637_v19, %v443_v30 }
  0xfc   : > { %v447_v15 = vpop.f32.mrf.mxu1  ;;  %v650_v34 = vpop.f32.mrf.mxu0 }
  0xfd   : > { %v448_v35 = vadd.f32 %v447_v15, %v313_v6 }
  0xfe   : > { %v2268_v36 = vpop.f32.mrf.mxu1  ;;  %v2300_v37 = vpop.f32.mrf.mxu0 }
  0xff   : > { %v674_v38 = vadd.f32 %v642_v23, %v448_v35 }
 0x100   : > { %v450_v39 = vpop.f32.mrf.mxu1  ;;  %v653_v40 = vpop.f32.mrf.mxu0 }
 0x101   : > { %v451_v42 = vadd.f32 %v450_v39, %v316_v10 }
 0x102   : > { %v2269_v27 = vpop.f32.mrf.mxu1  ;;  %v2301_v43 = vpop.f32.mrf.mxu0 }
 0x103   : > { %v675_v44 = vadd.f32 %v645_v29, %v451_v42 }
 0x104   : > { %v455_v45 = vpop.f32.mrf.mxu1  ;;  %v658_v46 = vpop.f32.mrf.mxu0 }
 0x105   : > { %v456_v47 = vadd.f32 %v455_v45, %v321_v60 }
 0x106   : > { %v2272_v48 = vpop.f32.mrf.mxu1  ;;  %v2304_v49 = vpop.f32.mrf.mxu0 }
 0x107   : > { %v676_v41 = vadd.f32 %v650_v34, %v456_v47 }
 0x108   : > { %v458_v50 = vpop.f32.mrf.mxu1  ;;  %v661_v51 = vpop.f32.mrf.mxu0 }
 0x109   : > { %v459_v52 = vadd.f32 %v458_v50, %v324_v0 }
 0x10a   : > { %v2273_v53 = vpop.f32.mrf.mxu1  ;;  %v2305_v54 = vpop.f32.mrf.mxu0 }
 0x10b   : > { %v677_v55 = vadd.f32 %v653_v40, %v459_v52 }
 0x10c   : > { %v463_v56 = vpop.f32.mrf.mxu1  ;;  %v666_v57 = vpop.f32.mrf.mxu0 }
 0x10d   : > { %v464_v58 = vadd.f32 %v463_v56, %v329_v5 }
 0x10e   : > { %v2276_v59 = vpop.f32.mrf.mxu1  ;;  %v2308_v61 = vpop.f32.mrf.mxu0 }
 0x10f   : > { %v678_v62 = vadd.f32 %v658_v46, %v464_v58 }
 0x110   : > { %v466_v63 = vpop.f32.mrf.mxu1  ;;  %v669_v2 = vpop.f32.mrf.mxu0 }
 0x111   : > { %v467_v3 = vadd.f32 %v466_v63, %v332_v9 }
 0x112   : > { %v2277_v4 = vpop.f32.mrf.mxu1  ;;  %v2309_v60 = vpop.f32.mrf.mxu0 }
 0x113   : > { %v679_v6 = vadd.f32 %v661_v51, %v467_v3 }
 0x114   : > { %v471_v7 = vpop.f32.mrf.mxu1  ;;  %v958_v8 = vpop.f32.mrf.mxu0 }
 0x115   : > { %v472_v10 = vadd.f32 %v471_v7, %v337_v1 }
 0x116   : > { %v2280_v12 = vpop.f32.mrf.mxu1  ;;  %v2348_v0 = vpop.f32.mrf.mxu0 }
 0x117   : > { %v680_v13 = vadd.f32 %v666_v57, %v472_v10 }
 0x118   : > { %v474_v14 = vpop.f32.mrf.mxu1  ;;  %v961_v16 = vpop.f32.mrf.mxu0 }
 0x11a   : > { %v2281_v17 = vpop.f32.mrf.mxu1  ;;  %v2349_v18 = vpop.f32.mrf.mxu0 }
 0x11c   : > { %v796_v5 = vpop.f32.mrf.mxu1  ;;  %v966_v19 = vpop.f32.mrf.mxu0 }
 0x11d   : > { %v834_v20 = vadd.f32 %v796_v5, %v672_v28 }
 0x11e   : > { %v2320_v21 = vpop.f32.mrf.mxu1  ;;  %v2352_v22 = vpop.f32.mrf.mxu0 }
 0x11f   : > { %v2990_v23 = vadd.f32 %v958_v8, %v834_v20 }
 0x120   : > { %v799_v9 = vpop.f32.mrf.mxu1  ;;  %v969_v24 = vpop.f32.mrf.mxu0 }
 0x121   : > { %v835_v25 = vadd.f32 %v799_v9, %v673_v33 }
 0x122   : > { %v2321_v26 = vpop.f32.mrf.mxu1  ;;  %v2353_v11 = vpop.f32.mrf.mxu0 }
 0x123   : > { %v2992_v1 = vadd.f32 %v961_v16, %v835_v25 }
 0x124   : > { %v804_v29 = vpop.f32.mrf.mxu1  ;;  %v974_v30 = vpop.f32.mrf.mxu0 }
 0x125   : > { %v836_v31 = vadd.f32 %v804_v29, %v674_v38 }
 0x126   : > { %v2324_v32 = vpop.f32.mrf.mxu1  ;;  %v2356_v15 = vpop.f32.mrf.mxu0 }
 0x127   : > { %v2994_v34 = vadd.f32 %v966_v19, %v836_v31 }
 0x128   : > { %v807_v35 = vpop.f32.mrf.mxu1  ;;  %v977_v28 = vpop.f32.mrf.mxu0 }
 0x129   : > { %v837_v36 = vadd.f32 %v807_v35, %v675_v44 }
 0x12a   : > { %v2325_v37 = vpop.f32.mrf.mxu1  ;;  %v2357_v39 = vpop.f32.mrf.mxu0 }
 0x12b   : > { %v2996_v40 = vadd.f32 %v969_v24, %v837_v36 }
 0x12c   : > { %v812_v42 = vpop.f32.mrf.mxu1  ;;  %v982_v33 = vpop.f32.mrf.mxu0 }
 0x12d   : > { %v838_v27 = vadd.f32 %v812_v42, %v676_v41 }
 0x12e   : > { %v2328_v43 = vpop.f32.mrf.mxu1  ;;  %v2360_v45 = vpop.f32.mrf.mxu0 }
 0x12f   : > { %v2998_v46 = vadd.f32 %v974_v30, %v838_v27 }
 0x130   : > { %v815_v47 = vpop.f32.mrf.mxu1  ;;  %v985_v38 = vpop.f32.mrf.mxu0 }
 0x131   : > { %v839_v48 = vadd.f32 %v815_v47, %v677_v55 }
 0x132   : > { %v2329_v49 = vpop.f32.mrf.mxu1  ;;  %v2361_v50 = vpop.f32.mrf.mxu0 }
 0x133   : > { %v3000_v51 = vadd.f32 %v977_v28, %v839_v48 }
 0x134   : > { %v820_v52 = vpop.f32.mrf.mxu1  ;;  %v990_v44 = vpop.f32.mrf.mxu0 }
 0x135   : > { %v840_v53 = vadd.f32 %v820_v52, %v678_v62 }
 0x136   : > { %v2332_v54 = vpop.f32.mrf.mxu1  ;;  %v2364_v56 = vpop.f32.mrf.mxu0 }
 0x137   : > { %v3002_v57 = vadd.f32 %v982_v33, %v840_v53 }
 0x138   : > { %v823_v58 = vpop.f32.mrf.mxu1  ;;  %v993_v41 = vpop.f32.mrf.mxu0 }
 0x139   : > { %v841_v59 = vadd.f32 %v823_v58, %v679_v6 }
 0x13a   : > { %v2333_v61 = vpop.f32.mrf.mxu1  ;;  %v2365_v63 = vpop.f32.mrf.mxu0 }
 0x13b   : > { %v3004_v2 = vadd.f32 %v985_v38, %v841_v59 }
 0x13c   : > { %v828_v3 = vpop.f32.mrf.mxu1  ;;  %v1364_v55 = vpop.f32.mrf.mxu0 }
 0x13d   : > { %v842_v4 = vadd.f32 %v828_v3, %v680_v13  ;;  %v3033_v3 = vld [vmem:[%s3090_s2] ss:$0 sm:$0xff] }
 0x13e   : > { %v2336_v60 = vpop.f32.mrf.mxu1  ;;  %v2404_v7 = vpop.f32.mrf.mxu0 }
 0x13f   : > { %v3006_v8 = vadd.f32 %v990_v44, %v842_v4 }
 0x140   : > { %v831_v10 = vpop.f32.mrf.mxu1  ;;  %v1367_v62 = vpop.f32.mrf.mxu0 }
 0x142   : > { %v2337_v12 = vpop.f32.mrf.mxu1  ;;  %v2405_v0 = vpop.f32.mrf.mxu0 }
 0x144   : > { %v1161_v14 = vpop.f32.mrf.mxu1  ;;  %v1372_v16 = vpop.f32.mrf.mxu0 }
 0x145   : > { %v1199_v52 = vadd.f32 %v1161_v14, %v2990_v23 }
 0x146   : > { %v2376_v17 = vpop.f32.mrf.mxu1  ;;  %v2408_v18 = vpop.f32.mrf.mxu0 }
 0x147   : > { %v1402_v41 = vadd.f32 %v1364_v55, %v1199_v52 }
 0x148   : > { %v1164_v6 = vpop.f32.mrf.mxu1  ;;  %v3008_v5 = vpop.f32.mrf.mxu0 }
 0x149   : > { %v1200_v58 = vadd.f32 %v1164_v6, %v2992_v1 }
 0x14a   : > { %v2377_v19 = vpop.f32.mrf.mxu1  ;;  %v2409_v20 = vpop.f32.mrf.mxu0 }
 0x14b   : > { %v1403_v10 = vadd.f32 %v1367_v62, %v1200_v58 }
 0x14c   : > { %v1169_v21 = vpop.f32.mrf.mxu1  ;;  %v3010_v22 = vpop.f32.mrf.mxu0 }
 0x14d   : > { %v1201_v23 = vadd.f32 %v1169_v21, %v2994_v34 }
 0x14e   : > { %v2380_v13 = vpop.f32.mrf.mxu1  ;;  %v2412_v9 = vpop.f32.mrf.mxu0 }
 0x14f   : > { %v1404_v20 = vadd.f32 %v1372_v16, %v1201_v23 }
 0x150   : > { %v1172_v24 = vpop.f32.mrf.mxu1  ;;  %v3012_v25 = vpop.f32.mrf.mxu0 }
 0x151   : > { %v1202_v18 = vadd.f32 %v1172_v24, %v2996_v40 }
 0x152   : > { %v2381_v26 = vpop.f32.mrf.mxu1  ;;  %v2413_v11 = vpop.f32.mrf.mxu0 }
 0x154   : > { %v1177_v29 = vpop.f32.mrf.mxu1  ;;  %v3014_v30 = vpop.f32.mrf.mxu0 }
 0x155   : > { %v1203_v40 = vadd.f32 %v1177_v29, %v2998_v46 }
 0x156   : > { %v2384_v31 = vpop.f32.mrf.mxu1  ;;  %v2416_v32 = vpop.f32.mrf.mxu0 }
 0x157   : > { %v1405_v31 = vadd.f32 %v3008_v5, %v1202_v18 }
 0x158   : > { %v3016_v15 = vpop.f32.mrf.mxu1  ;;  %v3018_v35 = vpop.f32.mrf.mxu0 }
 0x15a   : > { %v2385_v28 = vpop.f32.mrf.mxu1  ;;  %v2417_v36 = vpop.f32.mrf.mxu0 }
 0x15c   : > { %v3020_v37 = vpop.f32.mrf.mxu1  ;;  %v3022_v39 = vpop.f32.mrf.mxu0 }
 0x15e   : > { %v2388_v42 = vpop.f32.mrf.mxu1  ;;  %v2420_v33 = vpop.f32.mrf.mxu0 }
 0x160   : > { %v3024_v27 = vpop.f32.mrf.mxu1  ;;  %v1399_v43 = vpop.f32.mrf.mxu0 }
 0x161   : > { %v1206_v23 = vadd.f32 %v3024_v27, %v3004_v2 }
 0x162   : > { %v2389_v45 = vpop.f32.mrf.mxu1  ;;  %v2421_v47 = vpop.f32.mrf.mxu0 }
 0x163   : > { %v1204_v47 = vadd.f32 %v3016_v15, %v3000_v51  ;;  %v1409_v18 = vadd.f32 %v3018_v35, %v1206_v23 }
 0x164   : > { %v3026_v38 = vpop.f32.mrf.mxu1  ;;  %v1710_v48 = vpop.f32.mrf.mxu0 }
 0x165   : > { %v1407_v58 = vadd.f32 %v3012_v25, %v1204_v47 }
 0x166   : > { %v2392_v49 = vpop.f32.mrf.mxu1  ;;  %v2460_v50 = vpop.f32.mrf.mxu0 }
 0x168   : > { %v1196_v44 = vpop.f32.mrf.mxu1  ;;  %v1713_v53 = vpop.f32.mrf.mxu0 }
 0x16a   : > { %v2393_v54 = vpop.f32.mrf.mxu1  ;;  %v2461_v56 = vpop.f32.mrf.mxu0 }
 0x16b   : > { %v1205_v56 = vadd.f32 %v3020_v37, %v3002_v57 }
 0x16c   : > { %v1567_v59 = vpop.f32.mrf.mxu1  ;;  %v1718_v61 = vpop.f32.mrf.mxu0 }
 0x16d   : > { %v1605_v63 = vadd.f32 %v1567_v59, %v1402_v41 }
 0x16e   : > { %v2432_v4 = vpop.f32.mrf.mxu1  ;;  %v2464_v60 = vpop.f32.mrf.mxu0 }
 0x16f   : > { %v1748_v7 = vadd.f32 %v1710_v48, %v1605_v63  ;;  %v1406_v48 = vadd.f32 %v3010_v22, %v1203_v40 }
 0x170   : > { %v1570_v12 = vpop.f32.mrf.mxu1  ;;  %v1721_v0 = vpop.f32.mrf.mxu0 }
 0x171   : > { %v1764_v1 = vadd.f32 %v3033_v3, %v1748_v7  ;;  %v1606_v55 = vadd.f32 %v1570_v12, %v1403_v10  ;;  %v1408_v7 = vadd.f32 %v3014_v30, %v1205_v56 }
 0x172   : > { %v2433_v14 = vpop.f32.mrf.mxu1  ;;  %v2465_v17 = vpop.f32.mrf.mxu0 }
 0x173   : > { %v1773_v6 = vmax.f32 %v1764_v1, 0.0  ;;  %v1749_v19 = vadd.f32 %v1713_v53, %v1606_v55  ;;  %v1207_v17 = vadd.f32 %v3026_v38, %v3006_v8 }
 0x174   : > { %v1575_v34 = vpop.f32.mrf.mxu1  ;;  %v1726_v62 = vpop.f32.mrf.mxu0 }
 0x175   : > { %v2136_v21 = vpack.c.bf16 %v1773_v6, %v1773_v6  ;;  %v1765_v13 = vadd.f32 %v3033_v3, %v1749_v19  ;;  %v1607_v9 = vadd.f32 %v1575_v34, %v1404_v20  ;;  %v1410_v38 = vadd.f32 %v3022_v39, %v1207_v17 }
 0x176   : > { %v2436_v26 = vpop.f32.mrf.mxu1  ;;  %v2468_v11 = vpop.f32.mrf.mxu0 }
 0x177   : > { %1820 = vst.msk [vmem:[%s3042_s21] sm:$0xf] %vm1819_vm4, %v2136_v21  ;;  %v1774_v16 = vmax.f32 %v1765_v13, 0.0  ;;  %v1750_v24 = vadd.f32 %v1718_v61, %v1607_v9 }
 0x178   : > { %v1578_v32 = vpop.f32.mrf.mxu1  ;;  %v1729_v28 = vpop.f32.mrf.mxu0 }
 0x179   : > { %v2137_v36 = vpack.c.bf16 %v1774_v16, %v1774_v16  ;;  %v1766_v42 = vadd.f32 %v3033_v3, %v1750_v24  ;;  %v1608_v33 = vadd.f32 %v1578_v32, %v1405_v31 }
 0x17a   : > { %v2437_v43 = vpop.f32.mrf.mxu1  ;;  %v2469_v45 = vpop.f32.mrf.mxu0 }
 0x17b   : > { %1821 = vst.msk [vmem:[%s3042_s21 + $0x4] sm:$0xf] %vm1819_vm4, %v2137_v36  ;;  %v1775_v46 = vmax.f32 %v1766_v42, 0.0  ;;  %v1751_v29 = vadd.f32 %v1721_v0, %v1608_v33 }
 0x17c   : > { %v1583_v49 = vpop.f32.mrf.mxu1  ;;  %v1734_v5 = vpop.f32.mrf.mxu0 }
 0x17d   : > { %v2138_v50 = vpack.c.bf16 %v1775_v46, %v1775_v46  ;;  %v1767_v52 = vadd.f32 %v3033_v3, %v1751_v29  ;;  %v1609_v44 = vadd.f32 %v1583_v49, %v1406_v48 }
 0x17e   : > { %v2440_v53 = vpop.f32.mrf.mxu1  ;;  %v2472_v54 = vpop.f32.mrf.mxu0 }
 0x17f   : > { %1822 = vst.msk [vmem:[%s3042_s21 + $0x8] sm:$0xf] %vm1819_vm4, %v2138_v50  ;;  %v1776_v51 = vmax.f32 %v1767_v52, 0.0  ;;  %v1752_v15 = vadd.f32 %v1726_v62, %v1609_v44 }
 0x180   : > { %v1586_v41 = vpop.f32.mrf.mxu1  ;;  %v1737_v22 = vpop.f32.mrf.mxu0 }
 0x181   : > { %v2139_v59 = vpack.c.bf16 %v1776_v51, %v1776_v51  ;;  %v1768_v61 = vadd.f32 %v3033_v3, %v1752_v15  ;;  %v1610_v63 = vadd.f32 %v1586_v41, %v1407_v58 }
 0x182   : > { %v2441_v4 = vpop.f32.mrf.mxu1  ;;  %v2473_v60 = vpop.f32.mrf.mxu0 }
 0x183   : > { %1823 = vst.msk [vmem:[%s3042_s21 + $0xc] sm:$0xf] %vm1819_vm4, %v2139_v59  ;;  %v1777_v57 = vmax.f32 %v1768_v61, 0.0  ;;  %v1753_v37 = vadd.f32 %v1729_v28, %v1610_v63 }
 0x184   : > { %v1591_v10 = vpop.f32.mrf.mxu1  ;;  %v1742_v25 = vpop.f32.mrf.mxu0 }
 0x185   : > { %v2140_v12 = vpack.c.bf16 %v1777_v57, %v1777_v57  ;;  %v1769_v0 = vadd.f32 %v3033_v3, %v1753_v37  ;;  %v1611_v1 = vadd.f32 %v1591_v10, %v1408_v7 }
 0x186   : > { %v2444_v55 = vpop.f32.mrf.mxu1  ;;  %v2476_v14 = vpop.f32.mrf.mxu0 }
 0x187   : > { %1824 = vst.msk [vmem:[%s3042_s21 + $0x10] sm:$0xf] %vm1819_vm4, %v2140_v12  ;;  %v1778_v2 = vmax.f32 %v1769_v0, 0.0  ;;  %v1754_v27 = vadd.f32 %v1734_v5, %v1611_v1 }
 0x188   : > { %v1594_v6 = vpop.f32.mrf.mxu1  ;;  %v1745_v30 = vpop.f32.mrf.mxu0 }
 0x189   : > { %v2141_v19 = vpack.c.bf16 %v1778_v2, %v1778_v2  ;;  %v1770_v20 = vadd.f32 %v3033_v3, %v1754_v27  ;;  %v1612_v34 = vadd.f32 %v1594_v6, %v1409_v18 }
 0x18a   : > { %v2445_v62 = vpop.f32.mrf.mxu1  ;;  %v2477_v21 = vpop.f32.mrf.mxu0 }
 0x18b   : > { %1825 = vst.msk [vmem:[%s3042_s21 + $0x14] sm:$0xf] %vm1819_vm4, %v2141_v19  ;;  %v1779_v13 = vmax.f32 %v1770_v20, 0.0  ;;  %v1755_v8 = vadd.f32 %v1737_v22, %v1612_v34 }
 0x18c   : > { %v1599_v9 = vpop.f32.mrf.mxu1 }
 0x18d   : > { %v2142_v26 = vpack.c.bf16 %v1779_v13, %v1779_v13  ;;  %v1771_v35 = vadd.f32 %v3033_v3, %v1755_v8  ;;  %v1613_v11 = vadd.f32 %v1599_v9, %v1410_v38 }
 0x18e   : > { %v2448_v40 = vpop.f32.mrf.mxu1 }
 0x18f   : > { %1826 = vst.msk [vmem:[%s3042_s21 + $0x18] sm:$0xf] %vm1819_vm4, %v2142_v26  ;;  %v1780_v16 = vmax.f32 %v1771_v35, 0.0  ;;  %v1756_v24 = vadd.f32 %v1742_v25, %v1613_v11 }
 0x190   : > { %v1602_v31 = vpop.f32.mrf.mxu1 }
 0x191   : > { %v2143_v32 = vpack.c.bf16 %v1780_v16, %v1780_v16  ;;  %v1772_v28 = vadd.f32 %v3033_v3, %v1756_v24 }
 0x192   : > { %v2449_v36 = vpop.f32.mrf.mxu1 }
 0x193   : > { %1827 = vst.msk [vmem:[%s3042_s21 + $0x1c] sm:$0xf] %vm1819_vm4, %v2143_v32  ;;  %v1781_v42 = vmax.f32 %v1772_v28, 0.0 }
 0x195   : > { %v2144_v39 = vpack.c.bf16 %v1781_v42, %v1781_v42 }
 0x197   : > { %1828 = vst.msk [vmem:[%s3042_s21 + $0x20] sm:$0xf] %vm1819_vm4, %v2144_v39 }
 0x198 PF: > { %s13_s12 = sadd.s32 1, %s2581_s12  }
 0x199   : > { %p10_p4 = scmp.ge.s32.totalorder %s13_s12, 4  }
 0x19b   :  { %12 = sbr.rel (!%p10_p4) target bundleno = 1 (0x1), region = 73 }

// kernel: critic_forward.8
= control target key start
LH: loop header
LB: loop body
LE: loop exit
PB: predicated region body
PF: predicated region fallthrough
CT: control target
= control target key end

     0   :  { %s1635_s12 = smov 0   ;;  %s1816_s0 = inlined_call_operand.vmem [shape: bf16[2,4,31,64], index: 0, kind: input, shape index: {}]   ;;  %s1817_s1 = inlined_call_operand.vmem [shape: bf16[9,64,128], index: 1, kind: input, shape index: {}]   ;;  %s1818_s2 = inlined_call_operand.vmem [shape: f32[1,128], index: 2, kind: input, shape index: {}]   ;;  %s1819_s3 = inlined_call_operand.vmem [shape: bf16[2,20,128], index: 3, kind: output, shape index: {}]  }
   0x1 LB: > { %s1215_s13 = sadd.s32 4294967295, %s1613_s12   ;;  %p1219_p0 = scmp.ge.s32.totalorder %s1613_s12, 1  ;;  %s1613_s12 = sphi %s1635_s12, %s13_s12  }
   0x2   : > { %p137_p1 = scmp.lt.s32.totalorder %s1613_s12, 3 }
   0x4   : > { %p138_p2 = pnand %p1219_p0, %p137_p1 }
   0x5   : > { %p161_p3 = scmp.lt.s32.totalorder (!%p138_p2), %s1215_s13, 1 }
   0x6   : > { %141 = sbr.rel (%p138_p2) target bundleno = 300 (0x12c), region = 32 }
   0xb   : > { %v1556_v0 = vld [vmem:[%s1817_s1 + $0x38] sm:$0xff]   ;;  %v1558_v2 = vld [vmem:[%s1817_s1 + $0x30] sm:$0xff]   ;;  %s1821_s13 = smov (!%p161_p3, %s1215_s13), 1  ;;  %v1560_v4 = vld [vmem:[%s1817_s1 + $0x28] sm:$0xff]   ;;  %vm228_vm0 = vcmask 523264   ;;  %vm1046_vm3 = vcmask 1044480  }
   0xc   : > { %v1557_v1 = vld [vmem:[%s1817_s1 + $0x18] sm:$0xff]   ;;  %1439 = vmatprep.subr.bf16.mxu0 %v1556_v0  ;;  %v1559_v3 = vld [vmem:[%s1817_s1 + $0x10] sm:$0xff]   ;;  %s1376_s24 = sshll.u32 %s1821_s13, 6  ;;  %v1561_v5 = vld [vmem:[%s1817_s1 + $0x8] sm:$0xff]   ;;  %vm382_vm1 = vsmask.f32 7424 }
   0xd   : > { %1451 = vmatprep.subr.bf16.mxu1 %v1557_v1  ;;  %1440 = vmatpush3.bf16.msra.mxu0 %v1556_v0  ;;  %s1667_s29 = scalar_lea.vmem %s1816_s0, %s1376_s24  ;;  %v1562_v6 = vld [vmem:[%s1817_s1 + $0x20] sm:$0xff]   ;;  %v1568_v11 = vld [vmem:[%s1817_s1 + $0x58] sm:$0xff]   ;;  %v1570_v15 = vld [vmem:[%s1817_s1 + $0x50] sm:$0xff]   ;;  %vm813_vm2 = vsmask.f32 5376  ;;  %s1547_s18 = smul.u32 12, %s1821_s13 }
   0xe   : > { %1452 = vmatpush3.bf16.msra.mxu1 %v1557_v1  ;;  %1441 = vmatprep.subr.bf16.mxu0 %v1558_v2  ;;  %v1563_v7 = vld [vmem:[%s1817_s1] sm:$0xff]   ;;  %v1564_v8 = vld [vmem:[%s1667_s29 + $0x10] sm:$0xff]   ;;  %v1566_v10 = vld [vmem:[%s1667_s29 + $0x18] ss:$0 sps:$4 sm:$0x33]  }
   0xf   : > { %1453 = vmatprep.subr.bf16.mxu1 %v1559_v3  ;;  %v1565_v9 = vld [vmem:[%s1667_s29] sm:$0xff]   ;;  %1447 = vmatprep.mubr.msk.bf16.mxu0 %vm228_vm0, %v1564_v8  ;;  %v1567_v13 = vld [vmem:[%s1667_s29 + $0x8] ss:$0 sps:$4 sm:$0x33]   ;;  %v1569_v14 = vld [vmem:[%s1817_s1 + $0x78] sm:$0xff]   ;;  %s170_s21 = scalar_lea.vmem %s1819_s3, %s1547_s18 }
  0x10   : > { %1459 = vmatprep.mubr.msk.bf16.mxu1 %vm228_vm0, %v1565_v9  ;;  %v385_v12 = vshll.u32 %v1565_v9, 16  ;;  %v1571_v16 = vld [vmem:[%s1817_s1 + $0x70] sm:$0xff]   ;;  %v383_v17 = vshrl.u32 %v1565_v9, 16  ;;  %v1572_v19 = vld [vmem:[%s1817_s1 + $0x48] sm:$0xff]   ;;  %v1578_v24 = vld [vmem:[%s1667_s29 + $0x20] sm:$0xff]  }
  0x11   : > { %1442 = vmatpush3.bf16.msra.mxu0 %v1558_v2  ;;  %v1573_v20 = vld [vmem:[%s1817_s1 + $0x68] sm:$0xff]   ;;  %v1574_v25 = vld [vmem:[%s1817_s1 + $0x40] sm:$0xff]   ;;  %v1577_v30 = vld [vmem:[%s1817_s1 + $0x98] sm:$0xff]   ;;  %v697_v31 = vshll.u32 %v1578_v24, 16  ;;  %v695_v36 = vshrl.u32 %v1578_v24, 16 }
  0x12   : > { %1454 = vmatpush3.bf16.msra.mxu1 %v1559_v3  ;;  %1443 = vmatprep.subr.bf16.mxu0 %v1560_v4  ;;  %v387_v18 = vrot.slane %v385_v12, 1  ;;  %v1576_v21 = vld [vmem:[%s1667_s29 + $0x8] ss:$0 sps:$4 sm:$0x77]   ;;  %v1575_v26 = vld [vmem:[%s1817_s1 + $0x60] sm:$0xff]   ;;  %v1580_v33 = vld [vmem:[%s1817_s1 + $0xb8] sm:$0xff]  }
  0x13   : > { %1455 = vmatprep.subr.bf16.mxu1 %v1561_v5  ;;  %v390_v23 = vshll.u32 %v1576_v21, 16  ;;  %v394_v28 = vshrl.u32 %v1576_v21, 16  ;;  %v1579_v32 = vld [vmem:[%s1667_s29 + $0x28] ss:$0 sps:$4 sm:$0x33]   ;;  %v1581_v35 = vld [vmem:[%s1817_s1 + $0x90] sm:$0xff]  }
  0x14   : > { %v388_v22 = vor.u32 %v387_v18, %v383_v17  ;;  %v699_v37 = vrot.slane %v697_v31, 1  ;;  %v1582_v38 = vld [vmem:[%s1817_s1 + $0xb0] sm:$0xff]   ;;  %v1590_v40 = vld [vmem:[%s1667_s29 + $0x28] ss:$0 sps:$4 sm:$0x77]   ;;  %v1585_v46 = vld [vmem:[%s1817_s1 + $0x80] sm:$0xff]  }
  0x15   : > { %1444 = vmatpush3.bf16.msra.mxu0 %v1560_v4  ;;  %v392_v27 = vrot.slane %v390_v23, 1  ;;  %v1587_v39 = vld [vmem:[%s1667_s29 + $0x30] sm:$0xff]   ;;  %v1583_v41 = vld [vmem:[%s1817_s1 + $0x88] sm:$0xff]   ;;  %v702_v43 = vshll.u32 %v1590_v40, 16  ;;  %v1586_v48 = vld [vmem:[%s1817_s1 + $0xa0] sm:$0xff]   ;;  %v706_v52 = vshrl.u32 %v1590_v40, 16 }
  0x16   : > { %1456 = vmatpush3.bf16.msra.mxu1 %v1561_v5  ;;  %1445 = vmatprep.subr.bf16.mxu0 %v1562_v6  ;;  %v700_v42 = vor.u32 %v699_v37, %v695_v36  ;;  %v1584_v44 = vld [vmem:[%s1817_s1 + $0xa8] sm:$0xff]   ;;  %v790_v49 = vld [vmem:[%s1667_s29] sm:$0xc]  ;;  %v1746_v50 = vld [vmem:[%s1667_s29 + $0x4] sm:$0xf] }
  0x17   : > { %1457 = vmatprep.subr.bf16.mxu1 %v1563_v7  ;;  %v393_v29 = vsel %vm382_vm1, %v388_v22, %v392_v27  ;;  %v396_v34 = vor.u32 %v394_v28, %v392_v27  ;;  %v704_v45 = vrot.slane %v702_v43, 1  ;;  %v1589_v51 = vld [vmem:[%s1817_s1 + $0xd8] sm:$0xff]   ;;  %v1327_v53 = vcombine.low %v790_v49, %v1746_v50  ;;  %v1753_v54 = vld [vmem:[%s1667_s29 + $0x8] sm:$0x1f]   ;;  %v1601_v61 = vld [vmem:[%s1667_s29 + $0x10] sm:$0xfc]  }
  0x18   : > { %v1591_v55 = vld [vmem:[%s1817_s1 + $0xf8] sm:$0xff]   ;;  %v823_v59 = vshrl.u32 %v1753_v54, 16  ;;  %v826_v60 = vshll.u32 %v1753_v54, 16  ;;  %v936_v4 = vshrl.u32 %v1601_v61, 16  ;;  %v939_v5 = vshll.u32 %v1601_v61, 16  ;;  %v1594_v18 = vld [vmem:[%s1817_s1 + $0xc8] sm:$0xff]  }
  0x19   : > { %1446 = vmatpush3.bf16.msra.mxu0 %v1562_v6  ;;  %v705_v47 = vsel %vm382_vm1, %v700_v42, %v704_v45  ;;  %v1588_v56 = vld [vmem:[%s1667_s29 + $0x38] ss:$0 sps:$4 sm:$0x33]   ;;  %v815_v57 = vshrl.u32 %v1327_v53, 16  ;;  %v818_v58 = vshll.u32 %v1327_v53, 16  ;;  %v708_v3 = vor.u32 %v706_v52, %v704_v45  ;;  %v1592_v6 = vld [vmem:[%s1817_s1 + $0xd0] sm:$0xff]  }
  0x1a   : > { %1458 = vmatpush3.bf16.msra.mxu1 %v1563_v7  ;;  %1463 = vmatprep.subr.bf16.mxu0 %v1568_v11  ;;  %v825_v0 = vrot.slane %v823_v59, 2  ;;  %v828_v1 = vrot.slane %v826_v60, 3  ;;  %v1602_v2 = vld [vmem:[%s1667_s29 + $0x18] sm:$0x1f]   ;;  %v1593_v7 = vld [vmem:[%s1817_s1 + $0xf0] sm:$0xff]   ;;  %v938_v12 = vrot.slane %v936_v4, 2 }
  0x1b   : > { %1475 = vmatprep.subr.bf16.mxu1 %v1569_v14  ;;  %v817_v62 = vrot.slane %v815_v57, 2  ;;  %v820_v63 = vrot.slane %v818_v58, 3  ;;  %v1033_v22 = vld [vmem:[%s1667_s29] sm:$0x8]  ;;  %v1048_v28 = vrot.slane %v1753_v54, 3  ;;  %v1604_v31 = vld [vmem:[%s1817_s1 + $0x108] sm:$0xff]  }
  0x1c   : > { %1448 = vmatmul.mubr.msk.bf16.vlgmr.msra.gmra.mxu0 %vm228_vm0, %v1566_v10  ;;  %v829_v9 = vor.u32 %v828_v1, %v825_v0  ;;  %v944_v10 = vshrl.u32 %v1602_v2, 16  ;;  %v1596_v23 = vld [vmem:[%s1817_s1 + $0xc0] sm:$0xff]  }
  0x1d   : > { %1460 = vmatmul.mubr.msk.bf16.vlgmr.msra.gmra.mxu1 %vm228_vm0, %v1567_v13  ;;  %1464 = vmatpush3.bf16.msra.mxu0 %v1568_v11  ;;  %v821_v8 = vor.u32 %v820_v63, %v817_v62  ;;  %v947_v11 = vshll.u32 %v1602_v2, 16  ;;  %v941_v13 = vrot.slane %v939_v5, 3 }
  0x1e   : > { %1476 = vmatpush3.bf16.msra.mxu1 %v1569_v14  ;;  %1465 = vmatprep.subr.bf16.mxu0 %v1570_v15 }
  0x1f   : > { %1477 = vmatprep.subr.bf16.mxu1 %v1571_v16  ;;  %1483 = vmatprep.mubr.msk.bf16.mxu1 %vm228_vm0, %v1578_v24  ;;  %v830_v14 = vsel %vm813_vm2, %v821_v8, %v829_v9  ;;  %v942_v17 = vor.u32 %v941_v13, %v938_v12  ;;  %v1597_v24 = vld [vmem:[%s1817_s1 + $0xe0] sm:$0xff]  }
  0x20   : > { %1471 = vmatprep.mubr.msk.bf16.mxu0 %vm228_vm0, %v393_v29  ;;  %v1603_v29 = vld [vmem:[%s1817_s1 + $0x110] sm:$0xff]  }
  0x21   : > { %1466 = vmatpush3.bf16.msra.mxu0 %v1570_v15  ;;  %v946_v15 = vrot.slane %v944_v10, 2 }
  0x22   : > { %1478 = vmatpush3.bf16.msra.mxu1 %v1571_v16  ;;  %1467 = vmatprep.subr.bf16.mxu0 %v1572_v19  ;;  %v949_v16 = vrot.slane %v947_v11, 3 }
  0x23   : > { %1479 = vmatprep.subr.bf16.mxu1 %v1573_v20 }
  0x25   : > { %1468 = vmatpush3.bf16.msra.mxu0 %v1572_v19  ;;  %v950_v19 = vor.u32 %v949_v16, %v946_v15 }
  0x26   : > { %1480 = vmatpush3.bf16.msra.mxu1 %v1573_v20  ;;  %1469 = vmatprep.subr.bf16.mxu0 %v1574_v25  ;;  %v1595_v20 = vld [vmem:[%s1817_s1 + $0xe8] sm:$0xff]  }
  0x27   : > { %1481 = vmatprep.subr.bf16.mxu1 %v1575_v26  ;;  %v951_v21 = vsel %vm813_vm2, %v942_v17, %v950_v19 }
  0x29   : > { %1470 = vmatpush3.bf16.msra.mxu0 %v1574_v25  ;;  %v1363_v25 = vcombine.low %v1033_v22, %v1746_v50 }
  0x2a   : > { %1482 = vmatpush3.bf16.msra.mxu1 %v1575_v26  ;;  %1487 = vmatprep.subr.bf16.mxu0 %v1577_v30  ;;  %v1600_v26 = vld [vmem:[%s1817_s1 + $0x118] sm:$0xff]  }
  0x2b   : > { %1499 = vmatprep.subr.bf16.mxu1 %v1580_v33  ;;  %v1047_v27 = vrot.slane %v1363_v25, 3 }
  0x2c   : > { %1472 = vmatmul.mubr.msk.bf16.vlgmr.msra.gmra.mxu0 %vm228_vm0, %v396_v34 }
  0x2d   : > { %1488 = vmatpush3.bf16.msra.mxu0 %v1577_v30  ;;  %1484 = vmatmul.mubr.msk.bf16.vlgmr.msra.gmra.mxu1 %vm228_vm0, %v1579_v32  ;;  %v1049_v30 = vsel %vm1046_vm3, %v1047_v27, %v1048_v28  ;;  %v1605_v32 = vld [vmem:[%s1817_s1 + $0x100] sm:$0xff]  }
  0x2e   : > { %1500 = vmatpush3.bf16.msra.mxu1 %v1580_v33  ;;  %1489 = vmatprep.subr.bf16.mxu0 %v1581_v35 }
  0x2f   : > { %1501 = vmatprep.subr.bf16.mxu1 %v1582_v38  ;;  %1495 = vmatprep.mubr.msk.bf16.mxu0 %vm228_vm0, %v1587_v39 }
  0x30   : > { %1507 = vmatprep.mubr.msk.bf16.mxu1 %vm228_vm0, %v705_v47 }
  0x31   : > { %1490 = vmatpush3.bf16.msra.mxu0 %v1581_v35 }
  0x32   : > { %1502 = vmatpush3.bf16.msra.mxu1 %v1582_v38  ;;  %1491 = vmatprep.subr.bf16.mxu0 %v1583_v41 }
  0x33   : > { %1503 = vmatprep.subr.bf16.mxu1 %v1584_v44 }
  0x35   : > { %1492 = vmatpush3.bf16.msra.mxu0 %v1583_v41 }
  0x36   : > { %1504 = vmatpush3.bf16.msra.mxu1 %v1584_v44  ;;  %1493 = vmatprep.subr.bf16.mxu0 %v1585_v46 }
  0x37   : > { %1505 = vmatprep.subr.bf16.mxu1 %v1586_v48 }
  0x39   : > { %1494 = vmatpush3.bf16.msra.mxu0 %v1585_v46 }
  0x3a   : > { %1506 = vmatpush3.bf16.msra.mxu1 %v1586_v48  ;;  %1511 = vmatprep.subr.bf16.mxu0 %v1589_v51 }
  0x3b   : > { %1523 = vmatprep.subr.bf16.mxu1 %v1591_v55 }
  0x3c   : > { %1496 = vmatmul.mubr.msk.bf16.vlgmr.msra.gmra.mxu0 %vm228_vm0, %v1588_v56 }
  0x3d   : > { %1512 = vmatpush3.bf16.msra.mxu0 %v1589_v51  ;;  %1508 = vmatmul.mubr.msk.bf16.vlgmr.msra.gmra.mxu1 %vm228_vm0, %v708_v3 }
  0x3e   : > { %1524 = vmatpush3.bf16.msra.mxu1 %v1591_v55  ;;  %1513 = vmatprep.subr.bf16.mxu0 %v1592_v6 }
  0x3f   : > { %1525 = vmatprep.subr.bf16.mxu1 %v1593_v7  ;;  %1519 = vmatprep.mubr.msk.bf16.mxu0 %vm228_vm0, %v830_v14 }
  0x40   : > { %1531 = vmatprep.mubr.msk.bf16.mxu1 %vm228_vm0, %v951_v21 }
  0x41   : > { %1514 = vmatpush3.bf16.msra.mxu0 %v1592_v6 }
  0x42   : > { %1526 = vmatpush3.bf16.msra.mxu1 %v1593_v7  ;;  %1515 = vmatprep.subr.bf16.mxu0 %v1594_v18 }
  0x43   : > { %1527 = vmatprep.subr.bf16.mxu1 %v1595_v20 }
  0x45   : > { %1516 = vmatpush3.bf16.msra.mxu0 %v1594_v18 }
  0x46   : > { %1528 = vmatpush3.bf16.msra.mxu1 %v1595_v20  ;;  %1517 = vmatprep.subr.bf16.mxu0 %v1596_v23 }
  0x47   : > { %1529 = vmatprep.subr.bf16.mxu1 %v1597_v24 }
  0x49   : > { %1518 = vmatpush3.bf16.msra.mxu0 %v1596_v23 }
  0x4a   : > { %1530 = vmatpush3.bf16.msra.mxu1 %v1597_v24  ;;  %1535 = vmatprep.subr.bf16.mxu0 %v1600_v26 }
  0x4c   : > { %1520 = vmatmul.mubr.msk.bf16.vlgmr.msra.gmra.mxu0 %vm228_vm0, %v829_v9 }
  0x4d   : > { %1536 = vmatpush3.bf16.msra.mxu0 %v1600_v26  ;;  %1532 = vmatmul.mubr.msk.bf16.vlgmr.msra.gmra.mxu1 %vm228_vm0, %v950_v19  ;;  %v1370_v19 = vld [vmem:[%s1818_s2] ss:$0 sm:$0xff] }
  0x4e   : > { %1537 = vmatprep.subr.bf16.mxu0 %v1603_v29  ;;  %1543 = vmatprep.mubr.msk.bf16.mxu0 %vm228_vm0, %v1049_v30 }
  0x51   : > { %1538 = vmatpush3.bf16.msra.mxu0 %v1603_v29 }
  0x52   : > { %1539 = vmatprep.subr.bf16.mxu0 %v1604_v31 }
  0x55   : > { %1540 = vmatpush3.bf16.msra.mxu0 %v1604_v31 }
  0x56   : > { %1541 = vmatprep.subr.bf16.mxu0 %v1605_v32 }
  0x59   : > { %1542 = vmatpush3.bf16.msra.mxu0 %v1605_v32 }
  0x5c   : > { %1544 = vmatmul.mubr.msk.bf16.vlgmr.msra.gmra.mxu0 %vm228_vm0, %v1048_v28 }
  0xdc   : > { %v1449_v33 = vpop.f32.mrf.mxu0 }
  0xdd   : > { %v1461_v34 = vpop.f32.mrf.mxu1 }
  0xde   : > { %v269_v35 = vpop.f32.mrf.mxu0  ;;  %v364_v55 = vadd.f32 %v1461_v34, %v1449_v33 }
  0xdf   : > { %v355_v36 = vpop.f32.mrf.mxu1 }
  0xe0   : > { %v1450_v37 = vpop.f32.mrf.mxu0  ;;  %v356_v57 = vadd.f32 %v355_v36, %v269_v35 }
  0xe1   : > { %v1462_v38 = vpop.f32.mrf.mxu1 }
  0xe2   : > { %v272_v39 = vpop.f32.mrf.mxu0 }
  0xe3   : > { %v358_v40 = vpop.f32.mrf.mxu1 }
  0xe4   : > { %v359_v0 = vadd.f32 %v358_v40, %v272_v39 }
  0xec   : > { %v1473_v41 = vpop.f32.mrf.mxu0 }
  0xed   : > { %v1485_v42 = vpop.f32.mrf.mxu1  ;;  %v477_v58 = vadd.f32 %v1473_v41, %v364_v55 }
  0xee   : > { %v461_v43 = vpop.f32.mrf.mxu0 }
  0xef   : > { %v563_v44 = vpop.f32.mrf.mxu1  ;;  %v475_v61 = vadd.f32 %v461_v43, %v356_v57  ;;  %v579_v1 = vadd.f32 %v1485_v42, %v477_v58 }
  0xf0   : > { %v1474_v45 = vpop.f32.mrf.mxu0 }
  0xf1   : > { %v1486_v46 = vpop.f32.mrf.mxu1  ;;  %v577_v4 = vadd.f32 %v563_v44, %v475_v61 }
  0xf2   : > { %v464_v47 = vpop.f32.mrf.mxu0 }
  0xf3   : > { %v566_v48 = vpop.f32.mrf.mxu1  ;;  %v476_v5 = vadd.f32 %v464_v47, %v359_v0 }
  0xf5   : > { %v578_v9 = vadd.f32 %v566_v48, %v476_v5 }
  0xfc   : > { %v1497_v49 = vpop.f32.mrf.mxu0 }
  0xfd   : > { %v1509_v50 = vpop.f32.mrf.mxu1  ;;  %v681_v6 = vadd.f32 %v1497_v49, %v579_v1 }
  0xfe   : > { %v665_v51 = vpop.f32.mrf.mxu0 }
  0xff   : > { %v773_v52 = vpop.f32.mrf.mxu1  ;;  %v679_v8 = vadd.f32 %v665_v51, %v577_v4  ;;  %v789_v10 = vadd.f32 %v1509_v50, %v681_v6 }
 0x100   : > { %v1498_v53 = vpop.f32.mrf.mxu0 }
 0x101   : > { %v1510_v54 = vpop.f32.mrf.mxu1  ;;  %v787_v11 = vadd.f32 %v773_v52, %v679_v8 }
 0x102   : > { %v668_v56 = vpop.f32.mrf.mxu0 }
 0x103   : > { %v776_v59 = vpop.f32.mrf.mxu1  ;;  %v680_v12 = vadd.f32 %v668_v56, %v578_v9 }
 0x105   : > { %v788_v16 = vadd.f32 %v776_v59, %v680_v12 }
 0x10c   : > { %v1521_v60 = vpop.f32.mrf.mxu0 }
 0x10d   : > { %v1533_v62 = vpop.f32.mrf.mxu1  ;;  %v911_v13 = vadd.f32 %v1521_v60, %v789_v10 }
 0x10e   : > { %v895_v63 = vpop.f32.mrf.mxu0 }
 0x10f   : > { %v1016_v2 = vpop.f32.mrf.mxu1  ;;  %v909_v14 = vadd.f32 %v895_v63, %v787_v11  ;;  %v1032_v17 = vadd.f32 %v1533_v62, %v911_v13 }
 0x110   : > { %v1522_v3 = vpop.f32.mrf.mxu0 }
 0x111   : > { %v1534_v7 = vpop.f32.mrf.mxu1  ;;  %v1030_v20 = vadd.f32 %v1016_v2, %v909_v14 }
 0x112   : > { %v898_v15 = vpop.f32.mrf.mxu0 }
 0x113   : > { %v910_v21 = vadd.f32 %v898_v15, %v788_v16  ;;  %v1019_v23 = vpop.f32.mrf.mxu1 }
 0x115   : > { %v1031_v28 = vadd.f32 %v1019_v23, %v910_v21 }
 0x11c   : > { %v1545_v18 = vpop.f32.mrf.mxu0 }
 0x11d   : > { %v1130_v22 = vadd.f32 %v1545_v18, %v1032_v17 }
 0x11e   : > { %v1114_v24 = vpop.f32.mrf.mxu0 }
 0x11f   : > { %v1140_v25 = vadd.f32 %v1370_v19, %v1130_v22  ;;  %v1128_v26 = vadd.f32 %v1114_v24, %v1030_v20 }
 0x120   : > { %v1546_v27 = vpop.f32.mrf.mxu0 }
 0x121   : > { %v1143_v29 = vmax.f32 %v1140_v25, 0.0  ;;  %v1138_v32 = vadd.f32 %v1370_v19, %v1128_v26 }
 0x122   : > { %v1117_v30 = vpop.f32.mrf.mxu0 }
 0x123   : > { %v1379_v31 = vpack.c.bf16 %v1143_v29, %v1143_v29  ;;  %v1129_v33 = vadd.f32 %v1117_v30, %v1031_v28  ;;  %v1141_v35 = vmax.f32 %v1138_v32, 0.0 }
 0x125   : > { %1159 = vst [vmem:[%s170_s21 + $0x8] sm:$0x3] %v1379_v31  ;;  %v1139_v34 = vadd.f32 %v1370_v19, %v1129_v33 }
 0x127   : > { %v1142_v36 = vmax.f32 %v1139_v34, 0.0 }
 0x129   : > { %v1383_v37 = vpack.c.bf16 %v1142_v36, %v1141_v35 }
 0x12b   : > { %1384 = vst [vmem:[%s170_s21] sm:$0xff] %v1383_v37  }
 0x12c PF: > { %s13_s12 = sadd.s32 1, %s1613_s12  }
 0x12d   : > { %p10_p4 = scmp.ge.s32.totalorder %s13_s12, 4  }
 0x12f   :  { %12 = sbr.rel (!%p10_p4) target bundleno = 1 (0x1), region = 73 }

// kernel: critic_forward.9
= control target key start
LH: loop header
LB: loop body
LE: loop exit
PB: predicated region body
PF: predicated region fallthrough
CT: control target
= control target key end

     0   :  { %v550_v0 = vlaneseq  ;;  %v5367_v2 = vmov 1983009808   ;;  %v5368_v5 = vmov 0   ;;  %vm567_vm0 = vcmask 1041408   ;;  %s7145_s3 = inlined_call_operand.vmem [shape: bf16[4,512], index: 3, kind: input, shape index: {}]   ;;  %s7146_s2 = inlined_call_operand.vmem [shape: bf16[2048,512], index: 2, kind: input, shape index: {}]   ;;  %s7147_s1 = inlined_call_operand.vmem [shape: bf16[2,4], index: 1, kind: input, shape index: {}]   ;;  %s7148_s0 = inlined_call_operand.vmem [shape: bf16[2,2048], index: 0, kind: input, shape index: {}]   ;;  %s7149_s4 = inlined_call_operand.vmem [shape: f32[1,512], index: 4, kind: input, shape index: {}]   ;;  %s7150_s5 = inlined_call_operand.vmem [shape: f32[1,512], index: 5, kind: input, shape index: {}]   ;;  %s7151_s6 = inlined_call_operand.<no memory space> [shape: f32[1,1], index: 6, kind: input, shape index: {}]   ;;  %s7152_s7 = inlined_call_operand.vmem [shape: f32[2,1], index: 7, kind: output, shape index: {}]  }
   0x1   :  { %v544_v1 = vld [vmem:[%s7145_s3] sm:$0xff]  ;;  %v548_v3 = vunpack.c.l.s4 %v5367_v2  ;;  %612 = vmatprep.mubr.bf16.mxu0 %v5368_v5  ;;  %653 = vmatprep.mubr.bf16.mxu1 %v5368_v5  ;;  %vm563_vm1 = vcmask 31744   ;;  %v5369_v40 = vmov 1966171168   ;;  %vm4068_vm2 = vcmask 1024  }
   0x2   :  { %v5413_v4 = vshrl.u32 %v550_v0, 7  ;;  %v546_v7 = vcombine.high %v544_v1, %v544_v1  ;;  %v4597_v15 = vld [vmem:[%s7146_s2 + $0xe4] ss:$16 sps:$4 sm:$0xff]   ;;  %v543_v17 = vld [vmem:[%s7147_s1] sm:$0x1]  ;;  %v666_v41 = vunpack.c.l.s4 %v5369_v40 }
   0x3   :  { %v549_v6 = vunpack.c.0.s8 %v548_v3  ;;  %v4600_v16 = vld [vmem:[%s7146_s2 + $0x2e4] ss:$16 sps:$4 sm:$0xff]   ;;  %v4595_v18 = vld [vmem:[%s7146_s2 + $0xe0] ss:$16 sps:$4 sm:$0xff]  }
   0x4   :  { %v4598_v19 = vld [vmem:[%s7146_s2 + $0x2e0] ss:$16 sps:$4 sm:$0xff]   ;;  %v4603_v20 = vld [vmem:[%s7146_s2 + $0xc4] ss:$16 sps:$4 sm:$0xff]   ;;  %v667_v46 = vunpack.c.0.s8 %v666_v41 }
   0x5   :  { %v552_v8 = vsub.s32 %v549_v6, %v5413_v4  ;;  %v4606_v21 = vld [vmem:[%s7146_s2 + $0x2c4] ss:$16 sps:$4 sm:$0xff]   ;;  %v4601_v22 = vld [vmem:[%s7146_s2 + $0xc0] ss:$16 sps:$4 sm:$0xff]  }
   0x6   :  { %v4604_v23 = vld [vmem:[%s7146_s2 + $0x2c0] ss:$16 sps:$4 sm:$0xff]   ;;  %v4609_v24 = vld [vmem:[%s7146_s2 + $0xa4] ss:$16 sps:$4 sm:$0xff]   ;;  %v5520_v51 = vsub.s32 %v667_v46, %v5413_v4 }
   0x7   :  { %v553_v9 = vrot.slane %v544_v1, %v552_v8  ;;  %v560_v10 = vrot.slane %v546_v7, %v552_v8  ;;  %v4612_v25 = vld [vmem:[%s7146_s2 + $0x2a4] ss:$16 sps:$4 sm:$0xff]   ;;  %v4607_v26 = vld [vmem:[%s7146_s2 + $0xa0] ss:$16 sps:$4 sm:$0xff]  }
   0x8   :  { %v4610_v27 = vld [vmem:[%s7146_s2 + $0x2a0] ss:$16 sps:$4 sm:$0xff]   ;;  %v4615_v28 = vld [vmem:[%s7146_s2 + $0x84] ss:$16 sps:$4 sm:$0xff]  }
   0x9   :  { %v561_v11 = vcombine.high %v553_v9, %v553_v9  ;;  %v562_v12 = vcombine.high %v560_v10, %v560_v10  ;;  %v569_v13 = vsel %vm567_vm0, %v553_v9, 0  ;;  %v575_v14 = vsel %vm567_vm0, %v560_v10, 0  ;;  %v4618_v29 = vld [vmem:[%s7146_s2 + $0x284] ss:$16 sps:$4 sm:$0xff]   ;;  %v4613_v30 = vld [vmem:[%s7146_s2 + $0x80] ss:$16 sps:$4 sm:$0xff]  }
   0xa   :  { %v4616_v31 = vld [vmem:[%s7146_s2 + $0x280] ss:$16 sps:$4 sm:$0xff]   ;;  %v4621_v32 = vld [vmem:[%s7146_s2 + $0x64] ss:$16 sps:$4 sm:$0xff]  }
   0xb   :  { %4074 = vmatprep.subr.msk.bf16.mxu0 %vm567_vm0, %v561_v11  ;;  %4076 = vmatprep.subr.msk.bf16.mxu1 %vm567_vm0, %v562_v12  ;;  %v4624_v33 = vld [vmem:[%s7146_s2 + $0x264] ss:$16 sps:$4 sm:$0xff]   ;;  %v4619_v34 = vld [vmem:[%s7146_s2 + $0x60] ss:$16 sps:$4 sm:$0xff]  }
   0xc   :  { %595 = vmatpush1.bf16.msra.mxu0 %v569_v13  ;;  %636 = vmatpush1.bf16.msra.mxu1 %v575_v14  ;;  %v4622_v35 = vld [vmem:[%s7146_s2 + $0x260] ss:$16 sps:$4 sm:$0xff]   ;;  %v4627_v36 = vld [vmem:[%s7146_s2 + $0x44] ss:$16 sps:$4 sm:$0xff]  }
   0xd   :  { %3338 = vmatprep.subr.bf16.mxu0 %v4597_v15  ;;  %3379 = vmatprep.subr.bf16.mxu1 %v4600_v16  ;;  %v4630_v37 = vld [vmem:[%s7146_s2 + $0x244] ss:$16 sps:$4 sm:$0xff]   ;;  %v4625_v38 = vld [vmem:[%s7146_s2 + $0x40] ss:$16 sps:$4 sm:$0xff]  }
   0xe   :  { %v4628_v39 = vld [vmem:[%s7146_s2 + $0x240] ss:$16 sps:$4 sm:$0xff]   ;;  %v4633_v42 = vld [vmem:[%s7146_s2 + $0x24] ss:$16 sps:$4 sm:$0xff]  }
   0xf   :  { %4075 = vmatmul.mubr.msk.bf16.vlgmr.msra.gmra.mxu0 %vm563_vm1, %v543_v17  ;;  %4077 = vmatmul.mubr.msk.bf16.vlgmr.msra.gmra.mxu1 %vm563_vm1, %v543_v17  ;;  %v4636_v43 = vld [vmem:[%s7146_s2 + $0x224] ss:$16 sps:$4 sm:$0xff]   ;;  %v4631_v44 = vld [vmem:[%s7146_s2 + $0x20] ss:$16 sps:$4 sm:$0xff]  }
  0x10   :  { %3339 = vmatpush1.bf16.msra.mxu0 %v4595_v18  ;;  %3380 = vmatpush1.bf16.msra.mxu1 %v4598_v19  ;;  %v4634_v45 = vld [vmem:[%s7146_s2 + $0x220] ss:$16 sps:$4 sm:$0xff]   ;;  %v4639_v47 = vld [vmem:[%s7146_s2 + $0x4] ss:$16 sps:$4 sm:$0xff]  }
  0x11   :  { %3340 = vmatprep.subr.bf16.mxu0 %v4603_v20  ;;  %3381 = vmatprep.subr.bf16.mxu1 %v4606_v21  ;;  %v4642_v48 = vld [vmem:[%s7146_s2 + $0x204] ss:$16 sps:$4 sm:$0xff]   ;;  %v4637_v49 = vld [vmem:[%s7146_s2] ss:$16 sps:$4 sm:$0xff]  }
  0x12   :  { %v4640_v50 = vld [vmem:[%s7146_s2 + $0x200] ss:$16 sps:$4 sm:$0xff]   ;;  %v4645_v52 = vld [vmem:[%s7146_s2 + $0x1e4] ss:$16 sps:$4 sm:$0xff]  }
  0x13   :  { %v4648_v53 = vld [vmem:[%s7146_s2 + $0x3e4] ss:$16 sps:$4 sm:$0xff]   ;;  %v4643_v54 = vld [vmem:[%s7146_s2 + $0x1e0] ss:$16 sps:$4 sm:$0xff]  }
  0x14   :  { %3341 = vmatpush1.bf16.msra.mxu0 %v4601_v22  ;;  %3382 = vmatpush1.bf16.msra.mxu1 %v4604_v23  ;;  %v4646_v55 = vld [vmem:[%s7146_s2 + $0x3e0] ss:$16 sps:$4 sm:$0xff]   ;;  %v4651_v56 = vld [vmem:[%s7146_s2 + $0x1c4] ss:$16 sps:$4 sm:$0xff]  }
  0x15   :  { %3342 = vmatprep.subr.bf16.mxu0 %v4609_v24  ;;  %3383 = vmatprep.subr.bf16.mxu1 %v4612_v25  ;;  %v29_v57 = vld [vmem:[%s7148_s0] sm:$0xff] }
  0x16   :  { %v4654_v58 = vld [vmem:[%s7146_s2 + $0x3c4] ss:$16 sps:$4 sm:$0xff]   ;;  %v671_v59 = vrot.slane %v29_v57, %v5520_v51  ;;  %v4649_v60 = vld [vmem:[%s7146_s2 + $0x1c0] ss:$16 sps:$4 sm:$0xff]   ;;  %v664_v16 = vcombine.high %v29_v57, %v29_v57 }
  0x17   :  { %v4652_v62 = vld [vmem:[%s7146_s2 + $0x3c0] ss:$16 sps:$4 sm:$0xff]   ;;  %v4657_v63 = vld [vmem:[%s7146_s2 + $0x1a4] ss:$16 sps:$4 sm:$0xff]  }
  0x18   :  { %3343 = vmatpush1.bf16.msra.mxu0 %v4607_v26  ;;  %3384 = vmatpush1.bf16.msra.mxu1 %v4610_v27  ;;  %v679_v61 = vcombine.high %v671_v59, %v671_v59  ;;  %v4660_v0 = vld [vmem:[%s7146_s2 + $0x3a4] ss:$16 sps:$4 sm:$0xff]   ;;  %v4655_v2 = vld [vmem:[%s7146_s2 + $0x1a0] ss:$16 sps:$4 sm:$0xff]   ;;  %v5614_v21 = vrot.slane %v664_v16, %v5520_v51 }
  0x19   :  { %3344 = vmatprep.subr.bf16.mxu0 %v4615_v28  ;;  %3385 = vmatprep.subr.bf16.mxu1 %v4618_v29  ;;  %v4658_v5 = vld [vmem:[%s7146_s2 + $0x3a0] ss:$16 sps:$4 sm:$0xff]   ;;  %v4663_v6 = vld [vmem:[%s7146_s2 + $0x184] ss:$16 sps:$4 sm:$0xff]   ;;  %v5634_v28 = vrot.slane %v671_v59, %v5520_v51 }
  0x1a   :  { %v5557_v1 = vrot.slane %v679_v61, %v5520_v51  ;;  %v4666_v7 = vld [vmem:[%s7146_s2 + $0x384] ss:$16 sps:$4 sm:$0xff]   ;;  %v4661_v8 = vld [vmem:[%s7146_s2 + $0x180] ss:$16 sps:$4 sm:$0xff]   ;;  %v680_v26 = vcombine.high %v5614_v21, %v5614_v21 }
  0x1b   :  { %v4664_v9 = vld [vmem:[%s7146_s2 + $0x380] ss:$16 sps:$4 sm:$0xff]   ;;  %v4669_v10 = vld [vmem:[%s7146_s2 + $0x164] ss:$16 sps:$4 sm:$0xff]  }
  0x1c   :  { %3345 = vmatpush1.bf16.msra.mxu0 %v4613_v30  ;;  %3386 = vmatpush1.bf16.msra.mxu1 %v4616_v31  ;;  %v5565_v3 = vcombine.high %v5557_v1, %v5557_v1  ;;  %v4672_v11 = vld [vmem:[%s7146_s2 + $0x364] ss:$16 sps:$4 sm:$0xff]   ;;  %v4667_v12 = vld [vmem:[%s7146_s2 + $0x160] ss:$16 sps:$4 sm:$0xff]  }
  0x1d   :  { %3346 = vmatprep.subr.bf16.mxu0 %v4621_v32  ;;  %3387 = vmatprep.subr.bf16.mxu1 %v4624_v33  ;;  %v4670_v13 = vld [vmem:[%s7146_s2 + $0x360] ss:$16 sps:$4 sm:$0xff]   ;;  %v4675_v14 = vld [vmem:[%s7146_s2 + $0x144] ss:$16 sps:$4 sm:$0xff]   ;;  %v5646_v32 = vrot.slane %v680_v26, %v5520_v51  ;;  %v5650_v33 = vcombine.high %v5634_v28, %v5634_v28 }
  0x1e   :  { %3370 = vmatprep.mubr.bf16.mxu0 %v5557_v1  ;;  %3411 = vmatprep.mubr.bf16.mxu1 %v5565_v3  ;;  %v4678_v15 = vld [vmem:[%s7146_s2 + $0x344] ss:$16 sps:$4 sm:$0xff]   ;;  %v4673_v17 = vld [vmem:[%s7146_s2 + $0x140] ss:$16 sps:$4 sm:$0xff]  }
  0x1f   :  { %v4676_v18 = vld [vmem:[%s7146_s2 + $0x340] ss:$16 sps:$4 sm:$0xff]   ;;  %v4681_v19 = vld [vmem:[%s7146_s2 + $0x124] ss:$16 sps:$4 sm:$0xff]  }
  0x20   :  { %3347 = vmatpush1.bf16.msra.mxu0 %v4619_v34  ;;  %3388 = vmatpush1.bf16.msra.mxu1 %v4622_v35  ;;  %v4684_v20 = vld [vmem:[%s7146_s2 + $0x324] ss:$16 sps:$4 sm:$0xff]   ;;  %v4679_v22 = vld [vmem:[%s7146_s2 + $0x120] ss:$16 sps:$4 sm:$0xff]  }
  0x21   :  { %3348 = vmatprep.subr.bf16.mxu0 %v4627_v36  ;;  %3389 = vmatprep.subr.bf16.mxu1 %v4630_v37  ;;  %v4682_v23 = vld [vmem:[%s7146_s2 + $0x320] ss:$16 sps:$4 sm:$0xff]   ;;  %v4687_v24 = vld [vmem:[%s7146_s2 + $0x104] ss:$16 sps:$4 sm:$0xff]  }
  0x22   :  { %v4690_v25 = vld [vmem:[%s7146_s2 + $0x304] ss:$16 sps:$4 sm:$0xff]   ;;  %v4685_v27 = vld [vmem:[%s7146_s2 + $0x100] ss:$16 sps:$4 sm:$0xff]  }
  0x23   :  { %v4688_v29 = vld [vmem:[%s7146_s2 + $0x300] ss:$16 sps:$4 sm:$0xff]   ;;  %v4693_v30 = vld [vmem:[%s7146_s2 + $0x4e4] ss:$16 sps:$4 sm:$0xff]  }
  0x24   :  { %3349 = vmatpush1.bf16.msra.mxu0 %v4625_v38  ;;  %3390 = vmatpush1.bf16.msra.mxu1 %v4628_v39  ;;  %v4696_v31 = vld [vmem:[%s7146_s2 + $0x6e4] ss:$16 sps:$4 sm:$0xff]   ;;  %v4691_v34 = vld [vmem:[%s7146_s2 + $0x4e0] ss:$16 sps:$4 sm:$0xff]   ;;  %v5666_v38 = vcombine.high %v5646_v32, %v5646_v32 }
  0x25   :  { %3350 = vmatprep.subr.bf16.mxu0 %v4633_v42  ;;  %3391 = vmatprep.subr.bf16.mxu1 %v4636_v43  ;;  %v4694_v35 = vld [vmem:[%s7146_s2 + $0x6e0] ss:$16 sps:$4 sm:$0xff]   ;;  %v4699_v36 = vld [vmem:[%s7146_s2 + $0x4c4] ss:$16 sps:$4 sm:$0xff]  }
  0x26   :  { %v4702_v37 = vld [vmem:[%s7146_s2 + $0x6c4] ss:$16 sps:$4 sm:$0xff]   ;;  %v4697_v39 = vld [vmem:[%s7146_s2 + $0x4c0] ss:$16 sps:$4 sm:$0xff]  }
  0x27   :  { %v4700_v40 = vld [vmem:[%s7146_s2 + $0x6c0] ss:$16 sps:$4 sm:$0xff]   ;;  %v4705_v41 = vld [vmem:[%s7146_s2 + $0x4a4] ss:$16 sps:$4 sm:$0xff]  }
  0x28   :  { %3351 = vmatpush1.bf16.msra.mxu0 %v4631_v44  ;;  %3392 = vmatpush1.bf16.msra.mxu1 %v4634_v45  ;;  %v4708_v42 = vld [vmem:[%s7146_s2 + $0x6a4] ss:$16 sps:$4 sm:$0xff]   ;;  %v4703_v43 = vld [vmem:[%s7146_s2 + $0x4a0] ss:$16 sps:$4 sm:$0xff]  }
  0x29   :  { %3352 = vmatprep.subr.bf16.mxu0 %v4639_v47  ;;  %3393 = vmatprep.subr.bf16.mxu1 %v4642_v48  ;;  %v4706_v44 = vld [vmem:[%s7146_s2 + $0x6a0] ss:$16 sps:$4 sm:$0xff]   ;;  %v4711_v45 = vld [vmem:[%s7146_s2 + $0x484] ss:$16 sps:$4 sm:$0xff]  }
  0x2a   :  { %v4714_v46 = vld [vmem:[%s7146_s2 + $0x684] ss:$16 sps:$4 sm:$0xff]   ;;  %v4709_v47 = vld [vmem:[%s7146_s2 + $0x480] ss:$16 sps:$4 sm:$0xff]  }
  0x2b   :  { %v4712_v48 = vld [vmem:[%s7146_s2 + $0x680] ss:$16 sps:$4 sm:$0xff]   ;;  %v4732_v59 = vld [vmem:[%s7146_s2 + $0x624] ss:$16 sps:$4 sm:$0xff]  }
  0x2c   :  { %3353 = vmatpush1.bf16.msra.mxu0 %v4637_v49  ;;  %3394 = vmatpush1.bf16.msra.mxu1 %v4640_v50  ;;  %v4717_v49 = vld [vmem:[%s7146_s2 + $0x464] ss:$16 sps:$4 sm:$0xff]   ;;  %v4724_v57 = vld [vmem:[%s7146_s2 + $0x640] ss:$16 sps:$4 sm:$0xff]  }
  0x2d   :  { %3354 = vmatprep.subr.bf16.mxu0 %v4645_v52  ;;  %3395 = vmatprep.subr.bf16.mxu1 %v4648_v53  ;;  %v4720_v50 = vld [vmem:[%s7146_s2 + $0x664] ss:$16 sps:$4 sm:$0xff]   ;;  %v4715_v52 = vld [vmem:[%s7146_s2 + $0x460] ss:$16 sps:$4 sm:$0xff]  }
  0x2e   :  { %v4718_v53 = vld [vmem:[%s7146_s2 + $0x660] ss:$16 sps:$4 sm:$0xff]   ;;  %v4771_v26 = vld [vmem:[%s7146_s2 + $0x544] ss:$16 sps:$4 sm:$0xff]  }
  0x2f   :  { %v4730_v61 = vld [vmem:[%s7146_s2 + $0x620] ss:$16 sps:$4 sm:$0xff]  }
  0x30   :  { %3355 = vmatpush2.bf16.msra.mxu0 %v4643_v54  ;;  %3396 = vmatpush2.bf16.msra.mxu1 %v4646_v55  ;;  %v4723_v54 = vld [vmem:[%s7146_s2 + $0x444] ss:$16 sps:$4 sm:$0xff]   ;;  %v4754_v16 = vld [vmem:[%s7146_s2 + $0x7a0] ss:$16 sps:$4 sm:$0xff]  }
  0x31   :  { %3356 = vmatprep.subr.bf16.mxu0 %v4651_v56  ;;  %3397 = vmatprep.subr.bf16.mxu1 %v4654_v58  ;;  %v4726_v55 = vld [vmem:[%s7146_s2 + $0x644] ss:$16 sps:$4 sm:$0xff]   ;;  %v4721_v56 = vld [vmem:[%s7146_s2 + $0x440] ss:$16 sps:$4 sm:$0xff]  }
  0x32   :  { %v4729_v58 = vld [vmem:[%s7146_s2 + $0x424] ss:$16 sps:$4 sm:$0xff]  }
  0x34   :  { %3357 = vmatpush2.bf16.msra.mxu0 %v4649_v60  ;;  %3398 = vmatpush2.bf16.msra.mxu1 %v4652_v62  ;;  %v4727_v60 = vld [vmem:[%s7146_s2 + $0x420] ss:$16 sps:$4 sm:$0xff]   ;;  %v4735_v62 = vld [vmem:[%s7146_s2 + $0x404] ss:$16 sps:$4 sm:$0xff]  }
  0x35   :  { %3358 = vmatprep.subr.bf16.mxu0 %v4657_v63  ;;  %3399 = vmatprep.subr.bf16.mxu1 %v4660_v0  ;;  %v4738_v63 = vld [vmem:[%s7146_s2 + $0x604] ss:$16 sps:$4 sm:$0xff]   ;;  %v4733_v0 = vld [vmem:[%s7146_s2 + $0x400] ss:$16 sps:$4 sm:$0xff]  }
  0x38   :  { %3359 = vmatpush2.bf16.msra.mxu0 %v4655_v2  ;;  %3400 = vmatpush2.bf16.msra.mxu1 %v4658_v5  ;;  %v4736_v2 = vld [vmem:[%s7146_s2 + $0x600] ss:$16 sps:$4 sm:$0xff]   ;;  %v4741_v5 = vld [vmem:[%s7146_s2 + $0x5e4] ss:$16 sps:$4 sm:$0xff]  }
  0x39   :  { %3360 = vmatprep.subr.bf16.mxu0 %v4663_v6  ;;  %3401 = vmatprep.subr.bf16.mxu1 %v4666_v7  ;;  %v4744_v6 = vld [vmem:[%s7146_s2 + $0x7e4] ss:$16 sps:$4 sm:$0xff]   ;;  %v4739_v7 = vld [vmem:[%s7146_s2 + $0x5e0] ss:$16 sps:$4 sm:$0xff]  }
  0x3c   :  { %3361 = vmatpush2.bf16.msra.mxu0 %v4661_v8  ;;  %3402 = vmatpush2.bf16.msra.mxu1 %v4664_v9  ;;  %v4742_v8 = vld [vmem:[%s7146_s2 + $0x7e0] ss:$16 sps:$4 sm:$0xff]   ;;  %v4747_v9 = vld [vmem:[%s7146_s2 + $0x5c4] ss:$16 sps:$4 sm:$0xff]  }
  0x3d   :  { %3362 = vmatprep.subr.bf16.mxu0 %v4669_v10  ;;  %3403 = vmatprep.subr.bf16.mxu1 %v4672_v11  ;;  %v4750_v10 = vld [vmem:[%s7146_s2 + $0x7c4] ss:$16 sps:$4 sm:$0xff]   ;;  %v4745_v11 = vld [vmem:[%s7146_s2 + $0x5c0] ss:$16 sps:$4 sm:$0xff]  }
  0x40   :  { %3363 = vmatpush2.bf16.msra.mxu0 %v4667_v12  ;;  %3404 = vmatpush2.bf16.msra.mxu1 %v4670_v13  ;;  %v4748_v12 = vld [vmem:[%s7146_s2 + $0x7c0] ss:$16 sps:$4 sm:$0xff]   ;;  %v4753_v13 = vld [vmem:[%s7146_s2 + $0x5a4] ss:$16 sps:$4 sm:$0xff]  }
  0x41   :  { %3364 = vmatprep.subr.bf16.mxu0 %v4675_v14  ;;  %3405 = vmatprep.subr.bf16.mxu1 %v4678_v15  ;;  %v4756_v14 = vld [vmem:[%s7146_s2 + $0x7a4] ss:$16 sps:$4 sm:$0xff]   ;;  %v4751_v15 = vld [vmem:[%s7146_s2 + $0x5a0] ss:$16 sps:$4 sm:$0xff]  }
  0x44   :  { %3365 = vmatpush2.bf16.msra.mxu0 %v4673_v17  ;;  %3406 = vmatpush2.bf16.msra.mxu1 %v4676_v18  ;;  %v4759_v17 = vld [vmem:[%s7146_s2 + $0x584] ss:$16 sps:$4 sm:$0xff]  }
  0x45   :  { %3366 = vmatprep.subr.bf16.mxu0 %v4681_v19  ;;  %3407 = vmatprep.subr.bf16.mxu1 %v4684_v20  ;;  %v4762_v18 = vld [vmem:[%s7146_s2 + $0x784] ss:$16 sps:$4 sm:$0xff]   ;;  %v4757_v19 = vld [vmem:[%s7146_s2 + $0x580] ss:$16 sps:$4 sm:$0xff]  }
  0x46   :  { %v4760_v20 = vld [vmem:[%s7146_s2 + $0x780] ss:$16 sps:$4 sm:$0xff]  }
  0x48   :  { %3367 = vmatpush2.bf16.msra.mxu0 %v4679_v22  ;;  %3408 = vmatpush2.bf16.msra.mxu1 %v4682_v23  ;;  %v4765_v22 = vld [vmem:[%s7146_s2 + $0x564] ss:$16 sps:$4 sm:$0xff]  }
  0x49   :  { %3368 = vmatprep.subr.bf16.mxu0 %v4687_v24  ;;  %3409 = vmatprep.subr.bf16.mxu1 %v4690_v25  ;;  %v4768_v23 = vld [vmem:[%s7146_s2 + $0x764] ss:$16 sps:$4 sm:$0xff]   ;;  %v4763_v24 = vld [vmem:[%s7146_s2 + $0x560] ss:$16 sps:$4 sm:$0xff]  }
  0x4a   :  { %v4766_v25 = vld [vmem:[%s7146_s2 + $0x760] ss:$16 sps:$4 sm:$0xff]  }
  0x4c   :  { %3369 = vmatpush2.bf16.msra.mxu0 %v4685_v27  ;;  %3410 = vmatpush2.bf16.msra.mxu1 %v4688_v29  ;;  %v4774_v27 = vld [vmem:[%s7146_s2 + $0x744] ss:$16 sps:$4 sm:$0xff]   ;;  %v4769_v29 = vld [vmem:[%s7146_s2 + $0x540] ss:$16 sps:$4 sm:$0xff]  }
  0x4d   :  { %3420 = vmatprep.subr.bf16.mxu0 %v4693_v30  ;;  %3461 = vmatprep.subr.bf16.mxu1 %v4696_v31  ;;  %v4772_v30 = vld [vmem:[%s7146_s2 + $0x740] ss:$16 sps:$4 sm:$0xff]   ;;  %v4777_v31 = vld [vmem:[%s7146_s2 + $0x524] ss:$16 sps:$4 sm:$0xff]  }
  0x4f   :  { %3371 = vmatmul.mubr.bf16.vlgmr.msra.gmra.mxu0 %v5634_v28  ;;  %3412 = vmatmul.mubr.bf16.vlgmr.msra.gmra.mxu1 %v5650_v33 }
  0x50   :  { %3421 = vmatpush1.bf16.msra.mxu0 %v4691_v34  ;;  %3462 = vmatpush1.bf16.msra.mxu1 %v4694_v35  ;;  %v4780_v34 = vld [vmem:[%s7146_s2 + $0x724] ss:$16 sps:$4 sm:$0xff]   ;;  %v5831_v35 = vld [vmem:[%s7148_s0 + $0x8] sm:$0xff] }
  0x51   :  { %3422 = vmatprep.subr.bf16.mxu0 %v4699_v36  ;;  %3463 = vmatprep.subr.bf16.mxu1 %v4702_v37  ;;  %v4775_v36 = vld [vmem:[%s7146_s2 + $0x520] ss:$16 sps:$4 sm:$0xff]  }
  0x52   :  { %3452 = vmatprep.mubr.bf16.mxu0 %v5646_v32  ;;  %3493 = vmatprep.mubr.bf16.mxu1 %v5666_v38  ;;  %v4778_v37 = vld [vmem:[%s7146_s2 + $0x720] ss:$16 sps:$4 sm:$0xff]  }
  0x54   :  { %3423 = vmatpush1.bf16.msra.mxu0 %v4697_v39  ;;  %3464 = vmatpush1.bf16.msra.mxu1 %v4700_v40  ;;  %v5841_v39 = vrot.slane %v5831_v35, %v5520_v51  ;;  %v4783_v40 = vld [vmem:[%s7146_s2 + $0x504] ss:$16 sps:$4 sm:$0xff]  }
  0x55   :  { %3424 = vmatprep.subr.bf16.mxu0 %v4705_v41  ;;  %3465 = vmatprep.subr.bf16.mxu1 %v4708_v42  ;;  %v4786_v41 = vld [vmem:[%s7146_s2 + $0x704] ss:$16 sps:$4 sm:$0xff]  }
  0x56   :  { %v728_v42 = vcombine.high %v5841_v39, %v5841_v39 }
  0x58   :  { %3425 = vmatpush1.bf16.msra.mxu0 %v4703_v43  ;;  %3466 = vmatpush1.bf16.msra.mxu1 %v4706_v44  ;;  %v4781_v43 = vld [vmem:[%s7146_s2 + $0x500] ss:$16 sps:$4 sm:$0xff]  }
  0x59   :  { %3426 = vmatprep.subr.bf16.mxu0 %v4711_v45  ;;  %3467 = vmatprep.subr.bf16.mxu1 %v4714_v46  ;;  %v4784_v44 = vld [vmem:[%s7146_s2 + $0x700] ss:$16 sps:$4 sm:$0xff]   ;;  %v5859_v45 = vrot.slane %v5614_v21, %v5520_v51  ;;  %v4790_v46 = vld [vmem:[%s7146_s2 + $0x8e4] ss:$16 sps:$4 sm:$0xff]  }
  0x5a   :  { %v4788_v21 = vld [vmem:[%s7146_s2 + $0x8e0] ss:$16 sps:$4 sm:$0xff]  }
  0x5c   :  { %3427 = vmatpush1.bf16.msra.mxu0 %v4709_v47  ;;  %3468 = vmatpush1.bf16.msra.mxu1 %v4712_v48  ;;  %v4793_v47 = vld [vmem:[%s7146_s2 + $0xae4] ss:$16 sps:$4 sm:$0xff]   ;;  %v5868_v48 = vrot.slane %v728_v42, %v5520_v51  ;;  %v4857_v42 = vld [vmem:[%s7146_s2 + $0xb80] ss:$16 sps:$4 sm:$0xff]  }
  0x5d   :  { %3428 = vmatprep.subr.bf16.mxu0 %v4717_v49  ;;  %3469 = vmatprep.subr.bf16.mxu1 %v4720_v50  ;;  %v5872_v49 = vcombine.high %v5859_v45, %v5859_v45  ;;  %v4791_v50 = vld [vmem:[%s7146_s2 + $0xae0] ss:$16 sps:$4 sm:$0xff]  }
  0x60   :  { %3429 = vmatpush1.bf16.msra.mxu0 %v4715_v52  ;;  %3470 = vmatpush1.bf16.msra.mxu1 %v4718_v53  ;;  %v4796_v52 = vld [vmem:[%s7146_s2 + $0x8c4] ss:$16 sps:$4 sm:$0xff]  }
  0x61   :  { %3430 = vmatprep.subr.bf16.mxu0 %v4723_v54  ;;  %3471 = vmatprep.subr.bf16.mxu1 %v4726_v55  ;;  %v4799_v53 = vld [vmem:[%s7146_s2 + $0xac4] ss:$16 sps:$4 sm:$0xff]   ;;  %v5888_v54 = vcombine.high %v5868_v48, %v5868_v48  ;;  %v4794_v55 = vld [vmem:[%s7146_s2 + $0x8c0] ss:$16 sps:$4 sm:$0xff]  }
  0x64   :  { %3431 = vmatpush1.bf16.msra.mxu0 %v4721_v56  ;;  %3472 = vmatpush1.bf16.msra.mxu1 %v4724_v57  ;;  %v4797_v56 = vld [vmem:[%s7146_s2 + $0xac0] ss:$16 sps:$4 sm:$0xff]   ;;  %v4802_v57 = vld [vmem:[%s7146_s2 + $0x8a4] ss:$16 sps:$4 sm:$0xff]  }
  0x65   :  { %3432 = vmatprep.subr.bf16.mxu0 %v4729_v58  ;;  %3473 = vmatprep.subr.bf16.mxu1 %v4732_v59  ;;  %v4805_v58 = vld [vmem:[%s7146_s2 + $0xaa4] ss:$16 sps:$4 sm:$0xff]   ;;  %v4800_v59 = vld [vmem:[%s7146_s2 + $0x8a0] ss:$16 sps:$4 sm:$0xff]  }
  0x68   :  { %3433 = vmatpush1.bf16.msra.mxu0 %v4727_v60  ;;  %3474 = vmatpush1.bf16.msra.mxu1 %v4730_v61  ;;  %v4803_v60 = vld [vmem:[%s7146_s2 + $0xaa0] ss:$16 sps:$4 sm:$0xff]   ;;  %v4808_v61 = vld [vmem:[%s7146_s2 + $0x884] ss:$16 sps:$4 sm:$0xff]  }
  0x69   :  { %3434 = vmatprep.subr.bf16.mxu0 %v4735_v62  ;;  %3475 = vmatprep.subr.bf16.mxu1 %v4738_v63  ;;  %v4811_v62 = vld [vmem:[%s7146_s2 + $0xa84] ss:$16 sps:$4 sm:$0xff]   ;;  %v4806_v63 = vld [vmem:[%s7146_s2 + $0x880] ss:$16 sps:$4 sm:$0xff]  }
  0x6c   :  { %3435 = vmatpush1.bf16.msra.mxu0 %v4733_v0  ;;  %3476 = vmatpush1.bf16.msra.mxu1 %v4736_v2  ;;  %v4809_v0 = vld [vmem:[%s7146_s2 + $0xa80] ss:$16 sps:$4 sm:$0xff]   ;;  %v4814_v2 = vld [vmem:[%s7146_s2 + $0x864] ss:$16 sps:$4 sm:$0xff]  }
  0x6d   :  { %3436 = vmatprep.subr.bf16.mxu0 %v4741_v5  ;;  %3477 = vmatprep.subr.bf16.mxu1 %v4744_v6  ;;  %v4817_v5 = vld [vmem:[%s7146_s2 + $0xa64] ss:$16 sps:$4 sm:$0xff]   ;;  %v4812_v6 = vld [vmem:[%s7146_s2 + $0x860] ss:$16 sps:$4 sm:$0xff]  }
  0x70   :  { %3437 = vmatpush2.bf16.msra.mxu0 %v4739_v7  ;;  %3478 = vmatpush2.bf16.msra.mxu1 %v4742_v8  ;;  %v4815_v7 = vld [vmem:[%s7146_s2 + $0xa60] ss:$16 sps:$4 sm:$0xff]   ;;  %v4820_v8 = vld [vmem:[%s7146_s2 + $0x844] ss:$16 sps:$4 sm:$0xff]  }
  0x71   :  { %3438 = vmatprep.subr.bf16.mxu0 %v4747_v9  ;;  %3479 = vmatprep.subr.bf16.mxu1 %v4750_v10  ;;  %v4823_v9 = vld [vmem:[%s7146_s2 + $0xa44] ss:$16 sps:$4 sm:$0xff]   ;;  %v4818_v10 = vld [vmem:[%s7146_s2 + $0x840] ss:$16 sps:$4 sm:$0xff]  }
  0x74   :  { %3439 = vmatpush2.bf16.msra.mxu0 %v4745_v11  ;;  %3480 = vmatpush2.bf16.msra.mxu1 %v4748_v12  ;;  %v4821_v11 = vld [vmem:[%s7146_s2 + $0xa40] ss:$16 sps:$4 sm:$0xff]   ;;  %v4826_v12 = vld [vmem:[%s7146_s2 + $0x824] ss:$16 sps:$4 sm:$0xff]  }
  0x75   :  { %3440 = vmatprep.subr.bf16.mxu0 %v4753_v13  ;;  %3481 = vmatprep.subr.bf16.mxu1 %v4756_v14  ;;  %v4829_v13 = vld [vmem:[%s7146_s2 + $0xa24] ss:$16 sps:$4 sm:$0xff]   ;;  %v4824_v14 = vld [vmem:[%s7146_s2 + $0x820] ss:$16 sps:$4 sm:$0xff]  }
  0x78   :  { %3441 = vmatpush2.bf16.msra.mxu0 %v4751_v15  ;;  %3482 = vmatpush2.bf16.msra.mxu1 %v4754_v16  ;;  %v4827_v15 = vld [vmem:[%s7146_s2 + $0xa20] ss:$16 sps:$4 sm:$0xff]   ;;  %v4832_v16 = vld [vmem:[%s7146_s2 + $0x804] ss:$16 sps:$4 sm:$0xff]  }
  0x79   :  { %3442 = vmatprep.subr.bf16.mxu0 %v4759_v17  ;;  %3483 = vmatprep.subr.bf16.mxu1 %v4762_v18  ;;  %v4835_v17 = vld [vmem:[%s7146_s2 + $0xa04] ss:$16 sps:$4 sm:$0xff]   ;;  %v4830_v18 = vld [vmem:[%s7146_s2 + $0x800] ss:$16 sps:$4 sm:$0xff]  }
  0x7c   :  { %3443 = vmatpush2.bf16.msra.mxu0 %v4757_v19  ;;  %3484 = vmatpush2.bf16.msra.mxu1 %v4760_v20  ;;  %v4833_v19 = vld [vmem:[%s7146_s2 + $0xa00] ss:$16 sps:$4 sm:$0xff]   ;;  %v4838_v20 = vld [vmem:[%s7146_s2 + $0x9e4] ss:$16 sps:$4 sm:$0xff]  }
  0x7d   :  { %3444 = vmatprep.subr.bf16.mxu0 %v4765_v22  ;;  %3485 = vmatprep.subr.bf16.mxu1 %v4768_v23  ;;  %v4841_v22 = vld [vmem:[%s7146_s2 + $0xbe4] ss:$16 sps:$4 sm:$0xff]   ;;  %v4836_v23 = vld [vmem:[%s7146_s2 + $0x9e0] ss:$16 sps:$4 sm:$0xff]  }
  0x80   :  { %3445 = vmatpush2.bf16.msra.mxu0 %v4763_v24  ;;  %3486 = vmatpush2.bf16.msra.mxu1 %v4766_v25  ;;  %v4839_v24 = vld [vmem:[%s7146_s2 + $0xbe0] ss:$16 sps:$4 sm:$0xff]   ;;  %v4844_v25 = vld [vmem:[%s7146_s2 + $0x9c4] ss:$16 sps:$4 sm:$0xff]  }
  0x81   :  { %3446 = vmatprep.subr.bf16.mxu0 %v4771_v26  ;;  %3487 = vmatprep.subr.bf16.mxu1 %v4774_v27  ;;  %v4847_v26 = vld [vmem:[%s7146_s2 + $0xbc4] ss:$16 sps:$4 sm:$0xff]   ;;  %v4842_v27 = vld [vmem:[%s7146_s2 + $0x9c0] ss:$16 sps:$4 sm:$0xff]  }
  0x84   :  { %3447 = vmatpush2.bf16.msra.mxu0 %v4769_v29  ;;  %3488 = vmatpush2.bf16.msra.mxu1 %v4772_v30  ;;  %v4845_v29 = vld [vmem:[%s7146_s2 + $0xbc0] ss:$16 sps:$4 sm:$0xff]   ;;  %v4850_v30 = vld [vmem:[%s7146_s2 + $0x9a4] ss:$16 sps:$4 sm:$0xff]  }
  0x85   :  { %3448 = vmatprep.subr.bf16.mxu0 %v4777_v31  ;;  %3489 = vmatprep.subr.bf16.mxu1 %v4780_v34  ;;  %v4853_v31 = vld [vmem:[%s7146_s2 + $0xba4] ss:$16 sps:$4 sm:$0xff]   ;;  %v4848_v34 = vld [vmem:[%s7146_s2 + $0x9a0] ss:$16 sps:$4 sm:$0xff]  }
  0x88   :  { %3449 = vmatpush2.bf16.msra.mxu0 %v4775_v36  ;;  %3490 = vmatpush2.bf16.msra.mxu1 %v4778_v37  ;;  %v4851_v36 = vld [vmem:[%s7146_s2 + $0xba0] ss:$16 sps:$4 sm:$0xff]   ;;  %v4856_v37 = vld [vmem:[%s7146_s2 + $0x984] ss:$16 sps:$4 sm:$0xff]  }
  0x89   :  { %3450 = vmatprep.subr.bf16.mxu0 %v4783_v40  ;;  %3491 = vmatprep.subr.bf16.mxu1 %v4786_v41  ;;  %v4859_v40 = vld [vmem:[%s7146_s2 + $0xb84] ss:$16 sps:$4 sm:$0xff]   ;;  %v4854_v41 = vld [vmem:[%s7146_s2 + $0x980] ss:$16 sps:$4 sm:$0xff]  }
  0x8c   :  { %3451 = vmatpush2.bf16.msra.mxu0 %v4781_v43  ;;  %3492 = vmatpush2.bf16.msra.mxu1 %v4784_v44  ;;  %v4862_v43 = vld [vmem:[%s7146_s2 + $0x964] ss:$16 sps:$4 sm:$0xff]  }
  0x8d   :  { %3502 = vmatprep.subr.bf16.mxu0 %v4790_v46  ;;  %3543 = vmatprep.subr.bf16.mxu1 %v4793_v47  ;;  %v4865_v44 = vld [vmem:[%s7146_s2 + $0xb64] ss:$16 sps:$4 sm:$0xff]   ;;  %v4860_v46 = vld [vmem:[%s7146_s2 + $0x960] ss:$16 sps:$4 sm:$0xff]  }
  0x8e   :  { %v4863_v47 = vld [vmem:[%s7146_s2 + $0xb60] ss:$16 sps:$4 sm:$0xff]  }
  0x8f   :  { %3453 = vmatmul.mubr.bf16.vlgmr.msra.gmra.mxu0 %v5859_v45  ;;  %3494 = vmatmul.mubr.bf16.vlgmr.msra.gmra.mxu1 %v5872_v49 }
  0x90   :  { %3503 = vmatpush1.bf16.msra.mxu0 %v4788_v21  ;;  %3544 = vmatpush1.bf16.msra.mxu1 %v4791_v50  ;;  %v4868_v21 = vld [vmem:[%s7146_s2 + $0x944] ss:$16 sps:$4 sm:$0xff]  }
  0x91   :  { %3504 = vmatprep.subr.bf16.mxu0 %v4796_v52  ;;  %3545 = vmatprep.subr.bf16.mxu1 %v4799_v53  ;;  %v4871_v50 = vld [vmem:[%s7146_s2 + $0xb44] ss:$16 sps:$4 sm:$0xff]   ;;  %v713_v52 = vcombine.high %v5831_v35, %v5831_v35  ;;  %v4866_v53 = vld [vmem:[%s7146_s2 + $0x940] ss:$16 sps:$4 sm:$0xff]  }
  0x92   :  { %3534 = vmatprep.mubr.bf16.mxu0 %v5868_v48  ;;  %3575 = vmatprep.mubr.bf16.mxu1 %v5888_v54  ;;  %v4877_v35 = vld [vmem:[%s7146_s2 + $0xb24] ss:$16 sps:$4 sm:$0xff]  }
  0x94   :  { %3505 = vmatpush1.bf16.msra.mxu0 %v4794_v55  ;;  %3546 = vmatpush1.bf16.msra.mxu1 %v4797_v56  ;;  %v4869_v55 = vld [vmem:[%s7146_s2 + $0xb40] ss:$16 sps:$4 sm:$0xff]   ;;  %v4874_v56 = vld [vmem:[%s7146_s2 + $0x924] ss:$16 sps:$4 sm:$0xff]  }
  0x95   :  { %3506 = vmatprep.subr.bf16.mxu0 %v4802_v57  ;;  %3547 = vmatprep.subr.bf16.mxu1 %v4805_v58  ;;  %v6053_v57 = vrot.slane %v713_v52, %v5520_v51  ;;  %v4872_v58 = vld [vmem:[%s7146_s2 + $0x920] ss:$16 sps:$4 sm:$0xff]  }
  0x96   :  { %v4923_v52 = vld [vmem:[%s7146_s2 + $0xe20] ss:$16 sps:$4 sm:$0xff]  }
  0x98   :  { %3507 = vmatpush1.bf16.msra.mxu0 %v4800_v59  ;;  %3548 = vmatpush1.bf16.msra.mxu1 %v4803_v60  ;;  %v4875_v59 = vld [vmem:[%s7146_s2 + $0xb20] ss:$16 sps:$4 sm:$0xff]   ;;  %v4880_v60 = vld [vmem:[%s7146_s2 + $0x904] ss:$16 sps:$4 sm:$0xff]  }
  0x99   :  { %3508 = vmatprep.subr.bf16.mxu0 %v4808_v61  ;;  %3549 = vmatprep.subr.bf16.mxu1 %v4811_v62  ;;  %v4883_v61 = vld [vmem:[%s7146_s2 + $0xb04] ss:$16 sps:$4 sm:$0xff]   ;;  %v729_v62 = vcombine.high %v6053_v57, %v6053_v57 }
  0x9c   :  { %3509 = vmatpush1.bf16.msra.mxu0 %v4806_v63  ;;  %3550 = vmatpush1.bf16.msra.mxu1 %v4809_v0  ;;  %v4878_v63 = vld [vmem:[%s7146_s2 + $0x900] ss:$16 sps:$4 sm:$0xff]  }
  0x9d   :  { %3510 = vmatprep.subr.bf16.mxu0 %v4814_v2  ;;  %3551 = vmatprep.subr.bf16.mxu1 %v4817_v5  ;;  %v4881_v0 = vld [vmem:[%s7146_s2 + $0xb00] ss:$16 sps:$4 sm:$0xff]   ;;  %v6077_v2 = vrot.slane %v5841_v39, %v5520_v51  ;;  %v4886_v5 = vld [vmem:[%s7146_s2 + $0xce4] ss:$16 sps:$4 sm:$0xff]  }
  0x9e   :  { %v4884_v39 = vld [vmem:[%s7146_s2 + $0xce0] ss:$16 sps:$4 sm:$0xff]  }
  0xa0   :  { %3511 = vmatpush1.bf16.msra.mxu0 %v4812_v6  ;;  %3552 = vmatpush1.bf16.msra.mxu1 %v4815_v7  ;;  %v4889_v6 = vld [vmem:[%s7146_s2 + $0xee4] ss:$16 sps:$4 sm:$0xff]   ;;  %v6086_v7 = vrot.slane %v729_v62, %v5520_v51 }
  0xa1   :  { %3512 = vmatprep.subr.bf16.mxu0 %v4820_v8  ;;  %3553 = vmatprep.subr.bf16.mxu1 %v4823_v9  ;;  %v6090_v8 = vcombine.high %v6077_v2, %v6077_v2  ;;  %v4887_v9 = vld [vmem:[%s7146_s2 + $0xee0] ss:$16 sps:$4 sm:$0xff]   ;;  %v4940_v62 = vld [vmem:[%s7146_s2 + $0xdc4] ss:$16 sps:$4 sm:$0xff]  }
  0xa4   :  { %3513 = vmatpush1.bf16.msra.mxu0 %v4818_v10  ;;  %3554 = vmatpush1.bf16.msra.mxu1 %v4821_v11  ;;  %v4892_v10 = vld [vmem:[%s7146_s2 + $0xcc4] ss:$16 sps:$4 sm:$0xff]  }
  0xa5   :  { %3514 = vmatprep.subr.bf16.mxu0 %v4826_v12  ;;  %3555 = vmatprep.subr.bf16.mxu1 %v4829_v13  ;;  %v4895_v11 = vld [vmem:[%s7146_s2 + $0xec4] ss:$16 sps:$4 sm:$0xff]   ;;  %v6106_v12 = vcombine.high %v6086_v7, %v6086_v7 }
  0xa8   :  { %3515 = vmatpush1.bf16.msra.mxu0 %v4824_v14  ;;  %3556 = vmatpush1.bf16.msra.mxu1 %v4827_v15  ;;  %v4890_v15 = vld [vmem:[%s7146_s2 + $0xcc0] ss:$16 sps:$4 sm:$0xff]  }
  0xa9   :  { %3516 = vmatprep.subr.bf16.mxu0 %v4832_v16  ;;  %3557 = vmatprep.subr.bf16.mxu1 %v4835_v17  ;;  %v4893_v16 = vld [vmem:[%s7146_s2 + $0xec0] ss:$16 sps:$4 sm:$0xff]   ;;  %v4898_v17 = vld [vmem:[%s7146_s2 + $0xca4] ss:$16 sps:$4 sm:$0xff]  }
  0xac   :  { %3517 = vmatpush1.bf16.msra.mxu0 %v4830_v18  ;;  %3558 = vmatpush1.bf16.msra.mxu1 %v4833_v19 }
  0xad   :  { %3518 = vmatprep.subr.bf16.mxu0 %v4838_v20  ;;  %3559 = vmatprep.subr.bf16.mxu1 %v4841_v22  ;;  %v4901_v20 = vld [vmem:[%s7146_s2 + $0xea4] ss:$16 sps:$4 sm:$0xff]  }
  0xb0   :  { %3519 = vmatpush2.bf16.msra.mxu0 %v4836_v23  ;;  %3560 = vmatpush2.bf16.msra.mxu1 %v4839_v24  ;;  %v4896_v24 = vld [vmem:[%s7146_s2 + $0xca0] ss:$16 sps:$4 sm:$0xff]  }
  0xb1   :  { %3520 = vmatprep.subr.bf16.mxu0 %v4844_v25  ;;  %3561 = vmatprep.subr.bf16.mxu1 %v4847_v26  ;;  %v4899_v25 = vld [vmem:[%s7146_s2 + $0xea0] ss:$16 sps:$4 sm:$0xff]   ;;  %v4904_v26 = vld [vmem:[%s7146_s2 + $0xc84] ss:$16 sps:$4 sm:$0xff]  }
  0xb4   :  { %3521 = vmatpush2.bf16.msra.mxu0 %v4842_v27  ;;  %3562 = vmatpush2.bf16.msra.mxu1 %v4845_v29 }
  0xb5   :  { %3522 = vmatprep.subr.bf16.mxu0 %v4850_v30  ;;  %3563 = vmatprep.subr.bf16.mxu1 %v4853_v31  ;;  %v4907_v30 = vld [vmem:[%s7146_s2 + $0xe84] ss:$16 sps:$4 sm:$0xff]   ;;  %v4902_v31 = vld [vmem:[%s7146_s2 + $0xc80] ss:$16 sps:$4 sm:$0xff]  }
  0xb8   :  { %3523 = vmatpush2.bf16.msra.mxu0 %v4848_v34  ;;  %3564 = vmatpush2.bf16.msra.mxu1 %v4851_v36  ;;  %v4905_v34 = vld [vmem:[%s7146_s2 + $0xe80] ss:$16 sps:$4 sm:$0xff]   ;;  %v4910_v36 = vld [vmem:[%s7146_s2 + $0xc64] ss:$16 sps:$4 sm:$0xff]  }
  0xb9   :  { %3524 = vmatprep.subr.bf16.mxu0 %v4856_v37  ;;  %3565 = vmatprep.subr.bf16.mxu1 %v4859_v40  ;;  %v4913_v37 = vld [vmem:[%s7146_s2 + $0xe64] ss:$16 sps:$4 sm:$0xff]   ;;  %v4908_v40 = vld [vmem:[%s7146_s2 + $0xc60] ss:$16 sps:$4 sm:$0xff]  }
  0xbc   :  { %3525 = vmatpush2.bf16.msra.mxu0 %v4854_v41  ;;  %3566 = vmatpush2.bf16.msra.mxu1 %v4857_v42  ;;  %v4911_v41 = vld [vmem:[%s7146_s2 + $0xe60] ss:$16 sps:$4 sm:$0xff]   ;;  %v4916_v42 = vld [vmem:[%s7146_s2 + $0xc44] ss:$16 sps:$4 sm:$0xff]  }
  0xbd   :  { %3526 = vmatprep.subr.bf16.mxu0 %v4862_v43  ;;  %3567 = vmatprep.subr.bf16.mxu1 %v4865_v44  ;;  %v4919_v43 = vld [vmem:[%s7146_s2 + $0xe44] ss:$16 sps:$4 sm:$0xff]   ;;  %v4914_v44 = vld [vmem:[%s7146_s2 + $0xc40] ss:$16 sps:$4 sm:$0xff]  }
  0xc0   :  { %3527 = vmatpush2.bf16.msra.mxu0 %v4860_v46  ;;  %3568 = vmatpush2.bf16.msra.mxu1 %v4863_v47  ;;  %v4917_v46 = vld [vmem:[%s7146_s2 + $0xe40] ss:$16 sps:$4 sm:$0xff]   ;;  %v4922_v47 = vld [vmem:[%s7146_s2 + $0xc24] ss:$16 sps:$4 sm:$0xff]  }
  0xc1   :  { %3528 = vmatprep.subr.bf16.mxu0 %v4868_v21  ;;  %3569 = vmatprep.subr.bf16.mxu1 %v4871_v50  ;;  %v4925_v21 = vld [vmem:[%s7146_s2 + $0xe24] ss:$16 sps:$4 sm:$0xff]   ;;  %v4920_v50 = vld [vmem:[%s7146_s2 + $0xc20] ss:$16 sps:$4 sm:$0xff]  }
  0xc4   :  { %3529 = vmatpush2.bf16.msra.mxu0 %v4866_v53  ;;  %3570 = vmatpush2.bf16.msra.mxu1 %v4869_v55  ;;  %v4928_v53 = vld [vmem:[%s7146_s2 + $0xc04] ss:$16 sps:$4 sm:$0xff]  }
  0xc5   :  { %3530 = vmatprep.subr.bf16.mxu0 %v4874_v56  ;;  %3571 = vmatprep.subr.bf16.mxu1 %v4877_v35  ;;  %v4931_v55 = vld [vmem:[%s7146_s2 + $0xe04] ss:$16 sps:$4 sm:$0xff]   ;;  %v4926_v56 = vld [vmem:[%s7146_s2 + $0xc00] ss:$16 sps:$4 sm:$0xff]  }
  0xc6   :  { %v4929_v35 = vld [vmem:[%s7146_s2 + $0xe00] ss:$16 sps:$4 sm:$0xff]  }
  0xc8   :  { %3531 = vmatpush2.bf16.msra.mxu0 %v4872_v58  ;;  %3572 = vmatpush2.bf16.msra.mxu1 %v4875_v59  ;;  %v4934_v58 = vld [vmem:[%s7146_s2 + $0xde4] ss:$16 sps:$4 sm:$0xff]  }
  0xc9   :  { %3532 = vmatprep.subr.bf16.mxu0 %v4880_v60  ;;  %3573 = vmatprep.subr.bf16.mxu1 %v4883_v61  ;;  %v4937_v59 = vld [vmem:[%s7146_s2 + $0xfe4] ss:$16 sps:$4 sm:$0xff]   ;;  %v4932_v60 = vld [vmem:[%s7146_s2 + $0xde0] ss:$16 sps:$4 sm:$0xff]  }
  0xca   :  { %v4935_v61 = vld [vmem:[%s7146_s2 + $0xfe0] ss:$16 sps:$4 sm:$0xff]  }
  0xcc   :  { %3533 = vmatpush2.bf16.msra.mxu0 %v4878_v63  ;;  %3574 = vmatpush2.bf16.msra.mxu1 %v4881_v0  ;;  %v4943_v63 = vld [vmem:[%s7146_s2 + $0xfc4] ss:$16 sps:$4 sm:$0xff]   ;;  %v4938_v0 = vld [vmem:[%s7146_s2 + $0xdc0] ss:$16 sps:$4 sm:$0xff]  }
  0xcd   :  { %3584 = vmatprep.subr.bf16.mxu0 %v4886_v5  ;;  %3625 = vmatprep.subr.bf16.mxu1 %v4889_v6  ;;  %v4941_v5 = vld [vmem:[%s7146_s2 + $0xfc0] ss:$16 sps:$4 sm:$0xff]   ;;  %v4946_v6 = vld [vmem:[%s7146_s2 + $0xda4] ss:$16 sps:$4 sm:$0xff]  }
  0xcf   :  { %v6108_v13 = vpop.f32.mrf.mxu0  ;;  %v6110_v14 = vpop.f32.mrf.mxu1  ;;  %3535 = vmatmul.mubr.bf16.vlgmr.msra.gmra.mxu0 %v6077_v2  ;;  %3576 = vmatmul.mubr.bf16.vlgmr.msra.gmra.mxu1 %v6090_v8 }
  0xd0   :  { %3585 = vmatpush1.bf16.msra.mxu0 %v4884_v39  ;;  %3626 = vmatpush1.bf16.msra.mxu1 %v4887_v9  ;;  %v4949_v39 = vld [vmem:[%s7146_s2 + $0xfa4] ss:$16 sps:$4 sm:$0xff]   ;;  %v4944_v9 = vld [vmem:[%s7146_s2 + $0xda0] ss:$16 sps:$4 sm:$0xff]  }
  0xd1   :  { %v6123_v18 = vpop.f32.mrf.mxu0  ;;  %v6125_v19 = vpop.f32.mrf.mxu1  ;;  %3586 = vmatprep.subr.bf16.mxu0 %v4892_v10  ;;  %3627 = vmatprep.subr.bf16.mxu1 %v4895_v11  ;;  %v4947_v10 = vld [vmem:[%s7146_s2 + $0xfa0] ss:$16 sps:$4 sm:$0xff]   ;;  %v4952_v11 = vld [vmem:[%s7146_s2 + $0xd84] ss:$16 sps:$4 sm:$0xff]  }
  0xd2   :  { %3616 = vmatprep.mubr.bf16.mxu0 %v6086_v7  ;;  %3657 = vmatprep.mubr.bf16.mxu1 %v6106_v12 }
  0xd3   :  { %v618_v22 = vpop.f32.mrf.mxu0  ;;  %v659_v23 = vpop.f32.mrf.mxu1 }
  0xd4   :  { %3587 = vmatpush1.bf16.msra.mxu0 %v4890_v15  ;;  %3628 = vmatpush1.bf16.msra.mxu1 %v4893_v16  ;;  %v4955_v15 = vld [vmem:[%s7146_s2 + $0xf84] ss:$16 sps:$4 sm:$0xff]   ;;  %v4950_v16 = vld [vmem:[%s7146_s2 + $0xd80] ss:$16 sps:$4 sm:$0xff]  }
  0xd5   :  { %v619_v27 = vpop.f32.mrf.mxu0  ;;  %v660_v29 = vpop.f32.mrf.mxu1  ;;  %3588 = vmatprep.subr.bf16.mxu0 %v4898_v17  ;;  %3629 = vmatprep.subr.bf16.mxu1 %v4901_v20  ;;  %v4953_v17 = vld [vmem:[%s7146_s2 + $0xf80] ss:$16 sps:$4 sm:$0xff]   ;;  %v4958_v20 = vld [vmem:[%s7146_s2 + $0xd64] ss:$16 sps:$4 sm:$0xff]  }
  0xd6   :  { %v4961_v22 = vld [vmem:[%s7146_s2 + $0xf64] ss:$16 sps:$4 sm:$0xff]   ;;  %v4956_v23 = vld [vmem:[%s7146_s2 + $0xd60] ss:$16 sps:$4 sm:$0xff]  }
  0xd7   :  { %v4962_v27 = vld [vmem:[%s7146_s2 + $0xd40] ss:$16 sps:$4 sm:$0xff]  }
  0xd8   :  { %3589 = vmatpush1.bf16.msra.mxu0 %v4896_v24  ;;  %3630 = vmatpush1.bf16.msra.mxu1 %v4899_v25  ;;  %v4959_v24 = vld [vmem:[%s7146_s2 + $0xf60] ss:$16 sps:$4 sm:$0xff]   ;;  %v4964_v25 = vld [vmem:[%s7146_s2 + $0xd44] ss:$16 sps:$4 sm:$0xff]  }
  0xd9   :  { %3590 = vmatprep.subr.bf16.mxu0 %v4904_v26  ;;  %3631 = vmatprep.subr.bf16.mxu1 %v4907_v30  ;;  %v4967_v26 = vld [vmem:[%s7146_s2 + $0xf44] ss:$16 sps:$4 sm:$0xff]   ;;  %v4965_v29 = vld [vmem:[%s7146_s2 + $0xf40] ss:$16 sps:$4 sm:$0xff]  }
  0xda   :  { %v4970_v30 = vld [vmem:[%s7146_s2 + $0xd24] ss:$16 sps:$4 sm:$0xff]  }
  0xdc   :  { %3591 = vmatpush1.bf16.msra.mxu0 %v4902_v31  ;;  %3632 = vmatpush1.bf16.msra.mxu1 %v4905_v34  ;;  %v4973_v31 = vld [vmem:[%s7146_s2 + $0xf24] ss:$16 sps:$4 sm:$0xff]   ;;  %v4968_v34 = vld [vmem:[%s7146_s2 + $0xd20] ss:$16 sps:$4 sm:$0xff]  }
  0xdd   :  { %3592 = vmatprep.subr.bf16.mxu0 %v4910_v36  ;;  %3633 = vmatprep.subr.bf16.mxu1 %v4913_v37  ;;  %v4971_v36 = vld [vmem:[%s7146_s2 + $0xf20] ss:$16 sps:$4 sm:$0xff]   ;;  %v4976_v37 = vld [vmem:[%s7146_s2 + $0xd04] ss:$16 sps:$4 sm:$0xff]  }
  0xe0   :  { %3593 = vmatpush1.bf16.msra.mxu0 %v4908_v40  ;;  %3634 = vmatpush1.bf16.msra.mxu1 %v4911_v41  ;;  %v4979_v40 = vld [vmem:[%s7146_s2 + $0xf04] ss:$16 sps:$4 sm:$0xff]   ;;  %v6290_v41 = vrot.slane %v6053_v57, %v5520_v51  ;;  %v4986_v51 = vld [vmem:[%s7146_s2 + $0x2ec] ss:$16 sps:$4 sm:$0xff]   ;;  %v4981_v57 = vld [vmem:[%s7146_s2 + $0xe8] ss:$16 sps:$4 sm:$0xff]  }
  0xe1   :  { %3594 = vmatprep.subr.bf16.mxu0 %v4916_v42  ;;  %3635 = vmatprep.subr.bf16.mxu1 %v4919_v43  ;;  %v4974_v42 = vld [vmem:[%s7146_s2 + $0xd00] ss:$16 sps:$4 sm:$0xff]  }
  0xe2   :  { %v4977_v43 = vld [vmem:[%s7146_s2 + $0xf00] ss:$16 sps:$4 sm:$0xff]  }
  0xe4   :  { %3595 = vmatpush1.bf16.msra.mxu0 %v4914_v44  ;;  %3636 = vmatpush1.bf16.msra.mxu1 %v4917_v46  ;;  %v4983_v44 = vld [vmem:[%s7146_s2 + $0xec] ss:$16 sps:$4 sm:$0xff]   ;;  %v4984_v46 = vld [vmem:[%s7146_s2 + $0x2e8] ss:$16 sps:$4 sm:$0xff]  }
  0xe5   :  { %3596 = vmatprep.subr.bf16.mxu0 %v4922_v47  ;;  %3637 = vmatprep.subr.bf16.mxu1 %v4925_v21  ;;  %v6312_v47 = vcombine.high %v6290_v41, %v6290_v41  ;;  %v4989_v21 = vld [vmem:[%s7146_s2 + $0xcc] ss:$16 sps:$4 sm:$0xff]  }
  0xe8   :  { %3597 = vmatpush1.bf16.msra.mxu0 %v4920_v50  ;;  %3638 = vmatpush1.bf16.msra.mxu1 %v4923_v52  ;;  %v4992_v50 = vld [vmem:[%s7146_s2 + $0x2cc] ss:$16 sps:$4 sm:$0xff]   ;;  %v4987_v52 = vld [vmem:[%s7146_s2 + $0xc8] ss:$16 sps:$4 sm:$0xff]  }
  0xe9   :  { %3598 = vmatprep.subr.bf16.mxu0 %v4928_v53  ;;  %3639 = vmatprep.subr.bf16.mxu1 %v4931_v55  ;;  %v4990_v53 = vld [vmem:[%s7146_s2 + $0x2c8] ss:$16 sps:$4 sm:$0xff]  }
  0xec   :  { %3599 = vmatpush1.bf16.msra.mxu0 %v4926_v56  ;;  %3640 = vmatpush1.bf16.msra.mxu1 %v4929_v35 }
  0xed   :  { %3600 = vmatprep.subr.bf16.mxu0 %v4934_v58  ;;  %3641 = vmatprep.subr.bf16.mxu1 %v4937_v59 }
  0xf0   :  { %3601 = vmatpush2.bf16.msra.mxu0 %v4932_v60  ;;  %3642 = vmatpush2.bf16.msra.mxu1 %v4935_v61  ;;  %v4995_v60 = vld [vmem:[%s7146_s2 + $0xac] ss:$16 sps:$4 sm:$0xff]  }
  0xf1   :  { %3602 = vmatprep.subr.bf16.mxu0 %v4940_v62  ;;  %3643 = vmatprep.subr.bf16.mxu1 %v4943_v63  ;;  %v4998_v61 = vld [vmem:[%s7146_s2 + $0x2ac] ss:$16 sps:$4 sm:$0xff]  }
  0xf4   :  { %3603 = vmatpush2.bf16.msra.mxu0 %v4938_v0  ;;  %3644 = vmatpush2.bf16.msra.mxu1 %v4941_v5  ;;  %v4996_v0 = vld [vmem:[%s7146_s2 + $0x2a8] ss:$16 sps:$4 sm:$0xff]  }
  0xf5   :  { %3604 = vmatprep.subr.bf16.mxu0 %v4946_v6  ;;  %3645 = vmatprep.subr.bf16.mxu1 %v4949_v39 }
  0xf8   :  { %3605 = vmatpush2.bf16.msra.mxu0 %v4944_v9  ;;  %3646 = vmatpush2.bf16.msra.mxu1 %v4947_v10  ;;  %v5001_v10 = vld [vmem:[%s7146_s2 + $0x8c] ss:$16 sps:$4 sm:$0xff]  }
  0xf9   :  { %3606 = vmatprep.subr.bf16.mxu0 %v4952_v11  ;;  %3647 = vmatprep.subr.bf16.mxu1 %v4955_v15  ;;  %v5002_v11 = vld [vmem:[%s7146_s2 + $0x288] ss:$16 sps:$4 sm:$0xff]   ;;  %v5007_v15 = vld [vmem:[%s7146_s2 + $0x6c] ss:$16 sps:$4 sm:$0xff]  }
  0xfc   :  { %3607 = vmatpush2.bf16.msra.mxu0 %v4950_v16  ;;  %3648 = vmatpush2.bf16.msra.mxu1 %v4953_v17  ;;  %v5010_v16 = vld [vmem:[%s7146_s2 + $0x26c] ss:$16 sps:$4 sm:$0xff]   ;;  %v5005_v17 = vld [vmem:[%s7146_s2 + $0x68] ss:$16 sps:$4 sm:$0xff]  }
  0xfd   :  { %3608 = vmatprep.subr.bf16.mxu0 %v4958_v20  ;;  %3649 = vmatprep.subr.bf16.mxu1 %v4961_v22  ;;  %v5008_v20 = vld [vmem:[%s7146_s2 + $0x268] ss:$16 sps:$4 sm:$0xff]   ;;  %v5013_v22 = vld [vmem:[%s7146_s2 + $0x4c] ss:$16 sps:$4 sm:$0xff]  }
 0x100   :  { %3609 = vmatpush2.bf16.msra.mxu0 %v4956_v23  ;;  %3650 = vmatpush2.bf16.msra.mxu1 %v4959_v24  ;;  %v5016_v23 = vld [vmem:[%s7146_s2 + $0x24c] ss:$16 sps:$4 sm:$0xff]   ;;  %v5011_v24 = vld [vmem:[%s7146_s2 + $0x48] ss:$16 sps:$4 sm:$0xff]  }
 0x101   :  { %3610 = vmatprep.subr.bf16.mxu0 %v4964_v25  ;;  %3651 = vmatprep.subr.bf16.mxu1 %v4967_v26  ;;  %v5014_v25 = vld [vmem:[%s7146_s2 + $0x248] ss:$16 sps:$4 sm:$0xff]   ;;  %v5019_v26 = vld [vmem:[%s7146_s2 + $0x2c] ss:$16 sps:$4 sm:$0xff]  }
 0x104   :  { %3611 = vmatpush2.bf16.msra.mxu0 %v4962_v27  ;;  %3652 = vmatpush2.bf16.msra.mxu1 %v4965_v29  ;;  %v5022_v27 = vld [vmem:[%s7146_s2 + $0x22c] ss:$16 sps:$4 sm:$0xff]   ;;  %v5017_v29 = vld [vmem:[%s7146_s2 + $0x28] ss:$16 sps:$4 sm:$0xff]  }
 0x105   :  { %3612 = vmatprep.subr.bf16.mxu0 %v4970_v30  ;;  %3653 = vmatprep.subr.bf16.mxu1 %v4973_v31  ;;  %v5020_v30 = vld [vmem:[%s7146_s2 + $0x228] ss:$16 sps:$4 sm:$0xff]   ;;  %v5025_v31 = vld [vmem:[%s7146_s2 + $0xc] ss:$16 sps:$4 sm:$0xff]  }
 0x108   :  { %3613 = vmatpush2.bf16.msra.mxu0 %v4968_v34  ;;  %3654 = vmatpush2.bf16.msra.mxu1 %v4971_v36  ;;  %v5028_v34 = vld [vmem:[%s7146_s2 + $0x20c] ss:$16 sps:$4 sm:$0xff]   ;;  %v5023_v36 = vld [vmem:[%s7146_s2 + $0x8] ss:$16 sps:$4 sm:$0xff]  }
 0x109   :  { %3614 = vmatprep.subr.bf16.mxu0 %v4976_v37  ;;  %3655 = vmatprep.subr.bf16.mxu1 %v4979_v40  ;;  %v5026_v37 = vld [vmem:[%s7146_s2 + $0x208] ss:$16 sps:$4 sm:$0xff]   ;;  %v5031_v40 = vld [vmem:[%s7146_s2 + $0x1ec] ss:$16 sps:$4 sm:$0xff]  }
 0x10c   :  { %3615 = vmatpush2.bf16.msra.mxu0 %v4974_v42  ;;  %3656 = vmatpush2.bf16.msra.mxu1 %v4977_v43  ;;  %v5034_v42 = vld [vmem:[%s7146_s2 + $0x3ec] ss:$16 sps:$4 sm:$0xff]   ;;  %v5029_v43 = vld [vmem:[%s7146_s2 + $0x1e8] ss:$16 sps:$4 sm:$0xff]  }
 0x10d   :  { %3666 = vmatprep.subr.bf16.mxu0 %v4983_v44  ;;  %3707 = vmatprep.subr.bf16.mxu1 %v4986_v51  ;;  %v5032_v44 = vld [vmem:[%s7146_s2 + $0x3e8] ss:$16 sps:$4 sm:$0xff]   ;;  %v5037_v51 = vld [vmem:[%s7146_s2 + $0x1cc] ss:$16 sps:$4 sm:$0xff]  }
 0x10f   :  { %v3372_v55 = vpop.f32.mrf.mxu0  ;;  %v3413_v56 = vpop.f32.mrf.mxu1  ;;  %3617 = vmatmul.mubr.bf16.vlgmr.msra.gmra.mxu0 %v6290_v41  ;;  %3658 = vmatmul.mubr.bf16.vlgmr.msra.gmra.mxu1 %v6312_v47 }
 0x110   :  { %v3373_v35 = vadd.f32 %v3372_v55, %v6108_v13  ;;  %3667 = vmatpush1.bf16.msra.mxu0 %v4981_v57  ;;  %3708 = vmatpush1.bf16.msra.mxu1 %v4984_v46  ;;  %v4993_v13 = vld [vmem:[%s7146_s2 + $0xa8] ss:$16 sps:$4 sm:$0xff]   ;;  %v5040_v57 = vld [vmem:[%s7146_s2 + $0x3cc] ss:$16 sps:$4 sm:$0xff]  }
 0x111   :  { %v3374_v58 = vpop.f32.mrf.mxu0  ;;  %v3415_v59 = vpop.f32.mrf.mxu1  ;;  %3668 = vmatprep.subr.bf16.mxu0 %v4989_v21  ;;  %3709 = vmatprep.subr.bf16.mxu1 %v4992_v50  ;;  %v5035_v46 = vld [vmem:[%s7146_s2 + $0x1c8] ss:$16 sps:$4 sm:$0xff]   ;;  %v5043_v50 = vld [vmem:[%s7146_s2 + $0x1ac] ss:$16 sps:$4 sm:$0xff]  }
 0x112   :  { %v6335_v62 = vadd.f32 %v3413_v56, %v3373_v35  ;;  %v3375_v63 = vadd.f32 %v3374_v58, %v6123_v18  ;;  %3698 = vmatprep.mubr.bf16.mxu0 %v5557_v1  ;;  %3739 = vmatprep.mubr.bf16.mxu1 %v5565_v3  ;;  %v5004_v1 = vld [vmem:[%s7146_s2 + $0x28c] ss:$16 sps:$4 sm:$0xff]   ;;  %v4999_v3 = vld [vmem:[%s7146_s2 + $0x88] ss:$16 sps:$4 sm:$0xff]  }
 0x113   :  { %v3376_v5 = vpop.f32.mrf.mxu0  ;;  %v3417_v6 = vpop.f32.mrf.mxu1  ;;  %v5038_v21 = vld [vmem:[%s7146_s2 + $0x3c8] ss:$16 sps:$4 sm:$0xff]   ;;  %v5049_v56 = vld [vmem:[%s7146_s2 + $0x18c] ss:$16 sps:$4 sm:$0xff]  }
 0x114   :  { %v6346_v39 = vadd.f32 %v3415_v59, %v3375_v63  ;;  %3669 = vmatpush1.bf16.msra.mxu0 %v4987_v52  ;;  %3710 = vmatpush1.bf16.msra.mxu1 %v4990_v53  ;;  %v5046_v52 = vld [vmem:[%s7146_s2 + $0x3ac] ss:$16 sps:$4 sm:$0xff]   ;;  %v5041_v53 = vld [vmem:[%s7146_s2 + $0x1a8] ss:$16 sps:$4 sm:$0xff]  }
 0x115   :  { %v3377_v9 = vpop.f32.mrf.mxu0  ;;  %v3418_v18 = vpop.f32.mrf.mxu1  ;;  %3670 = vmatprep.subr.bf16.mxu0 %v4995_v60  ;;  %3711 = vmatprep.subr.bf16.mxu1 %v4998_v61  ;;  %v5044_v55 = vld [vmem:[%s7146_s2 + $0x3a8] ss:$16 sps:$4 sm:$0xff]   ;;  %v5052_v35 = vld [vmem:[%s7146_s2 + $0x38c] ss:$16 sps:$4 sm:$0xff]  }
 0x116   :  { %v5047_v58 = vld [vmem:[%s7146_s2 + $0x188] ss:$16 sps:$4 sm:$0xff]   ;;  %v5055_v60 = vld [vmem:[%s7146_s2 + $0x16c] ss:$16 sps:$4 sm:$0xff]  }
 0x117   :  { %v5050_v59 = vld [vmem:[%s7146_s2 + $0x388] ss:$16 sps:$4 sm:$0xff]   ;;  %v5058_v61 = vld [vmem:[%s7146_s2 + $0x36c] ss:$16 sps:$4 sm:$0xff]  }
 0x118   :  { %3671 = vmatpush1.bf16.msra.mxu0 %v4993_v13  ;;  %3712 = vmatpush1.bf16.msra.mxu1 %v4996_v0  ;;  %v5053_v63 = vld [vmem:[%s7146_s2 + $0x168] ss:$16 sps:$4 sm:$0xff]   ;;  %v5061_v0 = vld [vmem:[%s7146_s2 + $0x14c] ss:$16 sps:$4 sm:$0xff]  }
 0x119   :  { %3672 = vmatprep.subr.bf16.mxu0 %v5001_v10  ;;  %3713 = vmatprep.subr.bf16.mxu1 %v5004_v1  ;;  %v5056_v13 = vld [vmem:[%s7146_s2 + $0x368] ss:$16 sps:$4 sm:$0xff]   ;;  %v5064_v5 = vld [vmem:[%s7146_s2 + $0x34c] ss:$16 sps:$4 sm:$0xff]  }
 0x11a   :  { %v5059_v6 = vld [vmem:[%s7146_s2 + $0x148] ss:$16 sps:$4 sm:$0xff]   ;;  %v5067_v18 = vld [vmem:[%s7146_s2 + $0x12c] ss:$16 sps:$4 sm:$0xff]  }
 0x11b   :  { %v5062_v9 = vld [vmem:[%s7146_s2 + $0x348] ss:$16 sps:$4 sm:$0xff]   ;;  %v5070_v10 = vld [vmem:[%s7146_s2 + $0x32c] ss:$16 sps:$4 sm:$0xff]  }
 0x11c   :  { %3673 = vmatpush1.bf16.msra.mxu0 %v4999_v3  ;;  %3714 = vmatpush1.bf16.msra.mxu1 %v5002_v11  ;;  %v5065_v1 = vld [vmem:[%s7146_s2 + $0x128] ss:$16 sps:$4 sm:$0xff]   ;;  %v5073_v11 = vld [vmem:[%s7146_s2 + $0x10c] ss:$16 sps:$4 sm:$0xff]  }
 0x11d   :  { %3674 = vmatprep.subr.bf16.mxu0 %v5007_v15  ;;  %3715 = vmatprep.subr.bf16.mxu1 %v5010_v16  ;;  %v5068_v3 = vld [vmem:[%s7146_s2 + $0x328] ss:$16 sps:$4 sm:$0xff]   ;;  %v5076_v15 = vld [vmem:[%s7146_s2 + $0x30c] ss:$16 sps:$4 sm:$0xff]  }
 0x11e   :  { %v5071_v16 = vld [vmem:[%s7146_s2 + $0x108] ss:$16 sps:$4 sm:$0xff]  }
 0x120   :  { %3675 = vmatpush1.bf16.msra.mxu0 %v5005_v17  ;;  %3716 = vmatpush1.bf16.msra.mxu1 %v5008_v20  ;;  %v5074_v17 = vld [vmem:[%s7146_s2 + $0x308] ss:$16 sps:$4 sm:$0xff]   ;;  %v5079_v20 = vld [vmem:[%s7146_s2 + $0x4ec] ss:$16 sps:$4 sm:$0xff]  }
 0x121   :  { %3676 = vmatprep.subr.bf16.mxu0 %v5013_v22  ;;  %3717 = vmatprep.subr.bf16.mxu1 %v5016_v23  ;;  %v5082_v22 = vld [vmem:[%s7146_s2 + $0x6ec] ss:$16 sps:$4 sm:$0xff]   ;;  %v5077_v23 = vld [vmem:[%s7146_s2 + $0x4e8] ss:$16 sps:$4 sm:$0xff]  }
 0x124   :  { %3677 = vmatpush1.bf16.msra.mxu0 %v5011_v24  ;;  %3718 = vmatpush1.bf16.msra.mxu1 %v5014_v25  ;;  %v5080_v24 = vld [vmem:[%s7146_s2 + $0x6e8] ss:$16 sps:$4 sm:$0xff]   ;;  %v5085_v25 = vld [vmem:[%s7146_s2 + $0x4cc] ss:$16 sps:$4 sm:$0xff]  }
 0x125   :  { %3678 = vmatprep.subr.bf16.mxu0 %v5019_v26  ;;  %3719 = vmatprep.subr.bf16.mxu1 %v5022_v27  ;;  %v5088_v26 = vld [vmem:[%s7146_s2 + $0x6cc] ss:$16 sps:$4 sm:$0xff]  }
 0x128   :  { %3679 = vmatpush1.bf16.msra.mxu0 %v5017_v29  ;;  %3720 = vmatpush1.bf16.msra.mxu1 %v5020_v30 }
 0x129   :  { %3680 = vmatprep.subr.bf16.mxu0 %v5025_v31  ;;  %3721 = vmatprep.subr.bf16.mxu1 %v5028_v34  ;;  %v5083_v31 = vld [vmem:[%s7146_s2 + $0x4c8] ss:$16 sps:$4 sm:$0xff]  }
 0x12a   :  { %v5086_v34 = vld [vmem:[%s7146_s2 + $0x6c8] ss:$16 sps:$4 sm:$0xff]  }
 0x12c   :  { %3681 = vmatpush1.bf16.msra.mxu0 %v5023_v36  ;;  %3722 = vmatpush1.bf16.msra.mxu1 %v5026_v37 }
 0x12d   :  { %3682 = vmatprep.subr.bf16.mxu0 %v5031_v40  ;;  %3723 = vmatprep.subr.bf16.mxu1 %v5034_v42 }
 0x130   :  { %3683 = vmatpush2.bf16.msra.mxu0 %v5029_v43  ;;  %3724 = vmatpush2.bf16.msra.mxu1 %v5032_v44 }
 0x131   :  { %3684 = vmatprep.subr.bf16.mxu0 %v5037_v51  ;;  %3725 = vmatprep.subr.bf16.mxu1 %v5040_v57  ;;  %v5089_v51 = vld [vmem:[%s7146_s2 + $0x4a8] ss:$16 sps:$4 sm:$0xff]  }
 0x132   :  { %v5092_v57 = vld [vmem:[%s7146_s2 + $0x6a8] ss:$16 sps:$4 sm:$0xff]  }
 0x134   :  { %3685 = vmatpush2.bf16.msra.mxu0 %v5035_v46  ;;  %3726 = vmatpush2.bf16.msra.mxu1 %v5038_v21  ;;  %v5095_v21 = vld [vmem:[%s7146_s2 + $0x488] ss:$16 sps:$4 sm:$0xff]  }
 0x135   :  { %3686 = vmatprep.subr.bf16.mxu0 %v5043_v50  ;;  %3727 = vmatprep.subr.bf16.mxu1 %v5046_v52  ;;  %v5098_v50 = vld [vmem:[%s7146_s2 + $0x688] ss:$16 sps:$4 sm:$0xff]   ;;  %v5103_v52 = vld [vmem:[%s7146_s2 + $0x46c] ss:$16 sps:$4 sm:$0xff]  }
 0x138   :  { %3687 = vmatpush2.bf16.msra.mxu0 %v5041_v53  ;;  %3728 = vmatpush2.bf16.msra.mxu1 %v5044_v55  ;;  %v5106_v53 = vld [vmem:[%s7146_s2 + $0x66c] ss:$16 sps:$4 sm:$0xff]   ;;  %v5101_v55 = vld [vmem:[%s7146_s2 + $0x468] ss:$16 sps:$4 sm:$0xff]  }
 0x139   :  { %3688 = vmatprep.subr.bf16.mxu0 %v5049_v56  ;;  %3729 = vmatprep.subr.bf16.mxu1 %v5052_v35  ;;  %v5104_v56 = vld [vmem:[%s7146_s2 + $0x668] ss:$16 sps:$4 sm:$0xff]   ;;  %v5109_v35 = vld [vmem:[%s7146_s2 + $0x44c] ss:$16 sps:$4 sm:$0xff]  }
 0x13c   :  { %3689 = vmatpush2.bf16.msra.mxu0 %v5047_v58  ;;  %3730 = vmatpush2.bf16.msra.mxu1 %v5050_v59  ;;  %v5112_v58 = vld [vmem:[%s7146_s2 + $0x64c] ss:$16 sps:$4 sm:$0xff]   ;;  %v5107_v59 = vld [vmem:[%s7146_s2 + $0x448] ss:$16 sps:$4 sm:$0xff]  }
 0x13d   :  { %3690 = vmatprep.subr.bf16.mxu0 %v5055_v60  ;;  %3731 = vmatprep.subr.bf16.mxu1 %v5058_v61  ;;  %v5110_v60 = vld [vmem:[%s7146_s2 + $0x648] ss:$16 sps:$4 sm:$0xff]   ;;  %v5115_v61 = vld [vmem:[%s7146_s2 + $0x42c] ss:$16 sps:$4 sm:$0xff]  }
 0x140   :  { %3691 = vmatpush2.bf16.msra.mxu0 %v5053_v63  ;;  %3732 = vmatpush2.bf16.msra.mxu1 %v5056_v13  ;;  %v5118_v63 = vld [vmem:[%s7146_s2 + $0x62c] ss:$16 sps:$4 sm:$0xff]   ;;  %v5113_v13 = vld [vmem:[%s7146_s2 + $0x428] ss:$16 sps:$4 sm:$0xff]  }
 0x141   :  { %3692 = vmatprep.subr.bf16.mxu0 %v5061_v0  ;;  %3733 = vmatprep.subr.bf16.mxu1 %v5064_v5  ;;  %v5116_v0 = vld [vmem:[%s7146_s2 + $0x628] ss:$16 sps:$4 sm:$0xff]   ;;  %v5121_v5 = vld [vmem:[%s7146_s2 + $0x40c] ss:$16 sps:$4 sm:$0xff]  }
 0x144   :  { %3693 = vmatpush2.bf16.msra.mxu0 %v5059_v6  ;;  %3734 = vmatpush2.bf16.msra.mxu1 %v5062_v9  ;;  %v5124_v6 = vld [vmem:[%s7146_s2 + $0x60c] ss:$16 sps:$4 sm:$0xff]   ;;  %v5119_v9 = vld [vmem:[%s7146_s2 + $0x408] ss:$16 sps:$4 sm:$0xff]  }
 0x145   :  { %3694 = vmatprep.subr.bf16.mxu0 %v5067_v18  ;;  %3735 = vmatprep.subr.bf16.mxu1 %v5070_v10  ;;  %v5122_v18 = vld [vmem:[%s7146_s2 + $0x608] ss:$16 sps:$4 sm:$0xff]   ;;  %v5127_v10 = vld [vmem:[%s7146_s2 + $0x5ec] ss:$16 sps:$4 sm:$0xff]  }
 0x148   :  { %3695 = vmatpush2.bf16.msra.mxu0 %v5065_v1  ;;  %3736 = vmatpush2.bf16.msra.mxu1 %v5068_v3  ;;  %v5130_v1 = vld [vmem:[%s7146_s2 + $0x7ec] ss:$16 sps:$4 sm:$0xff]   ;;  %v5125_v3 = vld [vmem:[%s7146_s2 + $0x5e8] ss:$16 sps:$4 sm:$0xff]  }
 0x149   :  { %3696 = vmatprep.subr.bf16.mxu0 %v5073_v11  ;;  %3737 = vmatprep.subr.bf16.mxu1 %v5076_v15  ;;  %v5128_v11 = vld [vmem:[%s7146_s2 + $0x7e8] ss:$16 sps:$4 sm:$0xff]   ;;  %v5133_v15 = vld [vmem:[%s7146_s2 + $0x5cc] ss:$16 sps:$4 sm:$0xff]  }
 0x14c   :  { %3697 = vmatpush2.bf16.msra.mxu0 %v5071_v16  ;;  %3738 = vmatpush2.bf16.msra.mxu1 %v5074_v17  ;;  %v5136_v16 = vld [vmem:[%s7146_s2 + $0x7cc] ss:$16 sps:$4 sm:$0xff]   ;;  %v5131_v17 = vld [vmem:[%s7146_s2 + $0x5c8] ss:$16 sps:$4 sm:$0xff]  }
 0x14d   :  { %3748 = vmatprep.subr.bf16.mxu0 %v5079_v20  ;;  %3789 = vmatprep.subr.bf16.mxu1 %v5082_v22  ;;  %v5134_v20 = vld [vmem:[%s7146_s2 + $0x7c8] ss:$16 sps:$4 sm:$0xff]   ;;  %v5139_v22 = vld [vmem:[%s7146_s2 + $0x5ac] ss:$16 sps:$4 sm:$0xff]  }
 0x14f   :  { %v3454_v27 = vpop.f32.mrf.mxu0  ;;  %v3495_v29 = vpop.f32.mrf.mxu1  ;;  %3699 = vmatmul.mubr.bf16.vlgmr.msra.gmra.mxu0 %v5634_v28  ;;  %3740 = vmatmul.mubr.bf16.vlgmr.msra.gmra.mxu1 %v5650_v33  ;;  %v5091_v28 = vld [vmem:[%s7146_s2 + $0x4ac] ss:$16 sps:$4 sm:$0xff]  }
 0x150   :  { %v3455_v30 = vadd.f32 %v3454_v27, %v6335_v62  ;;  %3749 = vmatpush1.bf16.msra.mxu0 %v5077_v23  ;;  %3790 = vmatpush1.bf16.msra.mxu1 %v5080_v24  ;;  %v5094_v33 = vld [vmem:[%s7146_s2 + $0x6ac] ss:$16 sps:$4 sm:$0xff]   ;;  %v5137_v24 = vld [vmem:[%s7146_s2 + $0x5a8] ss:$16 sps:$4 sm:$0xff]  }
 0x151   :  { %v3456_v36 = vpop.f32.mrf.mxu0  ;;  %v3497_v37 = vpop.f32.mrf.mxu1  ;;  %3750 = vmatprep.subr.bf16.mxu0 %v5085_v25  ;;  %3791 = vmatprep.subr.bf16.mxu1 %v5088_v26  ;;  %v5142_v23 = vld [vmem:[%s7146_s2 + $0x7ac] ss:$16 sps:$4 sm:$0xff]   ;;  %v5140_v25 = vld [vmem:[%s7146_s2 + $0x7a8] ss:$16 sps:$4 sm:$0xff]  }
 0x152   :  { %v6537_v62 = vadd.f32 %v3495_v29, %v3455_v30  ;;  %v3457_v40 = vadd.f32 %v3456_v36, %v6346_v39  ;;  %3780 = vmatprep.mubr.bf16.mxu0 %v5646_v32  ;;  %3821 = vmatprep.mubr.bf16.mxu1 %v5666_v38  ;;  %v5097_v32 = vld [vmem:[%s7146_s2 + $0x48c] ss:$16 sps:$4 sm:$0xff]   ;;  %v5143_v29 = vld [vmem:[%s7146_s2 + $0x588] ss:$16 sps:$4 sm:$0xff]  }
 0x153   :  { %v3458_v42 = vpop.f32.mrf.mxu0  ;;  %v3499_v43 = vpop.f32.mrf.mxu1  ;;  %v5100_v38 = vld [vmem:[%s7146_s2 + $0x68c] ss:$16 sps:$4 sm:$0xff]   ;;  %v5146_v30 = vld [vmem:[%s7146_s2 + $0x788] ss:$16 sps:$4 sm:$0xff]  }
 0x154   :  { %v6542_v44 = vadd.f32 %v3497_v37, %v3457_v40  ;;  %3751 = vmatpush1.bf16.msra.mxu0 %v5083_v31  ;;  %3792 = vmatpush1.bf16.msra.mxu1 %v5086_v34  ;;  %v5145_v26 = vld [vmem:[%s7146_s2 + $0x58c] ss:$16 sps:$4 sm:$0xff]   ;;  %v5149_v36 = vld [vmem:[%s7146_s2 + $0x568] ss:$16 sps:$4 sm:$0xff]  }
 0x155   :  { %v3459_v46 = vpop.f32.mrf.mxu0  ;;  %v3500_v39 = vpop.f32.mrf.mxu1  ;;  %3752 = vmatprep.subr.bf16.mxu0 %v5091_v28  ;;  %3793 = vmatprep.subr.bf16.mxu1 %v5094_v33  ;;  %v5148_v27 = vld [vmem:[%s7146_s2 + $0x78c] ss:$16 sps:$4 sm:$0xff]   ;;  %v5152_v37 = vld [vmem:[%s7146_s2 + $0x768] ss:$16 sps:$4 sm:$0xff]  }
 0x156   :  { %v5151_v31 = vld [vmem:[%s7146_s2 + $0x56c] ss:$16 sps:$4 sm:$0xff]   ;;  %v5155_v40 = vld [vmem:[%s7146_s2 + $0x548] ss:$16 sps:$4 sm:$0xff]  }
 0x157   :  { %v5154_v34 = vld [vmem:[%s7146_s2 + $0x76c] ss:$16 sps:$4 sm:$0xff]   ;;  %v5158_v42 = vld [vmem:[%s7146_s2 + $0x748] ss:$16 sps:$4 sm:$0xff]  }
 0x158   :  { %3753 = vmatpush1.bf16.msra.mxu0 %v5089_v51  ;;  %3794 = vmatpush1.bf16.msra.mxu1 %v5092_v57  ;;  %v5157_v28 = vld [vmem:[%s7146_s2 + $0x54c] ss:$16 sps:$4 sm:$0xff]   ;;  %v5161_v57 = vld [vmem:[%s7146_s2 + $0x528] ss:$16 sps:$4 sm:$0xff]  }
 0x159   :  { %3754 = vmatprep.subr.bf16.mxu0 %v5097_v32  ;;  %3795 = vmatprep.subr.bf16.mxu1 %v5100_v38  ;;  %v5160_v33 = vld [vmem:[%s7146_s2 + $0x74c] ss:$16 sps:$4 sm:$0xff]   ;;  %v5164_v46 = vld [vmem:[%s7146_s2 + $0x728] ss:$16 sps:$4 sm:$0xff]  }
 0x15a   :  { %v5163_v43 = vld [vmem:[%s7146_s2 + $0x52c] ss:$16 sps:$4 sm:$0xff]   ;;  %v5167_v38 = vld [vmem:[%s7146_s2 + $0x508] ss:$16 sps:$4 sm:$0xff]  }
 0x15b   :  { %v5166_v51 = vld [vmem:[%s7146_s2 + $0x72c] ss:$16 sps:$4 sm:$0xff]  }
 0x15c   :  { %3755 = vmatpush1.bf16.msra.mxu0 %v5095_v21  ;;  %3796 = vmatpush1.bf16.msra.mxu1 %v5098_v50  ;;  %v5169_v39 = vld [vmem:[%s7146_s2 + $0x50c] ss:$16 sps:$4 sm:$0xff]   ;;  %v5170_v21 = vld [vmem:[%s7146_s2 + $0x708] ss:$16 sps:$4 sm:$0xff]  }
 0x15d   :  { %3756 = vmatprep.subr.bf16.mxu0 %v5103_v52  ;;  %3797 = vmatprep.subr.bf16.mxu1 %v5106_v53  ;;  %v5172_v32 = vld [vmem:[%s7146_s2 + $0x70c] ss:$16 sps:$4 sm:$0xff]   ;;  %v5173_v53 = vld [vmem:[%s7146_s2 + $0x8e8] ss:$16 sps:$4 sm:$0xff]  }
 0x15e   :  { %v5175_v50 = vld [vmem:[%s7146_s2 + $0x8ec] ss:$16 sps:$4 sm:$0xff]  }
 0x15f   :  { %v5178_v52 = vld [vmem:[%s7146_s2 + $0xaec] ss:$16 sps:$4 sm:$0xff]  }
 0x160   :  { %3757 = vmatpush1.bf16.msra.mxu0 %v5101_v55  ;;  %3798 = vmatpush1.bf16.msra.mxu1 %v5104_v56  ;;  %v5176_v55 = vld [vmem:[%s7146_s2 + $0xae8] ss:$16 sps:$4 sm:$0xff]   ;;  %v5181_v56 = vld [vmem:[%s7146_s2 + $0x8cc] ss:$16 sps:$4 sm:$0xff]  }
 0x161   :  { %3758 = vmatprep.subr.bf16.mxu0 %v5109_v35  ;;  %3799 = vmatprep.subr.bf16.mxu1 %v5112_v58  ;;  %v5184_v35 = vld [vmem:[%s7146_s2 + $0xacc] ss:$16 sps:$4 sm:$0xff]  }
 0x164   :  { %3759 = vmatpush1.bf16.msra.mxu0 %v5107_v59  ;;  %3800 = vmatpush1.bf16.msra.mxu1 %v5110_v60 }
 0x165   :  { %3760 = vmatprep.subr.bf16.mxu0 %v5115_v61  ;;  %3801 = vmatprep.subr.bf16.mxu1 %v5118_v63  ;;  %v5179_v61 = vld [vmem:[%s7146_s2 + $0x8c8] ss:$16 sps:$4 sm:$0xff]  }
 0x166   :  { %v5182_v63 = vld [vmem:[%s7146_s2 + $0xac8] ss:$16 sps:$4 sm:$0xff]  }
 0x168   :  { %3761 = vmatpush1.bf16.msra.mxu0 %v5113_v13  ;;  %3802 = vmatpush1.bf16.msra.mxu1 %v5116_v0 }
 0x169   :  { %3762 = vmatprep.subr.bf16.mxu0 %v5121_v5  ;;  %3803 = vmatprep.subr.bf16.mxu1 %v5124_v6 }
 0x16c   :  { %3763 = vmatpush1.bf16.msra.mxu0 %v5119_v9  ;;  %3804 = vmatpush1.bf16.msra.mxu1 %v5122_v18 }
 0x16d   :  { %3764 = vmatprep.subr.bf16.mxu0 %v5127_v10  ;;  %3805 = vmatprep.subr.bf16.mxu1 %v5130_v1  ;;  %v5185_v10 = vld [vmem:[%s7146_s2 + $0x8a8] ss:$16 sps:$4 sm:$0xff]  }
 0x16e   :  { %v5188_v1 = vld [vmem:[%s7146_s2 + $0xaa8] ss:$16 sps:$4 sm:$0xff]  }
 0x170   :  { %3765 = vmatpush2.bf16.msra.mxu0 %v5125_v3  ;;  %3806 = vmatpush2.bf16.msra.mxu1 %v5128_v11  ;;  %v5191_v11 = vld [vmem:[%s7146_s2 + $0x888] ss:$16 sps:$4 sm:$0xff]  }
 0x171   :  { %3766 = vmatprep.subr.bf16.mxu0 %v5133_v15  ;;  %3807 = vmatprep.subr.bf16.mxu1 %v5136_v16  ;;  %v5194_v15 = vld [vmem:[%s7146_s2 + $0xa88] ss:$16 sps:$4 sm:$0xff]   ;;  %v5199_v16 = vld [vmem:[%s7146_s2 + $0x86c] ss:$16 sps:$4 sm:$0xff]  }
 0x174   :  { %3767 = vmatpush2.bf16.msra.mxu0 %v5131_v17  ;;  %3808 = vmatpush2.bf16.msra.mxu1 %v5134_v20  ;;  %v5202_v17 = vld [vmem:[%s7146_s2 + $0xa6c] ss:$16 sps:$4 sm:$0xff]   ;;  %v5197_v20 = vld [vmem:[%s7146_s2 + $0x868] ss:$16 sps:$4 sm:$0xff]  }
 0x175   :  { %3768 = vmatprep.subr.bf16.mxu0 %v5139_v22  ;;  %3809 = vmatprep.subr.bf16.mxu1 %v5142_v23  ;;  %v5200_v22 = vld [vmem:[%s7146_s2 + $0xa68] ss:$16 sps:$4 sm:$0xff]   ;;  %v5205_v23 = vld [vmem:[%s7146_s2 + $0x84c] ss:$16 sps:$4 sm:$0xff]  }
 0x178   :  { %3769 = vmatpush2.bf16.msra.mxu0 %v5137_v24  ;;  %3810 = vmatpush2.bf16.msra.mxu1 %v5140_v25  ;;  %v5208_v24 = vld [vmem:[%s7146_s2 + $0xa4c] ss:$16 sps:$4 sm:$0xff]   ;;  %v5203_v25 = vld [vmem:[%s7146_s2 + $0x848] ss:$16 sps:$4 sm:$0xff]  }
 0x179   :  { %3770 = vmatprep.subr.bf16.mxu0 %v5145_v26  ;;  %3811 = vmatprep.subr.bf16.mxu1 %v5148_v27  ;;  %v5206_v26 = vld [vmem:[%s7146_s2 + $0xa48] ss:$16 sps:$4 sm:$0xff]   ;;  %v5211_v27 = vld [vmem:[%s7146_s2 + $0x82c] ss:$16 sps:$4 sm:$0xff]  }
 0x17c   :  { %3771 = vmatpush2.bf16.msra.mxu0 %v5143_v29  ;;  %3812 = vmatpush2.bf16.msra.mxu1 %v5146_v30  ;;  %v5214_v29 = vld [vmem:[%s7146_s2 + $0xa2c] ss:$16 sps:$4 sm:$0xff]   ;;  %v5209_v30 = vld [vmem:[%s7146_s2 + $0x828] ss:$16 sps:$4 sm:$0xff]  }
 0x17d   :  { %3772 = vmatprep.subr.bf16.mxu0 %v5151_v31  ;;  %3813 = vmatprep.subr.bf16.mxu1 %v5154_v34  ;;  %v5212_v31 = vld [vmem:[%s7146_s2 + $0xa28] ss:$16 sps:$4 sm:$0xff]   ;;  %v5217_v34 = vld [vmem:[%s7146_s2 + $0x80c] ss:$16 sps:$4 sm:$0xff]  }
 0x180   :  { %3773 = vmatpush2.bf16.msra.mxu0 %v5149_v36  ;;  %3814 = vmatpush2.bf16.msra.mxu1 %v5152_v37  ;;  %v5220_v36 = vld [vmem:[%s7146_s2 + $0xa0c] ss:$16 sps:$4 sm:$0xff]   ;;  %v5215_v37 = vld [vmem:[%s7146_s2 + $0x808] ss:$16 sps:$4 sm:$0xff]  }
 0x181   :  { %3774 = vmatprep.subr.bf16.mxu0 %v5157_v28  ;;  %3815 = vmatprep.subr.bf16.mxu1 %v5160_v33  ;;  %v5218_v28 = vld [vmem:[%s7146_s2 + $0xa08] ss:$16 sps:$4 sm:$0xff]   ;;  %v5223_v33 = vld [vmem:[%s7146_s2 + $0x9ec] ss:$16 sps:$4 sm:$0xff]  }
 0x184   :  { %3775 = vmatpush2.bf16.msra.mxu0 %v5155_v40  ;;  %3816 = vmatpush2.bf16.msra.mxu1 %v5158_v42  ;;  %v5226_v40 = vld [vmem:[%s7146_s2 + $0xbec] ss:$16 sps:$4 sm:$0xff]   ;;  %v5221_v42 = vld [vmem:[%s7146_s2 + $0x9e8] ss:$16 sps:$4 sm:$0xff]  }
 0x185   :  { %3776 = vmatprep.subr.bf16.mxu0 %v5163_v43  ;;  %3817 = vmatprep.subr.bf16.mxu1 %v5166_v51  ;;  %v5224_v43 = vld [vmem:[%s7146_s2 + $0xbe8] ss:$16 sps:$4 sm:$0xff]   ;;  %v5229_v51 = vld [vmem:[%s7146_s2 + $0x9cc] ss:$16 sps:$4 sm:$0xff]  }
 0x188   :  { %3777 = vmatpush2.bf16.msra.mxu0 %v5161_v57  ;;  %3818 = vmatpush2.bf16.msra.mxu1 %v5164_v46  ;;  %v5232_v57 = vld [vmem:[%s7146_s2 + $0xbcc] ss:$16 sps:$4 sm:$0xff]   ;;  %v5227_v46 = vld [vmem:[%s7146_s2 + $0x9c8] ss:$16 sps:$4 sm:$0xff]  }
 0x189   :  { %3778 = vmatprep.subr.bf16.mxu0 %v5169_v39  ;;  %3819 = vmatprep.subr.bf16.mxu1 %v5172_v32  ;;  %v5230_v39 = vld [vmem:[%s7146_s2 + $0xbc8] ss:$16 sps:$4 sm:$0xff]   ;;  %v5235_v32 = vld [vmem:[%s7146_s2 + $0x9ac] ss:$16 sps:$4 sm:$0xff]  }
 0x18c   :  { %3779 = vmatpush2.bf16.msra.mxu0 %v5167_v38  ;;  %3820 = vmatpush2.bf16.msra.mxu1 %v5170_v21  ;;  %v5238_v38 = vld [vmem:[%s7146_s2 + $0xbac] ss:$16 sps:$4 sm:$0xff]   ;;  %v5233_v21 = vld [vmem:[%s7146_s2 + $0x9a8] ss:$16 sps:$4 sm:$0xff]  }
 0x18d   :  { %3830 = vmatprep.subr.bf16.mxu0 %v5175_v50  ;;  %3871 = vmatprep.subr.bf16.mxu1 %v5178_v52  ;;  %v5236_v50 = vld [vmem:[%s7146_s2 + $0xba8] ss:$16 sps:$4 sm:$0xff]   ;;  %v5241_v52 = vld [vmem:[%s7146_s2 + $0x98c] ss:$16 sps:$4 sm:$0xff]  }
 0x18f   :  { %v3536_v58 = vpop.f32.mrf.mxu0  ;;  %v3577_v59 = vpop.f32.mrf.mxu1  ;;  %3781 = vmatmul.mubr.bf16.vlgmr.msra.gmra.mxu0 %v5859_v45  ;;  %3822 = vmatmul.mubr.bf16.vlgmr.msra.gmra.mxu1 %v5872_v49  ;;  %v5187_v45 = vld [vmem:[%s7146_s2 + $0x8ac] ss:$16 sps:$4 sm:$0xff]  }
 0x190   :  { %v3537_v60 = vadd.f32 %v3536_v58, %v6537_v62  ;;  %3831 = vmatpush1.bf16.msra.mxu0 %v5173_v53  ;;  %3872 = vmatpush1.bf16.msra.mxu1 %v5176_v55  ;;  %v5190_v49 = vld [vmem:[%s7146_s2 + $0xaac] ss:$16 sps:$4 sm:$0xff]   ;;  %v5239_v55 = vld [vmem:[%s7146_s2 + $0x988] ss:$16 sps:$4 sm:$0xff]  }
 0x191   :  { %v3538_v13 = vpop.f32.mrf.mxu0  ;;  %v3579_v0 = vpop.f32.mrf.mxu1  ;;  %3832 = vmatprep.subr.bf16.mxu0 %v5181_v56  ;;  %3873 = vmatprep.subr.bf16.mxu1 %v5184_v35  ;;  %v5244_v53 = vld [vmem:[%s7146_s2 + $0xb8c] ss:$16 sps:$4 sm:$0xff]   ;;  %v5242_v56 = vld [vmem:[%s7146_s2 + $0xb88] ss:$16 sps:$4 sm:$0xff]  }
 0x192   :  { %v6739_v62 = vadd.f32 %v3577_v59, %v3537_v60  ;;  %v3539_v5 = vadd.f32 %v3538_v13, %v6542_v44  ;;  %3862 = vmatprep.mubr.bf16.mxu0 %v5868_v48  ;;  %3903 = vmatprep.mubr.bf16.mxu1 %v5888_v54  ;;  %v5193_v48 = vld [vmem:[%s7146_s2 + $0x88c] ss:$16 sps:$4 sm:$0xff]   ;;  %v5245_v59 = vld [vmem:[%s7146_s2 + $0x968] ss:$16 sps:$4 sm:$0xff]  }
 0x193   :  { %v3540_v6 = vpop.f32.mrf.mxu0  ;;  %v3581_v9 = vpop.f32.mrf.mxu1  ;;  %v5196_v54 = vld [vmem:[%s7146_s2 + $0xa8c] ss:$16 sps:$4 sm:$0xff]   ;;  %v5248_v60 = vld [vmem:[%s7146_s2 + $0xb68] ss:$16 sps:$4 sm:$0xff]  }
 0x194   :  { %v6744_v18 = vadd.f32 %v3579_v0, %v3539_v5  ;;  %3833 = vmatpush1.bf16.msra.mxu0 %v5179_v61  ;;  %3874 = vmatpush1.bf16.msra.mxu1 %v5182_v63  ;;  %v5247_v35 = vld [vmem:[%s7146_s2 + $0x96c] ss:$16 sps:$4 sm:$0xff]   ;;  %v5251_v13 = vld [vmem:[%s7146_s2 + $0x948] ss:$16 sps:$4 sm:$0xff]  }
 0x195   :  { %v3541_v3 = vpop.f32.mrf.mxu0  ;;  %v3582_v44 = vpop.f32.mrf.mxu1  ;;  %3834 = vmatprep.subr.bf16.mxu0 %v5187_v45  ;;  %3875 = vmatprep.subr.bf16.mxu1 %v5190_v49  ;;  %v5250_v58 = vld [vmem:[%s7146_s2 + $0xb6c] ss:$16 sps:$4 sm:$0xff]   ;;  %v5254_v0 = vld [vmem:[%s7146_s2 + $0xb48] ss:$16 sps:$4 sm:$0xff]  }
 0x196   :  { %v5253_v61 = vld [vmem:[%s7146_s2 + $0x94c] ss:$16 sps:$4 sm:$0xff]   ;;  %v5257_v5 = vld [vmem:[%s7146_s2 + $0x928] ss:$16 sps:$4 sm:$0xff]  }
 0x197   :  { %v5256_v63 = vld [vmem:[%s7146_s2 + $0xb4c] ss:$16 sps:$4 sm:$0xff]   ;;  %v5260_v6 = vld [vmem:[%s7146_s2 + $0xb28] ss:$16 sps:$4 sm:$0xff]  }
 0x198   :  { %3835 = vmatpush1.bf16.msra.mxu0 %v5185_v10  ;;  %3876 = vmatpush1.bf16.msra.mxu1 %v5188_v1  ;;  %v5259_v45 = vld [vmem:[%s7146_s2 + $0x92c] ss:$16 sps:$4 sm:$0xff]   ;;  %v5263_v1 = vld [vmem:[%s7146_s2 + $0x908] ss:$16 sps:$4 sm:$0xff]  }
 0x199   :  { %3836 = vmatprep.subr.bf16.mxu0 %v5193_v48  ;;  %3877 = vmatprep.subr.bf16.mxu1 %v5196_v54  ;;  %v5262_v49 = vld [vmem:[%s7146_s2 + $0xb2c] ss:$16 sps:$4 sm:$0xff]   ;;  %v5266_v3 = vld [vmem:[%s7146_s2 + $0xb08] ss:$16 sps:$4 sm:$0xff]   ;;  %v3998_v54 = vsub.s32 0, %v5413_v4 }
 0x19a   :  { %v5265_v9 = vld [vmem:[%s7146_s2 + $0x90c] ss:$16 sps:$4 sm:$0xff]  }
 0x19b   :  { %v5268_v10 = vld [vmem:[%s7146_s2 + $0xb0c] ss:$16 sps:$4 sm:$0xff]  }
 0x19c   :  { %3837 = vmatpush1.bf16.msra.mxu0 %v5191_v11  ;;  %3878 = vmatpush1.bf16.msra.mxu1 %v5194_v15  ;;  %v5271_v44 = vld [vmem:[%s7146_s2 + $0xcec] ss:$16 sps:$4 sm:$0xff]   ;;  %v5269_v11 = vld [vmem:[%s7146_s2 + $0xce8] ss:$16 sps:$4 sm:$0xff]  }
 0x19d   :  { %3838 = vmatprep.subr.bf16.mxu0 %v5199_v16  ;;  %3879 = vmatprep.subr.bf16.mxu1 %v5202_v17  ;;  %v5274_v48 = vld [vmem:[%s7146_s2 + $0xeec] ss:$16 sps:$4 sm:$0xff]   ;;  %v5272_v15 = vld [vmem:[%s7146_s2 + $0xee8] ss:$16 sps:$4 sm:$0xff]   ;;  %v6924_v16 = vld [vmem:[%s7149_s4] sm:$0xf] }
 0x19e   :  { %v5277_v17 = vld [vmem:[%s7146_s2 + $0xccc] ss:$16 sps:$4 sm:$0xff]  }
 0x1a0   :  { %3839 = vmatpush1.bf16.msra.mxu0 %v5197_v20  ;;  %3880 = vmatpush1.bf16.msra.mxu1 %v5200_v22  ;;  %v5280_v20 = vld [vmem:[%s7146_s2 + $0xecc] ss:$16 sps:$4 sm:$0xff]   ;;  %v4002_v22 = vsub.s32 1, %v5413_v4 }
 0x1a1   :  { %3840 = vmatprep.subr.bf16.mxu0 %v5205_v23  ;;  %3881 = vmatprep.subr.bf16.mxu1 %v5208_v24 }
 0x1a4   :  { %3841 = vmatpush1.bf16.msra.mxu0 %v5203_v25  ;;  %3882 = vmatpush1.bf16.msra.mxu1 %v5206_v26  ;;  %v3999_v26 = vrot.slane %v6924_v16, %v3998_v54 }
 0x1a5   :  { %3842 = vmatprep.subr.bf16.mxu0 %v5211_v27  ;;  %3883 = vmatprep.subr.bf16.mxu1 %v5214_v29  ;;  %v5275_v27 = vld [vmem:[%s7146_s2 + $0xcc8] ss:$16 sps:$4 sm:$0xff]  }
 0x1a6   :  { %v5278_v29 = vld [vmem:[%s7146_s2 + $0xec8] ss:$16 sps:$4 sm:$0xff]  }
 0x1a8   :  { %3843 = vmatpush1.bf16.msra.mxu0 %v5209_v30  ;;  %3884 = vmatpush1.bf16.msra.mxu1 %v5212_v31  ;;  %v5286_v31 = vld [vmem:[%s7146_s2 + $0xeac] ss:$16 sps:$4 sm:$0xff]  }
 0x1a9   :  { %3844 = vmatprep.subr.bf16.mxu0 %v5217_v34  ;;  %3885 = vmatprep.subr.bf16.mxu1 %v5220_v36 }
 0x1ac   :  { %3845 = vmatpush1.bf16.msra.mxu0 %v5215_v37  ;;  %3886 = vmatpush1.bf16.msra.mxu1 %v5218_v28  ;;  %v4003_v37 = vrot.slane %v6924_v16, %v4002_v22 }
 0x1ad   :  { %3846 = vmatprep.subr.bf16.mxu0 %v5223_v33  ;;  %3887 = vmatprep.subr.bf16.mxu1 %v5226_v40 }
 0x1b0   :  { %3847 = vmatpush2.bf16.msra.mxu0 %v5221_v42  ;;  %3888 = vmatpush2.bf16.msra.mxu1 %v5224_v43 }
 0x1b1   :  { %3848 = vmatprep.subr.bf16.mxu0 %v5229_v51  ;;  %3889 = vmatprep.subr.bf16.mxu1 %v5232_v57  ;;  %v5281_v51 = vld [vmem:[%s7146_s2 + $0xca8] ss:$16 sps:$4 sm:$0xff]  }
 0x1b4   :  { %3849 = vmatpush2.bf16.msra.mxu0 %v5227_v46  ;;  %3890 = vmatpush2.bf16.msra.mxu1 %v5230_v39  ;;  %v5292_v46 = vld [vmem:[%s7146_s2 + $0xe8c] ss:$16 sps:$4 sm:$0xff]  }
 0x1b5   :  { %3850 = vmatprep.subr.bf16.mxu0 %v5235_v32  ;;  %3891 = vmatprep.subr.bf16.mxu1 %v5238_v38 }
 0x1b8   :  { %3851 = vmatpush2.bf16.msra.mxu0 %v5233_v21  ;;  %3892 = vmatpush2.bf16.msra.mxu1 %v5236_v50 }
 0x1b9   :  { %3852 = vmatprep.subr.bf16.mxu0 %v5241_v52  ;;  %3893 = vmatprep.subr.bf16.mxu1 %v5244_v53  ;;  %v5287_v52 = vld [vmem:[%s7146_s2 + $0xc88] ss:$16 sps:$4 sm:$0xff]  }
 0x1ba   :  { %v5290_v53 = vld [vmem:[%s7146_s2 + $0xe88] ss:$16 sps:$4 sm:$0xff]  }
 0x1bc   :  { %3853 = vmatpush2.bf16.msra.mxu0 %v5239_v55  ;;  %3894 = vmatpush2.bf16.msra.mxu1 %v5242_v56  ;;  %v5295_v55 = vld [vmem:[%s7146_s2 + $0xc6c] ss:$16 sps:$4 sm:$0xff]  }
 0x1bd   :  { %3854 = vmatprep.subr.bf16.mxu0 %v5247_v35  ;;  %3895 = vmatprep.subr.bf16.mxu1 %v5250_v58  ;;  %v5298_v56 = vld [vmem:[%s7146_s2 + $0xe6c] ss:$16 sps:$4 sm:$0xff]   ;;  %v5293_v58 = vld [vmem:[%s7146_s2 + $0xc68] ss:$16 sps:$4 sm:$0xff]  }
 0x1c0   :  { %3855 = vmatpush2.bf16.msra.mxu0 %v5245_v59  ;;  %3896 = vmatpush2.bf16.msra.mxu1 %v5248_v60  ;;  %v5296_v59 = vld [vmem:[%s7146_s2 + $0xe68] ss:$16 sps:$4 sm:$0xff]  }
 0x1c1   :  { %3856 = vmatprep.subr.bf16.mxu0 %v5253_v61  ;;  %3897 = vmatprep.subr.bf16.mxu1 %v5256_v63  ;;  %v5301_v63 = vld [vmem:[%s7146_s2 + $0xc4c] ss:$16 sps:$4 sm:$0xff]  }
 0x1c4   :  { %3857 = vmatpush2.bf16.msra.mxu0 %v5251_v13  ;;  %3898 = vmatpush2.bf16.msra.mxu1 %v5254_v0  ;;  %v5304_v13 = vld [vmem:[%s7146_s2 + $0xe4c] ss:$16 sps:$4 sm:$0xff]  }
 0x1c5   :  { %3858 = vmatprep.subr.bf16.mxu0 %v5259_v45  ;;  %3899 = vmatprep.subr.bf16.mxu1 %v5262_v49  ;;  %v5299_v45 = vld [vmem:[%s7146_s2 + $0xc48] ss:$16 sps:$4 sm:$0xff]  }
 0x1c6   :  { %v5302_v49 = vld [vmem:[%s7146_s2 + $0xe48] ss:$16 sps:$4 sm:$0xff]  }
 0x1c8   :  { %3859 = vmatpush2.bf16.msra.mxu0 %v5257_v5  ;;  %3900 = vmatpush2.bf16.msra.mxu1 %v5260_v6  ;;  %v5307_v5 = vld [vmem:[%s7146_s2 + $0xc2c] ss:$16 sps:$4 sm:$0xff]  }
 0x1c9   :  { %3860 = vmatprep.subr.bf16.mxu0 %v5265_v9  ;;  %3901 = vmatprep.subr.bf16.mxu1 %v5268_v10  ;;  %v5310_v6 = vld [vmem:[%s7146_s2 + $0xe2c] ss:$16 sps:$4 sm:$0xff]   ;;  %v5305_v9 = vld [vmem:[%s7146_s2 + $0xc28] ss:$16 sps:$4 sm:$0xff]  }
 0x1ca   :  { %v5308_v10 = vld [vmem:[%s7146_s2 + $0xe28] ss:$16 sps:$4 sm:$0xff]  }
 0x1cc   :  { %3861 = vmatpush2.bf16.msra.mxu0 %v5263_v1  ;;  %3902 = vmatpush2.bf16.msra.mxu1 %v5266_v3  ;;  %v5313_v1 = vld [vmem:[%s7146_s2 + $0xc0c] ss:$16 sps:$4 sm:$0xff]  }
 0x1cd   :  { %3912 = vmatprep.subr.bf16.mxu0 %v5271_v44  ;;  %3953 = vmatprep.subr.bf16.mxu1 %v5274_v48  ;;  %v5316_v3 = vld [vmem:[%s7146_s2 + $0xe0c] ss:$16 sps:$4 sm:$0xff]   ;;  %v5311_v44 = vld [vmem:[%s7146_s2 + $0xc08] ss:$16 sps:$4 sm:$0xff]  }
 0x1ce   :  { %v5314_v48 = vld [vmem:[%s7146_s2 + $0xe08] ss:$16 sps:$4 sm:$0xff]  }
 0x1cf   :  { %v3618_v23 = vpop.f32.mrf.mxu0  ;;  %v3659_v24 = vpop.f32.mrf.mxu1  ;;  %3863 = vmatmul.mubr.bf16.vlgmr.msra.gmra.mxu0 %v6077_v2  ;;  %3904 = vmatmul.mubr.bf16.vlgmr.msra.gmra.mxu1 %v6090_v8  ;;  %v6946_v2 = vld [vmem:[%s7150_s5] sm:$0xf] }
 0x1d0   :  { %v3619_v25 = vadd.f32 %v3618_v23, %v6739_v62  ;;  %3913 = vmatpush1.bf16.msra.mxu0 %v5269_v11  ;;  %3954 = vmatpush1.bf16.msra.mxu1 %v5272_v15  ;;  %v5283_v62 = vld [vmem:[%s7146_s2 + $0xcac] ss:$16 sps:$4 sm:$0xff]   ;;  %v4029_v42 = vrot.slane %v6946_v2, %v3998_v54  ;;  %v4033_v38 = vrot.slane %v6946_v2, %v4002_v22  ;;  %v5317_v15 = vld [vmem:[%s7146_s2 + $0xde8] ss:$16 sps:$4 sm:$0xff]  }
 0x1d1   :  { %v3620_v8 = vpop.f32.mrf.mxu0  ;;  %v3661_v30 = vpop.f32.mrf.mxu1  ;;  %3914 = vmatprep.subr.bf16.mxu0 %v5277_v17  ;;  %3955 = vmatprep.subr.bf16.mxu1 %v5280_v20  ;;  %v5319_v54 = vld [vmem:[%s7146_s2 + $0xdec] ss:$16 sps:$4 sm:$0xff]   ;;  %v5320_v17 = vld [vmem:[%s7146_s2 + $0xfe8] ss:$16 sps:$4 sm:$0xff]  }
 0x1d2   :  { %v3660_v34 = vadd.f32 %v3659_v24, %v3619_v25  ;;  %v3621_v36 = vadd.f32 %v3620_v8, %v6744_v18  ;;  %3944 = vmatprep.mubr.bf16.mxu0 %v6086_v7  ;;  %3985 = vmatprep.mubr.bf16.mxu1 %v6106_v12  ;;  %v5284_v18 = vld [vmem:[%s7146_s2 + $0xea8] ss:$16 sps:$4 sm:$0xff]   ;;  %v5289_v12 = vld [vmem:[%s7146_s2 + $0xc8c] ss:$16 sps:$4 sm:$0xff]  }
 0x1d3   :  { %v3622_v28 = vpop.f32.mrf.mxu0  ;;  %v3663_v33 = vpop.f32.mrf.mxu1  ;;  %v5322_v11 = vld [vmem:[%s7146_s2 + $0xfec] ss:$16 sps:$4 sm:$0xff]   ;;  %v5323_v23 = vld [vmem:[%s7146_s2 + $0xdc8] ss:$16 sps:$4 sm:$0xff]  }
 0x1d4   :  { %v4016_v40 = vadd.f32 %v3999_v26, %v3660_v34  ;;  %v3662_v43 = vadd.f32 %v3661_v30, %v3621_v36  ;;  %3915 = vmatpush1.bf16.msra.mxu0 %v5275_v27  ;;  %3956 = vmatpush1.bf16.msra.mxu1 %v5278_v29  ;;  %v5325_v20 = vld [vmem:[%s7146_s2 + $0xdcc] ss:$16 sps:$4 sm:$0xff]   ;;  %v5326_v24 = vld [vmem:[%s7146_s2 + $0xfc8] ss:$16 sps:$4 sm:$0xff]  }
 0x1d5   :  { %v3623_v57 = vpop.f32.mrf.mxu0  ;;  %v3664_v7 = vpop.f32.mrf.mxu1  ;;  %3916 = vmatprep.subr.bf16.mxu0 %v5283_v62  ;;  %3957 = vmatprep.subr.bf16.mxu1 %v5286_v31  ;;  %v5328_v22 = vld [vmem:[%s7146_s2 + $0xfcc] ss:$16 sps:$4 sm:$0xff]   ;;  %v5329_v27 = vld [vmem:[%s7146_s2 + $0xda8] ss:$16 sps:$4 sm:$0xff]  }
 0x1d6   :  { %v4020_v39 = vmax.f32 %v4016_v40, 0.0  ;;  %v4017_v32 = vadd.f32 %v4003_v37, %v3662_v43  ;;  %v5331_v25 = vld [vmem:[%s7146_s2 + $0xdac] ss:$16 sps:$4 sm:$0xff]   ;;  %v5332_v29 = vld [vmem:[%s7146_s2 + $0xfa8] ss:$16 sps:$4 sm:$0xff]  }
 0x1d7   :  { %v5334_v26 = vld [vmem:[%s7146_s2 + $0xfac] ss:$16 sps:$4 sm:$0xff]   ;;  %v5335_v62 = vld [vmem:[%s7146_s2 + $0xd88] ss:$16 sps:$4 sm:$0xff]  }
 0x1d8   :  { %v4046_v21 = vmul.f32 %v4029_v42, %v4020_v39  ;;  %v4021_v50 = vmax.f32 %v4017_v32, 0.0  ;;  %3917 = vmatpush1.bf16.msra.mxu0 %v5281_v51  ;;  %3958 = vmatpush1.bf16.msra.mxu1 %v5284_v18  ;;  %v5337_v8 = vld [vmem:[%s7146_s2 + $0xd8c] ss:$16 sps:$4 sm:$0xff]   ;;  %v5338_v31 = vld [vmem:[%s7146_s2 + $0xf88] ss:$16 sps:$4 sm:$0xff]  }
 0x1d9   :  { %3918 = vmatprep.subr.bf16.mxu0 %v5289_v12  ;;  %3959 = vmatprep.subr.bf16.mxu1 %v5292_v46  ;;  %v5340_v30 = vld [vmem:[%s7146_s2 + $0xf8c] ss:$16 sps:$4 sm:$0xff]   ;;  %v5341_v37 = vld [vmem:[%s7146_s2 + $0xd68] ss:$16 sps:$4 sm:$0xff]  }
 0x1da   :  { %v4047_v35 = vmul.f32 %v4033_v38, %v4021_v50  ;;  %v4050_v60 = vsel %vm567_vm0, %v4046_v21, 0.0  ;;  %v5343_v34 = vld [vmem:[%s7146_s2 + $0xd6c] ss:$16 sps:$4 sm:$0xff]   ;;  %v5344_v28 = vld [vmem:[%s7146_s2 + $0xf68] ss:$16 sps:$4 sm:$0xff]  }
 0x1db   :  { %v5346_v36 = vld [vmem:[%s7146_s2 + $0xf6c] ss:$16 sps:$4 sm:$0xff]   ;;  %v5347_v42 = vld [vmem:[%s7146_s2 + $0xd48] ss:$16 sps:$4 sm:$0xff]  }
 0x1dc   :  { %3919 = vmatpush1.bf16.msra.mxu0 %v5287_v52  ;;  %3960 = vmatpush1.bf16.msra.mxu1 %v5290_v53  ;;  %v4051_v61 = vsel %vm567_vm0, %v4047_v35, 0.0  ;;  %v5349_v33 = vld [vmem:[%s7146_s2 + $0xd4c] ss:$16 sps:$4 sm:$0xff]   ;;  %v5350_v43 = vld [vmem:[%s7146_s2 + $0xf48] ss:$16 sps:$4 sm:$0xff]  }
 0x1dd   :  { %3920 = vmatprep.subr.bf16.mxu0 %v5295_v55  ;;  %3961 = vmatprep.subr.bf16.mxu1 %v5298_v56  ;;  %v6998_v0 = vadd.f32 %v4051_v61, %v4050_v60  ;;  %v5352_v40 = vld [vmem:[%s7146_s2 + $0xf4c] ss:$16 sps:$4 sm:$0xff]   ;;  %v5353_v57 = vld [vmem:[%s7146_s2 + $0xd28] ss:$16 sps:$4 sm:$0xff]  }
 0x1de   :  { %v5355_v51 = vld [vmem:[%s7146_s2 + $0xd2c] ss:$16 sps:$4 sm:$0xff]   ;;  %v5356_v7 = vld [vmem:[%s7146_s2 + $0xf28] ss:$16 sps:$4 sm:$0xff]  }
 0x1df   :  { %v5358_v18 = vld [vmem:[%s7146_s2 + $0xf2c] ss:$16 sps:$4 sm:$0xff]   ;;  %v5359_v39 = vld [vmem:[%s7146_s2 + $0xd08] ss:$16 sps:$4 sm:$0xff]  }
 0x1e0   :  { %3921 = vmatpush1.bf16.msra.mxu0 %v5293_v58  ;;  %3962 = vmatpush1.bf16.msra.mxu1 %v5296_v59  ;;  %v5361_v12 = vld [vmem:[%s7146_s2 + $0xd0c] ss:$16 sps:$4 sm:$0xff]   ;;  %v5362_v32 = vld [vmem:[%s7146_s2 + $0xf08] ss:$16 sps:$4 sm:$0xff]  }
 0x1e1   :  { %3922 = vmatprep.subr.bf16.mxu0 %v5301_v63  ;;  %3963 = vmatprep.subr.bf16.mxu1 %v5304_v13  ;;  %v5364_v46 = vld [vmem:[%s7146_s2 + $0xf0c] ss:$16 sps:$4 sm:$0xff]  }
 0x1e4   :  { %3923 = vmatpush1.bf16.msra.mxu0 %v5299_v45  ;;  %3964 = vmatpush1.bf16.msra.mxu1 %v5302_v49 }
 0x1e5   :  { %3924 = vmatprep.subr.bf16.mxu0 %v5307_v5  ;;  %3965 = vmatprep.subr.bf16.mxu1 %v5310_v6 }
 0x1e8   :  { %3925 = vmatpush1.bf16.msra.mxu0 %v5305_v9  ;;  %3966 = vmatpush1.bf16.msra.mxu1 %v5308_v10 }
 0x1e9   :  { %3926 = vmatprep.subr.bf16.mxu0 %v5313_v1  ;;  %3967 = vmatprep.subr.bf16.mxu1 %v5316_v3 }
 0x1ec   :  { %3927 = vmatpush1.bf16.msra.mxu0 %v5311_v44  ;;  %3968 = vmatpush1.bf16.msra.mxu1 %v5314_v48 }
 0x1ed   :  { %3928 = vmatprep.subr.bf16.mxu0 %v5319_v54  ;;  %3969 = vmatprep.subr.bf16.mxu1 %v5322_v11 }
 0x1f0   :  { %3929 = vmatpush2.bf16.msra.mxu0 %v5317_v15  ;;  %3970 = vmatpush2.bf16.msra.mxu1 %v5320_v17 }
 0x1f1   :  { %3930 = vmatprep.subr.bf16.mxu0 %v5325_v20  ;;  %3971 = vmatprep.subr.bf16.mxu1 %v5328_v22 }
 0x1f4   :  { %3931 = vmatpush2.bf16.msra.mxu0 %v5323_v23  ;;  %3972 = vmatpush2.bf16.msra.mxu1 %v5326_v24  ;;  %v4006_v24 = vsub.s32 2, %v5413_v4 }
 0x1f5   :  { %3932 = vmatprep.subr.bf16.mxu0 %v5331_v25  ;;  %3973 = vmatprep.subr.bf16.mxu1 %v5334_v26  ;;  %v4010_v26 = vsub.s32 3, %v5413_v4 }
 0x1f8   :  { %3933 = vmatpush2.bf16.msra.mxu0 %v5329_v27  ;;  %3974 = vmatpush2.bf16.msra.mxu1 %v5332_v29 }
 0x1f9   :  { %3934 = vmatprep.subr.bf16.mxu0 %v5337_v8  ;;  %3975 = vmatprep.subr.bf16.mxu1 %v5340_v30 }
 0x1fc   :  { %3935 = vmatpush2.bf16.msra.mxu0 %v5335_v62  ;;  %3976 = vmatpush2.bf16.msra.mxu1 %v5338_v31  ;;  %v4007_v62 = vrot.slane %v6924_v16, %v4006_v24 }
 0x1fd   :  { %3936 = vmatprep.subr.bf16.mxu0 %v5343_v34  ;;  %3977 = vmatprep.subr.bf16.mxu1 %v5346_v36 }
 0x200   :  { %3937 = vmatpush2.bf16.msra.mxu0 %v5341_v37  ;;  %3978 = vmatpush2.bf16.msra.mxu1 %v5344_v28  ;;  %v4011_v28 = vrot.slane %v6924_v16, %v4010_v26 }
 0x201   :  { %3938 = vmatprep.subr.bf16.mxu0 %v5349_v33  ;;  %3979 = vmatprep.subr.bf16.mxu1 %v5352_v40 }
 0x204   :  { %3939 = vmatpush2.bf16.msra.mxu0 %v5347_v42  ;;  %3980 = vmatpush2.bf16.msra.mxu1 %v5350_v43 }
 0x205   :  { %3940 = vmatprep.subr.bf16.mxu0 %v5355_v51  ;;  %3981 = vmatprep.subr.bf16.mxu1 %v5358_v18  ;;  %v4037_v51 = vrot.slane %v6946_v2, %v4006_v24 }
 0x208   :  { %3941 = vmatpush2.bf16.msra.mxu0 %v5353_v57  ;;  %3982 = vmatpush2.bf16.msra.mxu1 %v5356_v7 }
 0x209   :  { %3942 = vmatprep.subr.bf16.mxu0 %v5361_v12  ;;  %3983 = vmatprep.subr.bf16.mxu1 %v5364_v46  ;;  %v4041_v12 = vrot.slane %v6946_v2, %v4010_v26 }
 0x20c   :  { %3943 = vmatpush2.bf16.msra.mxu0 %v5359_v39  ;;  %3984 = vmatpush2.bf16.msra.mxu1 %v5362_v32 }
 0x20f   :  { %v3700_v38 = vpop.f32.mrf.mxu0  ;;  %v3741_v21 = vpop.f32.mrf.mxu1  ;;  %3945 = vmatmul.mubr.bf16.vlgmr.msra.gmra.mxu0 %v6290_v41  ;;  %3986 = vmatmul.mubr.bf16.vlgmr.msra.gmra.mxu1 %v6312_v47 }
 0x210   :  { %v3701_v50 = vadd.f32 %v3700_v38, %v6110_v14 }
 0x211   :  { %v3702_v52 = vpop.f32.mrf.mxu0  ;;  %v3743_v53 = vpop.f32.mrf.mxu1 }
 0x212   :  { %v3742_v55 = vadd.f32 %v3741_v21, %v3701_v50  ;;  %v3703_v56 = vadd.f32 %v3702_v52, %v6125_v19  ;;  %v12_v19 = vstv %s7151_s6 }
 0x213   :  { %v3704_v35 = vpop.f32.mrf.mxu0  ;;  %v3745_v58 = vpop.f32.mrf.mxu1  ;;  %13 = vst [vmem:[#allocation2] sm:$0x1] %v12_v19 }
 0x214   :  { %v3744_v59 = vadd.f32 %v3743_v53, %v3703_v56 }
 0x215   :  { %v3705_v60 = vpop.f32.mrf.mxu0  ;;  %v3746_v61 = vpop.f32.mrf.mxu1 }
 0x21a   :  { %v4590_v52 = vld [vmem:[#allocation2] ss:$0 sm:$0xff] }
 0x24f   :  { %v3782_v63 = vpop.f32.mrf.mxu0  ;;  %v3823_v13 = vpop.f32.mrf.mxu1 }
 0x250   :  { %v3783_v45 = vadd.f32 %v3782_v63, %v3742_v55 }
 0x251   :  { %v3784_v49 = vpop.f32.mrf.mxu0  ;;  %v3825_v5 = vpop.f32.mrf.mxu1 }
 0x252   :  { %v3824_v41 = vadd.f32 %v3823_v13, %v3783_v45  ;;  %v3785_v6 = vadd.f32 %v3784_v49, %v3744_v59 }
 0x253   :  { %v3786_v47 = vpop.f32.mrf.mxu0  ;;  %v3827_v9 = vpop.f32.mrf.mxu1 }
 0x254   :  { %v3826_v14 = vadd.f32 %v3825_v5, %v3785_v6 }
 0x255   :  { %v3787_v10 = vpop.f32.mrf.mxu0  ;;  %v3828_v1 = vpop.f32.mrf.mxu1 }
 0x28f   :  { %v3864_v3 = vpop.f32.mrf.mxu0  ;;  %v3905_v44 = vpop.f32.mrf.mxu1 }
 0x290   :  { %v3865_v22 = vadd.f32 %v3864_v3, %v3824_v41 }
 0x291   :  { %v3866_v48 = vpop.f32.mrf.mxu0  ;;  %v3907_v54 = vpop.f32.mrf.mxu1 }
 0x292   :  { %v3867_v23 = vadd.f32 %v3866_v48, %v3826_v14  ;;  %v3906_v25 = vadd.f32 %v3905_v44, %v3865_v22 }
 0x293   :  { %v3868_v11 = vpop.f32.mrf.mxu0  ;;  %v3909_v15 = vpop.f32.mrf.mxu1 }
 0x294   :  { %v3908_v8 = vadd.f32 %v3907_v54, %v3867_v23 }
 0x295   :  { %v3869_v17 = vpop.f32.mrf.mxu0  ;;  %v3910_v20 = vpop.f32.mrf.mxu1 }
 0x2cf   :  { %v3946_v27 = vpop.f32.mrf.mxu0  ;;  %v3987_v29 = vpop.f32.mrf.mxu1 }
 0x2d0   :  { %v3947_v30 = vadd.f32 %v3946_v27, %v3906_v25 }
 0x2d1   :  { %v3948_v31 = vpop.f32.mrf.mxu0  ;;  %v3989_v34 = vpop.f32.mrf.mxu1 }
 0x2d2   :  { %v3988_v36 = vadd.f32 %v3987_v29, %v3947_v30  ;;  %v3949_v37 = vadd.f32 %v3948_v31, %v3908_v8 }
 0x2d3   :  { %v3950_v33 = vpop.f32.mrf.mxu0  ;;  %v3991_v40 = vpop.f32.mrf.mxu1 }
 0x2d4   :  { %v4018_v42 = vadd.f32 %v4007_v62, %v3988_v36  ;;  %v3990_v43 = vadd.f32 %v3989_v34, %v3949_v37 }
 0x2d5   :  { %v3951_v18 = vpop.f32.mrf.mxu0  ;;  %v3992_v4 = vpop.f32.mrf.mxu1 }
 0x2d6   :  { %v4022_v57 = vmax.f32 %v4018_v42, 0.0  ;;  %v4019_v7 = vadd.f32 %v4011_v28, %v3990_v43 }
 0x2d8   :  { %v4023_v46 = vmax.f32 %v4019_v7, 0.0  ;;  %v4048_v39 = vmul.f32 %v4037_v51, %v4022_v57 }
 0x2da   :  { %v4049_v32 = vmul.f32 %v4041_v12, %v4023_v46  ;;  %v4053_v38 = vsel %vm567_vm0, %v4048_v39, 0.0 }
 0x2db   :  { %v4054_v21 = vadd.f32 %v4053_v38, %v6998_v0 }
 0x2dc   :  { %v4055_v16 = vsel %vm567_vm0, %v4049_v32, 0.0 }
 0x2dd   :  { %v4056_v50 = vadd.f32 %v4055_v16, %v4054_v21 }
 0x2df   :  { %4057 = vadd.xlane.f32.xlu0 %v4056_v50 }
 0x368   :  { %v4058_v53 = vpop.xlane.xlu0 %4057 }
 0x369   :  { %v4066_v55 = vadd.f32 %v4590_v52, %v4058_v53 }
 0x36b   :  { %5365 = vtanh.f32 %v4066_v55 }
 0x378   :  { %v5366_v56 = vpop.eup %5365 }
 0x379   :  { %4069 = vst.msk [vmem:[%s7152_s7] sm:$0x3] %vm4068_vm2, %v5366_v56 }

</bundles_post_ra>
